<compile_context>
chip_gen: v6e
topology: v6e:2x2x1
jax: 0.10.0
libtpu: 0.0.40
codegen_flags: <defaults>
</compile_context>

<pallas_src>
import jax
import jax.numpy as jnp
from jax import lax
from jax.experimental import pallas as pl
from jax.experimental.pallas import tpu as pltpu

BN_EPS = 1e-5
LANES = 128


def _round_up(x, m):
    return (x + m - 1) // m * m


# ----------------------------- Pallas kernels ------------------------------

def _row_mask(MW, Wp, W):
    """Column-validity mask (MW, 1) f32 generated in-kernel (no mask DMA)."""
    row = lax.broadcasted_iota(jnp.int32, (MW, 1), 0)
    return (row % Wp < W).astype(jnp.float32)


def _make_stats1_kernel(Wp, W):
    """conv1 as ONE folded (MW, 9*Cin) x (9*Cin, Cpad) matmul -> BN1 partials."""
    def kernel(lhs_ref, w_ref, st_ref):
        MW = lhs_ref.shape[1]
        y1 = jnp.dot(lhs_ref[0], w_ref[...], preferred_element_type=jnp.float32)
        m = _row_mask(MW, Wp, W)
        ym = y1 * m
        st_ref[0, 0:1, :] = jnp.sum(ym, axis=0, keepdims=True)
        st_ref[0, 1:2, :] = jnp.sum(ym * y1, axis=0, keepdims=True)
    return kernel


def _make_conv2_kernel(Wp, W, FR2):
    """conv1 recompute + folded bn1 + relu + conv2 (9 shifted matmuls,
    accumulated locally, one output write) + BN2 partial stats."""
    def kernel(lhs_ref, bn1_ref, w1_ref, w2_ref, y2_ref, st_ref, rp_ref):
        MW, Cpad = y2_ref.shape[1], y2_ref.shape[2]
        m = _row_mask(MW, Wp, W)

        # Recompute conv1 (bit-identical to kernel A: same bf16 operands).
        y1 = jnp.dot(lhs_ref[0], w1_ref[...], preferred_element_type=jnp.float32)
        x1 = y1 * bn1_ref[0:1, :] + bn1_ref[1:2, :]
        r = jnp.maximum(x1, 0.0) * m          # relu + zero the 2 garbage cols/row

        # Scatter into a zero-padded flat frame; only zero the halo rows
        # (head + tail) every step — the body store covers the rest.
        rp_ref[0:Wp + 1, :] = jnp.zeros((Wp + 1, Cpad), jnp.bfloat16)
        rp_ref[Wp + 1 + MW:FR2, :] = jnp.zeros((FR2 - (Wp + 1 + MW), Cpad),
                                               jnp.bfloat16)
        rp_ref[Wp + 1:Wp + 1 + MW, :] = r.astype(jnp.bfloat16)

        # conv2: 9 shifted matmuls accumulated in a local traced value.
        acc = None
        for t in range(9):
            dy, dx = divmod(t, 3)
            off = dy * Wp + dx
            contrib = jnp.dot(rp_ref[off:off + MW, :], w2_ref[t],
                              preferred_element_type=jnp.float32)
            acc = contrib if acc is None else acc + contrib
        y2_ref[0] = acc                        # single output write

        am = acc * m
        st_ref[0, 0:1, :] = jnp.sum(am, axis=0, keepdims=True)
        st_ref[0, 1:2, :] = jnp.sum(am * acc, axis=0, keepdims=True)
    return kernel


def _final_kernel(lhs_ref, w1_ref, bn1_ref, y2_ref, bn2_ref, out_ref):
    # out = relu(2 * bn1(conv1(x)) + bn2(conv2(relu(bn1(conv1(x))))))
    y1 = jnp.dot(lhs_ref[0], w1_ref[...], preferred_element_type=jnp.float32)
    x1 = y1 * bn1_ref[0:1, :] + bn1_ref[1:2, :]
    z2 = y2_ref[0] * bn2_ref[0:1, :] + bn2_ref[1:2, :]
    res = jnp.maximum(2.0 * x1 + z2, 0.0)
    out_ref[0] = res[:, :out_ref.shape[2]]     # compact Cout-wide output block


# ----------------------------- pallas_call glue -----------------------------

def _compiler_params(per_step_block_bytes, scratch_bytes=0):
    # VMEM budget from the actual per-step footprint: double-buffered pipeline
    # blocks + scratch + slack, clamped to v7x's 64 MiB physical VMEM.
    need = 2 * per_step_block_bytes + scratch_bytes + (2 << 20)
    limit = int(min(max(need, 4 << 20), 64 << 20))
    return pltpu.CompilerParams(dimension_semantics=("parallel",),
                                vmem_limit_bytes=limit)


def _run_stats1(lhs1, w1f, Wp, W, Cpad):
    N, MW, K1 = lhs1.shape
    flops = 2 * N * MW * K1 * Cpad
    bytes_acc = lhs1.size * 2 + w1f.size * 2 + N * 2 * Cpad * 4
    blk = MW * K1 * 2 + K1 * Cpad * 2 + 2 * Cpad * 4
    return pl.pallas_call(
        _make_stats1_kernel(Wp, W),
        out_shape=jax.ShapeDtypeStruct((N, 2, Cpad), jnp.float32),
        grid_spec=pltpu.PrefetchScalarGridSpec(
            num_scalar_prefetch=0,
            grid=(N,),
            in_specs=[pl.BlockSpec((1, MW, K1), lambda n: (n, 0, 0)),
                      pl.BlockSpec((K1, Cpad), lambda n: (0, 0))],
            out_specs=pl.BlockSpec((1, 2, Cpad), lambda n: (n, 0, 0))),
        compiler_params=_compiler_params(blk),
        cost_estimate=pl.CostEstimate(flops=flops, transcendentals=0,
                                      bytes_accessed=bytes_acc),
    )(lhs1, w1f)


def _run_conv2(lhs1, bn1, w1f, w2, Wp, W, FR2, Cpad):
    N, MW, K1 = lhs1.shape
    flops = 2 * N * MW * (K1 * Cpad + 9 * Cpad * Cpad)
    bytes_acc = (lhs1.size * 2 + bn1.size * 4 + w1f.size * 2 + w2.size * 2
                 + N * MW * Cpad * 4 + N * 2 * Cpad * 4)
    blk = (MW * K1 * 2 + 2 * Cpad * 4 + K1 * Cpad * 2 + 9 * Cpad * Cpad * 2
           + MW * Cpad * 4 + 2 * Cpad * 4)
    scratch = FR2 * Cpad * 2
    return pl.pallas_call(
        _make_conv2_kernel(Wp, W, FR2),
        out_shape=(jax.ShapeDtypeStruct((N, MW, Cpad), jnp.float32),
                   jax.ShapeDtypeStruct((N, 2, Cpad), jnp.float32)),
        grid_spec=pltpu.PrefetchScalarGridSpec(
            num_scalar_prefetch=0,
            grid=(N,),
            in_specs=[pl.BlockSpec((1, MW, K1), lambda n: (n, 0, 0)),
                      pl.BlockSpec((2, Cpad), lambda n: (0, 0)),
                      pl.BlockSpec((K1, Cpad), lambda n: (0, 0)),
                      pl.BlockSpec((9, Cpad, Cpad), lambda n: (0, 0, 0))],
            out_specs=[pl.BlockSpec((1, MW, Cpad), lambda n: (n, 0, 0)),
                       pl.BlockSpec((1, 2, Cpad), lambda n: (n, 0, 0))],
            scratch_shapes=[pltpu.VMEM((FR2, Cpad), jnp.bfloat16)]),
        compiler_params=_compiler_params(blk, scratch),
        cost_estimate=pl.CostEstimate(flops=flops, transcendentals=0,
                                      bytes_accessed=bytes_acc),
    )(lhs1, bn1, w1f, w2)


def _run_final(lhs1, w1f, bn1, y2, bn2, Cout):
    N, MW, K1 = lhs1.shape
    Cpad = y2.shape[2]
    flops = 2 * N * MW * K1 * Cpad + 8 * N * MW * Cpad
    bytes_acc = (lhs1.size * 2 + w1f.size * 2 + 2 * bn1.size * 4
                 + y2.size * 4 + N * MW * Cout * 4)
    blk = (MW * K1 * 2 + K1 * Cpad * 2 + 2 * 2 * Cpad * 4
           + MW * Cpad * 4 + MW * Cout * 4)
    return pl.pallas_call(
        _final_kernel,
        out_shape=jax.ShapeDtypeStruct((N, MW, Cout), jnp.float32),
        grid_spec=pltpu.PrefetchScalarGridSpec(
            num_scalar_prefetch=0,
            grid=(N,),
            in_specs=[pl.BlockSpec((1, MW, K1), lambda n: (n, 0, 0)),
                      pl.BlockSpec((K1, Cpad), lambda n: (0, 0)),
                      pl.BlockSpec((2, Cpad), lambda n: (0, 0)),
                      pl.BlockSpec((1, MW, Cpad), lambda n: (n, 0, 0)),
                      pl.BlockSpec((2, Cpad), lambda n: (0, 0))],
            out_specs=pl.BlockSpec((1, MW, Cout), lambda n: (n, 0, 0))),
        compiler_params=_compiler_params(blk),
        cost_estimate=pl.CostEstimate(flops=flops, transcendentals=0,
                                      bytes_accessed=bytes_acc),
    )(lhs1, w1f, bn1, y2, bn2)


# ------------------------------ plain-JAX glue ------------------------------

def _bn_scale_shift(partial_stats, gamma, beta, count, Cpad):
    """Finish the global BN reduction and fold it into per-channel scale/shift."""
    s = jnp.sum(partial_stats[:, 0, :], axis=0)
    ss = jnp.sum(partial_stats[:, 1, :], axis=0)
    mean = s / count
    var = jnp.maximum(ss / count - mean * mean, 0.0)      # biased batch variance
    g = jnp.zeros((Cpad,), jnp.float32).at[:gamma.size].set(gamma.reshape(-1))
    b = jnp.zeros((Cpad,), jnp.float32).at[:beta.size].set(beta.reshape(-1))
    scale = g * lax.rsqrt(var + BN_EPS)
    shift = b - mean * scale
    return jnp.stack([scale, shift], axis=0)              # (2, Cpad) f32


def init_convblock_params(key, in_channels, out_channels):
    """Deterministic synthetic parameters (shapes follow ConvBlock.__init__)."""
    k1, k2, k3, k4 = jax.random.split(key, 4)
    w1 = jax.random.normal(k1, (3, 3, in_channels, out_channels),
                           jnp.float32) / jnp.sqrt(9.0 * in_channels)
    w2 = jax.random.normal(k2, (3, 3, out_channels, out_channels),
                           jnp.float32) / jnp.sqrt(9.0 * out_channels)
    g1 = 1.0 + 0.1 * jax.random.normal(k3, (1, out_channels), jnp.float32)
    b1 = 0.1 * jax.random.normal(k4, (1, out_channels), jnp.float32)
    g2 = jnp.ones((1, out_channels), jnp.float32)         # PyTorch BN defaults
    b2 = jnp.zeros((1, out_channels), jnp.float32)
    return dict(w1=w1, w2=w2, g1=g1, b1=b1, g2=g2, b2=b2)


def conv_block_forward(params, x_nchw, stride=1):
    # TODO(synk): stride != 1 and the optional `downsample` branch are not
    # implemented (module is used with stride=1, downsample=None); BatchNorm
    # running statistics are not updated (training-mode batch stats reproduced).
    # TODO(synk): for large H*W (ResNet-stem sizes) add a row-tile grid axis
    # with a 1-row halo so per-step VMEM stays bounded on v7x (64 MiB).
    if stride != 1:
        raise NotImplementedError("Pallas ConvBlock only implements stride=1")
    x = jnp.transpose(x_nchw, (0, 2, 3, 1))               # NCHW -> NHWC
    N, H, W, Cin = x.shape
    Cout = params["w1"].shape[-1]
    Cpad = _round_up(Cout, LANES)                          # lane-dense channels
    Hp, Wp = H + 2, W + 2
    MW = H * Wp                                            # wide-frame rows / image
    K1 = 9 * Cin                                           # folded conv1 contraction
    FR2 = _round_up(Hp * Wp + 2, 8)                        # conv2 scratch rows

    # conv1 LHS: fold the 9 taps into the contraction dim (tiny for small Cin;
    # ~20 KB/image at the driver sizes) — one matmul instead of 9 K=Cin matmuls.
    xp = jnp.pad(x, ((0, 0), (1, 1), (1, 1), (0, 0))).reshape(N, Hp * Wp, Cin)
    xflat = jnp.pad(xp, ((0, 0), (0, 2), (0, 0)))          # slack rows for last tap
    taps = [xflat[:, dy * Wp + dx: dy * Wp + dx + MW, :]
            for dy in range(3) for dx in range(3)]
    lhs1 = jnp.concatenate(taps, axis=-1).astype(jnp.bfloat16)   # (N, MW, 9*Cin)

    w1f = params["w1"].reshape(K1, Cout)
    w1f = jnp.pad(w1f, ((0, 0), (0, Cpad - Cout))).astype(jnp.bfloat16)
    w2 = jnp.pad(params["w2"],
                 ((0, 0), (0, 0), (0, Cpad - Cout), (0, Cpad - Cout)))
    w2 = w2.reshape(9, Cpad, Cpad).astype(jnp.bfloat16)

    count = N * H * W

    st1 = _run_stats1(lhs1, w1f, Wp, W, Cpad)
    bn1 = _bn_scale_shift(st1, params["g1"], params["b1"], count, Cpad)

    y2, st2 = _run_conv2(lhs1, bn1, w1f, w2, Wp, W, FR2, Cpad)
    bn2 = _bn_scale_shift(st2, params["g2"], params["b2"], count, Cpad)

    out_wide = _run_final(lhs1, w1f, bn1, y2, bn2, Cout)   # (N, MW, Cout)
    out = out_wide.reshape(N, H, Wp, Cout)[:, :, :W, :]
    return jnp.transpose(out, (0, 3, 1, 2))                # NHWC -> NCHW


# ------------------------------- reference ----------------------------------

def _bn_train(y, gamma, beta):
    mean = jnp.mean(y, axis=(0, 1, 2))
    var = jnp.maximum(jnp.mean(y * y, axis=(0, 1, 2)) - mean * mean, 0.0)
    scale = gamma.reshape(-1) * lax.rsqrt(var + BN_EPS)
    shift = beta.reshape(-1) - mean * scale
    return y * scale + shift


def reference_forward(params, x_nchw, stride=1):
    # Same math as the PyTorch module (training-mode BN); conv operands are
    # cast to bf16 to match the kernel's mixed-precision MXU path.
    x = jnp.transpose(x_nchw, (0, 2, 3, 1))
    dn = lax.conv_dimension_numbers(x.shape, params["w1"].shape,
                                    ("NHWC", "HWIO", "NHWC"))
    y1 = lax.conv_general_dilated(
        x.astype(jnp.bfloat16), params["w1"].astype(jnp.bfloat16),
        (stride, stride), ((1, 1), (1, 1)), dimension_numbers=dn,
        preferred_element_type=jnp.float32)
    x1 = _bn_train(y1, params["g1"], params["b1"])
    r = jnp.maximum(x1, 0.0)
    dn2 = lax.conv_dimension_numbers(r.shape, params["w2"].shape,
                                     ("NHWC", "HWIO", "NHWC"))
    y2 = lax.conv_general_dilated(
        r.astype(jnp.bfloat16), params["w2"].astype(jnp.bfloat16),
        (1, 1), ((1, 1), (1, 1)), dimension_numbers=dn2,
        preferred_element_type=jnp.float32)
    out = _bn_train(y2, params["g2"], params["b2"]) + x1
    out = jnp.maximum(x1 + out, 0.0)
    return jnp.transpose(out, (0, 3, 1, 2))


# --------------------------------- driver -----------------------------------

if __name__ == "__main__":
    key = jax.random.PRNGKey(0)
    kx, kp = jax.random.split(key)

    N, Cin, H, W, Cout = 2, 4, 16, 16, 8
    x = jax.random.normal(kx, (N, Cin, H, W), jnp.float32)   # NCHW like PyTorch
    params = init_convblock_params(kp, Cin, Cout)

    fwd = jax.jit(lambda p, xx: conv_block_forward(p, xx))
    out = jax.block_until_ready(fwd(params, x))
    assert out.shape == (N, Cout, H, W), out.shape

    ref = jax.block_until_ready(reference_forward(params, x))
    max_err = float(jnp.max(jnp.abs(out - ref)))
    if not jnp.allclose(out, ref, atol=5e-3, rtol=5e-3):
        raise AssertionError(
            f"Pallas ConvBlock does not match reference (max abs err {max_err:.3e})")

    print("KERNEL_OK")
</pallas_src>

<mosaic_0001>
module attributes {stable_mosaic.version = 11 : i64} {
  func.func @kernel(%arg0: i32, %arg1: memref<1x288x36xbf16, #tpu.memory_space<vmem>>, %arg2: memref<36x128xbf16, #tpu.memory_space<vmem>>, %arg3: memref<1x2x128xf32, #tpu.memory_space<vmem>>) attributes {dimension_semantics = [#tpu.dimension_semantics<parallel>], iteration_bounds = array<i64: 2>, scalar_prefetch = 0 : i64, scratch_operands = 0 : i64, tpu.core_type = #tpu.core_type<tc>, window_params = [{transform_indices = @transform_0, window_bounds = array<i64: 1, 288, 36>}, {pipeline_mode = #tpu.pipeline_mode<synchronous>, transform_indices = @transform_1, window_bounds = array<i64: 36, 128>}, {transform_indices = @transform_2, window_bounds = array<i64: 1, 2, 128>}]} {
    %c0 = arith.constant 0 : index
    %c0_0 = arith.constant 0 : index
    %c0_1 = arith.constant 0 : index
    %0 = vector.load %arg1[%c0, %c0_0, %c0_1] : memref<1x288x36xbf16, #tpu.memory_space<vmem>>, vector<1x288x36xbf16>
    %1 = vector.shape_cast %0 : vector<1x288x36xbf16> to vector<288x36xbf16>
    %c0_2 = arith.constant 0 : index
    %c0_3 = arith.constant 0 : index
    %2 = vector.load %arg2[%c0_2, %c0_3] : memref<36x128xbf16, #tpu.memory_space<vmem>>, vector<36x128xbf16>
    %cst = arith.constant dense<0.000000e+00> : vector<288x128xf32>
    %3 = tpu.matmul %1, %2, %cst {dimension_numbers = #tpu.dot_dimension_numbers<[1], [0], [0], [1], [0, 0, 1, 1], [], []>} : vector<288x36xbf16>, vector<36x128xbf16>, vector<288x128xf32> -> vector<288x128xf32>
    %4 = tpu.iota {dimensions = array<i32: 0>} : vector<288x1xi32>
    %c18_i32 = arith.constant 18 : i32
    %c0_i32 = arith.constant 0 : i32
    %5 = arith.cmpi eq, %c18_i32, %c0_i32 : i32
    %c1_i32 = arith.constant 1 : i32
    %6 = arith.select %5, %c1_i32, %c18_i32 : i32
    %7 = vector.broadcast %6 : i32 to vector<288x1xi32>
    %8 = arith.remsi %4, %7 : vector<288x1xi32>
    %c0_i32_4 = arith.constant 0 : i32
    %9 = vector.broadcast %c0_i32_4 : i32 to vector<288x1xi32>
    %10 = arith.cmpi ne, %8, %9 : vector<288x1xi32>
    %c0_i32_5 = arith.constant 0 : i32
    %11 = vector.broadcast %c0_i32_5 : i32 to vector<288x1xi32>
    %12 = arith.cmpi slt, %8, %11 : vector<288x1xi32>
    %c0_i32_6 = arith.constant 0 : i32
    %13 = arith.cmpi slt, %6, %c0_i32_6 : i32
    %14 = vector.broadcast %13 : i1 to vector<288x1xi1>
    %15 = vector.broadcast %14 : vector<288x1xi1> to vector<288x1xi1>
    %16 = arith.xori %12, %15 : vector<288x1xi1>
    %17 = arith.andi %16, %10 : vector<288x1xi1>
    %18 = vector.broadcast %6 : i32 to vector<288x1xi32>
    %19 = arith.addi %8, %18 : vector<288x1xi32>
    %20 = arith.select %17, %19, %8 : vector<288x1xi1>, vector<288x1xi32>
    %c16_i32 = arith.constant 16 : i32
    %21 = vector.broadcast %c16_i32 : i32 to vector<288x1xi32>
    %22 = arith.cmpi slt, %20, %21 : vector<288x1xi32>
    %23 = arith.extui %22 : vector<288x1xi1> to vector<288x1xi32>
    %24 = arith.sitofp %23 : vector<288x1xi32> to vector<288x1xf32>
    %25 = vector.broadcast %24 : vector<288x1xf32> to vector<288x128xf32>
    %26 = arith.mulf %3, %25 : vector<288x128xf32>
    %cst_7 = arith.constant dense<0.000000e+00> : vector<128xf32>
    %27 = vector.multi_reduction <add>, %26, %cst_7 [0] : vector<288x128xf32> to vector<128xf32>
    %28 = vector.shape_cast %27 : vector<128xf32> to vector<1x128xf32>
    %c0_8 = arith.constant 0 : index
    %c0_9 = arith.constant 0 : index
    %c0_10 = arith.constant 0 : index
    %29 = vector.load %arg3[%c0_8, %c0_9, %c0_10] : memref<1x2x128xf32, #tpu.memory_space<vmem>>, vector<1x1x128xf32>
    %30 = vector.shape_cast %29 : vector<1x1x128xf32> to vector<1x128xf32>
    %31 = vector.shape_cast %28 : vector<1x128xf32> to vector<1x1x128xf32>
    tpu.vector_store %arg3[%c0_8, %c0_9, %c0_10], %31 {strides = array<i32>} : memref<1x2x128xf32, #tpu.memory_space<vmem>>, vector<1x1x128xf32>,
    %32 = arith.mulf %26, %3 : vector<288x128xf32>
    %cst_11 = arith.constant dense<0.000000e+00> : vector<128xf32>
    %33 = vector.multi_reduction <add>, %32, %cst_11 [0] : vector<288x128xf32> to vector<128xf32>
    %34 = vector.shape_cast %33 : vector<128xf32> to vector<1x128xf32>
    %c0_12 = arith.constant 0 : index
    %c1 = arith.constant 1 : index
    %c0_13 = arith.constant 0 : index
    %35 = vector.load %arg3[%c0_12, %c1, %c0_13] : memref<1x2x128xf32, #tpu.memory_space<vmem>>, vector<1x1x128xf32>
    %36 = vector.shape_cast %35 : vector<1x1x128xf32> to vector<1x128xf32>
    %37 = vector.shape_cast %34 : vector<1x128xf32> to vector<1x1x128xf32>
    tpu.vector_store %arg3[%c0_12, %c1, %c0_13], %37 {strides = array<i32>} : memref<1x2x128xf32, #tpu.memory_space<vmem>>, vector<1x1x128xf32>,
    return
  }
  func.func @transform_0(%arg0: i32) -> (i32, i32, i32) {
    %c0_i32 = arith.constant 0 : i32
    %c0_i32_0 = arith.constant 0 : i32
    %c0_i32_1 = arith.constant 0 : i32
    return %arg0, %c0_i32, %c0_i32_0 : i32, i32, i32
  }
  func.func @transform_1(%arg0: i32) -> (i32, i32) {
    %c0_i32 = arith.constant 0 : i32
    %c0_i32_0 = arith.constant 0 : i32
    %c0_i32_1 = arith.constant 0 : i32
    return %c0_i32, %c0_i32_0 : i32, i32
  }
  func.func @transform_2(%arg0: i32) -> (i32, i32, i32) {
    %c0_i32 = arith.constant 0 : i32
    %c0_i32_0 = arith.constant 0 : i32
    %c0_i32_1 = arith.constant 0 : i32
    return %arg0, %c0_i32, %c0_i32_0 : i32, i32, i32
  }
}

module attributes {stable_mosaic.version = 11 : i64} {
  func.func @kernel(%arg0: i32, %arg1: memref<1x288x36xbf16, #tpu.memory_space<vmem>>, %arg2: memref<2x128xf32, #tpu.memory_space<vmem>>, %arg3: memref<36x128xbf16, #tpu.memory_space<vmem>>, %arg4: memref<9x128x128xbf16, #tpu.memory_space<vmem>>, %arg5: memref<1x288x128xf32, #tpu.memory_space<vmem>>, %arg6: memref<1x2x128xf32, #tpu.memory_space<vmem>>, %arg7: memref<328x128xbf16, #tpu.memory_space<vmem>>) attributes {dimension_semantics = [#tpu.dimension_semantics<parallel>], iteration_bounds = array<i64: 2>, scalar_prefetch = 0 : i64, scratch_operands = 1 : i64, tpu.core_type = #tpu.core_type<tc>, window_params = [{transform_indices = @transform_0, window_bounds = array<i64: 1, 288, 36>}, {pipeline_mode = #tpu.pipeline_mode<synchronous>, transform_indices = @transform_1, window_bounds = array<i64: 2, 128>}, {pipeline_mode = #tpu.pipeline_mode<synchronous>, transform_indices = @transform_2, window_bounds = array<i64: 36, 128>}, {pipeline_mode = #tpu.pipeline_mode<synchronous>, transform_indices = @transform_3, window_bounds = array<i64: 9, 128, 128>}, {transform_indices = @transform_4, window_bounds = array<i64: 1, 288, 128>}, {transform_indices = @transform_5, window_bounds = array<i64: 1, 2, 128>}]} {
    %0 = tpu.iota {dimensions = array<i32: 0>} : vector<288x1xi32>
    %c18_i32 = arith.constant 18 : i32
    %c0_i32 = arith.constant 0 : i32
    %1 = arith.cmpi eq, %c18_i32, %c0_i32 : i32
    %c1_i32 = arith.constant 1 : i32
    %2 = arith.select %1, %c1_i32, %c18_i32 : i32
    %3 = vector.broadcast %2 : i32 to vector<288x1xi32>
    %4 = arith.remsi %0, %3 : vector<288x1xi32>
    %c0_i32_0 = arith.constant 0 : i32
    %5 = vector.broadcast %c0_i32_0 : i32 to vector<288x1xi32>
    %6 = arith.cmpi ne, %4, %5 : vector<288x1xi32>
    %c0_i32_1 = arith.constant 0 : i32
    %7 = vector.broadcast %c0_i32_1 : i32 to vector<288x1xi32>
    %8 = arith.cmpi slt, %4, %7 : vector<288x1xi32>
    %c0_i32_2 = arith.constant 0 : i32
    %9 = arith.cmpi slt, %2, %c0_i32_2 : i32
    %10 = vector.broadcast %9 : i1 to vector<288x1xi1>
    %11 = vector.broadcast %10 : vector<288x1xi1> to vector<288x1xi1>
    %12 = arith.xori %8, %11 : vector<288x1xi1>
    %13 = arith.andi %12, %6 : vector<288x1xi1>
    %14 = vector.broadcast %2 : i32 to vector<288x1xi32>
    %15 = arith.addi %4, %14 : vector<288x1xi32>
    %16 = arith.select %13, %15, %4 : vector<288x1xi1>, vector<288x1xi32>
    %c16_i32 = arith.constant 16 : i32
    %17 = vector.broadcast %c16_i32 : i32 to vector<288x1xi32>
    %18 = arith.cmpi slt, %16, %17 : vector<288x1xi32>
    %19 = arith.extui %18 : vector<288x1xi1> to vector<288x1xi32>
    %20 = arith.sitofp %19 : vector<288x1xi32> to vector<288x1xf32>
    %c0 = arith.constant 0 : index
    %c0_3 = arith.constant 0 : index
    %c0_4 = arith.constant 0 : index
    %21 = vector.load %arg1[%c0, %c0_3, %c0_4] : memref<1x288x36xbf16, #tpu.memory_space<vmem>>, vector<1x288x36xbf16>
    %22 = vector.shape_cast %21 : vector<1x288x36xbf16> to vector<288x36xbf16>
    %c0_5 = arith.constant 0 : index
    %c0_6 = arith.constant 0 : index
    %23 = vector.load %arg3[%c0_5, %c0_6] : memref<36x128xbf16, #tpu.memory_space<vmem>>, vector<36x128xbf16>
    %cst = arith.constant dense<0.000000e+00> : vector<288x128xf32>
    %24 = tpu.matmul %22, %23, %cst {dimension_numbers = #tpu.dot_dimension_numbers<[1], [0], [0], [1], [0, 0, 1, 1], [], []>} : vector<288x36xbf16>, vector<36x128xbf16>, vector<288x128xf32> -> vector<288x128xf32>
    %c0_7 = arith.constant 0 : index
    %c0_8 = arith.constant 0 : index
    %25 = vector.load %arg2[%c0_7, %c0_8] : memref<2x128xf32, #tpu.memory_space<vmem>>, vector<1x128xf32>
    %26 = vector.broadcast %25 : vector<1x128xf32> to vector<288x128xf32>
    %27 = arith.mulf %24, %26 : vector<288x128xf32>
    %c1 = arith.constant 1 : index
    %c0_9 = arith.constant 0 : index
    %28 = vector.load %arg2[%c1, %c0_9] : memref<2x128xf32, #tpu.memory_space<vmem>>, vector<1x128xf32>
    %29 = vector.broadcast %28 : vector<1x128xf32> to vector<288x128xf32>
    %30 = arith.addf %27, %29 : vector<288x128xf32>
    %cst_10 = arith.constant 0.000000e+00 : f32
    %31 = vector.broadcast %cst_10 : f32 to vector<288x128xf32>
    %32 = arith.maximumf %30, %31 : vector<288x128xf32>
    %33 = vector.broadcast %20 : vector<288x1xf32> to vector<288x128xf32>
    %34 = arith.mulf %32, %33 : vector<288x128xf32>
    %cst_11 = arith.constant 0.000000e+00 : bf16
    %35 = vector.broadcast %cst_11 : bf16 to vector<19x128xbf16>
    %c0_12 = arith.constant 0 : index
    %c0_13 = arith.constant 0 : index
    %36 = vector.load %arg7[%c0_12, %c0_13] : memref<328x128xbf16, #tpu.memory_space<vmem>>, vector<19x128xbf16>
    tpu.vector_store %arg7[%c0_12, %c0_13], %35 {strides = array<i32>} : memref<328x128xbf16, #tpu.memory_space<vmem>>, vector<19x128xbf16>,
    %cst_14 = arith.constant 0.000000e+00 : bf16
    %37 = vector.broadcast %cst_14 : bf16 to vector<21x128xbf16>
    %c307 = arith.constant 307 : index
    %c0_15 = arith.constant 0 : index
    %38 = vector.load %arg7[%c307, %c0_15] : memref<328x128xbf16, #tpu.memory_space<vmem>>, vector<21x128xbf16>
    tpu.vector_store %arg7[%c307, %c0_15], %37 {strides = array<i32>} : memref<328x128xbf16, #tpu.memory_space<vmem>>, vector<21x128xbf16>,
    %39 = arith.truncf %34 : vector<288x128xf32> to vector<288x128xbf16>
    %c19 = arith.constant 19 : index
    %c0_16 = arith.constant 0 : index
    %40 = vector.load %arg7[%c19, %c0_16] : memref<328x128xbf16, #tpu.memory_space<vmem>>, vector<288x128xbf16>
    tpu.vector_store %arg7[%c19, %c0_16], %39 {strides = array<i32>} : memref<328x128xbf16, #tpu.memory_space<vmem>>, vector<288x128xbf16>,
    %c0_17 = arith.constant 0 : index
    %c0_18 = arith.constant 0 : index
    %41 = vector.load %arg7[%c0_17, %c0_18] : memref<328x128xbf16, #tpu.memory_space<vmem>>, vector<288x128xbf16>
    %c0_19 = arith.constant 0 : index
    %c0_20 = arith.constant 0 : index
    %c0_21 = arith.constant 0 : index
    %42 = vector.load %arg4[%c0_19, %c0_20, %c0_21] : memref<9x128x128xbf16, #tpu.memory_space<vmem>>, vector<1x128x128xbf16>
    %43 = vector.shape_cast %42 : vector<1x128x128xbf16> to vector<128x128xbf16>
    %cst_22 = arith.constant dense<0.000000e+00> : vector<288x128xf32>
    %44 = tpu.matmul %41, %43, %cst_22 {dimension_numbers = #tpu.dot_dimension_numbers<[1], [0], [0], [1], [0, 0, 1, 1], [], []>} : vector<288x128xbf16>, vector<128x128xbf16>, vector<288x128xf32> -> vector<288x128xf32>
    %c1_23 = arith.constant 1 : index
    %c0_24 = arith.constant 0 : index
    %45 = vector.load %arg7[%c1_23, %c0_24] : memref<328x128xbf16, #tpu.memory_space<vmem>>, vector<288x128xbf16>
    %c1_25 = arith.constant 1 : index
    %c0_26 = arith.constant 0 : index
    %c0_27 = arith.constant 0 : index
    %46 = vector.load %arg4[%c1_25, %c0_26, %c0_27] : memref<9x128x128xbf16, #tpu.memory_space<vmem>>, vector<1x128x128xbf16>
    %47 = vector.shape_cast %46 : vector<1x128x128xbf16> to vector<128x128xbf16>
    %cst_28 = arith.constant dense<0.000000e+00> : vector<288x128xf32>
    %48 = tpu.matmul %45, %47, %cst_28 {dimension_numbers = #tpu.dot_dimension_numbers<[1], [0], [0], [1], [0, 0, 1, 1], [], []>} : vector<288x128xbf16>, vector<128x128xbf16>, vector<288x128xf32> -> vector<288x128xf32>
    %49 = arith.addf %44, %48 : vector<288x128xf32>
    %c2 = arith.constant 2 : index
    %c0_29 = arith.constant 0 : index
    %50 = vector.load %arg7[%c2, %c0_29] : memref<328x128xbf16, #tpu.memory_space<vmem>>, vector<288x128xbf16>
    %c2_30 = arith.constant 2 : index
    %c0_31 = arith.constant 0 : index
    %c0_32 = arith.constant 0 : index
    %51 = vector.load %arg4[%c2_30, %c0_31, %c0_32] : memref<9x128x128xbf16, #tpu.memory_space<vmem>>, vector<1x128x128xbf16>
    %52 = vector.shape_cast %51 : vector<1x128x128xbf16> to vector<128x128xbf16>
    %cst_33 = arith.constant dense<0.000000e+00> : vector<288x128xf32>
    %53 = tpu.matmul %50, %52, %cst_33 {dimension_numbers = #tpu.dot_dimension_numbers<[1], [0], [0], [1], [0, 0, 1, 1], [], []>} : vector<288x128xbf16>, vector<128x128xbf16>, vector<288x128xf32> -> vector<288x128xf32>
    %54 = arith.addf %49, %53 : vector<288x128xf32>
    %c18 = arith.constant 18 : index
    %c0_34 = arith.constant 0 : index
    %55 = vector.load %arg7[%c18, %c0_34] : memref<328x128xbf16, #tpu.memory_space<vmem>>, vector<288x128xbf16>
    %c3 = arith.constant 3 : index
    %c0_35 = arith.constant 0 : index
    %c0_36 = arith.constant 0 : index
    %56 = vector.load %arg4[%c3, %c0_35, %c0_36] : memref<9x128x128xbf16, #tpu.memory_space<vmem>>, vector<1x128x128xbf16>
    %57 = vector.shape_cast %56 : vector<1x128x128xbf16> to vector<128x128xbf16>
    %cst_37 = arith.constant dense<0.000000e+00> : vector<288x128xf32>
    %58 = tpu.matmul %55, %57, %cst_37 {dimension_numbers = #tpu.dot_dimension_numbers<[1], [0], [0], [1], [0, 0, 1, 1], [], []>} : vector<288x128xbf16>, vector<128x128xbf16>, vector<288x128xf32> -> vector<288x128xf32>
    %59 = arith.addf %54, %58 : vector<288x128xf32>
    %c19_38 = arith.constant 19 : index
    %c0_39 = arith.constant 0 : index
    %60 = vector.load %arg7[%c19_38, %c0_39] : memref<328x128xbf16, #tpu.memory_space<vmem>>, vector<288x128xbf16>
    %c4 = arith.constant 4 : index
    %c0_40 = arith.constant 0 : index
    %c0_41 = arith.constant 0 : index
    %61 = vector.load %arg4[%c4, %c0_40, %c0_41] : memref<9x128x128xbf16, #tpu.memory_space<vmem>>, vector<1x128x128xbf16>
    %62 = vector.shape_cast %61 : vector<1x128x128xbf16> to vector<128x128xbf16>
    %cst_42 = arith.constant dense<0.000000e+00> : vector<288x128xf32>
    %63 = tpu.matmul %60, %62, %cst_42 {dimension_numbers = #tpu.dot_dimension_numbers<[1], [0], [0], [1], [0, 0, 1, 1], [], []>} : vector<288x128xbf16>, vector<128x128xbf16>, vector<288x128xf32> -> vector<288x128xf32>
    %64 = arith.addf %59, %63 : vector<288x128xf32>
    %c20 = arith.constant 20 : index
    %c0_43 = arith.constant 0 : index
    %65 = vector.load %arg7[%c20, %c0_43] : memref<328x128xbf16, #tpu.memory_space<vmem>>, vector<288x128xbf16>
    %c5 = arith.constant 5 : index
    %c0_44 = arith.constant 0 : index
    %c0_45 = arith.constant 0 : index
    %66 = vector.load %arg4[%c5, %c0_44, %c0_45] : memref<9x128x128xbf16, #tpu.memory_space<vmem>>, vector<1x128x128xbf16>
    %67 = vector.shape_cast %66 : vector<1x128x128xbf16> to vector<128x128xbf16>
    %cst_46 = arith.constant dense<0.000000e+00> : vector<288x128xf32>
    %68 = tpu.matmul %65, %67, %cst_46 {dimension_numbers = #tpu.dot_dimension_numbers<[1], [0], [0], [1], [0, 0, 1, 1], [], []>} : vector<288x128xbf16>, vector<128x128xbf16>, vector<288x128xf32> -> vector<288x128xf32>
    %69 = arith.addf %64, %68 : vector<288x128xf32>
    %c36 = arith.constant 36 : index
    %c0_47 = arith.constant 0 : index
    %70 = vector.load %arg7[%c36, %c0_47] : memref<328x128xbf16, #tpu.memory_space<vmem>>, vector<288x128xbf16>
    %c6 = arith.constant 6 : index
    %c0_48 = arith.constant 0 : index
    %c0_49 = arith.constant 0 : index
    %71 = vector.load %arg4[%c6, %c0_48, %c0_49] : memref<9x128x128xbf16, #tpu.memory_space<vmem>>, vector<1x128x128xbf16>
    %72 = vector.shape_cast %71 : vector<1x128x128xbf16> to vector<128x128xbf16>
    %cst_50 = arith.constant dense<0.000000e+00> : vector<288x128xf32>
    %73 = tpu.matmul %70, %72, %cst_50 {dimension_numbers = #tpu.dot_dimension_numbers<[1], [0], [0], [1], [0, 0, 1, 1], [], []>} : vector<288x128xbf16>, vector<128x128xbf16>, vector<288x128xf32> -> vector<288x128xf32>
    %74 = arith.addf %69, %73 : vector<288x128xf32>
    %c37 = arith.constant 37 : index
    %c0_51 = arith.constant 0 : index
    %75 = vector.load %arg7[%c37, %c0_51] : memref<328x128xbf16, #tpu.memory_space<vmem>>, vector<288x128xbf16>
    %c7 = arith.constant 7 : index
    %c0_52 = arith.constant 0 : index
    %c0_53 = arith.constant 0 : index
    %76 = vector.load %arg4[%c7, %c0_52, %c0_53] : memref<9x128x128xbf16, #tpu.memory_space<vmem>>, vector<1x128x128xbf16>
    %77 = vector.shape_cast %76 : vector<1x128x128xbf16> to vector<128x128xbf16>
    %cst_54 = arith.constant dense<0.000000e+00> : vector<288x128xf32>
    %78 = tpu.matmul %75, %77, %cst_54 {dimension_numbers = #tpu.dot_dimension_numbers<[1], [0], [0], [1], [0, 0, 1, 1], [], []>} : vector<288x128xbf16>, vector<128x128xbf16>, vector<288x128xf32> -> vector<288x128xf32>
    %79 = arith.addf %74, %78 : vector<288x128xf32>
    %c38 = arith.constant 38 : index
    %c0_55 = arith.constant 0 : index
    %80 = vector.load %arg7[%c38, %c0_55] : memref<328x128xbf16, #tpu.memory_space<vmem>>, vector<288x128xbf16>
    %c8 = arith.constant 8 : index
    %c0_56 = arith.constant 0 : index
    %c0_57 = arith.constant 0 : index
    %81 = vector.load %arg4[%c8, %c0_56, %c0_57] : memref<9x128x128xbf16, #tpu.memory_space<vmem>>, vector<1x128x128xbf16>
    %82 = vector.shape_cast %81 : vector<1x128x128xbf16> to vector<128x128xbf16>
    %cst_58 = arith.constant dense<0.000000e+00> : vector<288x128xf32>
    %83 = tpu.matmul %80, %82, %cst_58 {dimension_numbers = #tpu.dot_dimension_numbers<[1], [0], [0], [1], [0, 0, 1, 1], [], []>} : vector<288x128xbf16>, vector<128x128xbf16>, vector<288x128xf32> -> vector<288x128xf32>
    %84 = arith.addf %79, %83 : vector<288x128xf32>
    %c0_59 = arith.constant 0 : index
    %c0_60 = arith.constant 0 : index
    %c0_61 = arith.constant 0 : index
    %85 = vector.load %arg5[%c0_59, %c0_60, %c0_61] : memref<1x288x128xf32, #tpu.memory_space<vmem>>, vector<1x288x128xf32>
    %86 = vector.shape_cast %85 : vector<1x288x128xf32> to vector<288x128xf32>
    %87 = vector.shape_cast %84 : vector<288x128xf32> to vector<1x288x128xf32>
    tpu.vector_store %arg5[%c0_59, %c0_60, %c0_61], %87 {strides = array<i32>} : memref<1x288x128xf32, #tpu.memory_space<vmem>>, vector<1x288x128xf32>,
    %88 = vector.broadcast %20 : vector<288x1xf32> to vector<288x128xf32>
    %89 = arith.mulf %84, %88 : vector<288x128xf32>
    %cst_62 = arith.constant dense<0.000000e+00> : vector<128xf32>
    %90 = vector.multi_reduction <add>, %89, %cst_62 [0] : vector<288x128xf32> to vector<128xf32>
    %91 = vector.shape_cast %90 : vector<128xf32> to vector<1x128xf32>
    %c0_63 = arith.constant 0 : index
    %c0_64 = arith.constant 0 : index
    %c0_65 = arith.constant 0 : index
    %92 = vector.load %arg6[%c0_63, %c0_64, %c0_65] : memref<1x2x128xf32, #tpu.memory_space<vmem>>, vector<1x1x128xf32>
    %93 = vector.shape_cast %92 : vector<1x1x128xf32> to vector<1x128xf32>
    %94 = vector.shape_cast %91 : vector<1x128xf32> to vector<1x1x128xf32>
    tpu.vector_store %arg6[%c0_63, %c0_64, %c0_65], %94 {strides = array<i32>} : memref<1x2x128xf32, #tpu.memory_space<vmem>>, vector<1x1x128xf32>,
    %95 = arith.mulf %89, %84 : vector<288x128xf32>
    %cst_66 = arith.constant dense<0.000000e+00> : vector<128xf32>
    %96 = vector.multi_reduction <add>, %95, %cst_66 [0] : vector<288x128xf32> to vector<128xf32>
    %97 = vector.shape_cast %96 : vector<128xf32> to vector<1x128xf32>
    %c0_67 = arith.constant 0 : index
    %c1_68 = arith.constant 1 : index
    %c0_69 = arith.constant 0 : index
    %98 = vector.load %arg6[%c0_67, %c1_68, %c0_69] : memref<1x2x128xf32, #tpu.memory_space<vmem>>, vector<1x1x128xf32>
    %99 = vector.shape_cast %98 : vector<1x1x128xf32> to vector<1x128xf32>
    %100 = vector.shape_cast %97 : vector<1x128xf32> to vector<1x1x128xf32>
    tpu.vector_store %arg6[%c0_67, %c1_68, %c0_69], %100 {strides = array<i32>} : memref<1x2x128xf32, #tpu.memory_space<vmem>>, vector<1x1x128xf32>,
    return
  }
  func.func @transform_0(%arg0: i32) -> (i32, i32, i32) {
    %c0_i32 = arith.constant 0 : i32
    %c0_i32_0 = arith.constant 0 : i32
    %c0_i32_1 = arith.constant 0 : i32
    return %arg0, %c0_i32, %c0_i32_0 : i32, i32, i32
  }
  func.func @transform_1(%arg0: i32) -> (i32, i32) {
    %c0_i32 = arith.constant 0 : i32
    %c0_i32_0 = arith.constant 0 : i32
    %c0_i32_1 = arith.constant 0 : i32
    return %c0_i32, %c0_i32_0 : i32, i32
  }
  func.func @transform_2(%arg0: i32) -> (i32, i32) {
    %c0_i32 = arith.constant 0 : i32
    %c0_i32_0 = arith.constant 0 : i32
    %c0_i32_1 = arith.constant 0 : i32
    return %c0_i32, %c0_i32_0 : i32, i32
  }
  func.func @transform_3(%arg0: i32) -> (i32, i32, i32) {
    %c0_i32 = arith.constant 0 : i32
    %c0_i32_0 = arith.constant 0 : i32
    %c0_i32_1 = arith.constant 0 : i32
    %c0_i32_2 = arith.constant 0 : i32
    return %c0_i32, %c0_i32_0, %c0_i32_1 : i32, i32, i32
  }
  func.func @transform_4(%arg0: i32) -> (i32, i32, i32) {
    %c0_i32 = arith.constant 0 : i32
    %c0_i32_0 = arith.constant 0 : i32
    %c0_i32_1 = arith.constant 0 : i32
    return %arg0, %c0_i32, %c0_i32_0 : i32, i32, i32
  }
  func.func @transform_5(%arg0: i32) -> (i32, i32, i32) {
    %c0_i32 = arith.constant 0 : i32
    %c0_i32_0 = arith.constant 0 : i32
    %c0_i32_1 = arith.constant 0 : i32
    return %arg0, %c0_i32, %c0_i32_0 : i32, i32, i32
  }
}

module attributes {stable_mosaic.version = 11 : i64} {
  func.func @_final_kernel(%arg0: i32, %arg1: memref<1x288x36xbf16, #tpu.memory_space<vmem>>, %arg2: memref<36x128xbf16, #tpu.memory_space<vmem>>, %arg3: memref<2x128xf32, #tpu.memory_space<vmem>>, %arg4: memref<1x288x128xf32, #tpu.memory_space<vmem>>, %arg5: memref<2x128xf32, #tpu.memory_space<vmem>>, %arg6: memref<1x288x8xf32, #tpu.memory_space<vmem>>) attributes {dimension_semantics = [#tpu.dimension_semantics<parallel>], iteration_bounds = array<i64: 2>, scalar_prefetch = 0 : i64, scratch_operands = 0 : i64, tpu.core_type = #tpu.core_type<tc>, window_params = [{transform_indices = @transform_0, window_bounds = array<i64: 1, 288, 36>}, {pipeline_mode = #tpu.pipeline_mode<synchronous>, transform_indices = @transform_1, window_bounds = array<i64: 36, 128>}, {pipeline_mode = #tpu.pipeline_mode<synchronous>, transform_indices = @transform_2, window_bounds = array<i64: 2, 128>}, {transform_indices = @transform_3, window_bounds = array<i64: 1, 288, 128>}, {pipeline_mode = #tpu.pipeline_mode<synchronous>, transform_indices = @transform_4, window_bounds = array<i64: 2, 128>}, {transform_indices = @transform_5, window_bounds = array<i64: 1, 288, 8>}]} {
    %c0 = arith.constant 0 : index
    %c0_0 = arith.constant 0 : index
    %c0_1 = arith.constant 0 : index
    %0 = vector.load %arg1[%c0, %c0_0, %c0_1] : memref<1x288x36xbf16, #tpu.memory_space<vmem>>, vector<1x288x36xbf16>
    %1 = vector.shape_cast %0 : vector<1x288x36xbf16> to vector<288x36xbf16>
    %c0_2 = arith.constant 0 : index
    %c0_3 = arith.constant 0 : index
    %2 = vector.load %arg2[%c0_2, %c0_3] : memref<36x128xbf16, #tpu.memory_space<vmem>>, vector<36x128xbf16>
    %cst = arith.constant dense<0.000000e+00> : vector<288x128xf32>
    %3 = tpu.matmul %1, %2, %cst {dimension_numbers = #tpu.dot_dimension_numbers<[1], [0], [0], [1], [0, 0, 1, 1], [], []>} : vector<288x36xbf16>, vector<36x128xbf16>, vector<288x128xf32> -> vector<288x128xf32>
    %c0_4 = arith.constant 0 : index
    %c0_5 = arith.constant 0 : index
    %4 = vector.load %arg3[%c0_4, %c0_5] : memref<2x128xf32, #tpu.memory_space<vmem>>, vector<1x128xf32>
    %5 = vector.broadcast %4 : vector<1x128xf32> to vector<288x128xf32>
    %6 = arith.mulf %3, %5 : vector<288x128xf32>
    %c1 = arith.constant 1 : index
    %c0_6 = arith.constant 0 : index
    %7 = vector.load %arg3[%c1, %c0_6] : memref<2x128xf32, #tpu.memory_space<vmem>>, vector<1x128xf32>
    %8 = vector.broadcast %7 : vector<1x128xf32> to vector<288x128xf32>
    %9 = arith.addf %6, %8 : vector<288x128xf32>
    %c0_7 = arith.constant 0 : index
    %c0_8 = arith.constant 0 : index
    %c0_9 = arith.constant 0 : index
    %10 = vector.load %arg4[%c0_7, %c0_8, %c0_9] : memref<1x288x128xf32, #tpu.memory_space<vmem>>, vector<1x288x128xf32>
    %11 = vector.shape_cast %10 : vector<1x288x128xf32> to vector<288x128xf32>
    %c0_10 = arith.constant 0 : index
    %c0_11 = arith.constant 0 : index
    %12 = vector.load %arg5[%c0_10, %c0_11] : memref<2x128xf32, #tpu.memory_space<vmem>>, vector<1x128xf32>
    %13 = vector.broadcast %12 : vector<1x128xf32> to vector<288x128xf32>
    %14 = arith.mulf %11, %13 : vector<288x128xf32>
    %c1_12 = arith.constant 1 : index
    %c0_13 = arith.constant 0 : index
    %15 = vector.load %arg5[%c1_12, %c0_13] : memref<2x128xf32, #tpu.memory_space<vmem>>, vector<1x128xf32>
    %16 = vector.broadcast %15 : vector<1x128xf32> to vector<288x128xf32>
    %17 = arith.addf %14, %16 : vector<288x128xf32>
    %cst_14 = arith.constant 2.000000e+00 : f32
    %18 = vector.broadcast %cst_14 : f32 to vector<288x128xf32>
    %19 = arith.mulf %18, %9 : vector<288x128xf32>
    %20 = arith.addf %19, %17 : vector<288x128xf32>
    %cst_15 = arith.constant 0.000000e+00 : f32
    %21 = vector.broadcast %cst_15 : f32 to vector<288x128xf32>
    %22 = arith.maximumf %20, %21 : vector<288x128xf32>
    %23 = vector.extract_strided_slice %22 {offsets = [0, 0], sizes = [288, 8], strides = [1, 1]} : vector<288x128xf32> to vector<288x8xf32>
    %c0_16 = arith.constant 0 : index
    %c0_17 = arith.constant 0 : index
    %c0_18 = arith.constant 0 : index
    %24 = vector.load %arg6[%c0_16, %c0_17, %c0_18] : memref<1x288x8xf32, #tpu.memory_space<vmem>>, vector<1x288x8xf32>
    %25 = vector.shape_cast %24 : vector<1x288x8xf32> to vector<288x8xf32>
    %26 = vector.shape_cast %23 : vector<288x8xf32> to vector<1x288x8xf32>
    tpu.vector_store %arg6[%c0_16, %c0_17, %c0_18], %26 {strides = array<i32>} : memref<1x288x8xf32, #tpu.memory_space<vmem>>, vector<1x288x8xf32>,
    return
  }
  func.func @transform_0(%arg0: i32) -> (i32, i32, i32) {
    %c0_i32 = arith.constant 0 : i32
    %c0_i32_0 = arith.constant 0 : i32
    %c0_i32_1 = arith.constant 0 : i32
    return %arg0, %c0_i32, %c0_i32_0 : i32, i32, i32
  }
  func.func @transform_1(%arg0: i32) -> (i32, i32) {
    %c0_i32 = arith.constant 0 : i32
    %c0_i32_0 = arith.constant 0 : i32
    %c0_i32_1 = arith.constant 0 : i32
    return %c0_i32, %c0_i32_0 : i32, i32
  }
  func.func @transform_2(%arg0: i32) -> (i32, i32) {
    %c0_i32 = arith.constant 0 : i32
    %c0_i32_0 = arith.constant 0 : i32
    %c0_i32_1 = arith.constant 0 : i32
    return %c0_i32, %c0_i32_0 : i32, i32
  }
  func.func @transform_3(%arg0: i32) -> (i32, i32, i32) {
    %c0_i32 = arith.constant 0 : i32
    %c0_i32_0 = arith.constant 0 : i32
    %c0_i32_1 = arith.constant 0 : i32
    return %arg0, %c0_i32, %c0_i32_0 : i32, i32, i32
  }
  func.func @transform_4(%arg0: i32) -> (i32, i32) {
    %c0_i32 = arith.constant 0 : i32
    %c0_i32_0 = arith.constant 0 : i32
    %c0_i32_1 = arith.constant 0 : i32
    return %c0_i32, %c0_i32_0 : i32, i32
  }
  func.func @transform_5(%arg0: i32) -> (i32, i32, i32) {
    %c0_i32 = arith.constant 0 : i32
    %c0_i32_0 = arith.constant 0 : i32
    %c0_i32_1 = arith.constant 0 : i32
    return %arg0, %c0_i32, %c0_i32_0 : i32, i32, i32
  }
}

</mosaic_0001>

<bundles_post_ra>
// kernel: _lambda_.3
= control target key start
LH: loop header
LB: loop body
LE: loop exit
PB: predicated region body
PF: predicated region fallthrough
CT: control target
= control target key end

     0   :  { %s1737_s9 = smov 0   ;;  %s2899_s0 = inlined_call_operand.vmem [shape: bf16[2,288,36], index: 0, kind: input, shape index: {}]   ;;  %s2900_s1 = inlined_call_operand.vmem [shape: bf16[36,128], index: 1, kind: input, shape index: {}]   ;;  %s2901_s2 = inlined_call_operand.vmem [shape: f32[2,2,128], index: 2, kind: output, shape index: {}]  }
   0x1 LB: > { %s1455_s10 = sadd.s32 4294967295, %s1719_s9   ;;  %p1459_p0 = scmp.ge.s32.totalorder %s1719_s9, 1  ;;  %s1719_s9 = sphi %s1737_s9, %s12_s9  }
   0x2   : > { %p112_p1 = scmp.lt.s32.totalorder %s1719_s9, 3 }
   0x4   : > { %p113_p2 = pnand %p1459_p0, %p112_p1 }
   0x5   : > { %p133_p3 = scmp.lt.s32.totalorder (!%p113_p2), %s1455_s10, 1 }
   0x6   : > { %116 = sbr.rel (%p113_p2) target bundleno = 310 (0x136), region = 28 }
   0xb   : > { %v1692_v0 = vld [vmem:[%s2900_s1 + $0x10] ss:$0 sps:$4 sm:$0x33]   ;;  %vm344_vm0 = vcmask 1041408   ;;  %v1693_v1 = vld [vmem:[%s2900_s1 + $0x8] sm:$0xff]   ;;  %s3030_s10 = smov (!%p133_p3, %s1455_s10), 1  ;;  %v525_v22 = vlaneseq }
   0xc   : > { %1608 = vmatprep.subr.msk.bf16.mxu0 %vm344_vm0, %v1692_v0  ;;  %v346_v2 = vsel %vm344_vm0, %v1692_v0, 0  ;;  %1609 = vmatprep.subr.msk.bf16.mxu1 %vm344_vm0, %v1692_v0  ;;  %v1694_v3 = vld [vmem:[%s2900_s1] sm:$0xff]   ;;  %s1610_s17 = smul.u32 144, %s3030_s10  ;;  %vm289_vm1 = vcmask 293888   ;;  %s1461_s21 = sshll.u32 %s3030_s10, 1 }
   0xd   : > { %1561 = vmatpush3.bf16.msra.mxu0 %v346_v2  ;;  %1605 = vmatpush3.bf16.msra.mxu1 %v346_v2  ;;  %v1798_v23 = vshrl.u32 %v525_v22, 7  ;;  %s141_s24 = scalar_lea.vmem %s2901_s2, %s1461_s21 }
   0xe   : > { %1562 = vmatprep.subr.bf16.mxu0 %v1693_v1  ;;  %1603 = vmatprep.subr.bf16.mxu1 %v1693_v1  ;;  %s1760_s20 = scalar_lea.vmem %s2899_s0, %s1610_s17 }
   0xf   : > { %v1695_v4 = vld [vmem:[%s1760_s20] sm:$0xff]   ;;  %v1696_v5 = vld [vmem:[%s1760_s20 + $0x8] sm:$0xff]   ;;  %v1697_v6 = vld [vmem:[%s1760_s20 + $0x10] sm:$0xff]   ;;  %v528_v24 = vadd.s32 16, %v1798_v23  ;;  %v1806_v28 = vmul.u32.u64.low 3817748708, %v1798_v23  ;;  %v1807_v29 = vmul.u32.u64.high 3817748708, %v1798_v23, %v1806_v28 }
  0x10   : > { %1566 = vmatprep.mubr.msk.bf16.mxu0 %vm289_vm1, %v1695_v4  ;;  %v1698_v7 = vld [vmem:[%s1760_s20 + $0x18] sm:$0xff]   ;;  %v1704_v8 = vld [vmem:[%s1760_s20 + $0x50] sm:$0xff]   ;;  %v1699_v9 = vld [vmem:[%s1760_s20 + $0x20] sm:$0xff]   ;;  %v529_v30 = vadd.s32 24, %v1798_v23  ;;  %v527_v31 = vadd.s32 8, %v1798_v23  ;;  %v532_v35 = vadd.s32 48, %v1798_v23 }
  0x11   : > { %1563 = vmatpush3.bf16.msra.mxu0 %v1693_v1  ;;  %1606 = vmatpush3.bf16.msra.mxu1 %v1693_v1  ;;  %v1706_v10 = vld [vmem:[%s1760_s20 + $0x58] sm:$0xff]   ;;  %v1707_v11 = vld [vmem:[%s1760_s20 + $0x60] sm:$0xff]   ;;  %v1708_v12 = vld [vmem:[%s1760_s20 + $0x68] sm:$0xff]   ;;  %v1801_v25 = vmul.u32.u64.low 3817748708, %v528_v24  ;;  %v1802_v26 = vmul.u32.u64.high 3817748708, %v528_v24, %v1801_v25  ;;  %v530_v36 = vadd.s32 32, %v1798_v23 }
  0x12   : > { %1564 = vmatprep.subr.bf16.mxu0 %v1694_v3  ;;  %1604 = vmatprep.subr.bf16.mxu1 %v1694_v3  ;;  %v1700_v13 = vld [vmem:[%s1760_s20 + $0x28] sm:$0xff]   ;;  %v1709_v14 = vld [vmem:[%s1760_s20 + $0x70] sm:$0xff]   ;;  %v1710_v16 = vld [vmem:[%s1760_s20 + $0x78] sm:$0xff]   ;;  %v1811_v33 = vmul.u32.u64.low 3817748708, %v529_v30  ;;  %v1812_v34 = vmul.u32.u64.high 3817748708, %v529_v30, %v1811_v33  ;;  %v568_v40 = vshrl.u32 %v1807_v29, 4 }
  0x13   : > { %1586 = vmatprep.mubr.msk.bf16.mxu1 %vm289_vm1, %v1704_v8  ;;  %v1701_v15 = vld [vmem:[%s1760_s20 + $0x30] sm:$0xff]   ;;  %v1702_v17 = vld [vmem:[%s1760_s20 + $0x38] sm:$0xff]   ;;  %v1711_v18 = vld [vmem:[%s1760_s20 + $0x80] sm:$0xff]   ;;  %v590_v27 = vshrl.u32 %v1802_v26, 4  ;;  %v1816_v37 = vmul.u32.u64.low 3817748708, %v527_v31  ;;  %v1817_v38 = vmul.u32.u64.high 3817748708, %v527_v31, %v1816_v37 }
  0x14   : > { %v1703_v19 = vld [vmem:[%s1760_s20 + $0x40] sm:$0xff]   ;;  %v1712_v20 = vld [vmem:[%s1760_s20 + $0x88] sm:$0xff]   ;;  %v533_v41 = vadd.s32 56, %v1798_v23  ;;  %v1821_v42 = vmul.u32.u64.low 3817748708, %v532_v35  ;;  %v1822_v43 = vmul.u32.u64.high 3817748708, %v532_v35, %v1821_v42  ;;  %v531_v46 = vadd.s32 40, %v1798_v23 }
  0x15   : > { %1565 = vmatpush3.bf16.msra.mxu0 %v1694_v3  ;;  %1607 = vmatpush3.bf16.msra.mxu1 %v1694_v3  ;;  %v1705_v21 = vld [vmem:[%s1760_s20 + $0x48] sm:$0xff]   ;;  %v591_v32 = vmul.u32 18, %v590_v27  ;;  %v1824_v44 = vmul.u32.u64.low 3817748708, %v530_v36  ;;  %v1825_v45 = vmul.u32.u64.high 3817748708, %v530_v36, %v1824_v44  ;;  %v601_v47 = vshrl.u32 %v1812_v34, 4 }
  0x16   : > { %v1829_v48 = vmul.u32.u64.low 3817748708, %v533_v41  ;;  %v1830_v49 = vmul.u32.u64.high 3817748708, %v533_v41, %v1829_v48  ;;  %v569_v50 = vmul.u32 18, %v568_v40  ;;  %v1836_v53 = vadd.s32 80, %v1798_v23 }
  0x17   : > { %v592_v39 = vsub.s32 %v528_v24, %v591_v32  ;;  %v1832_v51 = vmul.u32.u64.low 3817748708, %v531_v46  ;;  %v1833_v52 = vmul.u32.u64.high 3817748708, %v531_v46, %v1832_v51  ;;  %v579_v54 = vshrl.u32 %v1817_v38, 4 }
  0x18   : > { %1567 = vmatmul.mubr.msk.bf16.vlgmr.msra.gmra.mxu0 %vm289_vm1, %v1696_v5  ;;  %1587 = vmatmul.mubr.msk.bf16.vlgmr.msra.gmra.mxu1 %vm289_vm1, %v1706_v10  ;;  %v602_v56 = vmul.u32 18, %v601_v47  ;;  %v634_v58 = vshrl.u32 %v1822_v43, 4  ;;  %v612_v59 = vshrl.u32 %v1825_v45, 4  ;;  %v1846_v60 = vsub.s32 %v1798_v23, %v569_v50 }
  0x19   : > { %1570 = vmatprep.mubr.msk.bf16.mxu0 %vm289_vm1, %v1697_v6  ;;  %1590 = vmatprep.mubr.msk.bf16.mxu1 %vm289_vm1, %v1707_v11  ;;  %vm960_vm2 = vcmp.ne.s32.totalorder %v592_v39, 0  ;;  %vm996_vm3 = vcmp.lt.s32.totalorder %v592_v39, 0  ;;  %v1068_v55 = vadd.s32 18, %v592_v39  ;;  %v580_v63 = vmul.u32 18, %v579_v54 }
  0x1a   : > { %vm1839_vm4 = vmand %vm996_vm3, %vm960_vm2  ;;  %v1849_v61 = vmul.u32.u64.low 3817748708, %v1836_v53  ;;  %v1850_v62 = vmul.u32.u64.high 3817748708, %v1836_v53, %v1849_v61  ;;  %v1854_v1 = vsub.s32 %v529_v30, %v602_v56  ;;  %v645_v2 = vshrl.u32 %v1830_v49, 4 }
  0x1b   : > { %v1104_v0 = vsel %vm1839_vm4, %v1068_v55, %v592_v39  ;;  %v635_v3 = vmul.u32 18, %v634_v58  ;;  %v613_v4 = vmul.u32 18, %v612_v59  ;;  %v1858_v5 = vadd.s32 64, %v1798_v23 }
  0x1c   : > { %vm958_vm5 = vcmp.ne.s32.totalorder %v1846_v60, 0  ;;  %v623_v6 = vshrl.u32 %v1833_v52, 4  ;;  %vm1865_vm6 = vcmp.lt.s32.totalorder %v1104_v0, 16  ;;  %vm994_vm7 = vcmp.lt.s32.totalorder %v1846_v60, 0 }
  0x1d   : > { %vm961_vm8 = vcmp.ne.s32.totalorder %v1854_v1, 0  ;;  %vm997_vm9 = vcmp.lt.s32.totalorder %v1854_v1, 0  ;;  %v646_v10 = vmul.u32 18, %v645_v2  ;;  %v1875_v11 = vadd.s32 72, %v1798_v23  ;;  %vm1897_vm11 = vmand %vm994_vm7, %vm958_vm5 }
  0x1e   : > { %v1721_v27 = vmov 0.0   ;;  %vm1917_vm13 = vmand %vm997_vm9, %vm961_vm8  ;;  %v1924_v30 = vadd.s32 112, %v1798_v23  ;;  %v1942_v37 = vadd.s32 96, %v1798_v23  ;;  %v2006_v61 = vadd.s32 104, %v1798_v23 }
  0x1f   : > { %v1902_v24 = vsub.s32 %v533_v41, %v646_v10  ;;  %v1905_v25 = vmul.u32.u64.low 3817748708, %v1875_v11  ;;  %v1906_v26 = vmul.u32.u64.high 3817748708, %v1875_v11, %v1905_v25  ;;  %v1911_v28 = vsel %vm1865_vm6, 1.0, %v1721_v27 }
  0x20   : > { %1571 = vmatmul.mubr.msk.bf16.gmra.mxu0 %vm289_vm1, %v1698_v7  ;;  %1591 = vmatmul.mubr.msk.bf16.gmra.mxu1 %vm289_vm1, %v1708_v12  ;;  %v1863_v7 = vadd.s32 88, %v1798_v23  ;;  %v1877_v12 = vsub.s32 %v532_v35, %v635_v3  ;;  %v1956_v41 = vadd.s32 120, %v1798_v23  ;;  %v2096_v34 = vadd.s32 160, %v1798_v23 }
  0x21   : > { %1574 = vmatprep.mubr.msk.bf16.mxu0 %vm289_vm1, %v1699_v9  ;;  %1594 = vmatprep.mubr.msk.bf16.mxu1 %vm289_vm1, %v1709_v14  ;;  %v1870_v9 = vsub.s32 %v527_v31, %v580_v63  ;;  %vm965_vm4 = vcmp.ne.s32.totalorder %v1902_v24, 0  ;;  %vm1001_vm6 = vcmp.lt.s32.totalorder %v1902_v24, 0  ;;  %v1073_v54 = vadd.s32 18, %v1902_v24 }
  0x22   : > { %vm964_vm14 = vcmp.ne.s32.totalorder %v1877_v12, 0  ;;  %vm1000_vm15 = vcmp.lt.s32.totalorder %v1877_v12, 0  ;;  %v1969_v44 = vmul.u32.u64.low 3817748708, %v1924_v30  ;;  %v1970_v45 = vmul.u32.u64.high 3817748708, %v1924_v30, %v1969_v44  ;;  %vm1991_vm9 = vmand %vm1001_vm6, %vm965_vm4 }
  0x23   : > { %vm959_vm10 = vcmp.ne.s32.totalorder %v1870_v9, 0  ;;  %vm995_vm12 = vcmp.lt.s32.totalorder %v1870_v9, 0  ;;  %v1067_v35 = vadd.s32 18, %v1870_v9  ;;  %vm1949_vm3 = vmand %vm1000_vm15, %vm964_vm14  ;;  %v667_v56 = vshrl.u32 %v1906_v26, 4 }
  0x24   : > { %vm1935_vm2 = vmand %vm995_vm12, %vm959_vm10  ;;  %v1983_v50 = vmul.u32.u64.low 3817748708, %v1942_v37  ;;  %v1984_v51 = vmul.u32.u64.high 3817748708, %v1942_v37, %v1983_v50  ;;  %v1109_v2 = vsel %vm1991_vm9, %v1073_v54, %v1902_v24  ;;  %v722_v10 = vshrl.u32 %v1970_v45, 4 }
  0x25   : > { %v1103_v48 = vsel %vm1935_vm2, %v1067_v35, %v1870_v9  ;;  %v2080_v24 = vadd.s32 144, %v1798_v23  ;;  %v2157_v54 = vadd.s32 136, %v1798_v23 }
  0x26   : > { %vm1139_vm15 = vcmp.lt.s32.totalorder %v1103_v48, 16  ;;  %v723_v25 = vmul.u32 18, %v722_v10  ;;  %v2206_v10 = vadd.s32 168, %v1798_v23 }
  0x28   : > { %1575 = vmatmul.mubr.msk.bf16.gmra.mxu0 %vm289_vm1, %v1700_v13  ;;  %1595 = vmatmul.mubr.msk.bf16.gmra.mxu1 %vm289_vm1, %v1710_v16  ;;  %v1879_v13 = vsub.s32 %v530_v36, %v613_v4  ;;  %v624_v16 = vmul.u32 18, %v623_v6  ;;  %v1072_v36 = vadd.s32 18, %v1877_v12  ;;  %v668_v6 = vmul.u32 18, %v667_v56 }
  0x29   : > { %1578 = vmatprep.mubr.msk.bf16.mxu0 %vm289_vm1, %v1701_v15  ;;  %1598 = vmatprep.mubr.msk.bf16.mxu1 %vm289_vm1, %v1711_v18  ;;  %v1882_v14 = vmul.u32.u64.low 3817748708, %v1858_v5  ;;  %v1883_v15 = vmul.u32.u64.high 3817748708, %v1858_v5, %v1882_v14  ;;  %v2113_v39 = vsub.s32 %v1924_v30, %v723_v25 }
  0x2a   : > { %vm962_vm0 = vcmp.ne.s32.totalorder %v1879_v13, 0  ;;  %v625_v31 = vsub.s32 %v531_v46, %v624_v16  ;;  %v1070_v40 = vadd.s32 18, %v1879_v13  ;;  %v1108_v49 = vsel %vm1949_vm3, %v1072_v36, %v1877_v12 }
  0x2b   : > { %v656_v43 = vshrl.u32 %v1883_v15, 4  ;;  %v2049_v16 = vsel %vm1139_vm15, 1.0, %v1721_v27  ;;  %vm2064_vm3 = vcmp.lt.s32.totalorder %v1109_v2, 16  ;;  %v2077_v22 = vsub.s32 %v1875_v11, %v668_v6 }
  0x2c   : > { %vm963_vm7 = vcmp.ne.s32.totalorder %v625_v31, 0  ;;  %vm999_vm8 = vcmp.lt.s32.totalorder %v625_v31, 0  ;;  %v1071_v55 = vadd.s32 18, %v625_v31  ;;  %v2091_v11 = vadd.s32 128, %v1798_v23 }
  0x2d   : > { %vm1997_vm10 = vmand %vm999_vm8, %vm963_vm7  ;;  %v657_v58 = vmul.u32 18, %v656_v43  ;;  %vm967_vm9 = vcmp.ne.s32.totalorder %v2077_v22, 0  ;;  %v2101_v35 = vmul.u32.u64.low 3817748708, %v2080_v24  ;;  %v2102_v36 = vmul.u32.u64.high 3817748708, %v2080_v24, %v2101_v35 }
  0x2e   : > { %v1107_v3 = vsel %vm1997_vm10, %v1071_v55, %v625_v31  ;;  %v2088_v31 = vadd.s32 176, %v1798_v23  ;;  %vm1003_vm10 = vcmp.lt.s32.totalorder %v2077_v22, 0  ;;  %v2117_v43 = vadd.s32 152, %v1798_v23 }
  0x2f   : > { %v2033_v9 = vsub.s32 %v1858_v5, %v657_v58  ;;  %vm2069_vm4 = vcmp.lt.s32.totalorder %v1107_v3, 16  ;;  %v1075_v55 = vadd.s32 18, %v2077_v22  ;;  %vm972_vm15 = vcmp.ne.s32.totalorder %v2113_v39, 0 }
  0x30   : > { %1579 = vmatmul.mubr.msk.bf16.gmra.mxu0 %vm289_vm1, %v1702_v17  ;;  %1599 = vmatmul.mubr.msk.bf16.gmra.mxu1 %vm289_vm1, %v1712_v20  ;;  %v678_v17 = vshrl.u32 %v1850_v62, 4  ;;  %v1066_v20 = vadd.s32 18, %v1846_v60  ;;  %v2120_v44 = vmul.u32.u64.low 3817748708, %v2088_v31  ;;  %v2121_v45 = vmul.u32.u64.high 3817748708, %v2088_v31, %v2120_v44 }
  0x31   : > { %1582 = vmatprep.mubr.msk.bf16.mxu0 %vm289_vm1, %v1703_v19  ;;  %v1887_v18 = vmul.u32.u64.low 3817748708, %v1863_v7  ;;  %v1888_v19 = vmul.u32.u64.high 3817748708, %v1863_v7, %v1887_v18  ;;  %vm1002_vm6 = vcmp.lt.s32.totalorder %v2033_v9, 0  ;;  %v1074_v29 = vadd.s32 18, %v2033_v9 }
  0x32   : > { %v679_v32 = vmul.u32 18, %v678_v17  ;;  %v1102_v33 = vsel %vm1897_vm11, %v1066_v20, %v1846_v60  ;;  %v2002_v59 = vmul.u32.u64.low 3817748708, %v1956_v41  ;;  %v2003_v60 = vmul.u32.u64.high 3817748708, %v1956_v41, %v2002_v59 }
  0x33   : > { %v689_v47 = vshrl.u32 %v1888_v19, 4  ;;  %vm2008_vm11 = vcmp.lt.s32.totalorder %v1102_v33, 16  ;;  %v700_v20 = vshrl.u32 %v1984_v51, 4  ;;  %v2141_v51 = vadd.s32 184, %v1798_v23 }
  0x34   : > { %v1973_v46 = vsub.s32 %v1836_v53, %v679_v32  ;;  %v2043_v14 = vsel %vm2008_vm11, 1.0, %v1721_v27  ;;  %v733_v26 = vshrl.u32 %v2003_v60, 4  ;;  %v2151_v53 = vsel %vm2069_vm4, 1.0, %v1721_v27 }
  0x35   : > { %v690_v63 = vmul.u32 18, %v689_v47  ;;  %v701_v33 = vmul.u32 18, %v700_v20  ;;  %v766_v2 = vshrl.u32 %v2102_v36, 4  ;;  %v2964_v20 = vmov 0 }
  0x36   : > { %vm968_vm12 = vcmp.ne.s32.totalorder %v1973_v46, 0  ;;  %v1076_v4 = vadd.s32 18, %v1973_v46  ;;  %v2164_v57 = vmul.u32.u64.low 3817748708, %v2117_v43  ;;  %v2165_v58 = vmul.u32.u64.high 3817748708, %v2117_v43, %v2164_v57 }
  0x37   : > { %v2052_v5 = vsub.s32 %v1863_v7, %v690_v63  ;;  %v2134_v30 = vsub.s32 %v1942_v37, %v701_v33  ;;  %v2187_v63 = vmul.u32.u64.low 3817748708, %v2141_v51  ;;  %v2188_v0 = vmul.u32.u64.high 3817748708, %v2141_v51, %v2187_v63 }
  0x38   : > { %1583 = vmatmul.mubr.msk.bf16.gmra.mxu0 %vm289_vm1, %v1705_v21  ;;  %v1069_v21 = vadd.s32 18, %v1854_v1  ;;  %vm998_vm1 = vcmp.lt.s32.totalorder %v1879_v13, 0  ;;  %v777_v35 = vshrl.u32 %v2165_v58, 4 }
  0x39   : > { %vm1962_vm5 = vmand %vm998_vm1, %vm962_vm0  ;;  %vm2014_vm0 = vcmp.lt.s32.totalorder %v1108_v49, 16  ;;  %vm969_vm7 = vcmp.ne.s32.totalorder %v2052_v5, 0  ;;  %vm1005_vm8 = vcmp.lt.s32.totalorder %v2052_v5, 0  ;;  %v1077_v32 = vadd.s32 18, %v2052_v5 }
  0x3a   : > { %v1105_v38 = vsel %vm1917_vm13, %v1069_v21, %v1854_v1  ;;  %v1106_v52 = vsel %vm1962_vm5, %v1070_v40, %v1879_v13  ;;  %vm1004_vm13 = vcmp.lt.s32.totalorder %v1973_v46, 0  ;;  %v2057_v17 = vsel %vm2014_vm0, 1.0, %v1721_v27 }
  0x3b   : > { %vm1141_vm14 = vcmp.lt.s32.totalorder %v1105_v38, 16  ;;  %vm2018_vm1 = vcmp.lt.s32.totalorder %v1106_v52, 16  ;;  %vm2028_vm2 = vmand %vm1004_vm13, %vm968_vm12  ;;  %v2037_v12 = vmul.u32.u64.low 3817748708, %v2006_v61  ;;  %v2038_v13 = vmul.u32.u64.high 3817748708, %v2006_v61, %v2037_v12 }
  0x3c   : > { %v2046_v15 = vsel %vm1141_vm14, 1.0, %v1721_v27  ;;  %v2062_v18 = vsel %vm2018_vm1, 1.0, %v1721_v27  ;;  %v1112_v7 = vsel %vm2028_vm2, %v1076_v4, %v1973_v46  ;;  %vm966_vm5 = vcmp.ne.s32.totalorder %v2033_v9, 0  ;;  %vm2129_vm12 = vmand %vm1005_vm8, %vm969_vm7 }
  0x3d   : > { %vm2108_vm11 = vmand %vm1002_vm6, %vm966_vm5  ;;  %v734_v40 = vmul.u32 18, %v733_v26  ;;  %v711_v42 = vshrl.u32 %v2038_v13, 4  ;;  %v2124_v46 = vmul.u32.u64.low 3817748708, %v2091_v11  ;;  %v2125_v47 = vmul.u32.u64.high 3817748708, %v2091_v11, %v2124_v46 }
  0x3e   : > { %v2137_v49 = vmul.u32.u64.low 3817748708, %v2096_v34  ;;  %v2138_v50 = vmul.u32.u64.high 3817748708, %v2096_v34, %v2137_v49  ;;  %v2146_v52 = vsel %vm2064_vm3, 1.0, %v1721_v27  ;;  %v1110_v37 = vsel %vm2108_vm11, %v1074_v29, %v2033_v9  ;;  %vm2178_vm14 = vmand %vm1003_vm10, %vm967_vm9 }
  0x3f   : > { %v2161_v56 = vsub.s32 %v1956_v41, %v734_v40  ;;  %vm2167_vm13 = vcmp.lt.s32.totalorder %v1112_v7, 16  ;;  %v1113_v60 = vsel %vm2129_vm12, %v1077_v32, %v2052_v5  ;;  %vm1008_vm0 = vcmp.lt.s32.totalorder %v2113_v39, 0 }
  0x40   : > { %v712_v41 = vmul.u32 18, %v711_v42  ;;  %vm970_vm1 = vcmp.ne.s32.totalorder %v2134_v30, 0  ;;  %vm1006_vm2 = vcmp.lt.s32.totalorder %v2134_v30, 0  ;;  %v1080_v1 = vadd.s32 18, %v2113_v39  ;;  %vm2199_vm3 = vmand %vm1008_vm0, %vm972_vm15 }
  0x41   : > { %v2193_v3 = vmul.u32.u64.low 3817748708, %v2157_v54  ;;  %v2194_v4 = vmul.u32.u64.high 3817748708, %v2157_v54, %v2193_v3  ;;  %v1111_v6 = vsel %vm2178_vm14, %v1075_v55, %v2077_v22  ;;  %v1078_v9 = vadd.s32 18, %v2134_v30  ;;  %vm2208_vm5 = vmand %vm1006_vm2, %vm970_vm1 }
  0x42   : > { %vm973_vm4 = vcmp.ne.s32.totalorder %v2161_v56, 0  ;;  %vm1009_vm6 = vcmp.lt.s32.totalorder %v2161_v56, 0  ;;  %v2214_v13 = vsub.s32 %v2006_v61, %v712_v41  ;;  %v810_v5 = vshrl.u32 %v2121_v45, 4 }
  0x43   : > { %v744_v19 = vshrl.u32 %v2125_v47, 4  ;;  %vm2218_vm7 = vcmp.lt.s32.totalorder %v1110_v37, 16  ;;  %vm2222_vm8 = vcmp.lt.s32.totalorder %v1113_v60, 16  ;;  %v788_v7 = vshrl.u32 %v2138_v50, 4  ;;  %vm2245_vm10 = vmand %vm1009_vm6, %vm973_vm4 }
  0x44   : > { %v2228_v22 = vadd.s32 208, %v1798_v23  ;;  %vm2230_vm9 = vcmp.lt.s32.totalorder %v1111_v6, 16  ;;  %v1116_v25 = vsel %vm2199_vm3, %v1080_v1, %v2113_v39  ;;  %v1081_v26 = vadd.s32 18, %v2161_v56 }
  0x45   : > { %v767_v29 = vmul.u32 18, %v766_v2  ;;  %v1114_v32 = vsel %vm2208_vm5, %v1078_v9, %v2134_v30  ;;  %v2251_v36 = vmul.u32.u64.low 3817748708, %v2206_v10  ;;  %v2252_v38 = vmul.u32.u64.high 3817748708, %v2206_v10, %v2251_v36 }
  0x46   : > { %vm971_vm11 = vcmp.ne.s32.totalorder %v2214_v13, 0  ;;  %vm1007_vm12 = vcmp.lt.s32.totalorder %v2214_v13, 0  ;;  %v811_v39 = vmul.u32 18, %v810_v5  ;;  %v745_v40 = vmul.u32 18, %v744_v19 }
  0x47   : > { %v789_v42 = vmul.u32 18, %v788_v7  ;;  %v821_v44 = vshrl.u32 %v2188_v0, 4  ;;  %v2258_v45 = vmul.u32.u64.low 3817748708, %v2228_v22  ;;  %v2259_v46 = vmul.u32.u64.high 3817748708, %v2228_v22, %v2258_v45  ;;  %vm2284_vm14 = vmand %vm1007_vm12, %vm971_vm11 }
  0x48   : > { %v1117_v47 = vsel %vm2245_vm10, %v1081_v26, %v2161_v56  ;;  %v1079_v48 = vadd.s32 18, %v2214_v13  ;;  %v2266_v30 = vsub.s32 %v2080_v24, %v767_v29  ;;  %v755_v49 = vshrl.u32 %v2194_v4, 4 }
  0x49   : > { %v2272_v50 = vsel %vm2167_vm13, 1.0, %v1721_v27  ;;  %v2277_v37 = vsel %vm2218_vm7, 1.0, %v1721_v27  ;;  %v2282_v55 = vsel %vm2222_vm8, 1.0, %v1721_v27  ;;  %v778_v56 = vmul.u32 18, %v777_v35 }
  0x4a   : > { %v2291_v57 = vsel %vm2230_vm9, 1.0, %v1721_v27  ;;  %vm2293_vm13 = vcmp.lt.s32.totalorder %v1116_v25, 16  ;;  %v2298_v59 = vsub.s32 %v2088_v31, %v811_v39  ;;  %v2301_v60 = vsub.s32 %v2091_v11, %v745_v40 }
  0x4b   : > { %vm2303_vm15 = vcmp.lt.s32.totalorder %v1114_v32, 16  ;;  %vm2307_vm0 = vcmp.lt.s32.totalorder %v1117_v47, 16  ;;  %v2312_v63 = vsub.s32 %v2096_v34, %v789_v42  ;;  %v822_v0 = vmul.u32 18, %v821_v44 }
  0x4c   : > { %v1115_v31 = vsel %vm2284_vm14, %v1079_v48, %v2214_v13  ;;  %vm976_vm1 = vcmp.ne.s32.totalorder %v2266_v30, 0  ;;  %v756_v11 = vmul.u32 18, %v755_v49  ;;  %v2319_v1 = vadd.s32 192, %v1798_v23 }
  0x4d   : > { %vm1012_vm2 = vcmp.lt.s32.totalorder %v2266_v30, 0  ;;  %v1084_v2 = vadd.s32 18, %v2266_v30  ;;  %v779_v3 = vsub.s32 %v2117_v43, %v778_v56  ;;  %v799_v34 = vshrl.u32 %v2252_v38, 4 }
  0x4e   : > { %vm980_vm3 = vcmp.ne.s32.totalorder %v2298_v59, 0  ;;  %vm1016_vm4 = vcmp.lt.s32.totalorder %v2298_v59, 0  ;;  %vm974_vm5 = vcmp.ne.s32.totalorder %v2301_v60, 0  ;;  %v2329_v4 = vadd.s32 216, %v1798_v23  ;;  %vm2337_vm8 = vmand %vm1012_vm2, %vm976_vm1 }
  0x4f   : > { %vm1010_vm6 = vcmp.lt.s32.totalorder %v2301_v60, 0  ;;  %vm978_vm7 = vcmp.ne.s32.totalorder %v2312_v63, 0  ;;  %v823_v6 = vsub.s32 %v2141_v51, %v822_v0  ;;  %v854_v8 = vshrl.u32 %v2259_v46, 4  ;;  %vm2347_vm10 = vmand %vm1016_vm4, %vm980_vm3 }
  0x50   : > { %vm1014_vm9 = vcmp.lt.s32.totalorder %v2312_v63, 0  ;;  %v757_v9 = vsub.s32 %v2157_v54, %v756_v11  ;;  %v2344_v12 = vmul.u32.u64.low 3817748708, %v2319_v1  ;;  %v2345_v13 = vmul.u32.u64.high 3817748708, %v2319_v1, %v2344_v12  ;;  %vm2354_vm14 = vmand %vm1010_vm6, %vm974_vm5 }
  0x51   : > { %v1088_v51 = vadd.s32 18, %v2298_v59  ;;  %vm977_vm11 = vcmp.ne.s32.totalorder %v779_v3, 0  ;;  %vm1013_vm12 = vcmp.lt.s32.totalorder %v779_v3, 0  ;;  %v800_v19 = vmul.u32 18, %v799_v34  ;;  %vm2366_vm1 = vmand %vm1014_vm9, %vm978_vm7 }
  0x52   : > { %v2965_v20 = vsel %vm2354_vm14, 4294967295, %v2964_v20  ;;  %v1082_v54 = vadd.s32 18, %v2301_v60  ;;  %v1086_v21 = vadd.s32 18, %v2312_v63  ;;  %v1085_v26 = vadd.s32 18, %v779_v3  ;;  %vm2375_vm5 = vmand %vm1013_vm12, %vm977_vm11 }
  0x53   : > { %v2361_v7 = vmul.u32.u64.low 3817748708, %v2329_v4  ;;  %v2362_v61 = vmul.u32.u64.high 3817748708, %v2329_v4, %v2361_v7  ;;  %vm981_vm2 = vcmp.ne.s32.totalorder %v823_v6, 0  ;;  %vm1017_vm3 = vcmp.lt.s32.totalorder %v823_v6, 0 }
  0x54   : > { %v855_v29 = vmul.u32 18, %v854_v8  ;;  %v2373_v32 = vsel %vm2293_vm13, 1.0, %v1721_v27  ;;  %vm1151_vm4 = vcmp.lt.s32.totalorder %v1115_v31, 16  ;;  %vm975_vm6 = vcmp.ne.s32.totalorder %v757_v9, 0  ;;  %vm2401_vm7 = vmand %vm1017_vm3, %vm981_vm2 }
  0x55   : > { %vm1011_vm14 = vcmp.lt.s32.totalorder %v757_v9, 0  ;;  %v1120_v35 = vsel %vm2337_vm8, %v1084_v2, %v2266_v30  ;;  %v1124_v36 = vsel %vm2347_vm10, %v1088_v51, %v2298_v59  ;;  %v1089_v38 = vadd.s32 18, %v823_v6 }
  0x56   : > { %v801_v39 = vsub.s32 %v2206_v10, %v800_v19  ;;  %v2389_v40 = vsel %vm2303_vm15, 1.0, %v1721_v27  ;;  %v2394_v42 = vsel %vm2307_vm0, 1.0, %v1721_v27  ;;  %vm2970_vm13 = vnez %v2965_v20  ;;  %vm2415_vm15 = vmand %vm1011_vm14, %vm975_vm6 }
  0x57   : > { %v1118_v44 = vsel %vm2970_vm13, %v1082_v54, %v2301_v60  ;;  %v1083_v10 = vadd.s32 18, %v757_v9  ;;  %v2406_v46 = vsel %vm1151_vm4, 1.0, %v1721_v27  ;;  %v1122_v47 = vsel %vm2366_vm1, %v1086_v21, %v2312_v63 }
  0x58   : > { %v1121_v48 = vsel %vm2375_vm5, %v1085_v26, %v779_v3  ;;  %v856_v49 = vsub.s32 %v2228_v22, %v855_v29  ;;  %vm2420_vm0 = vcmp.lt.s32.totalorder %v1120_v35, 16  ;;  %vm2424_vm8 = vcmp.lt.s32.totalorder %v1124_v36, 16 }
  0x59   : > { %v832_v58 = vshrl.u32 %v2345_v13, 4  ;;  %v2430_v59 = vadd.s32 200, %v1798_v23  ;;  %vm2432_vm9 = vcmp.lt.s32.totalorder %v1118_v44, 16  ;;  %v1125_v22 = vsel %vm2401_vm7, %v1089_v38, %v823_v6 }
  0x5a   : > { %vm979_vm10 = vcmp.ne.s32.totalorder %v801_v39, 0  ;;  %vm1015_vm11 = vcmp.lt.s32.totalorder %v801_v39, 0  ;;  %vm2438_vm12 = vcmp.lt.s32.totalorder %v1122_v47, 16  ;;  %vm2442_vm14 = vcmp.lt.s32.totalorder %v1121_v48, 16 }
  0x5b   : > { %v1119_v0 = vsel %vm2415_vm15, %v1083_v10, %v757_v9  ;;  %v865_v31 = vshrl.u32 %v2362_v61, 4  ;;  %v1087_v11 = vadd.s32 18, %v801_v39  ;;  %vm984_vm1 = vcmp.ne.s32.totalorder %v856_v49, 0  ;;  %vm2456_vm4 = vmand %vm1015_vm11, %vm979_vm10 }
  0x5c   : > { %vm1020_vm2 = vcmp.lt.s32.totalorder %v856_v49, 0  ;;  %v2450_v2 = vadd.s32 240, %v1798_v23  ;;  %vm2452_vm3 = vcmp.lt.s32.totalorder %v1125_v22, 16  ;;  %v833_v8 = vmul.u32 18, %v832_v58 }
  0x5d   : > { %v2461_v43 = vmul.u32.u64.low 3817748708, %v2430_v59  ;;  %v2462_v9 = vmul.u32.u64.high 3817748708, %v2430_v59, %v2461_v43  ;;  %v2467_v12 = vsel %vm2420_vm0, 1.0, %v1721_v27  ;;  %v2472_v13 = vsel %vm2424_vm8, 1.0, %v1721_v27  ;;  %vm2485_vm6 = vmand %vm1020_vm2, %vm984_vm1 }
  0x5e   : > { %vm1155_vm5 = vcmp.lt.s32.totalorder %v1119_v0, 16  ;;  %v1092_v5 = vadd.s32 18, %v856_v49  ;;  %v2477_v19 = vsel %vm2432_vm9, 1.0, %v1721_v27  ;;  %v2482_v20 = vsel %vm2438_vm12, 1.0, %v1721_v27 }
  0x5f   : > { %v866_v21 = vmul.u32 18, %v865_v31  ;;  %v2490_v7 = vadd.s32 224, %v1798_v23  ;;  %v2496_v25 = vsel %vm2442_vm14, 1.0, %v1721_v27  ;;  %v2501_v26 = vsel %vm2452_vm3, 1.0, %v1721_v27 }
  0x60   : > { %v1123_v29 = vsel %vm2456_vm4, %v1087_v11, %v801_v39  ;;  %v2506_v35 = vsel %vm1155_vm5, 1.0, %v1721_v27  ;;  %v2509_v36 = vsub.s32 %v2319_v1, %v833_v8  ;;  %v1128_v39 = vsel %vm2485_vm6, %v1092_v5, %v856_v49 }
  0x61   : > { %v2522_v47 = vadd.s32 248, %v1798_v23  ;;  %vm2524_vm13 = vcmp.lt.s32.totalorder %v1123_v29, 16  ;;  %v2529_v30 = vsub.s32 %v2329_v4, %v866_v21  ;;  %vm2538_vm7 = vcmp.lt.s32.totalorder %v1128_v39, 16 }
  0x62   : > { %vm982_vm15 = vcmp.ne.s32.totalorder %v2509_v36, 0  ;;  %vm1018_vm0 = vcmp.lt.s32.totalorder %v2509_v36, 0  ;;  %v843_v4 = vshrl.u32 %v2462_v9, 4  ;;  %v1090_v34 = vadd.s32 18, %v2509_v36 }
  0x63   : > { %vm985_vm8 = vcmp.ne.s32.totalorder %v2529_v30, 0  ;;  %vm1021_vm9 = vcmp.lt.s32.totalorder %v2529_v30, 0  ;;  %vm2558_vm10 = vmand %vm1018_vm0, %vm982_vm15  ;;  %v1093_v21 = vadd.s32 18, %v2529_v30 }
  0x64   : > { %vm2579_vm11 = vmand %vm1021_vm9, %vm985_vm8  ;;  %v1126_v39 = vsel %vm2558_vm10, %v1090_v34, %v2509_v36 }
  0x65   : > { %vm2605_vm12 = vcmp.lt.s32.totalorder %v1126_v39, 16 }
  0xd8   : > { %v1568_v62 = vpop.f32.mrf.mxu0  ;;  %v2517_v10 = vpop.f32.mrf.mxu1 }
  0xd9   : > { %v1248_v44 = vmul.f32 %v1568_v62, %v1911_v28  ;;  %v2532_v28 = vmul.u32.u64.low 3817748708, %v2490_v7  ;;  %v2533_v24 = vmul.u32.u64.high 3817748708, %v2490_v7, %v2532_v28 }
  0xda   : > { %v382_v3 = vpop.f32.mrf.mxu0  ;;  %v2536_v22 = vpop.f32.mrf.mxu1 }
  0xdb   : > { %v1246_v61 = vmul.f32 %v2043_v14, %v382_v3  ;;  %v2512_v14 = vmul.u32.u64.low 3817748708, %v2450_v2  ;;  %v2513_v38 = vmul.u32.u64.high 3817748708, %v2450_v2, %v2512_v14  ;;  %v1326_v63 = vmul.f32 %v1568_v62, %v1248_v44 }
  0xdc   : > { %v1569_v51 = vpop.f32.mrf.mxu0  ;;  %v2563_v62 = vadd.s32 232, %v1798_v23  ;;  %v2566_v54 = vpop.f32.mrf.mxu1 }
  0xdd   : > { %v1249_v56 = vmul.f32 %v1569_v51, %v2046_v15  ;;  %v898_v1 = vshrl.u32 %v2513_v38, 4  ;;  %v876_v38 = vshrl.u32 %v2533_v24, 4 }
  0xde   : > { %v385_v33 = vpop.f32.mrf.mxu0  ;;  %v2592_v41 = vpop.f32.mrf.mxu1 }
  0xdf   : > { %v1247_v45 = vmul.f32 %v2049_v16, %v385_v33  ;;  %v1324_v16 = vmul.f32 %v1246_v61, %v382_v3  ;;  %v2549_v3 = vsel %vm2524_vm13, 1.0, %v1721_v27  ;;  %v1327_v6 = vmul.f32 %v1569_v51, %v1249_v56 }
  0xe0   : > { %v1572_v48 = vpop.f32.mrf.mxu0  ;;  %v2571_v51 = vsel %vm2538_vm7, 1.0, %v1721_v27 }
  0xe1   : > { %v1282_v58 = vadd.f32 %v1247_v45, %v1246_v61  ;;  %v1325_v49 = vmul.f32 %v1247_v45, %v385_v33  ;;  %v1252_v9 = vmul.f32 %v1572_v48, %v2057_v17  ;;  %v844_v61 = vmul.u32 18, %v843_v4 }
  0xe2   : > { %v398_v60 = vpop.f32.mrf.mxu0  ;;  %v1129_v4 = vsel %vm2579_vm11, %v1093_v21, %v2529_v30  ;;  %v2629_v17 = vadd.s32 256, %v1798_v23 }
  0xe3   : > { %v1283_v0 = vadd.f32 %v1282_v58, %v1248_v44  ;;  %v1360_v31 = vadd.f32 %v1325_v49, %v1324_v16  ;;  %v1250_v15 = vmul.f32 %v2062_v18, %v398_v60  ;;  %v2598_v36 = vsub.s32 %v2430_v59, %v844_v61 }
  0xe4   : > { %v1573_v11 = vpop.f32.mrf.mxu0  ;;  %v2588_v28 = vmul.u32.u64.low 3817748708, %v2522_v47  ;;  %v2589_v16 = vmul.u32.u64.high 3817748708, %v2522_v47, %v2588_v28  ;;  %v2610_v30 = vmul.u32.u64.low 3817748708, %v2563_v62  ;;  %v2611_v59 = vmul.u32.u64.high 3817748708, %v2563_v62, %v2610_v30 }
  0xe5   : > { %v1361_v8 = vadd.f32 %v1360_v31, %v1326_v63  ;;  %v1284_v43 = vadd.f32 %v1283_v0, %v1249_v56  ;;  %v1328_v33 = vmul.f32 %v1250_v15, %v398_v60  ;;  %v1253_v56 = vmul.f32 %v1573_v11, %v2146_v52 }
  0xe6   : > { %v401_v5 = vpop.f32.mrf.mxu0  ;;  %v2602_v63 = vadd.s32 272, %v1798_v23  ;;  %v1330_v0 = vmul.f32 %v1572_v48, %v1252_v9  ;;  %vm1165_vm14 = vcmp.lt.s32.totalorder %v1129_v4, 16  ;;  %vm983_vm1 = vcmp.ne.s32.totalorder %v2598_v36, 0 }
  0xe7   : > { %v1285_v29 = vadd.f32 %v1284_v43, %v1250_v15  ;;  %v1362_v14 = vadd.f32 %v1361_v8, %v1327_v6  ;;  %v1251_v44 = vmul.f32 %v2151_v53, %v401_v5  ;;  %v899_v8 = vmul.u32 18, %v898_v1 }
  0xe8   : > { %v1576_v45 = vpop.f32.mrf.mxu0  ;;  %v1331_v43 = vmul.f32 %v1573_v11, %v1253_v56  ;;  %vm1019_vm2 = vcmp.lt.s32.totalorder %v2598_v36, 0  ;;  %v2622_v11 = vsel %vm2605_vm12, 1.0, %v1721_v27  ;;  %v909_v6 = vshrl.u32 %v2589_v16, 4 }
  0xe9   : > { %v1363_v53 = vadd.f32 %v1362_v14, %v1328_v33  ;;  %v1286_v58 = vadd.f32 %v1285_v29, %v1251_v44  ;;  %v1329_v49 = vmul.f32 %v1251_v44, %v401_v5  ;;  %v1256_v48 = vmul.f32 %v1576_v45, %v2272_v50  ;;  %v2614_v5 = vpop.f32.mrf.mxu1  ;;  %vm2638_vm3 = vmand %vm1019_vm2, %vm983_vm1 }
  0xea   : > { %v414_v60 = vpop.f32.mrf.mxu0  ;;  %v2625_v50 = vsel %vm1165_vm14, 1.0, %v1721_v27  ;;  %v1091_v44 = vadd.s32 18, %v2598_v36  ;;  %v2670_v16 = vadd.s32 280, %v1798_v23 }
  0xeb   : > { %v1287_v31 = vadd.f32 %v1286_v58, %v1252_v9  ;;  %v1364_v52 = vadd.f32 %v1363_v53, %v1329_v49  ;;  %v1254_v15 = vmul.f32 %v2277_v37, %v414_v60  ;;  %v877_v37 = vmul.u32 18, %v876_v38 }
  0xec   : > { %v1577_v34 = vpop.f32.mrf.mxu0  ;;  %v2643_v49 = vsub.s32 %v2450_v2, %v899_v8  ;;  %v1334_v38 = vmul.f32 %v1576_v45, %v1256_v48  ;;  %v2659_v2 = vadd.s32 264, %v1798_v23  ;;  %v1127_v45 = vsel %vm2638_vm3, %v1091_v44, %v2598_v36 }
  0xed   : > { %v1365_v24 = vadd.f32 %v1364_v52, %v1330_v0  ;;  %v1288_v18 = vadd.f32 %v1287_v31, %v1253_v56  ;;  %v1332_v61 = vmul.f32 %v1254_v15, %v414_v60  ;;  %v1257_v1 = vmul.f32 %v1577_v34, %v2282_v55  ;;  %v2632_v56 = vpop.f32.mrf.mxu1 }
  0xee   : > { %v417_v9 = vpop.f32.mrf.mxu0  ;;  %v2646_v60 = vsub.s32 %v2490_v7, %v877_v37  ;;  %v2649_v55 = vmul.u32.u64.low 3817748708, %v2602_v63  ;;  %v2650_v4 = vmul.u32.u64.high 3817748708, %v2602_v63, %v2649_v55  ;;  %vm2682_vm6 = vcmp.lt.s32.totalorder %v1127_v45, 16 }
  0xef   : > { %v1289_v21 = vadd.f32 %v1288_v18, %v1254_v15  ;;  %v1366_v29 = vadd.f32 %v1365_v24, %v1331_v43  ;;  %v1255_v33 = vmul.f32 %v2291_v57, %v417_v9  ;;  %v1335_v7 = vmul.f32 %v1577_v34, %v1257_v1 }
  0xf0   : > { %v1580_v14 = vpop.f32.mrf.mxu0  ;;  %v2655_v30 = vmul.u32.u64.low 3817748708, %v2629_v17  ;;  %v2656_v43 = vmul.u32.u64.high 3817748708, %v2629_v17, %v2655_v30  ;;  %vm986_vm4 = vcmp.ne.s32.totalorder %v2646_v60, 0  ;;  %vm1022_vm5 = vcmp.lt.s32.totalorder %v2646_v60, 0 }
  0xf1   : > { %v1367_v39 = vadd.f32 %v1366_v29, %v1332_v61  ;;  %v1290_v28 = vadd.f32 %v1289_v21, %v1255_v33  ;;  %v1333_v53 = vmul.f32 %v1255_v33, %v417_v9  ;;  %v1260_v18 = vmul.f32 %v1580_v14, %v2373_v32  ;;  %vm2692_vm15 = vmand %vm1022_vm5, %vm986_vm4 }
  0xf2   : > { %v430_v57 = vpop.f32.mrf.mxu0  ;;  %v1094_v36 = vadd.s32 18, %v2646_v60  ;;  %v887_v32 = vshrl.u32 %v2611_v59, 4  ;;  %v2676_v29 = vmul.u32.u64.low 3817748708, %v2659_v2  ;;  %v2677_v33 = vmul.u32.u64.high 3817748708, %v2659_v2, %v2676_v29 }
  0xf3   : > { %v1291_v0 = vadd.f32 %v1290_v28, %v1256_v48  ;;  %v1368_v31 = vadd.f32 %v1367_v39, %v1333_v53  ;;  %v1258_v52 = vmul.f32 %v2389_v40, %v430_v57  ;;  %v2665_v48 = vpop.f32.mrf.mxu1  ;;  %vm988_vm13 = vcmp.ne.s32.totalorder %v2643_v49, 0 }
  0xf4   : > { %v1581_v15 = vpop.f32.mrf.mxu0  ;;  %vm1024_vm7 = vcmp.lt.s32.totalorder %v2643_v49, 0  ;;  %v1338_v59 = vmul.f32 %v1580_v14, %v1260_v18  ;;  %v1130_v14 = vsel %vm2692_vm15, %v1094_v36, %v2646_v60  ;;  %v931_v29 = vshrl.u32 %v2677_v33, 4 }
  0xf5   : > { %v1369_v8 = vadd.f32 %v1368_v31, %v1334_v38  ;;  %v1292_v24 = vadd.f32 %v1291_v0, %v1257_v1  ;;  %v1336_v34 = vmul.f32 %v1258_v52, %v430_v57  ;;  %v1261_v39 = vmul.f32 %v1581_v15, %v2394_v42  ;;  %v2680_v53 = vpop.f32.mrf.mxu1  ;;  %vm2743_vm10 = vmand %vm1024_vm7, %vm988_vm13 }
  0xf6   : > { %v433_v40 = vpop.f32.mrf.mxu0  ;;  %v910_v42 = vmul.u32 18, %v909_v6  ;;  %v2698_v31 = vadd.s32 18, %v2643_v49  ;;  %vm2720_vm0 = vcmp.lt.s32.totalorder %v1130_v14, 16 }
  0xf7   : > { %v1293_v9 = vadd.f32 %v1292_v24, %v1258_v52  ;;  %v1370_v37 = vadd.f32 %v1369_v8, %v1335_v7  ;;  %v1259_v21 = vmul.f32 %v2406_v46, %v433_v40  ;;  %v888_v52 = vmul.u32 18, %v887_v32 }
  0xf8   : > { %v1584_v61 = vpop.f32.mrf.mxu0  ;;  %v2701_v30 = vmul.u32.u64.low 3817748708, %v2670_v16  ;;  %v2702_v7 = vmul.u32.u64.high 3817748708, %v2670_v16, %v2701_v30  ;;  %v1339_v8 = vmul.f32 %v1581_v15, %v1261_v39  ;;  %v920_v15 = vshrl.u32 %v2656_v43, 4 }
  0xf9   : > { %v1371_v44 = vadd.f32 %v1370_v37, %v1336_v34  ;;  %v1294_v1 = vadd.f32 %v1293_v9, %v1259_v21  ;;  %v1337_v23 = vmul.f32 %v1259_v21, %v433_v40  ;;  %v1264_v6 = vmul.f32 %v1584_v61, %v2467_v12  ;;  %v2713_v40 = vpop.f32.mrf.mxu1 }
  0xfa   : > { %v446_v28 = vpop.f32.mrf.mxu0  ;;  %v2716_v9 = vsub.s32 %v2522_v47, %v910_v42  ;;  %v2725_v36 = vsub.s32 %v2563_v62, %v888_v52  ;;  %v942_v32 = vshrl.u32 %v2650_v4, 4  ;;  %v921_v62 = vmul.u32 18, %v920_v15 }
  0xfb   : > { %v1295_v58 = vadd.f32 %v1294_v1, %v1260_v18  ;;  %v1372_v55 = vadd.f32 %v1371_v44, %v1337_v23  ;;  %v1262_v38 = vmul.f32 %v2477_v19, %v446_v28  ;;  %v2711_v19 = vsel %vm2682_vm6, 1.0, %v1721_v27  ;;  %v2730_v1 = vpop.f32.mrf.mxu1 }
  0xfc   : > { %v1585_v0 = vpop.f32.mrf.mxu0  ;;  %vm989_vm8 = vcmp.ne.s32.totalorder %v2716_v9, 0  ;;  %vm1025_vm9 = vcmp.lt.s32.totalorder %v2716_v9, 0  ;;  %v1342_v23 = vmul.f32 %v1584_v61, %v1264_v6  ;;  %v1266_v4 = vmul.f32 %v2482_v20, %v2536_v22 }
  0xfd   : > { %v1373_v24 = vadd.f32 %v1372_v55, %v1338_v59  ;;  %v1296_v45 = vadd.f32 %v1295_v58, %v1261_v39  ;;  %v1340_v37 = vmul.f32 %v1262_v38, %v446_v28  ;;  %v1265_v44 = vmul.f32 %v1585_v0, %v2496_v25  ;;  %vm2756_vm14 = vmand %vm1025_vm9, %vm989_vm8 }
  0xfe   : > { %v449_v18 = vpop.f32.mrf.mxu0  ;;  %vm987_vm11 = vcmp.ne.s32.totalorder %v2725_v36, 0  ;;  %vm1023_vm12 = vcmp.lt.s32.totalorder %v2725_v36, 0  ;;  %v953_v57 = vshrl.u32 %v2702_v7, 4  ;;  %v932_v61 = vmul.u32 18, %v931_v29 }
  0xff   : > { %v1297_v34 = vadd.f32 %v1296_v45, %v1262_v38  ;;  %v1374_v21 = vadd.f32 %v1373_v24, %v1339_v8  ;;  %v1263_v60 = vmul.f32 %v2506_v35, %v449_v18  ;;  %v2735_v35 = vadd.s32 18, %v2716_v9  ;;  %v2764_v38 = vpop.f32.mrf.mxu1  ;;  %vm2777_vm1 = vmand %vm1023_vm12, %vm987_vm11 }
 0x100   : > { %v1343_v46 = vmul.f32 %v1585_v0, %v1265_v44  ;;  %v1267_v59 = vmul.f32 %v2549_v3, %v2592_v41  ;;  %v1132_v55 = vsel %vm2743_vm10, %v2698_v31, %v2643_v49  ;;  %v1095_v0 = vadd.s32 18, %v2725_v36 }
 0x101   : > { %v1375_v47 = vadd.f32 %v1374_v21, %v1340_v37  ;;  %v1298_v43 = vadd.f32 %v1297_v34, %v1263_v60  ;;  %v1341_v39 = vmul.f32 %v1263_v60, %v449_v18  ;;  %v943_v52 = vmul.u32 18, %v942_v32  ;;  %v2798_v34 = vpop.f32.mrf.mxu1 }
 0x102   : > { %v2768_v3 = vsub.s32 %v2629_v17, %v921_v62  ;;  %v1268_v30 = vmul.f32 %v2517_v10, %v2472_v13  ;;  %v1344_v7 = vmul.f32 %v1266_v4, %v2536_v22  ;;  %v1529_v17 = vsel %vm2720_vm0, 1.0, %v1721_v27 }
 0x103   : > { %v1299_v33 = vadd.f32 %v1298_v43, %v1264_v6  ;;  %v1376_v28 = vadd.f32 %v1375_v47, %v1341_v39  ;;  %v1133_v13 = vsel %vm2756_vm14, %v2735_v35, %v2716_v9  ;;  %v954_v22 = vmul.u32 18, %v953_v57 }
 0x104   : > { %v2789_v31 = vsub.s32 %v2659_v2, %v932_v61  ;;  %v1269_v45 = vmul.f32 %v2566_v54, %v2501_v26  ;;  %v1345_v6 = vmul.f32 %v1267_v59, %v2592_v41  ;;  %vm2794_vm2 = vcmp.lt.s32.totalorder %v1132_v55, 16 }
 0x105   : > { %v1300_v42 = vadd.f32 %v1299_v33, %v1265_v44  ;;  %v1377_v20 = vadd.f32 %v1376_v28, %v1342_v23  ;;  %v1131_v9 = vsel %vm2777_vm1, %v1095_v0, %v2725_v36  ;;  %v944_v2 = vsub.s32 %v2602_v63, %v943_v52 }
 0x106   : > { %vm990_vm3 = vcmp.ne.s32.totalorder %v2768_v3, 0  ;;  %vm1026_vm4 = vcmp.lt.s32.totalorder %v2768_v3, 0  ;;  %v1346_v26 = vmul.f32 %v2517_v10, %v1268_v30  ;;  %v1270_v21 = vmul.f32 %v2622_v11, %v2632_v56 }
 0x107   : > { %v1378_v8 = vadd.f32 %v1377_v20, %v1343_v46  ;;  %v1301_v24 = vadd.f32 %v1300_v42, %v1266_v4  ;;  %v1098_v60 = vadd.s32 18, %v2768_v3  ;;  %v955_v12 = vsub.s32 %v2670_v16, %v954_v22  ;;  %vm2816_vm13 = vmand %vm1026_vm4, %vm990_vm3  ;;  %v2824_v16 = vpop.f32.mrf.mxu1 }
 0x108   : > { %vm991_vm5 = vcmp.ne.s32.totalorder %v2789_v31, 0  ;;  %vm1027_vm6 = vcmp.lt.s32.totalorder %v2789_v31, 0  ;;  %v1347_v63 = vmul.f32 %v2566_v54, %v1269_v45  ;;  %v1271_v10 = vmul.f32 %v2711_v19, %v2680_v53 }
 0x109   : > { %v1302_v14 = vadd.f32 %v1301_v24, %v1267_v59  ;;  %v1379_v18 = vadd.f32 %v1378_v8, %v1344_v7  ;;  %vm2820_vm7 = vcmp.lt.s32.totalorder %v1131_v9, 16  ;;  %vm992_vm15 = vcmp.ne.s32.totalorder %v944_v2, 0  ;;  %vm2834_vm8 = vmand %vm1027_vm6, %vm991_vm5  ;;  %v510_v57 = vpop.f32.mrf.mxu1 }
 0x10a   : > { %vm1028_vm0 = vcmp.lt.s32.totalorder %v944_v2, 0  ;;  %v1099_v47 = vadd.s32 18, %v2789_v31  ;;  %v1272_v54 = vmul.f32 %v2614_v5, %v2571_v51  ;;  %v1348_v19 = vmul.f32 %v1270_v21, %v2632_v56 }
 0x10b   : > { %v1303_v41 = vadd.f32 %v1302_v14, %v1268_v30  ;;  %v1380_v37 = vadd.f32 %v1379_v18, %v1345_v6  ;;  %v1100_v35 = vadd.s32 18, %v944_v2  ;;  %v1134_v62 = vsel %vm2816_vm13, %v1098_v60, %v2768_v3  ;;  %vm2846_vm11 = vmand %vm1028_vm0, %vm992_vm15  ;;  %v1601_v7 = vpop.f32.mrf.mxu1 }
 0x10c   : > { %vm993_vm9 = vcmp.ne.s32.totalorder %v955_v12, 0  ;;  %vm1029_vm10 = vcmp.lt.s32.totalorder %v955_v12, 0  ;;  %v1273_v56 = vmul.f32 %v2665_v48, %v2625_v50  ;;  %v1349_v4 = vmul.f32 %v1271_v10, %v2680_v53 }
 0x10d   : > { %v1381_v36 = vadd.f32 %v1380_v37, %v1346_v26  ;;  %v1304_v32 = vadd.f32 %v1303_v41, %v1269_v45  ;;  %vm2850_vm12 = vcmp.lt.s32.totalorder %v1133_v13, 16  ;;  %v1530_v25 = vsel %vm2820_vm7, 1.0, %v1721_v27  ;;  %vm2864_vm14 = vmand %vm1029_vm10, %vm993_vm9  ;;  %v513_v6 = vpop.f32.mrf.mxu1 }
 0x10e   : > { %v1101_v61 = vadd.s32 18, %v955_v12  ;;  %v1135_v50 = vsel %vm2834_vm8, %v1099_v47, %v2789_v31  ;;  %v1350_v53 = vmul.f32 %v2614_v5, %v1272_v54  ;;  %v1274_v20 = vmul.f32 %v1529_v17, %v2730_v1 }
 0x10f   : > { %v1305_v44 = vadd.f32 %v1304_v32, %v1270_v21  ;;  %v1382_v43 = vadd.f32 %v1381_v36, %v1347_v63  ;;  %v1531_v58 = vsel %vm2794_vm2, 1.0, %v1721_v27  ;;  %v1136_v55 = vsel %vm2846_vm11, %v1100_v35, %v944_v2 }
 0x110   : > { %vm1170_vm1 = vcmp.lt.s32.totalorder %v1134_v62, 16  ;;  %v1351_v5 = vmul.f32 %v2665_v48, %v1273_v56  ;;  %v1275_v3 = vmul.f32 %v1530_v25, %v2798_v34  ;;  %v1532_v30 = vsel %vm2850_vm12, 1.0, %v1721_v27 }
 0x111   : > { %v1383_v51 = vadd.f32 %v1382_v43, %v1348_v19  ;;  %v1306_v23 = vadd.f32 %v1305_v44, %v1271_v10  ;;  %v1137_v8 = vsel %vm2864_vm14, %v1101_v61, %v955_v12  ;;  %vm1171_vm3 = vcmp.lt.s32.totalorder %v1135_v50, 16 }
 0x112   : > { %v1276_v24 = vmul.f32 %v2713_v40, %v1531_v58  ;;  %v1352_v17 = vmul.f32 %v1274_v20, %v2730_v1  ;;  %vm1172_vm2 = vcmp.lt.s32.totalorder %v1136_v55, 16  ;;  %v1533_v48 = vsel %vm1170_vm1, 1.0, %v1721_v27 }
 0x113   : > { %v1307_v46 = vadd.f32 %v1306_v23, %v1272_v54  ;;  %v1384_v42 = vadd.f32 %v1383_v51, %v1349_v4  ;;  %v1277_v31 = vmul.f32 %v2764_v38, %v1532_v30  ;;  %v1353_v14 = vmul.f32 %v1275_v3, %v2798_v34 }
 0x114   : > { %vm1173_vm4 = vcmp.lt.s32.totalorder %v1137_v8, 16  ;;  %v1534_v18 = vsel %vm1171_vm3, 1.0, %v1721_v27  ;;  %v1354_v15 = vmul.f32 %v2713_v40, %v1276_v24  ;;  %v1278_v26 = vmul.f32 %v1533_v48, %v510_v57 }
 0x115   : > { %v1385_v0 = vadd.f32 %v1384_v42, %v1350_v53  ;;  %v1308_v52 = vadd.f32 %v1307_v46, %v1273_v56  ;;  %v1535_v1 = vsel %vm1172_vm2, 1.0, %v1721_v27  ;;  %v1355_v41 = vmul.f32 %v2764_v38, %v1277_v31 }
 0x116   : > { %v1279_v60 = vmul.f32 %v1534_v18, %v513_v6  ;;  %v1536_v12 = vsel %vm1173_vm4, 1.0, %v1721_v27  ;;  %v1280_v34 = vmul.f32 %v2824_v16, %v1535_v1  ;;  %v1356_v36 = vmul.f32 %v1278_v26, %v510_v57 }
 0x117   : > { %v1309_v49 = vadd.f32 %v1308_v52, %v1274_v20  ;;  %v1386_v13 = vadd.f32 %v1385_v0, %v1351_v5  ;;  %v1281_v40 = vmul.f32 %v1601_v7, %v1536_v12 }
 0x118   : > { %v1357_v11 = vmul.f32 %v1279_v60, %v513_v6  ;;  %v1358_v47 = vmul.f32 %v2824_v16, %v1280_v34 }
 0x119   : > { %v1387_v22 = vadd.f32 %v1386_v13, %v1352_v17  ;;  %v1310_v45 = vadd.f32 %v1309_v49, %v1275_v3  ;;  %v1359_v38 = vmul.f32 %v1601_v7, %v1281_v40 }
 0x11b   : > { %v1311_v9 = vadd.f32 %v1310_v45, %v1276_v24  ;;  %v1388_v2 = vadd.f32 %v1387_v22, %v1353_v14 }
 0x11d   : > { %v1389_v37 = vadd.f32 %v1388_v2, %v1354_v15  ;;  %v1312_v21 = vadd.f32 %v1311_v9, %v1277_v31 }
 0x11f   : > { %v1313_v63 = vadd.f32 %v1312_v21, %v1278_v26  ;;  %v1390_v32 = vadd.f32 %v1389_v37, %v1355_v41 }
 0x121   : > { %v1391_v10 = vadd.f32 %v1390_v32, %v1356_v36  ;;  %v1314_v29 = vadd.f32 %v1313_v63, %v1279_v60 }
 0x123   : > { %v1315_v54 = vadd.f32 %v1314_v29, %v1280_v34  ;;  %v1392_v44 = vadd.f32 %v1391_v10, %v1357_v11 }
 0x125   : > { %v1316_v19 = vadd.f32 %v1315_v54, %v1281_v40  ;;  %v1393_v43 = vadd.f32 %v1392_v44, %v1358_v47 }
 0x127   : > { %v1317_v39 = vrot.slane %v1316_v19, 4  ;;  %v1394_v35 = vadd.f32 %v1393_v43, %v1359_v38 }
 0x129   : > { %v1318_v27 = vadd.f32 %v1317_v39, %v1316_v19  ;;  %v1395_v62 = vrot.slane %v1394_v35, 4 }
 0x12b   : > { %v1319_v51 = vrot.slane %v1318_v27, 2  ;;  %v1396_v56 = vadd.f32 %v1395_v62, %v1394_v35 }
 0x12d   : > { %v1320_v23 = vadd.f32 %v1319_v51, %v1318_v27  ;;  %v1397_v4 = vrot.slane %v1396_v56, 2 }
 0x12f   : > { %v1321_v33 = vrot.slane %v1320_v23, 1  ;;  %v1398_v28 = vadd.f32 %v1397_v4, %v1396_v56 }
 0x131   : > { %v1322_v16 = vadd.f32 %v1321_v33, %v1320_v23  ;;  %v1399_v25 = vrot.slane %v1398_v28, 1 }
 0x133   : > { %1323 = vst [vmem:[%s141_s24] sm:$0x1] %v1322_v16  ;;  %v1400_v57 = vadd.f32 %v1399_v25, %v1398_v28 }
 0x135   : > { %1401 = vst [vmem:[%s141_s24 + $0x1] sm:$0x1] %v1400_v57 }
 0x136 PF: > { %s12_s9 = sadd.s32 1, %s1719_s9  }
 0x137   : > { %p9_p4 = scmp.ge.s32.totalorder %s12_s9, 4  }
 0x139   :  { %11 = sbr.rel (!%p9_p4) target bundleno = 1 (0x1), region = 58 }

// kernel: _lambda_.5
= control target key start
LH: loop header
LB: loop body
LE: loop exit
PB: predicated region body
PF: predicated region fallthrough
CT: control target
= control target key end

     0   :  { %s1233_s18 = smov 0   ;;  %s1692_s0 = inlined_call_operand.vmem [shape: bf16[2,288,36], index: 0, kind: input, shape index: {}]   ;;  %s1693_s1 = inlined_call_operand.vmem [shape: bf16[36,128], index: 1, kind: input, shape index: {}]   ;;  %s1694_s2 = inlined_call_operand.vmem [shape: f32[2,128], index: 2, kind: input, shape index: {}]   ;;  %s1695_s3 = inlined_call_operand.vmem [shape: f32[2,288,128], index: 3, kind: input, shape index: {}]   ;;  %s1696_s4 = inlined_call_operand.vmem [shape: f32[2,128], index: 4, kind: input, shape index: {}]   ;;  %s1697_s5 = inlined_call_operand.vmem [shape: f32[2,288,8], index: 5, kind: output, shape index: {}]  }
   0x1 LB: > { %s1040_s19 = sadd.s32 4294967295, %s1201_s18   ;;  %p1044_p0 = scmp.ge.s32.totalorder %s1201_s18, 1  ;;  %s1201_s18 = sphi %s1233_s18, %s15_s18  }
   0x2   : > { %p197_p1 = scmp.lt.s32.totalorder %s1201_s18, 3 }
   0x4   : > { %p198_p2 = pnand %p1044_p0, %p197_p1 }
   0x5   : > { %p230_p3 = scmp.lt.s32.totalorder (!%p198_p2), %s1040_s19, 1 }
   0x6   : > { %201 = sbr.rel (%p198_p2) target bundleno = 271 (0x10f), region = 40 }
   0xb   : > { %v1174_v0 = vld [vmem:[%s1693_s1 + $0x10] ss:$0 sps:$4 sm:$0x33]   ;;  %vm447_vm0 = vcmask 1041408   ;;  %v1175_v1 = vld [vmem:[%s1693_s1 + $0x8] sm:$0xff]   ;;  %s1699_s19 = smov (!%p230_p3, %s1040_s19), 1 }
   0xc   : > { %1162 = vmatprep.subr.msk.bf16.mxu0 %vm447_vm0, %v1174_v0  ;;  %v449_v2 = vsel %vm447_vm0, %v1174_v0, 0  ;;  %1163 = vmatprep.subr.msk.bf16.mxu1 %vm447_vm0, %v1174_v0  ;;  %v1176_v3 = vld [vmem:[%s1693_s1] sm:$0xff]   ;;  %s1164_s26 = smul.u32 144, %s1699_s19  ;;  %vm392_vm1 = vcmask 293888   ;;  %vm936_vm2 = vcmask 64512  }
   0xd   : > { %1115 = vmatpush3.bf16.msra.mxu0 %v449_v2  ;;  %1159 = vmatpush3.bf16.msra.mxu1 %v449_v2  ;;  %s1165_s30 = smul.u32 288, %s1699_s19  ;;  %v1306_v23 = vld [vmem:[%s1696_s4] ss:$0 sm:$0xff]  ;;  %v1320_v33 = vld [vmem:[%s1696_s4 + $0x1] ss:$0 sm:$0xff] }
   0xe   : > { %1116 = vmatprep.subr.bf16.mxu0 %v1175_v1  ;;  %1157 = vmatprep.subr.bf16.mxu1 %v1175_v1  ;;  %s1256_s29 = scalar_lea.vmem %s1692_s0, %s1164_s26 }
   0xf   : > { %v1177_v4 = vld [vmem:[%s1256_s29] sm:$0xff]   ;;  %v1178_v5 = vld [vmem:[%s1256_s29 + $0x8] sm:$0xff]   ;;  %v1179_v6 = vld [vmem:[%s1256_s29 + $0x50] sm:$0xff]   ;;  %s1300_s8 = scalar_lea.vmem %s1695_s3, %s1165_s30  ;;  %s1518_s21 = scalar_lea.vmem %s1697_s5, %s1165_s30 }
  0x10   : > { %1120 = vmatprep.mubr.msk.bf16.mxu0 %vm392_vm1, %v1177_v4  ;;  %v1180_v7 = vld [vmem:[%s1256_s29 + $0x58] sm:$0xff]   ;;  %1140 = vmatprep.mubr.msk.bf16.mxu1 %vm392_vm1, %v1179_v6  ;;  %v1181_v8 = vld [vmem:[%s1256_s29 + $0x10] sm:$0xff]   ;;  %v1183_v9 = vld [vmem:[%s1256_s29 + $0x60] sm:$0xff]  }
  0x11   : > { %1117 = vmatpush3.bf16.msra.mxu0 %v1175_v1  ;;  %1160 = vmatpush3.bf16.msra.mxu1 %v1175_v1  ;;  %v1182_v10 = vld [vmem:[%s1256_s29 + $0x18] sm:$0xff]   ;;  %v1184_v11 = vld [vmem:[%s1256_s29 + $0x68] sm:$0xff]   ;;  %v1185_v12 = vld [vmem:[%s1256_s29 + $0x20] sm:$0xff]  }
  0x12   : > { %1118 = vmatprep.subr.bf16.mxu0 %v1176_v3  ;;  %1158 = vmatprep.subr.bf16.mxu1 %v1176_v3  ;;  %v1187_v13 = vld [vmem:[%s1256_s29 + $0x70] sm:$0xff]   ;;  %v1186_v14 = vld [vmem:[%s1256_s29 + $0x28] sm:$0xff]   ;;  %v1188_v15 = vld [vmem:[%s1256_s29 + $0x78] sm:$0xff]  }
  0x13   : > { %v1189_v16 = vld [vmem:[%s1256_s29 + $0x30] sm:$0xff]   ;;  %v1191_v17 = vld [vmem:[%s1256_s29 + $0x80] sm:$0xff]   ;;  %v1190_v18 = vld [vmem:[%s1256_s29 + $0x38] sm:$0xff]  }
  0x14   : > { %v1192_v19 = vld [vmem:[%s1256_s29 + $0x88] sm:$0xff]   ;;  %v1193_v20 = vld [vmem:[%s1256_s29 + $0x40] sm:$0xff]   ;;  %v712_v22 = vld [vmem:[%s1300_s8 + $0x10] sm:$0xff] }
  0x15   : > { %1119 = vmatpush3.bf16.msra.mxu0 %v1176_v3  ;;  %1161 = vmatpush3.bf16.msra.mxu1 %v1176_v3  ;;  %v1194_v21 = vld [vmem:[%s1256_s29 + $0x48] sm:$0xff]   ;;  %v710_v24 = vld [vmem:[%s1300_s8] sm:$0xff]  ;;  %v713_v25 = vld [vmem:[%s1300_s8 + $0x18] sm:$0xff]  ;;  %v753_v28 = vmul.f32 %v1306_v23, %v712_v22 }
  0x16   : > { %v711_v26 = vld [vmem:[%s1300_s8 + $0x8] sm:$0xff]  ;;  %v732_v27 = vld [vmem:[%s1300_s8 + $0xb0] sm:$0xff]  ;;  %v751_v29 = vmul.f32 %v1306_v23, %v710_v24  ;;  %v730_v30 = vld [vmem:[%s1300_s8 + $0xa0] sm:$0xff]  ;;  %v754_v34 = vmul.f32 %v1306_v23, %v713_v25 }
  0x17   : > { %v733_v31 = vld [vmem:[%s1300_s8 + $0xb8] sm:$0xff]  ;;  %v716_v32 = vld [vmem:[%s1300_s8 + $0x30] sm:$0xff]  ;;  %v752_v35 = vmul.f32 %v1306_v23, %v711_v26  ;;  %v731_v36 = vld [vmem:[%s1300_s8 + $0xa8] sm:$0xff]  ;;  %v773_v39 = vmul.f32 %v1306_v23, %v732_v27  ;;  %v771_v40 = vmul.f32 %v1306_v23, %v730_v30  ;;  %v1335_v46 = vadd.f32 %v1320_v33, %v753_v28 }
  0x18   : > { %1121 = vmatmul.mubr.msk.bf16.vlgmr.msra.gmra.mxu0 %vm392_vm1, %v1178_v5  ;;  %1141 = vmatmul.mubr.msk.bf16.vlgmr.msra.gmra.mxu1 %vm392_vm1, %v1180_v7  ;;  %v714_v37 = vld [vmem:[%s1300_s8 + $0x20] sm:$0xff]  ;;  %v717_v38 = vld [vmem:[%s1300_s8 + $0x38] sm:$0xff]  ;;  %v774_v41 = vmul.f32 %v1306_v23, %v733_v31  ;;  %v757_v42 = vmul.f32 %v1306_v23, %v716_v32  ;;  %v736_v43 = vld [vmem:[%s1300_s8 + $0xd0] sm:$0xff]  ;;  %v1338_v47 = vadd.f32 %v1320_v33, %v751_v29 }
  0x19   : > { %1124 = vmatprep.mubr.msk.bf16.mxu0 %vm392_vm1, %v1181_v8  ;;  %1144 = vmatprep.mubr.msk.bf16.mxu1 %vm392_vm1, %v1183_v9  ;;  %v734_v44 = vld [vmem:[%s1300_s8 + $0xc0] sm:$0xff]  ;;  %v715_v45 = vld [vmem:[%s1300_s8 + $0x28] sm:$0xff]  ;;  %v737_v48 = vld [vmem:[%s1300_s8 + $0xd8] sm:$0xff]  ;;  %v1342_v49 = vadd.f32 %v1320_v33, %v754_v34  ;;  %v1345_v50 = vadd.f32 %v1320_v33, %v752_v35  ;;  %v772_v51 = vmul.f32 %v1306_v23, %v731_v36 }
  0x1a   : > { %v755_v52 = vmul.f32 %v1306_v23, %v714_v37  ;;  %v720_v53 = vld [vmem:[%s1300_s8 + $0x50] sm:$0xff]  ;;  %v735_v54 = vld [vmem:[%s1300_s8 + $0xc8] sm:$0xff]  ;;  %v718_v55 = vld [vmem:[%s1300_s8 + $0x40] sm:$0xff]  ;;  %v777_v56 = vmul.f32 %v1306_v23, %v736_v43  ;;  %v758_v57 = vmul.f32 %v1306_v23, %v717_v38  ;;  %v775_v58 = vmul.f32 %v1306_v23, %v734_v44 }
  0x1b   : > { %v756_v59 = vmul.f32 %v1306_v23, %v715_v45  ;;  %v721_v60 = vld [vmem:[%s1300_s8 + $0x58] sm:$0xff]  ;;  %v719_v61 = vld [vmem:[%s1300_s8 + $0x48] sm:$0xff]  ;;  %v1359_v62 = vadd.f32 %v1320_v33, %v773_v39  ;;  %v1362_v63 = vadd.f32 %v1320_v33, %v771_v40  ;;  %v1365_v0 = vadd.f32 %v1320_v33, %v774_v41  ;;  %v740_v2 = vld [vmem:[%s1300_s8 + $0xf0] sm:$0xff] }
  0x1c   : > { %v1368_v1 = vadd.f32 %v1320_v33, %v757_v42  ;;  %v778_v3 = vmul.f32 %v1306_v23, %v737_v48  ;;  %v761_v4 = vmul.f32 %v1306_v23, %v720_v53  ;;  %v776_v5 = vmul.f32 %v1306_v23, %v735_v54  ;;  %v738_v7 = vld [vmem:[%s1300_s8 + $0xe0] sm:$0xff]  ;;  %v741_v8 = vld [vmem:[%s1300_s8 + $0xf8] sm:$0xff]  ;;  %v724_v9 = vld [vmem:[%s1300_s8 + $0x70] sm:$0xff] }
  0x1d   : > { %v759_v6 = vmul.f32 %v1306_v23, %v718_v55  ;;  %v779_v22 = vmul.f32 %v1306_v23, %v738_v7  ;;  %v782_v24 = vmul.f32 %v1306_v23, %v741_v8  ;;  %v765_v25 = vmul.f32 %v1306_v23, %v724_v9  ;;  %v744_v26 = vld [vmem:[%s1300_s8 + $0x110] sm:$0xff]  ;;  %v742_v27 = vld [vmem:[%s1300_s8 + $0x100] sm:$0xff]  ;;  %v723_v28 = vld [vmem:[%s1300_s8 + $0x68] sm:$0xff] }
  0x1e   : > { %v1409_v29 = vadd.f32 %v1320_v33, %v778_v3  ;;  %v1412_v30 = vadd.f32 %v1320_v33, %v761_v4  ;;  %v1415_v31 = vadd.f32 %v1320_v33, %v776_v5  ;;  %v745_v34 = vld [vmem:[%s1300_s8 + $0x118] sm:$0xff]  ;;  %v728_v39 = vld [vmem:[%s1300_s8 + $0x90] sm:$0xff]  ;;  %v743_v40 = vld [vmem:[%s1300_s8 + $0x108] sm:$0xff]  ;;  %v785_v43 = vmul.f32 %v1306_v23, %v744_v26 }
  0x1f   : > { %v1418_v32 = vadd.f32 %v1320_v33, %v759_v6  ;;  %v726_v41 = vld [vmem:[%s1300_s8 + $0x80] sm:$0xff]  ;;  %v783_v45 = vmul.f32 %v1306_v23, %v742_v27  ;;  %v764_v48 = vmul.f32 %v1306_v23, %v723_v28  ;;  %v1448_v53 = vadd.f32 %v1320_v33, %v782_v24  ;;  %v727_v24 = vld [vmem:[%s1300_s8 + $0x88] sm:$0xff] }
  0x20   : > { %1125 = vmatmul.mubr.msk.bf16.gmra.mxu0 %vm392_vm1, %v1182_v10  ;;  %1145 = vmatmul.mubr.msk.bf16.gmra.mxu1 %vm392_vm1, %v1184_v11  ;;  %v1379_v10 = vadd.f32 %v1320_v33, %v772_v51  ;;  %v1382_v11 = vadd.f32 %v1320_v33, %v755_v52  ;;  %v1435_v42 = vld [vmem:[%s1694_s2] ss:$0 sm:$0xff]  ;;  %v1445_v52 = vadd.f32 %v1320_v33, %v779_v22  ;;  %v729_v22 = vld [vmem:[%s1300_s8 + $0x98] sm:$0xff] }
  0x21   : > { %1128 = vmatprep.mubr.msk.bf16.mxu0 %vm392_vm1, %v1185_v12  ;;  %1148 = vmatprep.mubr.msk.bf16.mxu1 %vm392_vm1, %v1187_v13  ;;  %v762_v12 = vmul.f32 %v1306_v23, %v721_v60  ;;  %v760_v13 = vmul.f32 %v1306_v23, %v719_v61  ;;  %v1451_v54 = vadd.f32 %v1320_v33, %v765_v25 }
  0x22   : > { %v784_v60 = vmul.f32 %v1306_v23, %v743_v40  ;;  %v767_v61 = vmul.f32 %v1306_v23, %v726_v41  ;;  %v1471_v8 = vadd.f32 %v1320_v33, %v785_v43 }
  0x23   : > { %v1422_v35 = vadd.f32 %v1320_v33, %v762_v12  ;;  %v1425_v36 = vadd.f32 %v1320_v33, %v760_v13  ;;  %v1477_v12 = vadd.f32 %v1320_v33, %v783_v45  ;;  %v1480_v13 = vadd.f32 %v1320_v33, %v764_v48 }
  0x28   : > { %1129 = vmatmul.mubr.msk.bf16.gmra.mxu0 %vm392_vm1, %v1186_v14  ;;  %1149 = vmatmul.mubr.msk.bf16.gmra.mxu1 %vm392_vm1, %v1188_v15  ;;  %v1387_v14 = vadd.f32 %v1320_v33, %v777_v56  ;;  %v1390_v15 = vadd.f32 %v1320_v33, %v758_v57  ;;  %v1456_v56 = vld [vmem:[%s1694_s2 + $0x1] ss:$0 sm:$0xff] }
  0x29   : > { %1132 = vmatprep.mubr.msk.bf16.mxu0 %vm392_vm1, %v1189_v16  ;;  %1152 = vmatprep.mubr.msk.bf16.mxu1 %vm392_vm1, %v1191_v17  ;;  %v1393_v16 = vadd.f32 %v1320_v33, %v775_v58  ;;  %v1396_v17 = vadd.f32 %v1320_v33, %v756_v59  ;;  %v786_v58 = vmul.f32 %v1306_v23, %v745_v34 }
  0x2a   : > { %v769_v59 = vmul.f32 %v1306_v23, %v728_v39  ;;  %v1495_v34 = vadd.f32 %v1320_v33, %v784_v60 }
  0x2b   : > { %v1489_v27 = vadd.f32 %v1320_v33, %v786_v58 }
  0x2c   : > { %v1492_v28 = vadd.f32 %v1320_v33, %v769_v59 }
  0x30   : > { %1133 = vmatmul.mubr.msk.bf16.gmra.mxu0 %vm392_vm1, %v1190_v18  ;;  %1153 = vmatmul.mubr.msk.bf16.gmra.mxu1 %vm392_vm1, %v1192_v19  ;;  %v739_v18 = vld [vmem:[%s1300_s8 + $0xe8] sm:$0xff]  ;;  %v722_v19 = vld [vmem:[%s1300_s8 + $0x60] sm:$0xff] }
  0x31   : > { %1136 = vmatprep.mubr.msk.bf16.mxu0 %vm392_vm1, %v1193_v20  ;;  %v725_v20 = vld [vmem:[%s1300_s8 + $0x78] sm:$0xff]  ;;  %v780_v37 = vmul.f32 %v1306_v23, %v739_v18  ;;  %v763_v38 = vmul.f32 %v1306_v23, %v722_v19 }
  0x32   : > { %v766_v44 = vmul.f32 %v1306_v23, %v725_v20 }
  0x33   : > { %v1465_v4 = vadd.f32 %v1320_v33, %v780_v37  ;;  %v1468_v5 = vadd.f32 %v1320_v33, %v763_v38  ;;  %v1498_v37 = vadd.f32 %v1320_v33, %v767_v61 }
  0x34   : > { %v1474_v9 = vadd.f32 %v1320_v33, %v766_v44 }
  0x38   : > { %1137 = vmatmul.mubr.msk.bf16.gmra.mxu0 %vm392_vm1, %v1194_v21  ;;  %v781_v21 = vmul.f32 %v1306_v23, %v740_v2 }
  0x3a   : > { %v1442_v51 = vadd.f32 %v1320_v33, %v781_v21 }
  0xd8   : > { %v1122_v55 = vpop.f32.mrf.mxu0  ;;  %v1142_v57 = vpop.f32.mrf.mxu1 }
  0xd9   : > { %v635_v2 = vmul.f32 %v1122_v55, %v1435_v42  ;;  %v655_v3 = vmul.f32 %v1142_v57, %v1435_v42  ;;  %v1505_v55 = vmul.f32 %v1306_v23, %v729_v22  ;;  %v1508_v57 = vmul.f32 %v1306_v23, %v727_v24 }
  0xda   : > { %v485_v6 = vpop.f32.mrf.mxu0  ;;  %v565_v7 = vpop.f32.mrf.mxu1 }
  0xdb   : > { %v676_v18 = vadd.f32 %v1456_v56, %v635_v2  ;;  %v633_v19 = vmul.f32 %v1435_v42, %v485_v6  ;;  %v696_v20 = vadd.f32 %v1456_v56, %v655_v3  ;;  %v653_v21 = vmul.f32 %v1435_v42, %v565_v7 }
  0xdc   : > { %v1123_v25 = vpop.f32.mrf.mxu0  ;;  %v1143_v26 = vpop.f32.mrf.mxu1 }
  0xdd   : > { %v830_v38 = vmul.f32 2.0, %v676_v18  ;;  %v674_v39 = vadd.f32 %v1456_v56, %v633_v19  ;;  %v850_v40 = vmul.f32 2.0, %v696_v20  ;;  %v636_v41 = vmul.f32 %v1123_v25, %v1435_v42 }
  0xde   : > { %v694_v43 = vadd.f32 %v1456_v56, %v653_v21  ;;  %v488_v44 = vpop.f32.mrf.mxu0  ;;  %v656_v45 = vmul.f32 %v1143_v26, %v1435_v42  ;;  %v568_v48 = vpop.f32.mrf.mxu1 }
  0xdf   : > { %v866_v58 = vadd.f32 %v830_v38, %v1335_v46  ;;  %v828_v59 = vmul.f32 2.0, %v674_v39  ;;  %v886_v60 = vadd.f32 %v850_v40, %v1359_v62  ;;  %v677_v61 = vadd.f32 %v1456_v56, %v636_v41 }
  0xe0   : > { %v848_v2 = vmul.f32 2.0, %v694_v43  ;;  %v634_v3 = vmul.f32 %v1435_v42, %v488_v44  ;;  %v697_v23 = vadd.f32 %v1456_v56, %v656_v45  ;;  %v1126_v6 = vpop.f32.mrf.mxu0  ;;  %v654_v46 = vmul.f32 %v1435_v42, %v568_v48  ;;  %v1146_v7 = vpop.f32.mrf.mxu1 }
  0xe1   : > { %v902_v62 = vmax.f32 %v866_v58, 0.0  ;;  %v864_v18 = vadd.f32 %v828_v59, %v1338_v47  ;;  %v922_v19 = vmax.f32 %v886_v60, 0.0  ;;  %v831_v20 = vmul.f32 2.0, %v677_v61 }
  0xe2   : > { %v884_v21 = vadd.f32 %v848_v2, %v1362_v63  ;;  %v675_v22 = vadd.f32 %v1456_v56, %v634_v3  ;;  %v851_v24 = vmul.f32 2.0, %v697_v23  ;;  %v639_v25 = vmul.f32 %v1126_v6, %v1435_v42  ;;  %v501_v26 = vpop.f32.mrf.mxu0  ;;  %v581_v38 = vpop.f32.mrf.mxu1 }
  0xe3   : > { %939 = vst.msk [vmem:[%s1518_s21 + $0x10] sm:$0xff] %vm936_vm2, %v902_v62  ;;  %v900_v39 = vmax.f32 %v864_v18, 0.0  ;;  %959 = vst.msk [vmem:[%s1518_s21 + $0xb0] sm:$0xff] %vm936_vm2, %v922_v19  ;;  %v867_v47 = vadd.f32 %v831_v20, %v1342_v49  ;;  %v695_v40 = vadd.f32 %v1456_v56, %v654_v46  ;;  %v637_v63 = vmul.f32 %v1435_v42, %v501_v26 }
  0xe4   : > { %v920_v41 = vmax.f32 %v884_v21, 0.0  ;;  %v829_v43 = vmul.f32 2.0, %v675_v22  ;;  %v887_v44 = vadd.f32 %v851_v24, %v1365_v0  ;;  %v680_v45 = vadd.f32 %v1456_v56, %v639_v25  ;;  %v1127_v48 = vpop.f32.mrf.mxu0  ;;  %v1147_v58 = vpop.f32.mrf.mxu1 }
  0xe5   : > { %937 = vst.msk [vmem:[%s1518_s21] sm:$0xff] %vm936_vm2, %v900_v39  ;;  %v903_v59 = vmax.f32 %v867_v47, 0.0  ;;  %v849_v60 = vmul.f32 2.0, %v695_v40  ;;  %v678_v49 = vadd.f32 %v1456_v56, %v637_v63  ;;  %v659_v61 = vmul.f32 %v1146_v7, %v1435_v42 }
  0xe6   : > { %957 = vst.msk [vmem:[%s1518_s21 + $0xa0] sm:$0xff] %vm936_vm2, %v920_v41  ;;  %v865_v2 = vadd.f32 %v829_v43, %v1345_v50  ;;  %v923_v3 = vmax.f32 %v887_v44, 0.0  ;;  %v834_v0 = vmul.f32 2.0, %v680_v45  ;;  %v640_v23 = vmul.f32 %v1127_v48, %v1435_v42  ;;  %v504_v6 = vpop.f32.mrf.mxu0  ;;  %v584_v46 = vpop.f32.mrf.mxu1 }
  0xe7   : > { %940 = vst.msk [vmem:[%s1518_s21 + $0x18] sm:$0xff] %vm936_vm2, %v903_v59  ;;  %v885_v62 = vadd.f32 %v849_v60, %v1379_v10  ;;  %v832_v18 = vmul.f32 2.0, %v678_v49  ;;  %v700_v19 = vadd.f32 %v1456_v56, %v659_v61  ;;  %v657_v7 = vmul.f32 %v1435_v42, %v581_v38 }
  0xe8   : > { %v901_v20 = vmax.f32 %v865_v2, 0.0  ;;  %960 = vst.msk [vmem:[%s1518_s21 + $0xb8] sm:$0xff] %vm936_vm2, %v923_v3  ;;  %v870_v50 = vadd.f32 %v834_v0, %v1368_v1  ;;  %v681_v21 = vadd.f32 %v1456_v56, %v640_v23  ;;  %v638_v22 = vmul.f32 %v1435_v42, %v504_v6  ;;  %v1130_v24 = vpop.f32.mrf.mxu0  ;;  %v1150_v25 = vpop.f32.mrf.mxu1 }
  0xe9   : > { %v921_v26 = vmax.f32 %v885_v62, 0.0  ;;  %v868_v10 = vadd.f32 %v832_v18, %v1382_v11  ;;  %v854_v39 = vmul.f32 2.0, %v700_v19  ;;  %v698_v47 = vadd.f32 %v1456_v56, %v657_v7 }
  0xea   : > { %938 = vst.msk [vmem:[%s1518_s21 + $0x8] sm:$0xff] %vm936_vm2, %v901_v20  ;;  %v906_v38 = vmax.f32 %v870_v50, 0.0  ;;  %v835_v40 = vmul.f32 2.0, %v681_v21  ;;  %v679_v1 = vadd.f32 %v1456_v56, %v638_v22  ;;  %v660_v63 = vmul.f32 %v1147_v58, %v1435_v42  ;;  %v517_v41 = vpop.f32.mrf.mxu0  ;;  %v597_v43 = vpop.f32.mrf.mxu1 }
  0xeb   : > { %958 = vst.msk [vmem:[%s1518_s21 + $0xa8] sm:$0xff] %vm936_vm2, %v921_v26  ;;  %v904_v44 = vmax.f32 %v868_v10, 0.0  ;;  %v890_v45 = vadd.f32 %v854_v39, %v1387_v14  ;;  %v852_v11 = vmul.f32 2.0, %v698_v47  ;;  %v643_v48 = vmul.f32 %v1130_v24, %v1435_v42 }
  0xec   : > { %943 = vst.msk [vmem:[%s1518_s21 + $0x30] sm:$0xff] %vm936_vm2, %v906_v38  ;;  %v871_v59 = vadd.f32 %v835_v40, %v1390_v15  ;;  %v833_v60 = vmul.f32 2.0, %v679_v1  ;;  %v701_v49 = vadd.f32 %v1456_v56, %v660_v63  ;;  %v658_v58 = vmul.f32 %v1435_v42, %v584_v46  ;;  %v1131_v61 = vpop.f32.mrf.mxu0  ;;  %v1151_v2 = vpop.f32.mrf.mxu1 }
  0xed   : > { %941 = vst.msk [vmem:[%s1518_s21 + $0x20] sm:$0xff] %vm936_vm2, %v904_v44  ;;  %v926_v3 = vmax.f32 %v890_v45, 0.0  ;;  %v888_v14 = vadd.f32 %v852_v11, %v1393_v16  ;;  %v684_v0 = vadd.f32 %v1456_v56, %v643_v48  ;;  %v641_v23 = vmul.f32 %v1435_v42, %v517_v41 }
  0xee   : > { %v907_v6 = vmax.f32 %v871_v59, 0.0  ;;  %v869_v15 = vadd.f32 %v833_v60, %v1396_v17  ;;  %v855_v62 = vmul.f32 2.0, %v701_v49  ;;  %v699_v18 = vadd.f32 %v1456_v56, %v658_v58  ;;  %v520_v46 = vpop.f32.mrf.mxu0  ;;  %v600_v19 = vpop.f32.mrf.mxu1 }
  0xef   : > { %963 = vst.msk [vmem:[%s1518_s21 + $0xd0] sm:$0xff] %vm936_vm2, %v926_v3  ;;  %v924_v7 = vmax.f32 %v888_v14, 0.0  ;;  %v838_v20 = vmul.f32 2.0, %v684_v0  ;;  %v682_v16 = vadd.f32 %v1456_v56, %v641_v23  ;;  %v663_v50 = vmul.f32 %v1150_v25, %v1435_v42 }
  0xf0   : > { %944 = vst.msk [vmem:[%s1518_s21 + $0x38] sm:$0xff] %vm936_vm2, %v907_v6  ;;  %v905_v21 = vmax.f32 %v869_v15, 0.0  ;;  %v891_v17 = vadd.f32 %v855_v62, %v1409_v29  ;;  %v853_v22 = vmul.f32 2.0, %v699_v18  ;;  %v644_v24 = vmul.f32 %v1131_v61, %v1435_v42  ;;  %v1134_v26 = vpop.f32.mrf.mxu0  ;;  %v1154_v25 = vpop.f32.mrf.mxu1 }
  0xf1   : > { %961 = vst.msk [vmem:[%s1518_s21 + $0xc0] sm:$0xff] %vm936_vm2, %v924_v7  ;;  %v874_v10 = vadd.f32 %v838_v20, %v1412_v30  ;;  %v836_v39 = vmul.f32 2.0, %v682_v16  ;;  %v704_v47 = vadd.f32 %v1456_v56, %v663_v50  ;;  %v661_v38 = vmul.f32 %v1435_v42, %v597_v43 }
  0xf2   : > { %942 = vst.msk [vmem:[%s1518_s21 + $0x28] sm:$0xff] %vm936_vm2, %v905_v21  ;;  %v927_v40 = vmax.f32 %v891_v17, 0.0  ;;  %v889_v29 = vadd.f32 %v853_v22, %v1415_v31  ;;  %v685_v1 = vadd.f32 %v1456_v56, %v644_v24  ;;  %v642_v63 = vmul.f32 %v1435_v42, %v520_v46  ;;  %v533_v41 = vpop.f32.mrf.mxu0  ;;  %v613_v3 = vpop.f32.mrf.mxu1 }
  0xf3   : > { %v910_v44 = vmax.f32 %v874_v10, 0.0  ;;  %v872_v30 = vadd.f32 %v836_v39, %v1418_v32  ;;  %v858_v45 = vmul.f32 2.0, %v704_v47  ;;  %v702_v11 = vadd.f32 %v1456_v56, %v661_v38 }
  0xf4   : > { %964 = vst.msk [vmem:[%s1518_s21 + $0xd8] sm:$0xff] %vm936_vm2, %v927_v40  ;;  %v925_v43 = vmax.f32 %v889_v29, 0.0  ;;  %v839_v48 = vmul.f32 2.0, %v685_v1  ;;  %v683_v59 = vadd.f32 %v1456_v56, %v642_v63  ;;  %v664_v31 = vmul.f32 %v1151_v2, %v1435_v42  ;;  %v1135_v60 = vpop.f32.mrf.mxu0  ;;  %v1155_v17 = vpop.f32.mrf.mxu1 }
  0xf5   : > { %947 = vst.msk [vmem:[%s1518_s21 + $0x50] sm:$0xff] %vm936_vm2, %v910_v44  ;;  %v908_v49 = vmax.f32 %v872_v30, 0.0  ;;  %v894_v58 = vadd.f32 %v858_v45, %v1442_v51  ;;  %v856_v61 = vmul.f32 2.0, %v702_v11  ;;  %v647_v32 = vmul.f32 %v1134_v26, %v1435_v42 }
  0xf6   : > { %962 = vst.msk [vmem:[%s1518_s21 + $0xc8] sm:$0xff] %vm936_vm2, %v925_v43  ;;  %v875_v14 = vadd.f32 %v839_v48, %v1422_v35  ;;  %v837_v0 = vmul.f32 2.0, %v683_v59  ;;  %v705_v23 = vadd.f32 %v1456_v56, %v664_v31  ;;  %v662_v2 = vmul.f32 %v1435_v42, %v600_v19  ;;  %v536_v6 = vpop.f32.mrf.mxu0  ;;  %v616_v30 = vpop.f32.mrf.mxu1 }
  0xf7   : > { %945 = vst.msk [vmem:[%s1518_s21 + $0x40] sm:$0xff] %vm936_vm2, %v908_v49  ;;  %v930_v15 = vmax.f32 %v894_v58, 0.0  ;;  %v892_v51 = vadd.f32 %v856_v61, %v1445_v52  ;;  %v688_v62 = vadd.f32 %v1456_v56, %v647_v32  ;;  %v645_v18 = vmul.f32 %v1435_v42, %v533_v41 }
  0xf8   : > { %v911_v46 = vmax.f32 %v875_v14, 0.0  ;;  %v873_v7 = vadd.f32 %v837_v0, %v1425_v36  ;;  %v859_v35 = vmul.f32 2.0, %v705_v23  ;;  %v703_v20 = vadd.f32 %v1456_v56, %v662_v2  ;;  %v1138_v16 = vpop.f32.mrf.mxu0 }
  0xf9   : > { %967 = vst.msk [vmem:[%s1518_s21 + $0xf0] sm:$0xff] %vm936_vm2, %v930_v15  ;;  %v928_v19 = vmax.f32 %v892_v51, 0.0  ;;  %v842_v50 = vmul.f32 2.0, %v688_v62  ;;  %v686_v21 = vadd.f32 %v1456_v56, %v645_v18  ;;  %v667_v52 = vmul.f32 %v1154_v25, %v1435_v42 }
  0xfa   : > { %948 = vst.msk [vmem:[%s1518_s21 + $0x58] sm:$0xff] %vm936_vm2, %v911_v46  ;;  %v909_v22 = vmax.f32 %v873_v7, 0.0  ;;  %v895_v36 = vadd.f32 %v859_v35, %v1448_v53  ;;  %v857_v24 = vmul.f32 2.0, %v703_v20  ;;  %v648_v26 = vmul.f32 %v1135_v60, %v1435_v42  ;;  %v549_v10 = vpop.f32.mrf.mxu0 }
  0xfb   : > { %965 = vst.msk [vmem:[%s1518_s21 + $0xe0] sm:$0xff] %vm936_vm2, %v928_v19  ;;  %v878_v39 = vadd.f32 %v842_v50, %v1451_v54  ;;  %v840_v47 = vmul.f32 2.0, %v686_v21  ;;  %v708_v38 = vadd.f32 %v1456_v56, %v667_v52  ;;  %v665_v25 = vmul.f32 %v1435_v42, %v613_v3 }
  0xfc   : > { %946 = vst.msk [vmem:[%s1518_s21 + $0x48] sm:$0xff] %vm936_vm2, %v909_v22  ;;  %v931_v40 = vmax.f32 %v895_v36, 0.0  ;;  %v893_v53 = vadd.f32 %v857_v24, %v1465_v4  ;;  %v689_v29 = vadd.f32 %v1456_v56, %v648_v26  ;;  %v646_v1 = vmul.f32 %v1435_v42, %v536_v6  ;;  %v1139_v45 = vpop.f32.mrf.mxu0 }
  0xfd   : > { %v914_v63 = vmax.f32 %v878_v39, 0.0  ;;  %v876_v41 = vadd.f32 %v840_v47, %v1468_v5  ;;  %v862_v54 = vmul.f32 2.0, %v708_v38  ;;  %v706_v44 = vadd.f32 %v1456_v56, %v665_v25 }
  0xfe   : > { %968 = vst.msk [vmem:[%s1518_s21 + $0xf8] sm:$0xff] %vm936_vm2, %v931_v40  ;;  %v929_v11 = vmax.f32 %v893_v53, 0.0  ;;  %v843_v43 = vmul.f32 2.0, %v689_v29  ;;  %v687_v4 = vadd.f32 %v1456_v56, %v646_v1  ;;  %v668_v48 = vmul.f32 %v1155_v17, %v1435_v42  ;;  %v552_v23 = vpop.f32.mrf.mxu0 }
  0xff   : > { %951 = vst.msk [vmem:[%s1518_s21 + $0x70] sm:$0xff] %vm936_vm2, %v914_v63  ;;  %v912_v59 = vmax.f32 %v876_v41, 0.0  ;;  %v898_v31 = vadd.f32 %v862_v54, %v1471_v8  ;;  %v860_v5 = vmul.f32 2.0, %v706_v44  ;;  %v651_v60 = vmul.f32 %v1138_v16, %v1435_v42 }
 0x100   : > { %966 = vst.msk [vmem:[%s1518_s21 + $0xe8] sm:$0xff] %vm936_vm2, %v929_v11  ;;  %v879_v49 = vadd.f32 %v843_v43, %v1474_v9  ;;  %v841_v58 = vmul.f32 2.0, %v687_v4  ;;  %v709_v61 = vadd.f32 %v1456_v56, %v668_v48  ;;  %v666_v32 = vmul.f32 %v1435_v42, %v616_v30 }
 0x101   : > { %949 = vst.msk [vmem:[%s1518_s21 + $0x60] sm:$0xff] %vm936_vm2, %v912_v59  ;;  %v934_v3 = vmax.f32 %v898_v31, 0.0  ;;  %v896_v14 = vadd.f32 %v860_v5, %v1477_v12  ;;  %v692_v8 = vadd.f32 %v1456_v56, %v651_v60  ;;  %v649_v0 = vmul.f32 %v1435_v42, %v549_v10 }
 0x102   : > { %v915_v2 = vmax.f32 %v879_v49, 0.0  ;;  %v877_v9 = vadd.f32 %v841_v58, %v1480_v13  ;;  %v863_v6 = vmul.f32 2.0, %v709_v61  ;;  %v707_v15 = vadd.f32 %v1456_v56, %v666_v32 }
 0x103   : > { %971 = vst.msk [vmem:[%s1518_s21 + $0x110] sm:$0xff] %vm936_vm2, %v934_v3  ;;  %v932_v51 = vmax.f32 %v896_v14, 0.0  ;;  %v846_v62 = vmul.f32 2.0, %v692_v8  ;;  %v690_v18 = vadd.f32 %v1456_v56, %v649_v0  ;;  %v652_v12 = vmul.f32 %v1139_v45, %v1435_v42 }
 0x104   : > { %952 = vst.msk [vmem:[%s1518_s21 + $0x78] sm:$0xff] %vm936_vm2, %v915_v2  ;;  %v913_v46 = vmax.f32 %v877_v9, 0.0  ;;  %v899_v7 = vadd.f32 %v863_v6, %v1489_v27  ;;  %v861_v35 = vmul.f32 2.0, %v707_v15  ;;  %v650_v13 = vmul.f32 %v1435_v42, %v552_v23 }
 0x105   : > { %969 = vst.msk [vmem:[%s1518_s21 + $0x100] sm:$0xff] %vm936_vm2, %v932_v51  ;;  %v882_v20 = vadd.f32 %v846_v62, %v1492_v28  ;;  %v844_v16 = vmul.f32 2.0, %v690_v18  ;;  %v693_v19 = vadd.f32 %v1456_v56, %v652_v12  ;;  %v811_v50 = vadd.f32 %v1320_v33, %v1505_v55 }
 0x106   : > { %950 = vst.msk [vmem:[%s1518_s21 + $0x68] sm:$0xff] %vm936_vm2, %v913_v46  ;;  %v935_v27 = vmax.f32 %v899_v7, 0.0  ;;  %v897_v21 = vadd.f32 %v861_v35, %v1495_v34  ;;  %v691_v42 = vadd.f32 %v1456_v56, %v650_v13  ;;  %v809_v52 = vadd.f32 %v1320_v33, %v1508_v57 }
 0x107   : > { %v918_v28 = vmax.f32 %v882_v20, 0.0  ;;  %v880_v17 = vadd.f32 %v844_v16, %v1498_v37  ;;  %v847_v22 = vmul.f32 2.0, %v693_v19 }
 0x108   : > { %972 = vst.msk [vmem:[%s1518_s21 + $0x118] sm:$0xff] %vm936_vm2, %v935_v27  ;;  %v933_v55 = vmax.f32 %v897_v21, 0.0  ;;  %v845_v36 = vmul.f32 2.0, %v691_v42 }
 0x109   : > { %955 = vst.msk [vmem:[%s1518_s21 + $0x90] sm:$0xff] %vm936_vm2, %v918_v28  ;;  %v916_v24 = vmax.f32 %v880_v17, 0.0  ;;  %v883_v26 = vadd.f32 %v847_v22, %v811_v50 }
 0x10a   : > { %970 = vst.msk [vmem:[%s1518_s21 + $0x108] sm:$0xff] %vm936_vm2, %v933_v55  ;;  %v881_v56 = vadd.f32 %v845_v36, %v809_v52 }
 0x10b   : > { %953 = vst.msk [vmem:[%s1518_s21 + $0x80] sm:$0xff] %vm936_vm2, %v916_v24  ;;  %v919_v34 = vmax.f32 %v883_v26, 0.0 }
 0x10c   : > { %v917_v33 = vmax.f32 %v881_v56, 0.0 }
 0x10d   : > { %956 = vst.msk [vmem:[%s1518_s21 + $0x98] sm:$0xff] %vm936_vm2, %v919_v34 }
 0x10e   : > { %954 = vst.msk [vmem:[%s1518_s21 + $0x88] sm:$0xff] %vm936_vm2, %v917_v33 }
 0x10f PF: > { %s15_s18 = sadd.s32 1, %s1201_s18  }
 0x110   : > { %p12_p4 = scmp.ge.s32.totalorder %s15_s18, 4  }
 0x112   :  { %14 = sbr.rel (!%p12_p4) target bundleno = 1 (0x1), region = 73 }

// kernel: _lambda_.4
= control target key start
LH: loop header
LB: loop body
LE: loop exit
PB: predicated region body
PF: predicated region fallthrough
CT: control target
= control target key end

     0   :  { %s7508_s18 = smov 0   ;;  %s10620_s0 = inlined_call_operand.vmem [shape: bf16[2,288,36], index: 0, kind: input, shape index: {}]   ;;  %s10621_s1 = inlined_call_operand.vmem [shape: f32[2,128], index: 1, kind: input, shape index: {}]   ;;  %s10622_s2 = inlined_call_operand.vmem [shape: bf16[36,128], index: 2, kind: input, shape index: {}]   ;;  %s10623_s3 = inlined_call_operand.vmem [shape: bf16[9,128,128], index: 3, kind: input, shape index: {}]   ;;  %s10624_s4 = inlined_call_operand.vmem [shape: f32[2,288,128], index: 4, kind: output, shape index: {0}]   ;;  %s10625_s5 = inlined_call_operand.vmem [shape: f32[2,2,128], index: 5, kind: output, shape index: {1}]  }
   0x1 LB: > { %s6015_s19 = sadd.s32 4294967295, %s7474_s18   ;;  %p6019_p0 = scmp.ge.s32.totalorder %s7474_s18, 1  ;;  %s7474_s18 = sphi %s7508_s18, %s16_s18  }
   0x2   : > { %p190_p1 = scmp.lt.s32.totalorder %s7474_s18, 3 }
   0x4   : > { %p191_p2 = pnand %p6019_p0, %p190_p1 }
   0x6   : > { %194 = sbr.rel (%p191_p2) target bundleno = 879 (0x36f), region = 36 }
   0xb   : > { %v7302_v0 = vld [vmem:[%s10622_s2 + $0x10] ss:$0 sps:$4 sm:$0x33]   ;;  %vm1159_vm0 = vcmask 1041408   ;;  %vm10626_vm1 = vsmask.f32 1280  ;;  %v237_v30 = vlaneseq }
   0xc   : > { %v1499_v1 = vld [vmem:[#allocation2 + $0x8] sm:$0x3]  ;;  %7217 = vmatprep.subr.msk.bf16.mxu0 %vm1159_vm0, %v7302_v0  ;;  %vm7520_vm2 = vmand %vm1159_vm0, %vm10626_vm1  ;;  %v10669_v2 = vmov 0  ;;  %v1161_v3 = vsel %vm1159_vm0, %v7302_v0, 0  ;;  %p222_p3 = scmp.lt.s32.totalorder %s6015_s19, 1  ;;  %v7304_v6 = vld [vmem:[%s10622_s2] sm:$0xff]  }
   0xd   : > { %v10670_v2 = vsel %vm7520_vm2, 4294967295, %v10669_v2  ;;  %v1500_v4 = vsel %vm7520_vm2, 0, %v1499_v1  ;;  %6692 = vmatpush3.bf16.msra.mxu0 %v1161_v3  ;;  %v7303_v5 = vld [vmem:[%s10622_s2 + $0x8] sm:$0xff]   ;;  %vm1104_vm3 = vcmask 293888   ;;  %v7323_v7 = vld [vmem:[%s10623_s3 + $0x38] sm:$0xff]   ;;  %v7324_v11 = vld [vmem:[%s10623_s3 + $0x30] sm:$0xff]  }
   0xe   : > { %10671 = vst [vmem:[#allocation3_spill] sm:$0xff] %v10670_v2  ;;  %1501 = vst [vmem:[#allocation2 + $0x8] sm:$0x3] %v1500_v4  ;;  %s10960_s19 = smov (!%p222_p3, %s6015_s19), 1  ;;  %6693 = vmatprep.subr.bf16.mxu0 %v7303_v5  ;;  %v7325_v12 = vld [vmem:[%s10623_s3 + $0x28] sm:$0xff]   ;;  %v7326_v15 = vld [vmem:[%s10623_s3 + $0x20] sm:$0xff]  }
   0xf   : > { %s7218_s26 = smul.u32 144, %s10960_s19  ;;  %v7327_v18 = vld [vmem:[%s10623_s3 + $0x18] sm:$0xff]   ;;  %v7591_v31 = vshrl.u32 %v237_v30, 7  ;;  %v7330_v34 = vld [vmem:[%s10623_s3 + $0x70] sm:$0xff]   ;;  %vm1502_vm4 = vcmask 1043457   ;;  %v10672_v43 = vmov 0 }
  0x10   : > { %v7329_v32 = vld [vmem:[%s10623_s3 + $0x78] sm:$0xff]   ;;  %vm1503_vm5 = vsmask.f32 7942  ;;  %v7328_v50 = vld [vmem:[%s10623_s3 + $0x10] sm:$0xff]   ;;  %v7332_v53 = vld [vmem:[%s10623_s3 + $0x68] sm:$0xff]   ;;  %s7219_s25 = smul.u32 288, %s10960_s19 }
  0x11   : > { %6694 = vmatpush3.bf16.msra.mxu0 %v7303_v5  ;;  %s7538_s29 = scalar_lea.vmem %s10620_s0, %s7218_s26  ;;  %6733 = vmatprep.subr.bf16.mxu1 %v7329_v32  ;;  %v240_v33 = vadd.s32 16, %v7591_v31  ;;  %v241_v35 = vadd.s32 24, %v7591_v31  ;;  %v7605_v38 = vmul.u32.u64.low 3817748708, %v7591_v31  ;;  %v7606_v39 = vmul.u32.u64.high 3817748708, %v7591_v31, %v7605_v38  ;;  %v1505_v41 = vld [vmem:[#allocation2 + $0x98] sm:$0xe]  ;;  %vm7610_vm6 = vmand %vm1502_vm4, %vm1503_vm5 }
  0x12   : > { %6695 = vmatprep.subr.bf16.mxu0 %v7304_v6  ;;  %v7305_v8 = vld [vmem:[%s7538_s29] sm:$0xff]   ;;  %v7306_v9 = vld [vmem:[%s7538_s29 + $0x8] sm:$0xff]   ;;  %v7307_v10 = vld [vmem:[%s7538_s29 + $0x10] sm:$0xff]   ;;  %6734 = vmatpush3.bf16.msra.mxu1 %v7329_v32  ;;  %v239_v40 = vadd.s32 8, %v7591_v31  ;;  %v244_v42 = vadd.s32 48, %v7591_v31  ;;  %v10673_v43 = vsel %vm7610_vm6, 4294967295, %v10672_v43  ;;  %s10467_s28 = scalar_lea.vmem %s10624_s4, %s7219_s25 }
  0x13   : > { %6697 = vmatprep.mubr.msk.bf16.mxu0 %vm1104_vm3, %v7305_v8  ;;  %v7308_v13 = vld [vmem:[%s7538_s29 + $0x18] sm:$0xff]   ;;  %v7309_v14 = vld [vmem:[%s7538_s29 + $0x20] sm:$0xff]   ;;  %v7310_v16 = vld [vmem:[%s7538_s29 + $0x28] sm:$0xff]   ;;  %v7601_v36 = vmul.u32.u64.low 3817748708, %v240_v33  ;;  %v7602_v37 = vmul.u32.u64.high 3817748708, %v240_v33, %v7601_v36  ;;  %6735 = vmatprep.subr.bf16.mxu1 %v7330_v34  ;;  %v1506_v46 = vsel %vm7610_vm6, 0, %v1505_v41 }
  0x14   : > { %v7311_v17 = vld [vmem:[%s7538_s29 + $0x30] sm:$0xff]   ;;  %v7312_v19 = vld [vmem:[%s7538_s29 + $0x38] sm:$0xff]   ;;  %v7313_v20 = vld [vmem:[%s7538_s29 + $0x40] sm:$0xff]   ;;  %v7614_v44 = vmul.u32.u64.low 3817748708, %v241_v35  ;;  %v7615_v45 = vmul.u32.u64.high 3817748708, %v241_v35, %v7614_v44  ;;  %v7620_v47 = vadd.s32 32, %v7591_v31 }
  0x15   : > { %6696 = vmatpush3.bf16.msra.mxu0 %v7304_v6  ;;  %v7314_v21 = vld [vmem:[%s7538_s29 + $0x48] sm:$0xff]   ;;  %v7315_v22 = vld [vmem:[%s7538_s29 + $0x50] sm:$0xff]   ;;  %v7316_v23 = vld [vmem:[%s7538_s29 + $0x58] sm:$0xff]   ;;  %1507 = vst [vmem:[#allocation2 + $0x98] sm:$0xe] %v1506_v46  ;;  %v302_v56 = vshrl.u32 %v7602_v37, 4 }
  0x16   : > { %6785 = vmatprep.subr.bf16.mxu0 %v7323_v7  ;;  %v7317_v24 = vld [vmem:[%s7538_s29 + $0x60] sm:$0xff]   ;;  %v7318_v25 = vld [vmem:[%s7538_s29 + $0x68] sm:$0xff]   ;;  %v7319_v26 = vld [vmem:[%s7538_s29 + $0x70] sm:$0xff]   ;;  %6736 = vmatpush3.bf16.msra.mxu1 %v7330_v34  ;;  %v7622_v48 = vmul.u32.u64.low 3817748708, %v239_v40  ;;  %v7623_v49 = vmul.u32.u64.high 3817748708, %v239_v40, %v7622_v48  ;;  %v280_v57 = vshrl.u32 %v7606_v39, 4 }
  0x17   : > { %v7320_v27 = vld [vmem:[%s7538_s29 + $0x78] sm:$0xff]   ;;  %v7321_v28 = vld [vmem:[%s7538_s29 + $0x80] sm:$0xff]   ;;  %v7322_v29 = vld [vmem:[%s7538_s29 + $0x88] sm:$0xff]   ;;  %v7628_v51 = vmul.u32.u64.low 3817748708, %v244_v42  ;;  %v7629_v52 = vmul.u32.u64.high 3817748708, %v244_v42, %v7628_v51  ;;  %6737 = vmatprep.subr.bf16.mxu1 %v7332_v53  ;;  %v313_v58 = vshrl.u32 %v7615_v45, 4 }
  0x18   : > { %6698 = vmatmul.mubr.msk.bf16.vlgmr.msra.gmra.mxu0 %vm1104_vm3, %v7306_v9  ;;  %v7635_v54 = vmul.u32.u64.low 3817748708, %v7620_v47  ;;  %v7636_v55 = vmul.u32.u64.high 3817748708, %v7620_v47, %v7635_v54  ;;  %v7642_v59 = vadd.s32 56, %v7591_v31  ;;  %v7333_v60 = vld [vmem:[%s10623_s3 + $0x60] sm:$0xff]   ;;  %v303_v61 = vmul.u32 18, %v302_v56  ;;  %v7331_v6 = vld [vmem:[%s10623_s3 + $0x8] sm:$0xff]  }
  0x19   : > { %6701 = vmatprep.mubr.msk.bf16.mxu0 %vm1104_vm3, %v7307_v10  ;;  %6786 = vmatpush3.bf16.msra.mxu0 %v7323_v7  ;;  %v291_v62 = vshrl.u32 %v7623_v49, 4  ;;  %v7649_v63 = vadd.s32 40, %v7591_v31  ;;  %v281_v0 = vmul.u32 18, %v280_v57  ;;  %v346_v1 = vshrl.u32 %v7629_v52, 4  ;;  %v7335_v8 = vld [vmem:[%s10623_s3 + $0x58] sm:$0xff]   ;;  %s6022_s29 = sshll.u32 %s10960_s19, 1 }
  0x1a   : > { %6787 = vmatprep.subr.bf16.mxu0 %v7324_v11  ;;  %6738 = vmatpush3.bf16.msra.mxu1 %v7332_v53  ;;  %v314_v3 = vmul.u32 18, %v313_v58  ;;  %v7653_v4 = vmul.u32.u64.low 3817748708, %v7642_v59  ;;  %v7654_v5 = vmul.u32.u64.high 3817748708, %v7642_v59, %v7653_v4  ;;  %v324_v7 = vshrl.u32 %v7636_v55, 4  ;;  %s235_s7 = scalar_lea.vmem %s10625_s5, %s6022_s29 }
  0x1b   : > { %6739 = vmatprep.subr.bf16.mxu1 %v7333_v60  ;;  %v7663_v9 = vsub.s32 %v240_v33, %v303_v61  ;;  %v292_v10 = vmul.u32 18, %v291_v62  ;;  %v7721_v34 = vadd.s32 88, %v7591_v31  ;;  %v7736_v39 = vadd.s32 72, %v7591_v31  ;;  %v7337_v61 = vld [vmem:[%s10623_s3 + $0x48] sm:$0xff]  }
  0x1c   : > { %v7765_v48 = vadd.s32 112, %v7591_v31  ;;  %v7927_v51 = vadd.s32 144, %v7591_v31  ;;  %v8094_v62 = vadd.s32 184, %v7591_v31 }
  0x1d   : > { %6788 = vmatpush3.bf16.msra.mxu0 %v7324_v11  ;;  %vm672_vm7 = vcmp.ne.s32.totalorder %v7663_v9, 0  ;;  %vm708_vm8 = vcmp.lt.s32.totalorder %v7663_v9, 0  ;;  %v7776_v52 = vmul.u32.u64.low 3817748708, %v7721_v34  ;;  %v7777_v53 = vmul.u32.u64.high 3817748708, %v7721_v34, %v7776_v52 }
  0x1e   : > { %6789 = vmatprep.subr.bf16.mxu0 %v7325_v12  ;;  %6740 = vmatpush3.bf16.msra.mxu1 %v7333_v60  ;;  %vm7713_vm15 = vmand %vm708_vm8, %vm672_vm7  ;;  %v7791_v57 = vmul.u32.u64.low 3817748708, %v7736_v39  ;;  %v7792_v58 = vmul.u32.u64.high 3817748708, %v7736_v39, %v7791_v57  ;;  %v7795_v60 = vadd.s32 96, %v7591_v31 }
  0x1f   : > { %6741 = vmatprep.subr.bf16.mxu1 %v7335_v8 }
  0x20   : > { %6702 = vmatmul.mubr.msk.bf16.gmra.mxu0 %vm1104_vm3, %v7308_v13  ;;  %v7670_v13 = vsub.s32 %v7591_v31, %v281_v0 }
  0x21   : > { %6705 = vmatprep.mubr.msk.bf16.mxu0 %vm1104_vm3, %v7309_v14  ;;  %6790 = vmatpush3.bf16.msra.mxu0 %v7325_v12  ;;  %v7666_v11 = vmul.u32.u64.low 3817748708, %v7649_v63  ;;  %v7667_v12 = vmul.u32.u64.high 3817748708, %v7649_v63, %v7666_v11  ;;  %v347_v14 = vmul.u32 18, %v346_v1 }
  0x22   : > { %6791 = vmatprep.subr.bf16.mxu0 %v7326_v15  ;;  %6742 = vmatpush3.bf16.msra.mxu1 %v7335_v8  ;;  %vm670_vm9 = vcmp.ne.s32.totalorder %v7670_v13, 0  ;;  %vm706_vm10 = vcmp.lt.s32.totalorder %v7670_v13, 0 }
  0x23   : > { %v335_v30 = vshrl.u32 %v7667_v12, 4  ;;  %vm7727_vm4 = vmand %vm706_vm10, %vm670_vm9  ;;  %v7343_v12 = vld [vmem:[%s10623_s3 + $0x40] sm:$0xff]  }
  0x25   : > { %6792 = vmatpush3.bf16.msra.mxu0 %v7326_v15  ;;  %v7672_v15 = vsub.s32 %v241_v35, %v314_v3 }
  0x26   : > { %6793 = vmatprep.subr.bf16.mxu0 %v7327_v18 }
  0x27   : > { %vm673_vm11 = vcmp.ne.s32.totalorder %v7672_v15, 0  ;;  %vm709_vm12 = vcmp.lt.s32.totalorder %v7672_v15, 0 }
  0x28   : > { %6706 = vmatmul.mubr.msk.bf16.gmra.mxu0 %vm1104_vm3, %v7310_v16  ;;  %v325_v16 = vmul.u32 18, %v324_v7  ;;  %vm7745_vm5 = vmand %vm709_vm12, %vm673_vm11 }
  0x29   : > { %6709 = vmatprep.mubr.msk.bf16.mxu0 %vm1104_vm3, %v7311_v17  ;;  %6794 = vmatpush3.bf16.msra.mxu0 %v7327_v18  ;;  %v7675_v17 = vadd.s32 80, %v7591_v31  ;;  %v7679_v18 = vsub.s32 %v239_v40, %v292_v10  ;;  %v7336_v40 = vld [vmem:[%s10623_s3 + $0x50] sm:$0xff]   ;;  %v7833_v10 = vmul.u32.u64.low 3817748708, %v7795_v60  ;;  %v7834_v11 = vmul.u32.u64.high 3817748708, %v7795_v60, %v7833_v10 }
  0x2a   : > { %6795 = vmatprep.subr.bf16.mxu0 %v7328_v50  ;;  %6743 = vmatprep.subr.bf16.mxu1 %v7336_v40 }
  0x2b   : > { %vm671_vm13 = vcmp.ne.s32.totalorder %v7679_v18, 0  ;;  %vm707_vm14 = vcmp.lt.s32.totalorder %v7679_v18, 0  ;;  %v779_v33 = vadd.s32 18, %v7679_v18  ;;  %6744 = vmatpush3.bf16.msra.mxu1 %v7336_v40  ;;  %v7904_v40 = vadd.s32 104, %v7591_v31 }
  0x2c   : > { %vm7760_vm9 = vmand %vm707_vm14, %vm671_vm13  ;;  %6745 = vmatprep.subr.bf16.mxu1 %v7337_v61 }
  0x2d   : > { %6796 = vmatpush3.bf16.msra.mxu0 %v7328_v50  ;;  %v815_v7 = vsel %vm7760_vm9, %v779_v33, %v7679_v18  ;;  %v8006_v18 = vadd.s32 176, %v7591_v31 }
  0x2e   : > { %6797 = vmatprep.subr.bf16.mxu0 %v7331_v6 }
  0x2f   : > { %6746 = vmatpush3.bf16.msra.mxu1 %v7337_v61 }
  0x30   : > { %6710 = vmatmul.mubr.msk.bf16.gmra.mxu0 %vm1104_vm3, %v7312_v19  ;;  %v7334_v19 = vld [vmem:[%s10623_s3] sm:$0xff]   ;;  %6747 = vmatprep.subr.bf16.mxu1 %v7343_v12 }
  0x31   : > { %6713 = vmatprep.mubr.msk.bf16.mxu0 %vm1104_vm3, %v7313_v20  ;;  %6798 = vmatpush3.bf16.msra.mxu0 %v7331_v6  ;;  %v780_v20 = vadd.s32 18, %v7663_v9 }
  0x32   : > { %6799 = vmatprep.subr.bf16.mxu0 %v7334_v19 }
  0x33   : > { %v816_v45 = vsel %vm7713_vm15, %v780_v20, %v7663_v9  ;;  %6748 = vmatpush3.bf16.msra.mxu1 %v7343_v12 }
  0x34   : > { %vm7800_vm12 = vcmp.lt.s32.totalorder %v816_v45, 16 }
  0x35   : > { %6800 = vmatpush3.bf16.msra.mxu0 %v7334_v19 }
  0x38   : > { %6714 = vmatmul.mubr.msk.bf16.gmra.mxu0 %vm1104_vm3, %v7314_v21  ;;  %v7687_v21 = vsub.s32 %v244_v42, %v347_v14 }
  0x39   : > { %6717 = vmatprep.mubr.msk.bf16.mxu0 %vm1104_vm3, %v7315_v22  ;;  %v7476_v22 = vmov 0  }
  0x3a   : > { %1494 = vst [vmem:[#allocation2] sm:$0xf] %v7476_v22  ;;  %1495 = vst [vmem:[#allocation2 + $0x4] sm:$0xf] %v7476_v22  ;;  %vm676_vm0 = vcmp.ne.s32.totalorder %v7687_v21, 0  ;;  %v784_v42 = vadd.s32 18, %v7687_v21 }
  0x3b   : > { %1508 = vst [vmem:[#allocation2 + $0x9c] sm:$0xf] %v7476_v22  ;;  %1509 = vst [vmem:[#allocation2 + $0xa0] sm:$0xf] %v7476_v22  ;;  %v401_v22 = vshrl.u32 %v7777_v53, 4 }
  0x3c   : > { %v7930_v53 = vmul.u32.u64.low 3817748708, %v7904_v40  ;;  %v7931_v55 = vmul.u32.u64.high 3817748708, %v7904_v40, %v7930_v53 }
  0x40   : > { %6718 = vmatmul.mubr.msk.bf16.gmra.mxu0 %vm1104_vm3, %v7316_v23  ;;  %v7690_v23 = vadd.s32 18, %v7670_v13 }
  0x41   : > { %6721 = vmatprep.mubr.msk.bf16.mxu0 %vm1104_vm3, %v7317_v24  ;;  %v357_v24 = vshrl.u32 %v7654_v5, 4  ;;  %v2057_v49 = vld [vmem:[#allocation2] sm:$0xf]  ;;  %v2058_v50 = vld [vmem:[#allocation2 + $0x4] sm:$0xf] }
  0x42   : > { %v7779_v54 = vcombine.low %v2057_v49, %v2058_v50  ;;  %v814_v1 = vsel %vm7727_vm4, %v7690_v23, %v7670_v13  ;;  %v7815_v4 = vmul.u32.u64.low 3817748708, %v7765_v48  ;;  %v7816_v5 = vmul.u32.u64.high 3817748708, %v7765_v48, %v7815_v4 }
  0x43   : > { %v358_v36 = vmul.u32 18, %v357_v24  ;;  %vm7844_vm15 = vcmp.lt.s32.totalorder %v814_v1, 16  ;;  %v412_v49 = vshrl.u32 %v7834_v11, 4 }
  0x45   : > { %v7788_v56 = vsub.s32 %v7642_v59, %v358_v36  ;;  %v7806_v59 = vadd.s32 120, %v7591_v31  ;;  %v413_v1 = vmul.u32 18, %v412_v49 }
  0x47   : > { %vm677_vm13 = vcmp.ne.s32.totalorder %v7788_v56, 0  ;;  %vm713_vm14 = vcmp.lt.s32.totalorder %v7788_v56, 0 }
  0x48   : > { %6722 = vmatmul.mubr.msk.bf16.gmra.mxu0 %vm1104_vm3, %v7318_v25  ;;  %v7695_v25 = vadd.s32 64, %v7591_v31  ;;  %vm7870_vm9 = vmand %vm713_vm14, %vm677_vm13 }
  0x49   : > { %6725 = vmatprep.mubr.msk.bf16.mxu0 %vm1104_vm3, %v7319_v26  ;;  %v7699_v26 = vsub.s32 %v7620_v47, %v325_v16  ;;  %v336_v47 = vmul.u32 18, %v335_v30  ;;  %v423_v16 = vshrl.u32 %v7931_v55, 4  ;;  %v8077_v55 = vadd.s32 160, %v7591_v31 }
  0x4a   : > { %v7732_v37 = vmul.u32.u64.low 3817748708, %v7695_v25  ;;  %v7733_v38 = vmul.u32.u64.high 3817748708, %v7695_v25, %v7732_v37 }
  0x4b   : > { %vm674_vm7 = vcmp.ne.s32.totalorder %v7699_v26, 0  ;;  %vm710_vm8 = vcmp.lt.s32.totalorder %v7699_v26, 0  ;;  %v782_v44 = vadd.s32 18, %v7699_v26  ;;  %v337_v3 = vsub.s32 %v7649_v63, %v336_v47 }
  0x4c   : > { %vm7783_vm11 = vmand %vm710_vm8, %vm674_vm7  ;;  %v368_v9 = vshrl.u32 %v7733_v38, 4  ;;  %v434_v38 = vshrl.u32 %v7816_v5, 4 }
  0x4d   : > { %v818_v63 = vsel %vm7783_vm11, %v782_v44, %v7699_v26  ;;  %vm711_vm4 = vcmp.lt.s32.totalorder %v337_v3, 0  ;;  %v783_v26 = vadd.s32 18, %v337_v3  ;;  %v402_v44 = vmul.u32 18, %v401_v22 }
  0x4e   : > { %vm7862_vm8 = vcmp.lt.s32.totalorder %v818_v63, 16  ;;  %v435_v52 = vmul.u32 18, %v434_v38 }
  0x4f   : > { %v7945_v61 = vsub.s32 %v7721_v34, %v402_v44  ;;  %v7963_v34 = vadd.s32 136, %v7591_v31 }
  0x50   : > { %6726 = vmatmul.mubr.msk.bf16.gmra.mxu0 %vm1104_vm3, %v7320_v27 }
  0x51   : > { %6729 = vmatprep.mubr.msk.bf16.mxu0 %vm1104_vm3, %v7321_v28  ;;  %v7702_v27 = vmul.u32.u64.low 3817748708, %v7675_v17  ;;  %v7703_v28 = vmul.u32.u64.high 3817748708, %v7675_v17, %v7702_v27 }
  0x52   : > { %v369_v27 = vmul.u32 18, %v368_v9 }
  0x53   : > { %v390_v0 = vshrl.u32 %v7703_v28, 4  ;;  %v379_v28 = vshrl.u32 %v7792_v58, 4 }
  0x54   : > { %v7922_v46 = vsub.s32 %v7695_v25, %v369_v27 }
  0x55   : > { %v391_v13 = vmul.u32 18, %v390_v0  ;;  %v380_v47 = vmul.u32 18, %v379_v28 }
  0x56   : > { %v786_v10 = vadd.s32 18, %v7922_v46 }
  0x57   : > { %v392_v35 = vsub.s32 %v7675_v17, %v391_v13  ;;  %v7953_v0 = vsub.s32 %v7736_v39, %v380_v47  ;;  %v7970_v39 = vld [vmem:[%s10623_s3 + $0xf8] sm:$0xff]  }
  0x58   : > { %6730 = vmatmul.mubr.msk.bf16.gmra.mxu0 %vm1104_vm3, %v7322_v29  ;;  %v781_v29 = vadd.s32 18, %v7672_v15  ;;  %vm712_vm3 = vcmp.lt.s32.totalorder %v7687_v21, 0  ;;  %6889 = vmatprep.subr.bf16.mxu0 %v7970_v39 }
  0x59   : > { %vm7771_vm10 = vmand %vm712_vm3, %vm676_vm0  ;;  %6801 = vmatprep.mubr.bf16.mxu0 %v7779_v54  ;;  %vm675_vm3 = vcmp.ne.s32.totalorder %v337_v3, 0  ;;  %vm680_vm11 = vcmp.ne.s32.totalorder %v392_v35, 0  ;;  %v788_v58 = vadd.s32 18, %v392_v35  ;;  %v787_v22 = vadd.s32 18, %v7953_v0 }
  0x5a   : > { %v817_v6 = vsel %vm7745_vm5, %v781_v29, %v7672_v15  ;;  %v820_v8 = vsel %vm7771_vm10, %v784_v42, %v7687_v21  ;;  %v7841_v14 = vmul.u32.u64.low 3817748708, %v7806_v59  ;;  %v7842_v15 = vmul.u32.u64.high 3817748708, %v7806_v59, %v7841_v14  ;;  %vm7887_vm10 = vmand %vm711_vm4, %vm675_vm3 }
  0x5b   : > { %vm7848_vm0 = vcmp.lt.s32.totalorder %v817_v6, 16  ;;  %vm7852_vm5 = vcmp.lt.s32.totalorder %v815_v7, 16  ;;  %vm7856_vm7 = vcmp.lt.s32.totalorder %v820_v8, 16  ;;  %v785_v21 = vadd.s32 18, %v7788_v56 }
  0x5c   : > { %v10629_v29 = vmov 0.0   ;;  %v819_v45 = vsel %vm7887_vm10, %v783_v26, %v337_v3  ;;  %v445_v50 = vshrl.u32 %v7842_v15, 4  ;;  %v7956_v3 = vadd.s32 152, %v7591_v31 }
  0x5d   : > { %v7878_v30 = vsel %vm7800_vm12, 1.0, %v10629_v29  ;;  %v7883_v32 = vsel %vm7844_vm15, 1.0, %v10629_v29  ;;  %v7895_v36 = vsel %vm7848_vm0, 1.0, %v10629_v29  ;;  %v7900_v37 = vsel %vm7852_vm5, 1.0, %v10629_v29 }
  0x5e   : > { %10700 = vst [vmem:[#allocation4_spill] sm:$0xff] %v7878_v30  ;;  %10701 = vst [vmem:[#allocation5_spill] sm:$0xff] %v7883_v32  ;;  %v7909_v41 = vsel %vm7856_vm7, 1.0, %v10629_v29  ;;  %v7914_v17 = vsel %vm7862_vm8, 1.0, %v10629_v29  ;;  %v821_v42 = vsel %vm7870_vm9, %v785_v21, %v7788_v56  ;;  %vm716_vm12 = vcmp.lt.s32.totalorder %v392_v35, 0 }
  0x5f   : > { %10704 = vst [vmem:[#allocation6_spill] sm:$0xff] %v7895_v36  ;;  %10705 = vst [vmem:[#allocation7_spill] sm:$0xff] %v7900_v37  ;;  %v7934_v56 = vadd.s32 128, %v7591_v31  ;;  %vm7936_vm13 = vcmp.lt.s32.totalorder %v821_v42, 16  ;;  %vm7940_vm14 = vcmp.lt.s32.totalorder %v819_v45, 16  ;;  %vm678_vm0 = vcmp.ne.s32.totalorder %v7922_v46, 0 }
  0x60   : > { %10706 = vst [vmem:[#allocation8_spill] sm:$0xff] %v7909_v41  ;;  %10707 = vst [vmem:[#allocation9_spill] sm:$0xff] %v7914_v17  ;;  %v446_v4 = vmul.u32 18, %v445_v50  ;;  %v7959_v5 = vmul.u32.u64.low 3817748708, %v7927_v51  ;;  %v7960_v6 = vmul.u32.u64.high 3817748708, %v7927_v51, %v7959_v5  ;;  %vm714_vm3 = vcmp.lt.s32.totalorder %v7922_v46, 0 }
  0x61   : > { %vm7947_vm15 = vmand %vm716_vm12, %vm680_vm11  ;;  %v436_v7 = vsub.s32 %v7765_v48, %v435_v52  ;;  %v7973_v8 = vmul.u32.u64.low 3817748708, %v7934_v56  ;;  %v7974_v63 = vmul.u32.u64.high 3817748708, %v7934_v56, %v7973_v8  ;;  %vm681_vm4 = vcmp.ne.s32.totalorder %v7945_v61, 0 }
  0x62   : > { %v824_v9 = vsel %vm7947_vm15, %v788_v58, %v392_v35  ;;  %vm717_vm5 = vcmp.lt.s32.totalorder %v7945_v61, 0  ;;  %vm679_vm7 = vcmp.ne.s32.totalorder %v7953_v0, 0  ;;  %v7983_v48 = vsub.s32 %v7795_v60, %v413_v1  ;;  %vm7992_vm8 = vmand %vm714_vm3, %vm678_vm0 }
  0x63   : > { %v7987_v11 = vmul.u32.u64.low 3817748708, %v7956_v3  ;;  %v7988_v12 = vmul.u32.u64.high 3817748708, %v7956_v3, %v7987_v11  ;;  %vm715_vm9 = vcmp.lt.s32.totalorder %v7953_v0, 0  ;;  %v7998_v14 = vsub.s32 %v7806_v59, %v446_v4  ;;  %vm8022_vm12 = vmand %vm717_vm5, %vm681_vm4 }
  0x64   : > { %v8001_v60 = vmul.u32.u64.low 3817748708, %v7963_v34  ;;  %v8002_v15 = vmul.u32.u64.high 3817748708, %v7963_v34, %v8001_v60  ;;  %vm684_vm10 = vcmp.ne.s32.totalorder %v436_v7, 0  ;;  %vm720_vm11 = vcmp.lt.s32.totalorder %v436_v7, 0 }
  0x65   : > { %v8011_v19 = vsel %vm7936_vm13, 1.0, %v10629_v29  ;;  %v8016_v59 = vsel %vm7940_vm14, 1.0, %v10629_v29  ;;  %v789_v21 = vadd.s32 18, %v7945_v61  ;;  %vm8028_vm15 = vcmp.lt.s32.totalorder %v824_v9, 16  ;;  %vm8039_vm13 = vmand %vm715_vm9, %vm679_vm7 }
  0x66   : > { %10716 = vst [vmem:[#allocation10_spill] sm:$0xff] %v8011_v19  ;;  %10717 = vst [vmem:[#allocation11_spill] sm:$0xff] %v8016_v59  ;;  %v822_v24 = vsel %vm7992_vm8, %v786_v10, %v7922_v46  ;;  %v792_v27 = vadd.s32 18, %v436_v7  ;;  %vm682_vm14 = vcmp.ne.s32.totalorder %v7983_v48, 0  ;;  %vm718_vm3 = vcmp.lt.s32.totalorder %v7983_v48, 0 }
  0x67   : > { %vm8046_vm0 = vmand %vm720_vm11, %vm684_vm10  ;;  %vm685_vm4 = vcmp.ne.s32.totalorder %v7998_v14, 0  ;;  %vm721_vm5 = vcmp.lt.s32.totalorder %v7998_v14, 0  ;;  %v478_v33 = vshrl.u32 %v7960_v6, 4  ;;  %v424_v35 = vmul.u32 18, %v423_v16 }
  0x68   : > { %v456_v38 = vshrl.u32 %v7974_v63, 4  ;;  %v8056_v42 = vmul.u32.u64.low 3817748708, %v8006_v18  ;;  %v8057_v44 = vmul.u32.u64.high 3817748708, %v8006_v18, %v8056_v42  ;;  %vm858_vm7 = vcmp.lt.s32.totalorder %v822_v24, 16  ;;  %vm8070_vm8 = vmand %vm718_vm3, %vm682_vm14 }
  0x69   : > { %v825_v45 = vsel %vm8022_vm12, %v789_v21, %v7945_v61  ;;  %v823_v46 = vsel %vm8039_vm13, %v787_v22, %v7953_v0  ;;  %v790_v47 = vadd.s32 18, %v7983_v48  ;;  %v828_v49 = vsel %vm8046_vm0, %v792_v27, %v436_v7  ;;  %vm8088_vm9 = vmand %vm721_vm5, %vm685_vm4 }
  0x6a   : > { %v793_v52 = vadd.s32 18, %v7998_v14  ;;  %v489_v53 = vshrl.u32 %v7988_v12, 4  ;;  %v8082_v25 = vsel %vm8028_vm15, 1.0, %v10629_v29  ;;  %v479_v58 = vmul.u32 18, %v478_v33 }
  0x6b   : > { %10728 = vst [vmem:[#allocation12_spill] sm:$0xff] %v8082_v25  ;;  %v467_v61 = vshrl.u32 %v8002_v15, 4  ;;  %v8097_v0 = vsel %vm858_vm7, 1.0, %v10629_v29  ;;  %vm8099_vm10 = vcmp.lt.s32.totalorder %v825_v45, 16  ;;  %v425_v4 = vsub.s32 %v7904_v40, %v424_v35 }
  0x6c   : > { %10731 = vst [vmem:[#allocation13_spill] sm:$0xff] %v8097_v0  ;;  %v457_v5 = vmul.u32 18, %v456_v38  ;;  %vm8104_vm11 = vcmp.lt.s32.totalorder %v823_v46, 16  ;;  %vm8108_vm12 = vcmp.lt.s32.totalorder %v828_v49, 16  ;;  %v826_v8 = vsel %vm8070_vm8, %v790_v47, %v7983_v48 }
  0x6d   : > { %v8116_v63 = vadd.s32 168, %v7591_v31  ;;  %v829_v40 = vsel %vm8088_vm9, %v793_v52, %v7998_v14  ;;  %v490_v9 = vmul.u32 18, %v489_v53  ;;  %v8126_v12 = vsub.s32 %v7927_v51, %v479_v58  ;;  %v7344_v14 = vld [vmem:[%s10623_s3 + $0xb8] sm:$0xff]  }
  0x6e   : > { %v8122_v10 = vmul.u32.u64.low 3817748708, %v8077_v55  ;;  %v8123_v11 = vmul.u32.u64.high 3817748708, %v8077_v55, %v8122_v10  ;;  %v468_v13 = vmul.u32 18, %v467_v61  ;;  %vm683_vm15 = vcmp.ne.s32.totalorder %v425_v4, 0  ;;  %6837 = vmatprep.subr.bf16.mxu1 %v7344_v14 }
  0x6f   : > { %v8129_v60 = vmul.u32.u64.low 3817748708, %v8094_v62  ;;  %v8130_v15 = vmul.u32.u64.high 3817748708, %v8094_v62, %v8129_v60  ;;  %vm719_vm13 = vcmp.lt.s32.totalorder %v425_v4, 0  ;;  %v458_v48 = vsub.s32 %v7934_v56, %v457_v5 }
  0x70   : > { %v522_v16 = vshrl.u32 %v8057_v44, 4  ;;  %v8140_v51 = vsel %vm8099_vm10, 1.0, %v10629_v29  ;;  %v8145_v20 = vsel %vm8104_vm11, 1.0, %v10629_v29  ;;  %vm8151_vm14 = vcmp.lt.s32.totalorder %v826_v8, 16  ;;  %vm8168_vm3 = vmand %vm719_vm13, %vm683_vm15 }
  0x71   : > { %10738 = vst [vmem:[#allocation14_spill] sm:$0xff] %v8140_v51  ;;  %10739 = vst [vmem:[#allocation15_spill] sm:$0xff] %v8145_v20  ;;  %v8148_v21 = vmul.u32.u64.low 3817748708, %v8116_v63  ;;  %v8149_v22 = vmul.u32.u64.high 3817748708, %v8116_v63, %v8148_v21  ;;  %vm8155_vm0 = vcmp.lt.s32.totalorder %v829_v40, 16  ;;  %v791_v24 = vadd.s32 18, %v425_v4 }
  0x72   : > { %v8160_v26 = vsub.s32 %v7956_v3, %v490_v9  ;;  %v8165_v27 = vsel %vm8108_vm12, 1.0, %v10629_v29  ;;  %vm688_vm4 = vcmp.ne.s32.totalorder %v8126_v12, 0  ;;  %vm724_vm5 = vcmp.lt.s32.totalorder %v8126_v12, 0 }
  0x73   : > { %10744 = vst [vmem:[#allocation16_spill] sm:$0xff] %v8165_v27  ;;  %v469_v33 = vsub.s32 %v7963_v34, %v468_v13  ;;  %vm686_vm7 = vcmp.ne.s32.totalorder %v458_v48, 0  ;;  %vm722_vm8 = vcmp.lt.s32.totalorder %v458_v48, 0  ;;  %v523_v3 = vmul.u32 18, %v522_v16  ;;  %vm8192_vm9 = vmand %vm724_vm5, %vm688_vm4 }
  0x74   : > { %v8176_v35 = vadd.s32 208, %v7591_v31  ;;  %v8181_v38 = vsel %vm8151_vm14, 1.0, %v10629_v29  ;;  %v8186_v42 = vsel %vm8155_vm0, 1.0, %v10629_v29  ;;  %v796_v44 = vadd.s32 18, %v8126_v12  ;;  %vm8198_vm11 = vmand %vm722_vm8, %vm686_vm7 }
  0x75   : > { %10747 = vst [vmem:[#allocation17_spill] sm:$0xff] %v8181_v38  ;;  %10748 = vst [vmem:[#allocation18_spill] sm:$0xff] %v8186_v42  ;;  %v2222_v34 = vshrl.u32 %v7779_v54, 16  ;;  %v827_v45 = vsel %vm8168_vm3, %v791_v24, %v425_v4  ;;  %v794_v47 = vadd.s32 18, %v458_v48  ;;  %vm689_vm10 = vcmp.ne.s32.totalorder %v8160_v26, 0 }
  0x76   : > { %v500_v49 = vshrl.u32 %v8123_v11, 4  ;;  %vm725_vm12 = vcmp.lt.s32.totalorder %v8160_v26, 0  ;;  %vm687_vm15 = vcmp.ne.s32.totalorder %v469_v33, 0  ;;  %v533_v52 = vshrl.u32 %v8130_v15, 4 }
  0x77   : > { %v8205_v53 = vadd.s32 192, %v7591_v31  ;;  %vm723_vm13 = vcmp.lt.s32.totalorder %v469_v33, 0  ;;  %v524_v57 = vsub.s32 %v8006_v18, %v523_v3  ;;  %vm863_vm14 = vcmp.lt.s32.totalorder %v827_v45, 16  ;;  %vm8221_vm0 = vmand %vm725_vm12, %vm689_vm10 }
  0x78   : > { %v8209_v58 = vmul.u32.u64.low 3817748708, %v8176_v35  ;;  %v8210_v61 = vmul.u32.u64.high 3817748708, %v8176_v35, %v8209_v58  ;;  %v832_v1 = vsel %vm8192_vm9, %v796_v44, %v8126_v12  ;;  %v2224_v4 = vshll.u32 %v7779_v54, 16  ;;  %vm8227_vm3 = vmand %vm723_vm13, %vm687_vm15 }
  0x79   : > { %v511_v5 = vshrl.u32 %v8149_v22, 4  ;;  %v830_v6 = vsel %vm8198_vm11, %v794_v47, %v458_v48  ;;  %v797_v7 = vadd.s32 18, %v8160_v26  ;;  %v795_v8 = vadd.s32 18, %v469_v33 }
  0x7a   : > { %v501_v40 = vmul.u32 18, %v500_v49  ;;  %v534_v10 = vmul.u32 18, %v533_v52  ;;  %v8236_v13 = vadd.s32 216, %v7591_v31  ;;  %v8239_v60 = vsel %vm863_vm14, 1.0, %v10629_v29 }
  0x7b   : > { %v8232_v11 = vmul.u32.u64.low 3817748708, %v8205_v53  ;;  %v8233_v12 = vmul.u32.u64.high 3817748708, %v8205_v53, %v8232_v11  ;;  %10757 = vst [vmem:[#allocation19_spill] sm:$0xff] %v8239_v60  ;;  %vm692_vm4 = vcmp.ne.s32.totalorder %v524_v57, 0  ;;  %vm728_vm5 = vcmp.lt.s32.totalorder %v524_v57, 0 }
  0x7c   : > { %v8242_v15 = vadd.s32 200, %v7591_v31  ;;  %vm8244_vm7 = vcmp.lt.s32.totalorder %v832_v1, 16  ;;  %v2226_v16 = vrot.slane %v2224_v4, 1  ;;  %v512_v14 = vmul.u32 18, %v511_v5  ;;  %vm8260_vm9 = vmand %vm728_vm5, %vm692_vm4 }
  0x7d   : > { %v8249_v21 = vadd.s32 240, %v7591_v31  ;;  %vm8251_vm8 = vcmp.lt.s32.totalorder %v830_v6, 16  ;;  %v833_v56 = vsel %vm8221_vm0, %v797_v7, %v8160_v26  ;;  %v831_v23 = vsel %vm8227_vm3, %v795_v8, %v469_v33 }
  0x7e   : > { %v800_v24 = vadd.s32 18, %v524_v57  ;;  %v8265_v3 = vsub.s32 %v8077_v55, %v501_v40  ;;  %v8268_v44 = vsub.s32 %v8094_v62, %v534_v10  ;;  %v566_v26 = vshrl.u32 %v8210_v61, 4 }
  0x7f   : > { %v8271_v45 = vmul.u32.u64.low 3817748708, %v8236_v13  ;;  %v8272_v46 = vmul.u32.u64.high 3817748708, %v8236_v13, %v8271_v45  ;;  %v8276_v47 = vmul.u32.u64.low 3817748708, %v8242_v15  ;;  %v8277_v33 = vmul.u32.u64.high 3817748708, %v8242_v15, %v8276_v47 }
  0x80   : > { %v8280_v49 = vadd.s32 224, %v7591_v31  ;;  %v8283_v50 = vsub.s32 %v8116_v63, %v512_v14  ;;  %v8286_v55 = vmul.u32.u64.low 3817748708, %v8249_v21  ;;  %v8287_v62 = vmul.u32.u64.high 3817748708, %v8249_v21, %v8286_v55 }
  0x81   : > { %v8290_v52 = vadd.s32 248, %v7591_v31  ;;  %vm8292_vm10 = vcmp.lt.s32.totalorder %v833_v56, 16  ;;  %vm8296_vm11 = vcmp.lt.s32.totalorder %v831_v23, 16  ;;  %v836_v1 = vsel %vm8260_vm9, %v800_v24, %v524_v57 }
  0x82   : > { %v8303_v63 = vadd.s32 232, %v7591_v31  ;;  %vm690_vm12 = vcmp.ne.s32.totalorder %v8265_v3, 0  ;;  %vm726_vm15 = vcmp.lt.s32.totalorder %v8265_v3, 0  ;;  %vm693_vm13 = vcmp.ne.s32.totalorder %v8268_v44, 0 }
  0x83   : > { %v544_v4 = vshrl.u32 %v8233_v12, 4  ;;  %vm729_vm14 = vcmp.lt.s32.totalorder %v8268_v44, 0  ;;  %v567_v5 = vmul.u32 18, %v566_v26  ;;  %vm691_vm0 = vcmp.ne.s32.totalorder %v8283_v50, 0  ;;  %vm8320_vm4 = vmand %vm726_vm15, %vm690_vm12 }
  0x84   : > { %v8311_v6 = vmul.u32.u64.low 3817748708, %v8280_v49  ;;  %v8312_v18 = vmul.u32.u64.high 3817748708, %v8280_v49, %v8311_v6  ;;  %vm727_vm3 = vcmp.lt.s32.totalorder %v8283_v50, 0  ;;  %v798_v40 = vadd.s32 18, %v8265_v3  ;;  %vm8336_vm9 = vmand %vm729_vm14, %vm693_vm13 }
  0x85   : > { %v8317_v57 = vmul.u32.u64.low 3817748708, %v8290_v52  ;;  %v8318_v7 = vmul.u32.u64.high 3817748708, %v8290_v52, %v8317_v57  ;;  %v801_v9 = vadd.s32 18, %v8268_v44  ;;  %vm8330_vm5 = vcmp.lt.s32.totalorder %v836_v1, 16  ;;  %vm8353_vm12 = vmand %vm727_vm3, %vm691_vm0 }
  0x86   : > { %v8327_v10 = vmul.u32.u64.low 3817748708, %v8303_v63  ;;  %v8328_v11 = vmul.u32.u64.high 3817748708, %v8303_v63, %v8327_v10  ;;  %v799_v56 = vadd.s32 18, %v8283_v50  ;;  %v545_v23 = vmul.u32 18, %v544_v4 }
  0x87   : > { %v577_v24 = vshrl.u32 %v8272_v46, 4  ;;  %v8345_v28 = vsel %vm8244_vm7, 1.0, %v10629_v29  ;;  %v8349_v45 = vor.u32 %v2226_v16, %v2222_v34  ;;  %v8358_v47 = vsub.s32 %v8176_v35, %v567_v5 }
  0x88   : > { %10774 = vst [vmem:[#allocation20_spill] sm:$0xff] %v8345_v28  ;;  %v555_v46 = vshrl.u32 %v8277_v33, 4  ;;  %v8364_v48 = vsel %vm8251_vm8, 1.0, %v10629_v29  ;;  %v8369_v54 = vsel %vm8292_vm10, 1.0, %v10629_v29  ;;  %v8374_v34 = vsel %vm8296_vm11, 1.0, %v10629_v29 }
  0x89   : > { %10777 = vst [vmem:[#allocation21_spill] sm:$0xff] %v8364_v48  ;;  %10778 = vst [vmem:[#allocation22_spill] sm:$0xff] %v8369_v54  ;;  %v610_v35 = vshrl.u32 %v8287_v62, 4  ;;  %v8380_v16 = vsel %vm8330_vm5, 1.0, %v10629_v29  ;;  %v834_v22 = vsel %vm8320_vm4, %v798_v40, %v8265_v3  ;;  %v837_v33 = vsel %vm8336_vm9, %v801_v9, %v8268_v44 }
  0x8a   : > { %10779 = vst [vmem:[#allocation23_spill] sm:$0xff] %v8374_v34  ;;  %10780 = vst [vmem:[#allocation24_spill] sm:$0xff] %v8380_v16  ;;  %v272_v55 = vadd.s32 272, %v7591_v31  ;;  %v835_v58 = vsel %vm8353_vm12, %v799_v56, %v8283_v50  ;;  %v8393_v62 = vsub.s32 %v8205_v53, %v545_v23  ;;  %v578_v61 = vmul.u32 18, %v577_v24 }
  0x8b   : > { %v270_v1 = vadd.s32 256, %v7591_v31  ;;  %vm696_vm7 = vcmp.ne.s32.totalorder %v8358_v47, 0  ;;  %vm732_vm8 = vcmp.lt.s32.totalorder %v8358_v47, 0  ;;  %v556_v3 = vmul.u32 18, %v555_v46 }
  0x8c   : > { %v588_v4 = vshrl.u32 %v8312_v18, 4  ;;  %v611_v44 = vmul.u32 18, %v610_v35  ;;  %v621_v5 = vshrl.u32 %v8318_v7, 4  ;;  %v599_v50 = vshrl.u32 %v8328_v11, 4  ;;  %vm8431_vm15 = vmand %vm732_vm8, %vm696_vm7 }
  0x8d   : > { %v8400_v6 = vmul.u32.u64.low 3817748708, %v272_v55  ;;  %v8401_v57 = vmul.u32.u64.high 3817748708, %v272_v55, %v8400_v6  ;;  %v8404_v53 = vmul.u32.u64.low 3817748708, %v270_v1  ;;  %v8405_v8 = vmul.u32.u64.high 3817748708, %v270_v1, %v8404_v53 }
  0x8e   : > { %v273_v40 = vadd.s32 280, %v7591_v31  ;;  %v804_v9 = vadd.s32 18, %v8358_v47  ;;  %vm694_vm10 = vcmp.ne.s32.totalorder %v8393_v62, 0  ;;  %vm730_vm11 = vcmp.lt.s32.totalorder %v8393_v62, 0 }
  0x8f   : > { %v8412_v18 = vsub.s32 %v8236_v13, %v578_v61  ;;  %v589_v7 = vmul.u32 18, %v588_v4  ;;  %v8418_v11 = vadd.s32 264, %v7591_v31  ;;  %v8421_v14 = vsub.s32 %v8242_v15, %v556_v3  ;;  %vm8454_vm3 = vmand %vm730_vm11, %vm694_vm10 }
  0x90   : > { %v8414_v10 = vmul.u32.u64.low 3817748708, %v273_v40  ;;  %v8415_v12 = vmul.u32.u64.high 3817748708, %v273_v40, %v8414_v10  ;;  %v8424_v56 = vsub.s32 %v8249_v21, %v611_v44  ;;  %v622_v23 = vmul.u32 18, %v621_v5 }
  0x91   : > { %v654_v24 = vshrl.u32 %v8401_v57, 4  ;;  %v600_v26 = vmul.u32 18, %v599_v50  ;;  %v632_v31 = vshrl.u32 %v8405_v8, 4  ;;  %vm8440_vm13 = vcmp.lt.s32.totalorder %v834_v22, 16 }
  0x92   : > { %v8437_v15 = vmul.u32.u64.low 3817748708, %v8418_v11  ;;  %v8438_v46 = vmul.u32.u64.high 3817748708, %v8418_v11, %v8437_v15  ;;  %vm8444_vm14 = vcmp.lt.s32.totalorder %v837_v33, 16  ;;  %v802_v61 = vadd.s32 18, %v8393_v62 }
  0x93   : > { %vm697_vm0 = vcmp.ne.s32.totalorder %v8412_v18, 0  ;;  %v655_v3 = vmul.u32 18, %v654_v24  ;;  %vm733_vm4 = vcmp.lt.s32.totalorder %v8412_v18, 0  ;;  %v8460_v22 = vsub.s32 %v8280_v49, %v589_v7 }
  0x94   : > { %v633_v33 = vmul.u32 18, %v632_v31  ;;  %v665_v44 = vshrl.u32 %v8415_v12, 4  ;;  %vm8463_vm5 = vcmp.lt.s32.totalorder %v835_v58, 16  ;;  %v840_v6 = vsel %vm8431_vm15, %v804_v9, %v8358_v47  ;;  %vm8487_vm10 = vmand %vm733_vm4, %vm697_vm0  ;;  %v8593_v47 = vld [vmem:[%s10621_s1 + $0x1] ss:$0 sm:$0xff] }
  0x95   : > { %vm695_vm9 = vcmp.ne.s32.totalorder %v8421_v14, 0  ;;  %vm731_vm12 = vcmp.lt.s32.totalorder %v8421_v14, 0  ;;  %v8473_v57 = vsub.s32 %v8290_v52, %v622_v23  ;;  %vm700_vm7 = vcmp.ne.s32.totalorder %v8424_v56, 0 }
  0x96   : > { %vm736_vm8 = vcmp.lt.s32.totalorder %v8424_v56, 0  ;;  %v8478_v49 = vsub.s32 %v8303_v63, %v600_v26  ;;  %v666_v58 = vmul.u32 18, %v665_v44  ;;  %v838_v50 = vsel %vm8454_vm3, %v802_v61, %v8393_v62  ;;  %vm8495_vm11 = vmand %vm731_vm12, %vm695_vm9 }
  0x97   : > { %v805_v52 = vadd.s32 18, %v8412_v18  ;;  %v803_v53 = vadd.s32 18, %v8421_v14  ;;  %v8493_v8 = vsub.s32 %v272_v55, %v655_v3  ;;  %v808_v62 = vadd.s32 18, %v8424_v56  ;;  %vm8512_vm4 = vmand %vm736_vm8, %vm700_vm7 }
  0x98   : > { %vm698_vm15 = vcmp.ne.s32.totalorder %v8460_v22, 0  ;;  %vm734_vm3 = vcmp.lt.s32.totalorder %v8460_v22, 0  ;;  %v8502_v9 = vsub.s32 %v270_v1, %v633_v33  ;;  %vm8504_vm0 = vcmp.lt.s32.totalorder %v840_v6, 16 }
  0x99   : > { %v10795_v7 = vmov 0  ;;  %vm701_vm9 = vcmp.ne.s32.totalorder %v8473_v57, 0  ;;  %vm737_vm12 = vcmp.lt.s32.totalorder %v8473_v57, 0  ;;  %v667_v10 = vsub.s32 %v273_v40, %v666_v58  ;;  %vm8531_vm7 = vmand %vm734_vm3, %vm698_vm15 }
  0x9a   : > { %v10796_v7 = vsel %vm8504_vm0, 4294967295, %v10795_v7  ;;  %vm8518_vm1 = vcmp.lt.s32.totalorder %v838_v50, 16  ;;  %v10799_v1 = vmov 0  ;;  %vm699_vm2 = vcmp.ne.s32.totalorder %v8478_v49, 0  ;;  %vm8541_vm0 = vmand %vm737_vm12, %vm701_vm9 }
  0x9b   : > { %v10800_v1 = vsel %vm8518_vm1, 4294967295, %v10799_v1  ;;  %vm735_vm6 = vcmp.lt.s32.totalorder %v8478_v49, 0  ;;  %v643_v12 = vshrl.u32 %v8438_v46, 4  ;;  %v841_v23 = vsel %vm8487_vm10, %v805_v52, %v8412_v18 }
  0x9c   : > { %v839_v24 = vsel %vm8495_vm11, %v803_v53, %v8421_v14  ;;  %vm704_vm8 = vcmp.ne.s32.totalorder %v8493_v8, 0  ;;  %vm740_vm1 = vcmp.lt.s32.totalorder %v8493_v8, 0  ;;  %v844_v13 = vsel %vm8512_vm4, %v808_v62, %v8424_v56  ;;  %vm8548_vm15 = vmand %vm735_vm6, %vm699_vm2  ;;  %v8556_v56 = vld [vmem:[%s10621_s1] ss:$0 sm:$0xff] }
  0x9d   : > { %v806_v26 = vadd.s32 18, %v8460_v22  ;;  %vm702_vm10 = vcmp.ne.s32.totalorder %v8502_v9, 0  ;;  %vm738_vm11 = vcmp.lt.s32.totalorder %v8502_v9, 0  ;;  %v809_v14 = vadd.s32 18, %v8473_v57  ;;  %vm8570_vm2 = vmand %vm740_vm1, %vm704_vm8 }
  0x9e   : > { %v807_v15 = vadd.s32 18, %v8478_v49  ;;  %vm705_vm3 = vcmp.ne.s32.totalorder %v667_v10, 0  ;;  %vm741_vm4 = vcmp.lt.s32.totalorder %v667_v10, 0  ;;  %v8561_v46 = vsel %vm8440_vm13, 1.0, %v10629_v29 }
  0x9f   : > { %10807 = vst [vmem:[#allocation25_spill] sm:$0xff] %v8561_v46  ;;  %v8566_v61 = vsel %vm8444_vm14, 1.0, %v10629_v29  ;;  %v812_v4 = vadd.s32 18, %v8493_v8  ;;  %v644_v33 = vmul.u32 18, %v643_v12  ;;  %vm8575_vm6 = vcmp.lt.s32.totalorder %v841_v23, 16  ;;  %vm8585_vm14 = vmand %vm738_vm11, %vm702_vm10 }
  0xa0   : > { %10808 = vst [vmem:[#allocation26_spill] sm:$0xff] %v8566_v61  ;;  %vm8579_vm13 = vcmp.lt.s32.totalorder %v839_v24, 16  ;;  %v810_v6 = vadd.s32 18, %v8502_v9  ;;  %v813_v58 = vadd.s32 18, %v667_v10  ;;  %v8598_v52 = vsel %vm8463_vm5, 1.0, %v10629_v29  ;;  %vm8616_vm8 = vmand %vm741_vm4, %vm705_vm3 }
  0xa1   : > { %10817 = vst [vmem:[#allocation27_spill] sm:$0xff] %v8598_v52  ;;  %vm10818_vm1 = vnez %v10796_v7  ;;  %vm10820_vm9 = vnez %v10800_v1  ;;  %vm8610_vm12 = vcmp.lt.s32.totalorder %v844_v13, 16  ;;  %v842_v7 = vsel %vm8531_vm7, %v806_v26, %v8460_v22 }
  0xa2   : > { %v8603_v53 = vsel %vm10818_vm1, 1.0, %v10629_v29  ;;  %v8608_v63 = vsel %vm10820_vm9, 1.0, %v10629_v29  ;;  %v845_v1 = vsel %vm8541_vm0, %v809_v14, %v8473_v57  ;;  %v843_v12 = vsel %vm8548_vm15, %v807_v15, %v8478_v49 }
  0xa3   : > { %10819 = vst [vmem:[#allocation28_spill] sm:$0xff] %v8603_v53  ;;  %10821 = vst [vmem:[#allocation29_spill] sm:$0xff] %v8608_v63  ;;  %v8633_v24 = vsel %vm8575_vm6, 1.0, %v10629_v29  ;;  %v8638_v13 = vsel %vm8579_vm13, 1.0, %v10629_v29  ;;  %v848_v22 = vsel %vm8570_vm2, %v812_v4, %v8493_v8  ;;  %v8644_v57 = vsub.s32 %v8418_v11, %v644_v33 }
  0xa4   : > { %10826 = vst [vmem:[#allocation30_spill] sm:$0xff] %v8633_v24  ;;  %10827 = vst [vmem:[#allocation31_spill] sm:$0xff] %v8638_v13  ;;  %v846_v26 = vsel %vm8585_vm14, %v810_v6, %v8502_v9  ;;  %v849_v18 = vsel %vm8616_vm8, %v813_v58, %v667_v10  ;;  %v8656_v31 = vsel %vm8610_vm12, 1.0, %v10629_v29  ;;  %vm8658_vm5 = vcmp.lt.s32.totalorder %v842_v7, 16 }
  0xa5   : > { %10828 = vst [vmem:[#allocation32_spill] sm:$0xff] %v8656_v31  ;;  %vm8662_vm0 = vcmp.lt.s32.totalorder %v845_v1, 16  ;;  %vm8666_vm7 = vcmp.lt.s32.totalorder %v843_v12, 16  ;;  %vm8672_vm10 = vcmp.lt.s32.totalorder %v848_v22, 16  ;;  %vm8676_vm11 = vcmp.lt.s32.totalorder %v846_v26, 16 }
  0xa6   : > { %vm8680_vm15 = vcmp.lt.s32.totalorder %v849_v18, 16  ;;  %vm703_vm3 = vcmp.ne.s32.totalorder %v8644_v57, 0  ;;  %vm739_vm4 = vcmp.lt.s32.totalorder %v8644_v57, 0  ;;  %vm1618_vm2 = vsmask.f32 5392 }
  0xa7   : > { %v8692_v5 = vsel %vm8658_vm5, 1.0, %v10629_v29  ;;  %v8702_v7 = vsel %vm8666_vm7, 1.0, %v10629_v29  ;;  %v8705_v1 = vadd.s32 18, %v8644_v57  ;;  %vm8713_vm6 = vmand %vm739_vm4, %vm703_vm3  ;;  %v8726_v11 = vsel %vm8676_vm11, 1.0, %v10629_v29 }
  0xa8   : > { %10841 = vst [vmem:[#allocation33_spill] sm:$0xff] %v8692_v5  ;;  %10843 = vst [vmem:[#allocation35_spill] sm:$0xff] %v8702_v7  ;;  %v8731_v8 = vsel %vm8680_vm15, 1.0, %v10629_v29  ;;  %vm10849_vm13 = vsmask.f32 1280  ;;  %vm10852_vm1 = vnez %v10673_v43  ;;  %vm2876_vm5 = vcmask 1046528  }
  0xa9   : > { %10847 = vst [vmem:[#allocation37_spill] sm:$0xff] %v8726_v11  ;;  %10848 = vst [vmem:[#allocation38_spill] sm:$0xff] %v8731_v8  ;;  %vm2220_vm9 = vsmask.f32 7424  ;;  %vm3677_vm7 = vsmask.f32 6400 }
  0xaa   : > { %vm8747_vm14 = vmor %vm10849_vm13, %vm1618_vm2  ;;  %vm4949_vm11 = vsmask.f32 5376 }
  0xd8   : > { %v6699_v50 = vpop.f32.mrf.mxu0 }
  0xd9   : > { %v1347_v55 = vmul.f32 %v6699_v50, %v8556_v56 }
  0xda   : > { %v1197_v23 = vpop.f32.mrf.mxu0 }
  0xdb   : > { %v1388_v49 = vadd.f32 %v8593_v47, %v1347_v55  ;;  %v1345_v40 = vmul.f32 %v8556_v56, %v1197_v23  ;;  %v8697_v55 = vsel %vm8662_vm0, 1.0, %v10629_v29  ;;  %vm4148_vm0 = vcmask 1045504  }
  0xdc   : > { %v6700_v14 = vpop.f32.mrf.mxu0  ;;  %10842 = vst [vmem:[#allocation34_spill] sm:$0xff] %v8697_v55 }
  0xdd   : > { %v1424_v9 = vmax.f32 %v1388_v49, 0.0  ;;  %v1386_v10 = vadd.f32 %v8593_v47, %v1345_v40  ;;  %v1348_v3 = vmul.f32 %v6700_v14, %v8556_v56  ;;  %v8721_v14 = vsel %vm8672_vm10, 1.0, %v10629_v29 }
  0xde   : > { %v1200_v33 = vpop.f32.mrf.mxu0  ;;  %10846 = vst [vmem:[#allocation36_spill] sm:$0xff] %v8721_v14  ;;  %vm5420_vm10 = vcmask 1044480  }
  0xdf   : > { %v1460_v35 = vmul.f32 %v7878_v30, %v1424_v9  ;;  %v1422_v6 = vmax.f32 %v1386_v10, 0.0  ;;  %v1389_v58 = vadd.f32 %v8593_v47, %v1348_v3  ;;  %v1346_v50 = vmul.f32 %v8556_v56, %v1200_v33 }
  0xe0   : > { %v6703_v62 = vpop.f32.mrf.mxu0 }
  0xe1   : > { %v6402_v12 = vpack.c.bf16 %v1460_v35, %v1460_v35  ;;  %v1458_v23 = vmul.f32 %v7883_v32, %v1422_v6  ;;  %v1425_v22 = vmax.f32 %v1389_v58, 0.0  ;;  %v1387_v49 = vadd.f32 %v8593_v47, %v1346_v50  ;;  %v2016_v32 = vld [vmem:[#allocation2 + $0x8] sm:$0xe] }
  0xe2   : > { %v1351_v26 = vmul.f32 %v6703_v62, %v8556_v56  ;;  %v1213_v18 = vpop.f32.mrf.mxu0 }
  0xe3   : > { %v1640_v15 = vshrl.u32 %v6402_v12, 16  ;;  %v1643_v9 = vshll.u32 %v6402_v12, 16  ;;  %v6400_v10 = vpack.c.bf16 %v1458_v23, %v1458_v23  ;;  %v1461_v3 = vmul.f32 %v7895_v36, %v1425_v22 }
  0xe4   : > { %v1423_v33 = vmax.f32 %v1387_v49, 0.0  ;;  %v1392_v4 = vadd.f32 %v8593_v47, %v1351_v26  ;;  %v1349_v35 = vmul.f32 %v8556_v56, %v1213_v18  ;;  %v6704_v6 = vpop.f32.mrf.mxu0 }
  0xe5   : > { %v1642_v58 = vrot.slane %v1640_v15, 6  ;;  %v1645_v21 = vrot.slane %v1643_v9, 7  ;;  %v1621_v50 = vshrl.u32 %v6400_v10, 16  ;;  %v1624_v62 = vshll.u32 %v6400_v10, 16 }
  0xe6   : > { %v6403_v29 = vpack.c.bf16 %v1461_v3, %v1461_v3  ;;  %v1459_v12 = vmul.f32 %v7900_v37, %v1423_v33  ;;  %v1428_v23 = vmax.f32 %v1392_v4, 0.0  ;;  %v1390_v22 = vadd.f32 %v8593_v47, %v1349_v35  ;;  %v1216_v49 = vpop.f32.mrf.mxu0 }
  0xe7   : > { %v1646_v26 = vor.u32 %v1645_v21, %v1642_v58  ;;  %v1623_v36 = vrot.slane %v1621_v50, 6  ;;  %v1626_v18 = vrot.slane %v1624_v62, 7  ;;  %v1352_v30 = vmul.f32 %v6704_v6, %v8556_v56 }
  0xe8   : > { %v1650_v2 = vshrl.u32 %v6403_v29, 16  ;;  %v1653_v8 = vshll.u32 %v6403_v29, 16  ;;  %v6401_v44 = vpack.c.bf16 %v1459_v12, %v1459_v12  ;;  %v1464_v15 = vmul.f32 %v7909_v41, %v1428_v23  ;;  %v6707_v9 = vpop.f32.mrf.mxu0 }
  0xe9   : > { %v1648_v10 = vrot.slane %v1646_v26, 4  ;;  %v1627_v3 = vor.u32 %v1626_v18, %v1623_v36  ;;  %v1426_v11 = vmax.f32 %v1390_v22, 0.0  ;;  %v1393_v33 = vadd.f32 %v8593_v47, %v1352_v30 }
  0xea   : > { %v1652_v4 = vrot.slane %v1650_v2, 6  ;;  %v1655_v35 = vrot.slane %v1653_v8, 7  ;;  %v1630_v37 = vshrl.u32 %v6401_v44, 16  ;;  %v1633_v58 = vshll.u32 %v6401_v44, 16  ;;  %v1229_v21 = vpop.f32.mrf.mxu0 }
  0xeb   : > { %v1628_v29 = vrot.slane %v1627_v3, 4  ;;  %v2017_v50 = vsel %vm10852_vm1, %v1627_v3, %v2016_v32  ;;  %v6406_v62 = vpack.c.bf16 %v1464_v15, %v1464_v15  ;;  %v1462_v36 = vmul.f32 %v7914_v17, %v1426_v11 }
  0xec   : > { %2018 = vst [vmem:[#allocation2 + $0x8] sm:$0xe] %v2017_v50  ;;  %v1656_v30 = vor.u32 %v1655_v35, %v1652_v4  ;;  %v1632_v2 = vrot.slane %v1630_v37, 6  ;;  %v1635_v8 = vrot.slane %v1633_v58, 7  ;;  %v1429_v12 = vmax.f32 %v1393_v33, 0.0  ;;  %v6708_v44 = vpop.f32.mrf.mxu0 }
  0xed   : > { %v1680_v23 = vshrl.u32 %v6406_v62, 16  ;;  %v1683_v22 = vshll.u32 %v6406_v62, 16  ;;  %v6404_v18 = vpack.c.bf16 %v1462_v36, %v1462_v36  ;;  %v1350_v41 = vmul.f32 %v8556_v56, %v1216_v49 }
  0xee   : > { %v1657_v14 = vsel %vm8747_vm14, %v1648_v10, %v1656_v30  ;;  %v1658_v7 = vrot.slane %v1656_v30, 4  ;;  %v1636_v43 = vor.u32 %v1635_v8, %v1632_v2  ;;  %v1465_v32 = vmul.f32 %v8011_v19, %v1429_v12  ;;  %v1232_v15 = vpop.f32.mrf.mxu0 }
  0xef   : > { %2021 = vst [vmem:[#allocation2 + $0x14] sm:$0xf] %v1657_v14  ;;  %v1682_v11 = vrot.slane %v1680_v23, 6  ;;  %v1685_v3 = vrot.slane %v1683_v22, 7  ;;  %v1660_v37 = vshrl.u32 %v6404_v18, 16  ;;  %v1663_v4 = vshll.u32 %v6404_v18, 16 }
  0xf0   : > { %v1637_v33 = vsel %vm8747_vm14, %v1628_v29, %v1636_v43  ;;  %v1638_v35 = vrot.slane %v1636_v43, 4  ;;  %v6407_v58 = vpack.c.bf16 %v1465_v32, %v1465_v32  ;;  %v1391_v49 = vadd.f32 %v8593_v47, %v1350_v41  ;;  %v6711_v50 = vpop.f32.mrf.mxu0 }
  0xf1   : > { %2019 = vst [vmem:[#allocation2 + $0xc] sm:$0xf] %v1637_v33  ;;  %v8761_v10 = vor.u32 %v1685_v3, %v1682_v11  ;;  %v1662_v62 = vrot.slane %v1660_v37, 6  ;;  %v1665_v36 = vrot.slane %v1663_v4, 7  ;;  %v1355_v30 = vmul.f32 %v6707_v9, %v8556_v56 }
  0xf2   : > { %v1647_v14 = vsel %vm8747_vm14, %v1638_v35, %v1646_v26  ;;  %v1690_v2 = vshrl.u32 %v6407_v58, 16  ;;  %v1693_v8 = vshll.u32 %v6407_v58, 16  ;;  %v1427_v12 = vmax.f32 %v1391_v49, 0.0  ;;  %v1245_v23 = vpop.f32.mrf.mxu0 }
  0xf3   : > { %2020 = vst [vmem:[#allocation2 + $0x10] sm:$0xf] %v1647_v14  ;;  %v1688_v29 = vrot.slane %v8761_v10, 4  ;;  %v1666_v22 = vor.u32 %v1665_v36, %v1662_v62  ;;  %v1396_v41 = vadd.f32 %v8593_v47, %v1355_v30  ;;  %v1353_v18 = vmul.f32 %v8556_v56, %v1229_v21  ;;  %v7346_v14 = vld [vmem:[%s10623_s3 + $0xf0] sm:$0xff]  }
  0xf4   : > { %v1692_v43 = vrot.slane %v1690_v2, 6  ;;  %v1695_v32 = vrot.slane %v1693_v8, 7  ;;  %v1463_v11 = vmul.f32 %v8016_v59, %v1427_v12  ;;  %v1356_v9 = vmul.f32 %v6708_v44, %v8556_v56  ;;  %v8771_v3 = vpop.f32.mrf.mxu0 }
  0xf5   : > { %v1667_v26 = vsel %vm8747_vm14, %v1658_v7, %v1666_v22  ;;  %v1668_v37 = vrot.slane %v1666_v22, 4  ;;  %v1432_v4 = vmax.f32 %v1396_v41, 0.0  ;;  %v1394_v33 = vadd.f32 %v8593_v47, %v1353_v18 }
  0xf6   : > { %2022 = vst [vmem:[#allocation2 + $0x18] sm:$0xf] %v1667_v26  ;;  %v8776_v35 = vor.u32 %v1695_v32, %v1692_v43  ;;  %v6405_v58 = vpack.c.bf16 %v1463_v11, %v1463_v11  ;;  %v1397_v21 = vadd.f32 %v8593_v47, %v1356_v9  ;;  %v1354_v49 = vmul.f32 %v8556_v56, %v1232_v15  ;;  %v8780_v62 = vpop.f32.mrf.mxu0 }
  0xf7   : > { %v1468_v44 = vmul.f32 %v8082_v25, %v1432_v4  ;;  %v1430_v36 = vmax.f32 %v1394_v33, 0.0  ;;  %v1359_v30 = vmul.f32 %v6711_v50, %v8556_v56  ;;  %v1357_v7 = vmul.f32 %v8556_v56, %v1245_v23 }
  0xf8   : > { %v1697_v2 = vsel %vm8747_vm14, %v1688_v29, %v8776_v35  ;;  %v1698_v8 = vrot.slane %v8776_v35, 4  ;;  %v1670_v15 = vshrl.u32 %v6405_v58, 16  ;;  %v1673_v12 = vshll.u32 %v6405_v58, 16  ;;  %v8792_v22 = vld [vmem:[#allocation2 + $0x8] sm:$0xff]   ;;  %v8796_v43 = vpop.f32.mrf.mxu0 }
  0xf9   : > { %2025 = vst [vmem:[#allocation2 + $0x24] sm:$0xf] %v1697_v2  ;;  %v6410_v41 = vpack.c.bf16 %v1468_v44, %v1468_v44  ;;  %v1466_v50 = vmul.f32 %v8097_v0, %v1430_v36  ;;  %v1433_v18 = vmax.f32 %v1397_v21, 0.0  ;;  %v1395_v23 = vadd.f32 %v8593_v47, %v1354_v49  ;;  %6802 = vmatmul.mubr.bf16.vlgmr.msra.gmra.mxu0 %v8792_v22 }
  0xfa   : > { %v1672_v32 = vrot.slane %v1670_v15, 6  ;;  %v1675_v11 = vrot.slane %v1673_v12, 7  ;;  %v1400_v9 = vadd.f32 %v8593_v47, %v1359_v30  ;;  %v1398_v29 = vadd.f32 %v8593_v47, %v1357_v7  ;;  %v8801_v26 = vld [vmem:[#allocation2 + $0x10] sm:$0xff]   ;;  %6890 = vmatpush3.bf16.msra.mxu0 %v7970_v39  ;;  %v7350_v30 = vld [vmem:[%s10623_s3 + $0xe8] sm:$0xff]  }
  0xfb   : > { %v1720_v4 = vshrl.u32 %v6410_v41, 16  ;;  %v1723_v33 = vshll.u32 %v6410_v41, 16  ;;  %v6408_v35 = vpack.c.bf16 %v1466_v50, %v1466_v50  ;;  %v1469_v58 = vmul.f32 %v8140_v51, %v1433_v18  ;;  %6805 = vmatprep.mubr.bf16.mxu0 %v8801_v26  ;;  %6891 = vmatprep.subr.bf16.mxu0 %v7346_v14  ;;  %v8809_v41 = vpop.f32.mrf.mxu0 }
  0xfc   : > { %v1676_v21 = vor.u32 %v1675_v11, %v1672_v32  ;;  %v1431_v49 = vmax.f32 %v1395_v23, 0.0  ;;  %v1436_v44 = vmax.f32 %v1400_v9, 0.0  ;;  %v1434_v36 = vmax.f32 %v1398_v29, 0.0 }
  0xfd   : > { %v1722_v7 = vrot.slane %v1720_v4, 6  ;;  %v1725_v2 = vrot.slane %v1723_v33, 7  ;;  %v1700_v15 = vshrl.u32 %v6408_v35, 16  ;;  %v1703_v12 = vshll.u32 %v6408_v35, 16  ;;  %v7355_v4 = vld [vmem:[%s10623_s3 + $0xe0] sm:$0xff]  }
  0xfe   : > { %v1677_v39 = vsel %vm8747_vm14, %v1668_v37, %v1676_v21  ;;  %v1678_v50 = vrot.slane %v1676_v21, 4  ;;  %v6411_v18 = vpack.c.bf16 %v1469_v58, %v1469_v58  ;;  %v1467_v23 = vmul.f32 %v8145_v20, %v1431_v49  ;;  %6892 = vmatpush3.bf16.msra.mxu0 %v7346_v14  ;;  %v6716_v14 = vpop.f32.mrf.mxu0 }
  0xff   : > { %2023 = vst [vmem:[#allocation2 + $0x1c] sm:$0xf] %v1677_v39  ;;  %v8814_v32 = vor.u32 %v1725_v2, %v1722_v7  ;;  %v1702_v11 = vrot.slane %v1700_v15, 6  ;;  %v1705_v9 = vrot.slane %v1703_v12, 7  ;;  %v1472_v29 = vmul.f32 %v8165_v27, %v1436_v44  ;;  %6893 = vmatprep.subr.bf16.mxu0 %v7350_v30 }
 0x100   : > { %v1687_v37 = vsel %vm8747_vm14, %v1678_v50, %v8761_v10  ;;  %v1730_v33 = vshrl.u32 %v6411_v18, 16  ;;  %v1733_v35 = vshll.u32 %v6411_v18, 16  ;;  %v6409_v58 = vpack.c.bf16 %v1467_v23, %v1467_v23 }
 0x101   : > { %2024 = vst [vmem:[#allocation2 + $0x20] sm:$0xf] %v1687_v37  ;;  %v1728_v21 = vrot.slane %v8814_v32, 4  ;;  %v1706_v49 = vor.u32 %v1705_v9, %v1702_v11  ;;  %v6414_v7 = vpack.c.bf16 %v1472_v29, %v1472_v29  ;;  %v1470_v44 = vmul.f32 %v8181_v38, %v1434_v36  ;;  %v7359_v36 = vld [vmem:[%s10623_s3 + $0xd8] sm:$0xff]  }
 0x102   : > { %v1732_v2 = vrot.slane %v1730_v33, 6  ;;  %v1735_v15 = vrot.slane %v1733_v35, 7  ;;  %v1710_v12 = vshrl.u32 %v6409_v58, 16  ;;  %v1713_v39 = vshll.u32 %v6409_v58, 16  ;;  %6894 = vmatpush3.bf16.msra.mxu0 %v7350_v30  ;;  %v1264_v35 = vpop.f32.mrf.mxu0 }
 0x103   : > { %v1707_v27 = vsel %vm8747_vm14, %v1698_v8, %v1706_v49  ;;  %v1708_v10 = vrot.slane %v1706_v49, 4  ;;  %v1760_v50 = vshrl.u32 %v6414_v7, 16  ;;  %v1763_v18 = vshll.u32 %v6414_v7, 16  ;;  %6895 = vmatprep.subr.bf16.mxu0 %v7355_v4 }
 0x104   : > { %2026 = vst [vmem:[#allocation2 + $0x28] sm:$0xf] %v1707_v27  ;;  %v1736_v23 = vor.u32 %v1735_v15, %v1732_v2  ;;  %v1712_v37 = vrot.slane %v1710_v12, 6  ;;  %v1715_v51 = vrot.slane %v1713_v39, 7  ;;  %v6412_v11 = vpack.c.bf16 %v1470_v44, %v1470_v44 }
 0x105   : > { %v1762_v9 = vrot.slane %v1760_v50, 6  ;;  %v1765_v29 = vrot.slane %v1763_v18, 7  ;;  %v1360_v33 = vmul.f32 %v8771_v3, %v8556_v56  ;;  %v1358_v8 = vmul.f32 %v8556_v56, %v8780_v62  ;;  %v7363_v50 = vld [vmem:[%s10623_s3 + $0xd0] sm:$0xff]  }
 0x106   : > { %v1737_v27 = vsel %vm8747_vm14, %v1728_v21, %v1736_v23  ;;  %v1738_v30 = vrot.slane %v1736_v23, 4  ;;  %v1716_v58 = vor.u32 %v1715_v51, %v1712_v37  ;;  %v1740_v49 = vshrl.u32 %v6412_v11, 16  ;;  %v8836_v7 = vld [vmem:[#allocation2 + $0x18] sm:$0xff]   ;;  %6896 = vmatpush3.bf16.msra.mxu0 %v7355_v4  ;;  %v8853_v37 = vpop.f32.mrf.mxu0 }
 0x107   : > { %2029 = vst [vmem:[#allocation2 + $0x34] sm:$0xf] %v1737_v27  ;;  %v8838_v44 = vor.u32 %v1765_v29, %v1762_v9  ;;  %v1743_v2 = vshll.u32 %v6412_v11, 16  ;;  %v1401_v15 = vadd.f32 %v8593_v47, %v1360_v33  ;;  %v1399_v3 = vadd.f32 %v8593_v47, %v1358_v8  ;;  %6806 = vmatmul.mubr.bf16.gmra.mxu0 %v8836_v7 }
 0x108   : > { %v1717_v62 = vsel %vm8747_vm14, %v1708_v10, %v1716_v58  ;;  %v1718_v12 = vrot.slane %v1716_v58, 4  ;;  %v1742_v39 = vrot.slane %v1740_v49, 6  ;;  %v1363_v51 = vmul.f32 %v8796_v43, %v8556_v56  ;;  %v8847_v21 = vld [vmem:[#allocation2 + $0x20] sm:$0xff]   ;;  %6897 = vmatprep.subr.bf16.mxu0 %v7359_v36 }
 0x109   : > { %2027 = vst [vmem:[#allocation2 + $0x2c] sm:$0xf] %v1717_v62  ;;  %v1745_v18 = vrot.slane %v1743_v2, 7  ;;  %v1437_v23 = vmax.f32 %v1401_v15, 0.0  ;;  %v1435_v10 = vmax.f32 %v1399_v3, 0.0  ;;  %v1361_v9 = vmul.f32 %v8556_v56, %v8809_v41  ;;  %6809 = vmatprep.mubr.bf16.mxu0 %v8847_v21 }
 0x10a   : > { %v1727_v43 = vsel %vm8747_vm14, %v1718_v12, %v8814_v32  ;;  %v1404_v11 = vadd.f32 %v8593_v47, %v1363_v51  ;;  %v1364_v29 = vmul.f32 %v6716_v14, %v8556_v56  ;;  %v1362_v58 = vmul.f32 %v8556_v56, %v1264_v35  ;;  %6898 = vmatpush3.bf16.msra.mxu0 %v7359_v36  ;;  %v7367_v14 = vld [vmem:[%s10623_s3 + $0xc8] sm:$0xff]   ;;  %v8874_v36 = vpop.f32.mrf.mxu0 }
 0x10b   : > { %2028 = vst [vmem:[#allocation2 + $0x30] sm:$0xf] %v1727_v43  ;;  %v1746_v33 = vor.u32 %v1745_v18, %v1742_v39  ;;  %v1473_v8 = vmul.f32 %v8186_v42, %v1437_v23  ;;  %v1471_v27 = vmul.f32 %v8239_v60, %v1435_v10  ;;  %v1402_v32 = vadd.f32 %v8593_v47, %v1361_v9 }
 0x10c   : > { %v1440_v49 = vmax.f32 %v1404_v11, 0.0  ;;  %v1405_v2 = vadd.f32 %v8593_v47, %v1364_v29  ;;  %v2229_v41 = vshll.u32 %v8792_v22, 16  ;;  %6899 = vmatprep.subr.bf16.mxu0 %v7363_v50  ;;  %v1403_v18 = vadd.f32 %v8593_v47, %v1362_v58 }
 0x10d   : > { %v1747_v15 = vsel %vm8747_vm14, %v1738_v30, %v1746_v33  ;;  %v1748_v3 = vrot.slane %v1746_v33, 4  ;;  %v6415_v62 = vpack.c.bf16 %v1473_v8, %v1473_v8  ;;  %v6413_v35 = vpack.c.bf16 %v1471_v27, %v1471_v27  ;;  %v7371_v30 = vld [vmem:[%s10623_s3 + $0xc0] sm:$0xff]  }
 0x10e   : > { %2030 = vst [vmem:[#allocation2 + $0x38] sm:$0xf] %v1747_v15  ;;  %v1476_v12 = vmul.f32 %v8345_v28, %v1440_v49  ;;  %v1438_v39 = vmax.f32 %v1402_v32, 0.0  ;;  %v1441_v51 = vmax.f32 %v1405_v2, 0.0  ;;  %6900 = vmatpush3.bf16.msra.mxu0 %v7363_v50  ;;  %v1439_v8 = vmax.f32 %v1403_v18, 0.0  ;;  %v6720_v15 = vpop.f32.mrf.mxu0 }
 0x10f   : > { %v1770_v23 = vshrl.u32 %v6415_v62, 16  ;;  %v1773_v10 = vshll.u32 %v6415_v62, 16  ;;  %v1750_v43 = vshrl.u32 %v6413_v35, 16  ;;  %v1753_v11 = vshll.u32 %v6413_v35, 16  ;;  %6901 = vmatprep.subr.bf16.mxu0 %v7367_v14 }
 0x110   : > { %v6418_v9 = vpack.c.bf16 %v1476_v12, %v1476_v12  ;;  %v1474_v29 = vmul.f32 %v8364_v48, %v1438_v39  ;;  %v1477_v33 = vmul.f32 %v8369_v54, %v1441_v51  ;;  %v8883_v27 = vld [vmem:[#allocation2 + $0x28] sm:$0xff]   ;;  %v1475_v51 = vmul.f32 %v8374_v34, %v1439_v8  ;;  %v1280_v8 = vpop.f32.mrf.mxu0 }
 0x111   : > { %v1772_v49 = vrot.slane %v1770_v23, 6  ;;  %v1775_v58 = vrot.slane %v1773_v10, 7  ;;  %v1752_v32 = vrot.slane %v1750_v43, 6  ;;  %v1755_v2 = vrot.slane %v1753_v11, 7  ;;  %6810 = vmatmul.mubr.bf16.gmra.mxu0 %v8883_v27  ;;  %v7377_v23 = vld [vmem:[%s10623_s3 + $0x178] sm:$0xff]  }
 0x112   : > { %v1800_v62 = vshrl.u32 %v6418_v9, 16  ;;  %v1803_v50 = vshll.u32 %v6418_v9, 16  ;;  %v6416_v35 = vpack.c.bf16 %v1474_v29, %v1474_v29  ;;  %v6419_v4 = vpack.c.bf16 %v1477_v33, %v1477_v33  ;;  %v8886_v12 = vld [vmem:[#allocation2 + $0x30] sm:$0xff]   ;;  %6902 = vmatpush3.bf16.msra.mxu0 %v7367_v14 }
 0x113   : > { %v1776_v39 = vor.u32 %v1775_v58, %v1772_v49  ;;  %v1756_v28 = vor.u32 %v1755_v2, %v1752_v32  ;;  %v2231_v18 = vrot.slane %v2229_v41, 1  ;;  %6813 = vmatprep.mubr.bf16.mxu0 %v8886_v12  ;;  %6903 = vmatprep.subr.bf16.mxu0 %v7371_v30  ;;  %v10853_v29 = vrot.slane %v8838_v44, 4 }
 0x114   : > { %v1802_v10 = vrot.slane %v1800_v62, 6  ;;  %v1805_v43 = vrot.slane %v1803_v50, 7  ;;  %v1780_v11 = vshrl.u32 %v6416_v35, 16  ;;  %v1783_v9 = vshll.u32 %v6416_v35, 16 }
 0x115   : > { %v1777_v33 = vsel %vm8747_vm14, %v10853_v29, %v1776_v39  ;;  %v1778_v49 = vrot.slane %v1776_v39, 4  ;;  %v1757_v41 = vsel %vm8747_vm14, %v1748_v3, %v1756_v28  ;;  %v1758_v14 = vrot.slane %v1756_v28, 4 }
 0x116   : > { %2033 = vst [vmem:[#allocation2 + $0x44] sm:$0xf] %v1777_v33  ;;  %2031 = vst [vmem:[#allocation2 + $0x3c] sm:$0xf] %v1757_v41  ;;  %v1806_v58 = vor.u32 %v1805_v43, %v1802_v10  ;;  %v1782_v32 = vrot.slane %v1780_v11, 6  ;;  %v1785_v2 = vrot.slane %v1783_v9, 7  ;;  %v6417_v54 = vpack.c.bf16 %v1475_v51, %v1475_v51  ;;  %6904 = vmatpush3.bf16.msra.mxu0 %v7371_v30 }
 0x117   : > { %v1810_v62 = vshrl.u32 %v6419_v4, 16  ;;  %v1767_v50 = vsel %vm8747_vm14, %v1758_v14, %v8838_v44  ;;  %v1813_v35 = vshll.u32 %v6419_v4, 16  ;;  %v2232_v39 = vsel %vm2220_vm9, %v8349_v45, %v2231_v18  ;;  %6993 = vmatprep.subr.bf16.mxu0 %v7377_v23  ;;  %v6723_v4 = vpop.f32.mrf.mxu0 }
 0x118   : > { %2032 = vst [vmem:[#allocation2 + $0x40] sm:$0xf] %v1767_v50  ;;  %v1808_v3 = vrot.slane %v1806_v58, 4  ;;  %v1786_v28 = vor.u32 %v1785_v2, %v1782_v32  ;;  %6749 = vmatprep.mubr.bf16.mxu1 %v2232_v39  ;;  %v1367_v10 = vmul.f32 %v8853_v37, %v8556_v56  ;;  %v1790_v11 = vshrl.u32 %v6417_v54, 16 }
 0x119   : > { %v1812_v29 = vrot.slane %v1810_v62, 6  ;;  %v1815_v43 = vrot.slane %v1813_v35, 7  ;;  %v1793_v9 = vshll.u32 %v6417_v54, 16  ;;  %v2233_v44 = vshrl.u32 %v8792_v22, 16  ;;  %v8924_v39 = vpop.f32.mrf.mxu0 }
 0x11a   : > { %v1787_v51 = vsel %vm8747_vm14, %v1778_v49, %v1786_v28  ;;  %v1788_v45 = vrot.slane %v1786_v28, 4  ;;  %v1408_v30 = vadd.f32 %v8593_v47, %v1367_v10  ;;  %v2237_v33 = vshll.u32 %v8801_v26, 16  ;;  %v7349_v49 = vld [vmem:[%s10623_s3 + $0xb0] sm:$0xff]  }
 0x11b   : > { %2034 = vst [vmem:[#allocation2 + $0x48] sm:$0xf] %v1787_v51  ;;  %v8911_v41 = vor.u32 %v1815_v43, %v1812_v29  ;;  %v1792_v14 = vrot.slane %v1790_v11, 6  ;;  %v1795_v37 = vrot.slane %v1793_v9, 7  ;;  %v2235_v23 = vor.u32 %v2233_v44, %v2231_v18 }
 0x11c   : > { %v1444_v32 = vmax.f32 %v1408_v30, 0.0  ;;  %v2239_v2 = vrot.slane %v2237_v33, 1  ;;  %v1365_v54 = vmul.f32 %v8556_v56, %v8874_v36  ;;  %v1368_v22 = vmul.f32 %v6720_v15, %v8556_v56  ;;  %v7457_v30 = vld [vmem:[%s10623_s3 + $0xb8] sm:$0xff]  }
 0x11d   : > { %v1817_v62 = vsel %vm8747_vm14, %v1808_v3, %v8911_v41  ;;  %v1818_v50 = vrot.slane %v8911_v41, 4  ;;  %v1796_v35 = vor.u32 %v1795_v37, %v1792_v14  ;;  %v1366_v18 = vmul.f32 %v8556_v56, %v1280_v8  ;;  %v8926_v28 = vld [vmem:[#allocation2 + $0x38] sm:$0xff]  }
 0x11e   : > { %2037 = vst [vmem:[#allocation2 + $0x54] sm:$0xf] %v1817_v62  ;;  %v1480_v36 = vmul.f32 %v8380_v16, %v1444_v32  ;;  %v2240_v15 = vsel %vm2220_vm9, %v2235_v23, %v2239_v2  ;;  %v1406_v29 = vadd.f32 %v8593_v47, %v1365_v54  ;;  %v1409_v10 = vadd.f32 %v8593_v47, %v1368_v22  ;;  %v6724_v32 = vpop.f32.mrf.mxu0  ;;  %v7353_v54 = vld [vmem:[%s10623_s3 + $0xa8] sm:$0xff]  }
 0x11f   : > { %v1797_v3 = vsel %vm8747_vm14, %v1788_v45, %v1796_v35  ;;  %v1798_v43 = vrot.slane %v1796_v35, 4  ;;  %6750 = vmatmul.mubr.bf16.vlgmr.msra.gmra.mxu1 %v2240_v15  ;;  %v1407_v8 = vadd.f32 %v8593_v47, %v1366_v18  ;;  %v2241_v11 = vshrl.u32 %v8801_v26, 16  ;;  %6814 = vmatmul.mubr.bf16.gmra.mxu0 %v8926_v28  ;;  %v8937_v9 = vld [vmem:[#allocation2 + $0x40] sm:$0xff]  }
 0x120   : > { %2035 = vst [vmem:[#allocation2 + $0x4c] sm:$0xf] %v1797_v3  ;;  %v6422_v44 = vpack.c.bf16 %v1480_v36, %v1480_v36  ;;  %v1442_v51 = vmax.f32 %v1406_v29, 0.0  ;;  %6838 = vmatpush3.bf16.msra.mxu1 %v7457_v30  ;;  %v1445_v33 = vmax.f32 %v1409_v10, 0.0  ;;  %v2245_v45 = vshll.u32 %v8836_v7, 16  ;;  %6817 = vmatprep.mubr.bf16.mxu0 %v8937_v9 }
 0x121   : > { %v1807_v14 = vsel %vm8747_vm14, %v1798_v43, %v1806_v58  ;;  %v1443_v37 = vmax.f32 %v1407_v8, 0.0  ;;  %v2243_v26 = vor.u32 %v2241_v11, %v2239_v2  ;;  %v1371_v23 = vmul.f32 %v6723_v4, %v8556_v56  ;;  %6839 = vmatprep.subr.bf16.mxu1 %v7349_v49  ;;  %v9008_v4 = vld [vmem:[%s10621_s1 + $0x1] ss:$0 sm:$0xff] }
 0x122   : > { %2036 = vst [vmem:[#allocation2 + $0x50] sm:$0xf] %v1807_v14  ;;  %v1840_v22 = vshrl.u32 %v6422_v44, 16  ;;  %v1843_v62 = vshll.u32 %v6422_v44, 16  ;;  %v1478_v35 = vmul.f32 %v8561_v46, %v1442_v51  ;;  %v1481_v18 = vmul.f32 %v8566_v61, %v1445_v33  ;;  %v1296_v44 = vpop.f32.mrf.mxu0  ;;  %v7358_v51 = vld [vmem:[%s10623_s3 + $0xa0] sm:$0xff]  }
 0x123   : > { %v10854_v58 = vsel %vm8713_vm6, %v8705_v1, %v8644_v57  ;;  %v1479_v2 = vmul.f32 %v8598_v52, %v1443_v37  ;;  %v2247_v36 = vrot.slane %v2245_v45, 1  ;;  %v1412_v15 = vadd.f32 %v8593_v47, %v1371_v23 }
 0x124   : > { %vm8957_vm12 = vcmp.lt.s32.totalorder %v10854_v58, 16  ;;  %v2249_v29 = vshrl.u32 %v8836_v7, 16  ;;  %v1842_v10 = vrot.slane %v1840_v22, 6  ;;  %v1845_v3 = vrot.slane %v1843_v62, 7  ;;  %6840 = vmatpush3.bf16.msra.mxu1 %v7349_v49 }
 0x125   : > { %v6420_v43 = vpack.c.bf16 %v1478_v35, %v1478_v35  ;;  %v6423_v8 = vpack.c.bf16 %v1481_v18, %v1481_v18  ;;  %v6421_v40 = vpack.c.bf16 %v1479_v2, %v1479_v2  ;;  %v2248_v11 = vsel %vm2220_vm9, %v2243_v26, %v2247_v36  ;;  %6841 = vmatprep.subr.bf16.mxu1 %v7353_v54  ;;  %v7362_v26 = vld [vmem:[%s10623_s3 + $0x98] sm:$0xff]  }
 0x126   : > { %v1448_v57 = vmax.f32 %v1412_v15, 0.0  ;;  %v2251_v1 = vor.u32 %v2249_v29, %v2247_v36  ;;  %v1846_v30 = vor.u32 %v1845_v3, %v1842_v10  ;;  %6753 = vmatprep.mubr.bf16.mxu1 %v2248_v11  ;;  %v6727_v10 = vpop.f32.mrf.mxu0  ;;  %v1372_v11 = vmul.f32 %v6724_v32, %v8556_v56 }
 0x127   : > { %v1820_v33 = vshrl.u32 %v6420_v43, 16  ;;  %v1823_v45 = vshll.u32 %v6420_v43, 16  ;;  %v1850_v7 = vshrl.u32 %v6423_v8, 16  ;;  %v1853_v14 = vshll.u32 %v6423_v8, 16  ;;  %v8969_v22 = vld [vmem:[#allocation2 + $0x48] sm:$0xff]  }
 0x128   : > { %v1830_v37 = vshrl.u32 %v6421_v40, 16  ;;  %v1833_v23 = vshll.u32 %v6421_v40, 16  ;;  %v1484_v49 = vmul.f32 %v8603_v53, %v1448_v57  ;;  %v1848_v62 = vrot.slane %v1846_v30, 4  ;;  %6842 = vmatpush3.bf16.msra.mxu1 %v7353_v54  ;;  %6818 = vmatmul.mubr.bf16.gmra.mxu0 %v8969_v22  ;;  %v9191_v16 = vld [vmem:[#allocation2 + $0x48] sm:$0xff]  }
 0x129   : > { %v1822_v35 = vrot.slane %v1820_v33, 6  ;;  %v1825_v18 = vrot.slane %v1823_v45, 7  ;;  %v1852_v58 = vrot.slane %v1850_v7, 6  ;;  %v1855_v2 = vrot.slane %v1853_v14, 7  ;;  %v8975_v3 = vld [vmem:[#allocation2 + $0x50] sm:$0xff]   ;;  %6843 = vmatprep.subr.bf16.mxu1 %v7358_v51 }
 0x12a   : > { %v1832_v36 = vrot.slane %v1830_v37, 6  ;;  %v1835_v15 = vrot.slane %v1833_v23, 7  ;;  %v6426_v29 = vpack.c.bf16 %v1484_v49, %v1484_v49  ;;  %v2253_v8 = vshll.u32 %v8847_v21, 16  ;;  %6821 = vmatprep.mubr.bf16.mxu0 %v8975_v3  ;;  %v1309_v49 = vpop.f32.mrf.mxu0 }
 0x12b   : > { %v1826_v43 = vor.u32 %v1825_v18, %v1822_v35  ;;  %v1369_v40 = vmul.f32 %v8556_v56, %v8924_v39  ;;  %v8981_v57 = vor.u32 %v1855_v2, %v1852_v58  ;;  %v10857_v35 = vmov 0.0  }
 0x12c   : > { %v1836_v54 = vor.u32 %v1835_v15, %v1832_v36  ;;  %v1880_v33 = vshrl.u32 %v6426_v29, 16  ;;  %v1883_v45 = vshll.u32 %v6426_v29, 16  ;;  %v2255_v37 = vrot.slane %v2253_v8, 1  ;;  %6844 = vmatpush3.bf16.msra.mxu1 %v7358_v51  ;;  %v9014_v36 = vld [vmem:[%s10621_s1] ss:$0 sm:$0xff] }
 0x12d   : > { %v1827_v7 = vsel %vm8747_vm14, %v1818_v50, %v1826_v43  ;;  %v1828_v14 = vrot.slane %v1826_v43, 4  ;;  %v1410_v23 = vadd.f32 %v8593_v47, %v1369_v40  ;;  %v1857_v56 = vsel %vm8747_vm14, %v1848_v62, %v8981_v57  ;;  %6845 = vmatprep.subr.bf16.mxu1 %v7362_v26  ;;  %v7366_v50 = vld [vmem:[%s10623_s3 + $0x90] sm:$0xff]  }
 0x12e   : > { %2038 = vst [vmem:[#allocation2 + $0x58] sm:$0xf] %v1827_v7  ;;  %v1838_v39 = vrot.slane %v1836_v54, 4  ;;  %v1882_v32 = vrot.slane %v1880_v33, 6  ;;  %v8995_v41 = vsel %vm8957_vm12, 1.0, %v10857_v35  ;;  %v1885_v51 = vrot.slane %v1883_v45, 7  ;;  %v6728_v45 = vpop.f32.mrf.mxu0 }
 0x12f   : > { %10858 = vst [vmem:[#allocation39_spill] sm:$0xff] %v8995_v41  ;;  %2041 = vst [vmem:[#allocation2 + $0x64] sm:$0xf] %v1857_v56  ;;  %v1837_v47 = vsel %vm8747_vm14, %v1828_v14, %v1836_v54  ;;  %v2256_v62 = vsel %vm2220_vm9, %v2251_v1, %v2255_v37  ;;  %v1446_v18 = vmax.f32 %v1410_v23, 0.0  ;;  %v1413_v2 = vadd.f32 %v9008_v4, %v1372_v11 }
 0x130   : > { %v1847_v58 = vsel %vm8747_vm14, %v1838_v39, %v1846_v30  ;;  %2039 = vst [vmem:[#allocation2 + $0x5c] sm:$0xf] %v1837_v47  ;;  %6754 = vmatmul.mubr.bf16.gmra.mxu1 %v2256_v62  ;;  %v1370_v1 = vmul.f32 %v9014_v36, %v1296_v44  ;;  %v2257_v15 = vshrl.u32 %v8847_v21, 16  ;;  %v1858_v30 = vrot.slane %v8981_v57, 4  ;;  %v7370_v21 = vld [vmem:[%s10623_s3 + $0x88] sm:$0xff]  }
 0x131   : > { %2040 = vst [vmem:[#allocation2 + $0x60] sm:$0xf] %v1847_v58  ;;  %v1482_v29 = vmul.f32 %v8608_v63, %v1446_v18  ;;  %v2261_v43 = vshll.u32 %v8883_v27, 16  ;;  %v1375_v8 = vmul.f32 %v9014_v36, %v6727_v10  ;;  %6846 = vmatpush3.bf16.msra.mxu1 %v7362_v26  ;;  %v9022_v40 = vor.u32 %v1885_v51, %v1882_v32 }
 0x132   : > { %v1449_v11 = vmax.f32 %v1413_v2, 0.0  ;;  %v1411_v54 = vadd.f32 %v9008_v4, %v1370_v1  ;;  %v2259_v33 = vor.u32 %v2257_v15, %v2255_v37  ;;  %6847 = vmatprep.subr.bf16.mxu1 %v7366_v50  ;;  %v2265_v14 = vshrl.u32 %v8883_v27, 16  ;;  %v1312_v27 = vpop.f32.mrf.mxu0 }
 0x133   : > { %v6424_v44 = vpack.c.bf16 %v1482_v29, %v1482_v29  ;;  %v2263_v57 = vrot.slane %v2261_v43, 1  ;;  %v1416_v7 = vadd.f32 %v9008_v4, %v1375_v8  ;;  %v2269_v23 = vshll.u32 %v8886_v12, 16 }
 0x134   : > { %v1485_v26 = vmul.f32 %v8633_v24, %v1449_v11  ;;  %v1447_v10 = vmax.f32 %v1411_v54, 0.0  ;;  %v1373_v56 = vmul.f32 %v9014_v36, %v1309_v49 }
 0x135   : > { %v1860_v37 = vshrl.u32 %v6424_v44, 16  ;;  %v1863_v39 = vshll.u32 %v6424_v44, 16  ;;  %v2264_v32 = vsel %vm2220_vm9, %v2259_v33, %v2263_v57  ;;  %v1452_v35 = vmax.f32 %v1416_v7, 0.0  ;;  %6848 = vmatpush3.bf16.msra.mxu1 %v7366_v50  ;;  %v7375_v50 = vld [vmem:[%s10623_s3 + $0x80] sm:$0xff]  }
 0x136   : > { %v6427_v47 = vpack.c.bf16 %v1485_v26, %v1485_v26  ;;  %v1483_v51 = vmul.f32 %v8638_v13, %v1447_v10  ;;  %6757 = vmatprep.mubr.bf16.mxu1 %v2264_v32  ;;  %v2267_v62 = vor.u32 %v2265_v14, %v2263_v57  ;;  %v2271_v18 = vrot.slane %v2269_v23, 1  ;;  %6849 = vmatprep.subr.bf16.mxu1 %v7370_v21 }
 0x137   : > { %v1862_v58 = vrot.slane %v1860_v37, 6  ;;  %v1865_v2 = vrot.slane %v1863_v39, 7  ;;  %v1488_v1 = vmul.f32 %v8656_v31, %v1452_v35  ;;  %v1414_v49 = vadd.f32 %v9008_v4, %v1373_v56  ;;  %v9037_v15 = vld [vmem:[#allocation2 + $0x58] sm:$0xff]   ;;  %v6731_v56 = vpop.f32.mrf.mxu0 }
 0x138   : > { %v1890_v29 = vshrl.u32 %v6427_v47, 16  ;;  %v1893_v43 = vshll.u32 %v6427_v47, 16  ;;  %v6425_v8 = vpack.c.bf16 %v1483_v51, %v1483_v51  ;;  %v2272_v11 = vsel %vm2220_vm9, %v2267_v62, %v2271_v18  ;;  %v9043_v54 = vld [vmem:[#allocation2 + $0x60] sm:$0xff]   ;;  %6822 = vmatmul.mubr.bf16.gmra.mxu0 %v9037_v15 }
 0x139   : > { %v1866_v33 = vor.u32 %v1865_v2, %v1862_v58  ;;  %v6430_v44 = vpack.c.bf16 %v1488_v1, %v1488_v1  ;;  %6758 = vmatmul.mubr.bf16.gmra.mxu1 %v2272_v11  ;;  %v1450_v57 = vmax.f32 %v1414_v49, 0.0  ;;  %v1376_v7 = vmul.f32 %v9014_v36, %v6728_v45  ;;  %6825 = vmatprep.mubr.bf16.mxu0 %v9043_v54  ;;  %v9054_v45 = vld [vmem:[%s10623_s3 + $0x138] sm:$0xff]   ;;  %v1325_v11 = vpop.f32.mrf.mxu0 }
 0x13a   : > { %v1892_v14 = vrot.slane %v1890_v29, 6  ;;  %v1895_v26 = vrot.slane %v1893_v43, 7  ;;  %v1870_v10 = vshrl.u32 %v6425_v8, 16  ;;  %v1873_v23 = vshll.u32 %v6425_v8, 16  ;;  %6850 = vmatpush3.bf16.msra.mxu1 %v7370_v21 }
 0x13b   : > { %v1888_v37 = vrot.slane %v9022_v40, 4  ;;  %v1867_v39 = vsel %vm8747_vm14, %v1858_v30, %v1866_v33  ;;  %v1920_v32 = vshrl.u32 %v6430_v44, 16  ;;  %v1923_v35 = vshll.u32 %v6430_v44, 16  ;;  %6851 = vmatprep.subr.bf16.mxu1 %v7375_v50 }
 0x13c   : > { %2042 = vst [vmem:[#allocation2 + $0x68] sm:$0xf] %v1867_v39  ;;  %v1896_v47 = vor.u32 %v1895_v26, %v1892_v14  ;;  %v1872_v51 = vrot.slane %v1870_v10, 6  ;;  %v1875_v62 = vrot.slane %v1873_v23, 7  ;;  %v1486_v58 = vmul.f32 %v8692_v5, %v1450_v57 }
 0x13d   : > { %v1922_v21 = vrot.slane %v1920_v32, 6  ;;  %v1925_v2 = vrot.slane %v1923_v35, 7  ;;  %v1417_v1 = vadd.f32 %v9008_v4, %v1376_v7  ;;  %v1374_v30 = vmul.f32 %v9014_v36, %v1312_v27 }
 0x13e   : > { %v1868_v49 = vrot.slane %v1866_v33, 4  ;;  %v1897_v29 = vsel %vm8747_vm14, %v1888_v37, %v1896_v47  ;;  %v1876_v43 = vor.u32 %v1875_v62, %v1872_v51  ;;  %v6428_v8 = vpack.c.bf16 %v1486_v58, %v1486_v58  ;;  %6852 = vmatpush3.bf16.msra.mxu1 %v7375_v50  ;;  %v6732_v51 = vpop.f32.mrf.mxu0  ;;  %v10859_v58 = vld [vmem:[#allocation35_spill] sm:$0xff] }
 0x13f   : > { %v1898_v44 = vrot.slane %v1896_v47, 4  ;;  %2045 = vst [vmem:[#allocation2 + $0x74] sm:$0xf] %v1897_v29  ;;  %v1453_v14 = vmax.f32 %v1417_v1, 0.0  ;;  %v1415_v26 = vadd.f32 %v9008_v4, %v1374_v30  ;;  %v2273_v57 = vshrl.u32 %v8886_v12, 16  ;;  %6941 = vmatprep.subr.bf16.mxu1 %v9054_v45 }
 0x140   : > { %v1877_v27 = vsel %vm8747_vm14, %v1868_v49, %v1876_v43  ;;  %v1878_v33 = vrot.slane %v1876_v43, 4  ;;  %v1900_v7 = vshrl.u32 %v6428_v8, 16  ;;  %v1903_v10 = vshll.u32 %v6428_v8, 16 }
 0x141   : > { %2043 = vst [vmem:[#allocation2 + $0x6c] sm:$0xf] %v1877_v27  ;;  %v9066_v23 = vor.u32 %v1925_v2, %v1922_v21  ;;  %v1489_v50 = vmul.f32 %v8697_v55, %v1453_v14  ;;  %v1451_v37 = vmax.f32 %v1415_v26, 0.0  ;;  %v2275_v39 = vor.u32 %v2273_v57, %v2271_v18 }
 0x142   : > { %v1887_v32 = vsel %vm8747_vm14, %v1878_v33, %v9022_v40  ;;  %v1902_v12 = vrot.slane %v1900_v7, 6  ;;  %v1905_v35 = vrot.slane %v1903_v10, 7  ;;  %v2277_v47 = vshll.u32 %v8926_v28, 16  ;;  %v1328_v33 = vpop.f32.mrf.mxu0 }
 0x143   : > { %2044 = vst [vmem:[#allocation2 + $0x70] sm:$0xf] %v1887_v32  ;;  %v6431_v62 = vpack.c.bf16 %v1489_v50, %v1489_v50  ;;  %v1487_v1 = vmul.f32 %v10859_v58, %v1451_v37  ;;  %v1379_v21 = vmul.f32 %v9014_v36, %v6731_v56  ;;  %v2281_v2 = vshrl.u32 %v8926_v28, 16 }
 0x144   : > { %v1906_v30 = vor.u32 %v1905_v35, %v1902_v12  ;;  %v2279_v49 = vrot.slane %v2277_v47, 1  ;;  %v2285_v18 = vshll.u32 %v8937_v9, 16  ;;  %v1377_v29 = vmul.f32 %v9014_v36, %v1325_v11 }
 0x145   : > { %v1930_v40 = vshrl.u32 %v6431_v62, 16  ;;  %v1933_v43 = vshll.u32 %v6431_v62, 16  ;;  %v6429_v8 = vpack.c.bf16 %v1487_v1, %v1487_v1  ;;  %v1420_v14 = vadd.f32 %v9008_v4, %v1379_v21  ;;  %v10860_v21 = vld [vmem:[#allocation36_spill] sm:$0xff] }
 0x146   : > { %v1928_v26 = vrot.slane %v9066_v23, 4  ;;  %v1907_v57 = vsel %vm8747_vm14, %v1898_v44, %v1906_v30  ;;  %v2280_v56 = vsel %vm2220_vm9, %v2275_v39, %v2279_v49  ;;  %v2283_v27 = vor.u32 %v2281_v2, %v2279_v49 }
 0x147   : > { %2046 = vst [vmem:[#allocation2 + $0x78] sm:$0xf] %v1907_v57  ;;  %v1932_v7 = vrot.slane %v1930_v40, 6  ;;  %v1935_v10 = vrot.slane %v1933_v43, 7  ;;  %v1910_v50 = vshrl.u32 %v6429_v8, 16  ;;  %v1913_v37 = vshll.u32 %v6429_v8, 16  ;;  %6761 = vmatprep.mubr.bf16.mxu1 %v2280_v56 }
 0x148   : > { %v1456_v11 = vmax.f32 %v1420_v14, 0.0  ;;  %v2287_v32 = vrot.slane %v2285_v18, 1  ;;  %v1418_v12 = vadd.f32 %v9008_v4, %v1377_v29  ;;  %v1380_v35 = vmul.f32 %v9014_v36, %v6732_v51  ;;  %v9085_v47 = vld [vmem:[#allocation2 + $0x68] sm:$0xff]   ;;  %v10861_v57 = vld [vmem:[#allocation37_spill] sm:$0xff] }
 0x149   : > { %v9087_v62 = vor.u32 %v1935_v10, %v1932_v7  ;;  %v1912_v44 = vrot.slane %v1910_v50, 6  ;;  %v1915_v39 = vrot.slane %v1913_v37, 7  ;;  %v1378_v1 = vmul.f32 %v9014_v36, %v1328_v33  ;;  %6826 = vmatmul.mubr.bf16.gmra.mxu0 %v9085_v47 }
 0x14a   : > { %v1492_v2 = vmul.f32 %v10860_v21, %v1456_v11  ;;  %v2288_v49 = vsel %vm2220_vm9, %v2283_v27, %v2287_v32  ;;  %v1454_v40 = vmax.f32 %v1418_v12, 0.0  ;;  %v1421_v43 = vadd.f32 %v9008_v4, %v1380_v35  ;;  %v9094_v18 = vld [vmem:[#allocation2 + $0x70] sm:$0xff]   ;;  %v10862_v11 = vld [vmem:[#allocation38_spill] sm:$0xff] }
 0x14b   : > { %v1908_v51 = vrot.slane %v1906_v30, 4  ;;  %v1937_v29 = vsel %vm8747_vm14, %v1928_v26, %v9087_v62  ;;  %v1916_v8 = vor.u32 %v1915_v39, %v1912_v44  ;;  %6762 = vmatmul.mubr.bf16.gmra.mxu1 %v2288_v49  ;;  %v1419_v36 = vadd.f32 %v9008_v4, %v1378_v1  ;;  %6829 = vmatprep.mubr.bf16.mxu0 %v9094_v18 }
 0x14c   : > { %2049 = vst [vmem:[#allocation2 + $0x84] sm:$0xf] %v1937_v29  ;;  %v6434_v14 = vpack.c.bf16 %v1492_v2, %v1492_v2  ;;  %v1490_v56 = vmul.f32 %v10861_v57, %v1454_v40  ;;  %v1457_v27 = vmax.f32 %v1421_v43, 0.0  ;;  %v2289_v33 = vshrl.u32 %v8937_v9, 16  ;;  %v7462_v57 = vld [vmem:[#allocation2 + $0x10] sm:$0xff]  }
 0x14d   : > { %v1917_v30 = vsel %vm8747_vm14, %v1908_v51, %v1916_v8  ;;  %v1918_v7 = vrot.slane %v1916_v8, 4  ;;  %v1455_v10 = vmax.f32 %v1419_v36, 0.0  ;;  %v2293_v26 = vshll.u32 %v8969_v22, 16 }
 0x14e   : > { %2047 = vst [vmem:[#allocation2 + $0x7c] sm:$0xf] %v1917_v30  ;;  %v1960_v50 = vshrl.u32 %v6434_v14, 16  ;;  %v1963_v37 = vshll.u32 %v6434_v14, 16  ;;  %v6432_v4 = vpack.c.bf16 %v1490_v56, %v1490_v56  ;;  %v1493_v12 = vmul.f32 %v10862_v11, %v1457_v27 }
 0x14f   : > { %v1927_v35 = vsel %vm8747_vm14, %v1918_v7, %v9066_v23  ;;  %v1491_v44 = vmul.f32 %v8995_v41, %v1455_v10  ;;  %v2291_v39 = vor.u32 %v2289_v33, %v2287_v32  ;;  %v2295_v1 = vrot.slane %v2293_v26, 1 }
 0x150   : > { %2048 = vst [vmem:[#allocation2 + $0x80] sm:$0xf] %v1927_v35  ;;  %v1962_v2 = vrot.slane %v1960_v50, 6  ;;  %v1965_v49 = vrot.slane %v1963_v37, 7  ;;  %v1940_v40 = vshrl.u32 %v6432_v4, 16  ;;  %v1943_v43 = vshll.u32 %v6432_v4, 16 }
 0x151   : > { %v6435_v51 = vpack.c.bf16 %v1493_v12, %v1493_v12  ;;  %v6433_v29 = vpack.c.bf16 %v1491_v44, %v1491_v44  ;;  %v2296_v8 = vsel %vm2220_vm9, %v2291_v39, %v2295_v1  ;;  %v2297_v36 = vshrl.u32 %v8969_v22, 16  ;;  %v2855_v39 = vld [vmem:[#allocation2] sm:$0xe] }
 0x152   : > { %v1966_v14 = vor.u32 %v1965_v49, %v1962_v2  ;;  %v1942_v56 = vrot.slane %v1940_v40, 6  ;;  %v1945_v27 = vrot.slane %v1943_v43, 7  ;;  %6765 = vmatprep.mubr.bf16.mxu1 %v2296_v8  ;;  %v2301_v23 = vshll.u32 %v8975_v3, 16  ;;  %v2054_v40 = vld [vmem:[#allocation2 + $0x98] sm:$0x3] }
 0x153   : > { %v1970_v30 = vshrl.u32 %v6435_v51, 16  ;;  %v1973_v32 = vshll.u32 %v6435_v51, 16  ;;  %v1950_v33 = vshrl.u32 %v6433_v29, 16  ;;  %v1953_v7 = vshll.u32 %v6433_v29, 16 }
 0x154   : > { %v1938_v10 = vrot.slane %v9087_v62, 4  ;;  %v1946_v26 = vor.u32 %v1945_v27, %v1942_v56  ;;  %v2299_v50 = vor.u32 %v2297_v36, %v2295_v1  ;;  %v2303_v37 = vrot.slane %v2301_v23, 1 }
 0x155   : > { %v1972_v4 = vrot.slane %v1970_v30, 6  ;;  %v1975_v12 = vrot.slane %v1973_v32, 7  ;;  %v1952_v35 = vrot.slane %v1950_v33, 6  ;;  %v1955_v44 = vrot.slane %v1953_v7, 7  ;;  %v9119_v29 = vld [vmem:[#allocation2 + $0x78] sm:$0xff]  }
 0x156   : > { %v1968_v2 = vrot.slane %v1966_v14, 4  ;;  %v1947_v49 = vsel %vm8747_vm14, %v1938_v10, %v1946_v26  ;;  %v2304_v43 = vsel %vm2220_vm9, %v2299_v50, %v2303_v37  ;;  %v2305_v51 = vshrl.u32 %v8975_v3, 16  ;;  %6830 = vmatmul.mubr.bf16.gmra.mxu0 %v9119_v29 }
 0x157   : > { %v1948_v62 = vrot.slane %v1946_v26, 4  ;;  %2050 = vst [vmem:[#allocation2 + $0x88] sm:$0xf] %v1947_v49  ;;  %v1976_v1 = vor.u32 %v1975_v12, %v1972_v4  ;;  %v1956_v8 = vor.u32 %v1955_v44, %v1952_v35  ;;  %6766 = vmatmul.mubr.bf16.gmra.mxu1 %v2304_v43  ;;  %v2309_v36 = vshll.u32 %v9037_v15, 16  ;;  %v9122_v56 = vld [vmem:[#allocation2 + $0x80] sm:$0xff]  }
 0x158   : > { %v2307_v27 = vor.u32 %v2305_v51, %v2303_v37  ;;  %v2313_v23 = vshrl.u32 %v9037_v15, 16  ;;  %v2317_v30 = vshll.u32 %v9043_v54, 16  ;;  %v2325_v32 = vshll.u32 %v9085_v47, 16  ;;  %6833 = vmatprep.mubr.bf16.mxu0 %v9122_v56  ;;  %v7460_v35 = vld [vmem:[#allocation2 + $0x4] sm:$0xf] }
 0x159   : > { %v1977_v33 = vsel %vm8747_vm14, %v1968_v2, %v1976_v1  ;;  %v1978_v7 = vrot.slane %v1976_v1, 4  ;;  %v1957_v10 = vsel %vm8747_vm14, %v1948_v62, %v1956_v8  ;;  %v1958_v26 = vrot.slane %v1956_v8, 4  ;;  %v10863_v49 = vld [vmem:[#allocation3_spill] sm:$0xff]  ;;  %v9139_v62 = vld [vmem:[#allocation2 + $0xc] sm:$0xf]  ;;  %v9141_v1 = vld [vmem:[#allocation2 + $0x10] sm:$0xff]  }
 0x15a   : > { %2053 = vst [vmem:[#allocation2 + $0x94] sm:$0xf] %v1977_v33  ;;  %2051 = vst [vmem:[#allocation2 + $0x8c] sm:$0xf] %v1957_v10  ;;  %v2311_v50 = vrot.slane %v2309_v36, 1  ;;  %v2319_v37 = vrot.slane %v2317_v30, 1  ;;  %v6203_v44 = vcombine.low %v2855_v39, %v7460_v35  ;;  %vm10864_vm8 = vnez %v10863_v49 }
 0x15b   : > { %v2321_v4 = vshrl.u32 %v9043_v54, 16  ;;  %v2327_v12 = vrot.slane %v2325_v32, 1  ;;  %v2055_v43 = vsel %vm10864_vm8, %v1978_v7, %v2054_v40  ;;  %v1967_v2 = vsel %vm8747_vm14, %v1958_v26, %v1966_v14  ;;  %v3193_v14 = vld [vmem:[#allocation2 + $0x8] sm:$0xe]  ;;  %v9147_v32 = vld [vmem:[#allocation2 + $0x18] sm:$0xff]   ;;  %v9156_v35 = vld [vmem:[#allocation2 + $0x20] sm:$0xff]  }
 0x15c   : > { %v2333_v51 = vshll.u32 %v9094_v18, 16  ;;  %2056 = vst [vmem:[#allocation2 + $0x98] sm:$0x3] %v2055_v43  ;;  %2052 = vst [vmem:[#allocation2 + $0x90] sm:$0xf] %v1967_v2  ;;  %v2312_v8 = vsel %vm2220_vm9, %v2307_v27, %v2311_v50  ;;  %v2315_v36 = vor.u32 %v2313_v23, %v2311_v50  ;;  %v2329_v39 = vshrl.u32 %v9085_v47, 16 }
 0x15d   : > { %v2323_v30 = vor.u32 %v2321_v4, %v2319_v37  ;;  %6769 = vmatprep.mubr.bf16.mxu1 %v2312_v8  ;;  %v2341_v40 = vshll.u32 %v9119_v29, 16  ;;  %v2349_v6 = vshll.u32 %v9122_v56, 16  ;;  %v9152_v27 = vcombine.low %v3193_v14, %v9139_v62  ;;  %v9162_v8 = vld [vmem:[#allocation2 + $0x30] sm:$0xff]   ;;  %v9168_v14 = vld [vmem:[#allocation2 + $0x38] sm:$0xff]  }
 0x15e   : > { %v2320_v33 = vsel %vm2220_vm9, %v2315_v36, %v2319_v37  ;;  %v2335_v10 = vrot.slane %v2333_v51, 1  ;;  %v2331_v23 = vor.u32 %v2329_v39, %v2327_v12  ;;  %v2337_v26 = vshrl.u32 %v9094_v18, 16  ;;  %v9160_v51 = vld [vmem:[#allocation2 + $0x28] sm:$0xff]  }
 0x15f   : > { %v2328_v7 = vsel %vm2220_vm9, %v2323_v30, %v2327_v12  ;;  %6770 = vmatmul.mubr.bf16.gmra.mxu1 %v2320_v33  ;;  %v3341_v50 = vrot.slane %v9141_v1, 1  ;;  %v2877_v4 = vrot.slane %v6203_v44, 1  ;;  %v2343_v49 = vrot.slane %v2341_v40, 1  ;;  %v7461_v30 = vld [vmem:[#allocation2 + $0x8] sm:$0xff]  }
 0x160   : > { %6773 = vmatprep.mubr.bf16.mxu1 %v2328_v7  ;;  %v2345_v43 = vshrl.u32 %v9119_v29, 16  ;;  %v2351_v37 = vrot.slane %v2349_v6, 1  ;;  %v3340_v2 = vrot.slane %v9152_v27, 1  ;;  %v2353_v12 = vshrl.u32 %v9122_v56, 16 }
 0x161   : > { %v9164_v36 = vld [vmem:[#allocation2 + $0x88] sm:$0xff]   ;;  %v2878_v39 = vrot.slane %v7461_v30, 1  ;;  %v3343_v44 = vrot.slane %v9147_v32, 1  ;;  %v2339_v40 = vor.u32 %v2337_v26, %v2335_v10  ;;  %v2336_v33 = vsel %vm2220_vm9, %v2331_v23, %v2335_v10  ;;  %v7463_v23 = vld [vmem:[#allocation2 + $0x18] sm:$0xff]  }
 0x162   : > { %6834 = vmatmul.mubr.bf16.gmra.mxu0 %v9164_v36  ;;  %v3342_v6 = vsel %vm2876_vm5, %v3340_v2, %v3341_v50  ;;  %v2357_v7 = vshll.u32 %v9164_v36, 16  ;;  %v2347_v41 = vor.u32 %v2345_v43, %v2343_v49  ;;  %v3345_v30 = vrot.slane %v9156_v35, 1  ;;  %v9180_v2 = vld [vmem:[#allocation2 + $0x40] sm:$0xff]  }
 0x163   : > { %v9174_v11 = vld [vmem:[#allocation2 + $0x90] ss:$0 sps:$4 sm:$0x11]   ;;  %v2344_v21 = vsel %vm2220_vm9, %v2339_v40, %v2343_v49  ;;  %6905 = vmatprep.mubr.bf16.mxu0 %v3342_v6  ;;  %v2880_v55 = vrot.slane %v7462_v57, 1  ;;  %v2361_v26 = vshrl.u32 %v9164_v36, 16  ;;  %v2882_v58 = vrot.slane %v7463_v23, 1 }
 0x164   : > { %v2359_v31 = vrot.slane %v2357_v7, 1  ;;  %v2365_v10 = vshll.u32 %v9174_v11, 16  ;;  %v2355_v5 = vor.u32 %v2353_v12, %v2351_v37  ;;  %v3347_v24 = vrot.slane %v9160_v51, 1  ;;  %v7464_v49 = vld [vmem:[#allocation2 + $0x20] sm:$0xff]   ;;  %v7465_v57 = vld [vmem:[#allocation2 + $0x28] sm:$0xff]   ;;  %v9479_v19 = vld [vmem:[#allocation2 + $0x90] sm:$0xff]  }
 0x165   : > { %v3349_v40 = vrot.slane %v9162_v8, 1  ;;  %v2884_v43 = vrot.slane %v7464_v49, 1  ;;  %v2886_v7 = vrot.slane %v7465_v57, 1  ;;  %v3351_v13 = vrot.slane %v9168_v14, 1  ;;  %v9193_v49 = vld [vmem:[#allocation2 + $0x50] sm:$0xff]   ;;  %v9211_v57 = vld [vmem:[#allocation2 + $0x58] sm:$0xff]  }
 0x166   : > { %v2363_v6 = vor.u32 %v2361_v26, %v2359_v31  ;;  %v2367_v53 = vrot.slane %v2365_v10, 1  ;;  %v2352_v63 = vsel %vm2220_vm9, %v2347_v41, %v2351_v37  ;;  %v9187_v23 = vsel %vm2876_vm5, %v2877_v4, %v2878_v39  ;;  %v7382_v41 = vld [vmem:[%s10623_s3 + $0x170] sm:$0xff]  }
 0x167   : > { %6774 = vmatmul.mubr.bf16.gmra.mxu1 %v2336_v33  ;;  %v3344_v12 = vsel %vm2876_vm5, %v3341_v50, %v3343_v44  ;;  %v3346_v61 = vsel %vm2876_vm5, %v3343_v44, %v3345_v30  ;;  %v9196_v33 = vsel %vm2876_vm5, %v2878_v39, %v2880_v55  ;;  %v9199_v26 = vsel %vm2876_vm5, %v2880_v55, %v2882_v58  ;;  %v7466_v4 = vld [vmem:[#allocation2 + $0x30] sm:$0xff]  }
 0x168   : > { %6777 = vmatprep.mubr.bf16.mxu1 %v2344_v21  ;;  %v3353_v21 = vrot.slane %v9180_v2, 1  ;;  %v2888_v50 = vrot.slane %v7466_v4, 1  ;;  %v2360_v37 = vsel %vm2220_vm9, %v2355_v5, %v2359_v31  ;;  %v3348_v44 = vsel %vm2876_vm5, %v3345_v30, %v3347_v24  ;;  %v9223_v5 = vld [vmem:[#allocation2 + $0x60] sm:$0xff]  }
 0x169   : > { %v3350_v10 = vsel %vm2876_vm5, %v3347_v24, %v3349_v40  ;;  %v9209_v39 = vsel %vm2876_vm5, %v2882_v58, %v2884_v43  ;;  %v9214_v55 = vsel %vm2220_vm9, %v2363_v6, %v2367_v53  ;;  %v9217_v52 = vsel %vm2876_vm5, %v2884_v43, %v2886_v7  ;;  %v9225_v24 = vld [vmem:[#allocation2 + $0x68] sm:$0xff]   ;;  %v9227_v58 = vld [vmem:[#allocation2 + $0x70] sm:$0xff]   ;;  %v7467_v53 = vld [vmem:[%s10623_s3 + $0x178] sm:$0xff]  }
 0x16a   : > { %6906 = vmatmul.mubr.bf16.vlgmr.msra.gmra.mxu0 %v3344_v12  ;;  %v9220_v4 = vsel %vm2876_vm5, %v3349_v40, %v3351_v13  ;;  %v2890_v31 = vrot.slane %v8926_v28, 1  ;;  %v3355_v30 = vrot.slane %v9191_v16, 1  ;;  %v3357_v43 = vrot.slane %v9193_v49, 1  ;;  %v7387_v12 = vld [vmem:[%s10623_s3 + $0x168] sm:$0xff]  }
 0x16b   : > { %6994 = vmatpush3.bf16.msra.mxu0 %v7467_v53  ;;  %6909 = vmatprep.mubr.bf16.mxu0 %v3346_v61  ;;  %v10660_v40 = vrot.slane %v8969_v22, 1  ;;  %v2896_v28 = vrot.slane %v8975_v3, 1  ;;  %v9237_v6 = vsel %vm2876_vm5, %v3351_v13, %v3353_v21  ;;  %v9243_v46 = vsel %vm2876_vm5, %v2886_v7, %v2888_v50 }
 0x16c   : > { %6995 = vmatprep.subr.bf16.mxu0 %v7382_v41  ;;  %v2898_v53 = vrot.slane %v9037_v15, 1  ;;  %v3359_v34 = vrot.slane %v9211_v57, 1  ;;  %v2900_v13 = vrot.slane %v9043_v54, 1  ;;  %v2902_v48 = vrot.slane %v9085_v47, 1 }
 0x16d   : > { %v9251_v3 = vsel %vm2876_vm5, %v10660_v40, %v2896_v28  ;;  %v3361_v42 = vrot.slane %v9223_v5, 1  ;;  %v3363_v61 = vrot.slane %v9225_v24, 1  ;;  %v9262_v60 = vsel %vm2876_vm5, %v2888_v50, %v2890_v31 }
 0x16e   : > { %v9257_v7 = vsel %vm2876_vm5, %v2896_v28, %v2898_v53  ;;  %v9265_v40 = vsel %vm2876_vm5, %v2898_v53, %v2900_v13  ;;  %v9268_v54 = vsel %vm2876_vm5, %v2900_v13, %v2902_v48  ;;  %v2904_v47 = vrot.slane %v9094_v18, 1 }
 0x16f   : > { %6778 = vmatmul.mubr.bf16.gmra.mxu1 %v2352_v63  ;;  %6996 = vmatpush3.bf16.msra.mxu0 %v7382_v41  ;;  %v9270_v63 = vld [vmem:[#allocation2 + $0x78] sm:$0xff]   ;;  %v9274_v28 = vsel %vm2876_vm5, %v3353_v21, %v3355_v30  ;;  %v7391_v41 = vld [vmem:[%s10623_s3 + $0x160] sm:$0xff]   ;;  %v10865_v50 = vrot.slane %v8937_v9, 1  ;;  %v2906_v13 = vrot.slane %v9119_v29, 1  ;;  %v9289_v18 = vsel %vm2876_vm5, %v3357_v43, %v3359_v34 }
 0x170   : > { %6781 = vmatprep.mubr.bf16.mxu1 %v2360_v37  ;;  %6997 = vmatprep.subr.bf16.mxu0 %v7387_v12  ;;  %v9277_v37 = vsel %vm2876_vm5, %v3355_v30, %v3357_v43  ;;  %v9292_v21 = vsel %vm2876_vm5, %v2902_v48, %v2904_v47  ;;  %v2908_v30 = vrot.slane %v9122_v56, 1  ;;  %v2910_v15 = vrot.slane %v9164_v36, 1  ;;  %v4127_v48 = vld [vmem:[#allocation2 + $0x8] sm:$0xc] }
 0x171   : > { %v9285_v53 = vsel %vm2876_vm5, %v2890_v31, %v10865_v50  ;;  %v9297_v38 = vsel %vm2876_vm5, %v3359_v34, %v3361_v42  ;;  %v9300_v20 = vsel %vm2876_vm5, %v3361_v42, %v3363_v61  ;;  %v10866_v31 = vrot.slane %v9227_v58, 1 }
 0x172   : > { %6910 = vmatmul.mubr.bf16.gmra.mxu0 %v3348_v44  ;;  %v9308_v43 = vsel %vm2876_vm5, %v2904_v47, %v2906_v13  ;;  %v9312_v36 = vsel %vm2876_vm5, %v2906_v13, %v2908_v30  ;;  %v9315_v34 = vsel %vm2876_vm5, %v2908_v30, %v2910_v15  ;;  %v6296_v42 = vcombine.low %v4127_v48, %v9139_v62  ;;  %v7395_v44 = vld [vmem:[%s10623_s3 + $0x158] sm:$0xff]  }
 0x173   : > { %v9305_v29 = vsel %vm2876_vm5, %v3363_v61, %v10866_v31  ;;  %6913 = vmatprep.mubr.bf16.mxu0 %v3350_v10  ;;  %6998 = vmatpush3.bf16.msra.mxu0 %v7387_v12  ;;  %v4150_v61 = vrot.slane %v9141_v1, 2  ;;  %v2912_v10 = vrot.slane %v9174_v11, 1  ;;  %v3679_v47 = vshrl.u32 %v9152_v27, 16 }
 0x174   : > { %6999 = vmatprep.subr.bf16.mxu0 %v7391_v41  ;;  %v4149_v12 = vrot.slane %v6296_v42, 2  ;;  %v3682_v50 = vshll.u32 %v9152_v27, 16  ;;  %v3687_v13 = vshrl.u32 %v9141_v1, 16  ;;  %v3690_v30 = vshll.u32 %v9141_v1, 16 }
 0x175   : > { %v9328_v62 = vsel %vm2876_vm5, %v2910_v15, %v2912_v10  ;;  %v4152_v31 = vrot.slane %v9147_v32, 2  ;;  %v4154_v48 = vrot.slane %v9156_v35, 2  ;;  %v3681_v27 = vrot.slane %v3679_v47, 1 }
 0x176   : > { %v9335_v11 = vsel %vm4148_vm0, %v4149_v12, %v4150_v61  ;;  %v3684_v42 = vrot.slane %v3682_v50, 2  ;;  %v3689_v56 = vrot.slane %v3687_v13, 1  ;;  %v3692_v15 = vrot.slane %v3690_v30, 2 }
 0x177   : > { %6782 = vmatmul.mubr.bf16.gmra.mxu1 %v9214_v55  ;;  %7000 = vmatpush3.bf16.msra.mxu0 %v7391_v41  ;;  %v7399_v55 = vld [vmem:[%s10623_s3 + $0x150] sm:$0xff]   ;;  %v9341_v1 = vsel %vm4148_vm0, %v4150_v61, %v4152_v31  ;;  %v9344_v10 = vsel %vm4148_vm0, %v4152_v31, %v4154_v48  ;;  %v3699_v12 = vshll.u32 %v9147_v32, 16  ;;  %v3705_v47 = vshrl.u32 %v9156_v35, 16 }
 0x178   : > { %6853 = vmatprep.mubr.bf16.mxu1 %v9187_v23  ;;  %7001 = vmatprep.subr.bf16.mxu0 %v7395_v44  ;;  %v3696_v23 = vshrl.u32 %v9147_v32, 16  ;;  %v3685_v41 = vor.u32 %v3684_v42, %v3681_v27  ;;  %v3708_v50 = vshll.u32 %v9156_v35, 16  ;;  %v3693_v13 = vor.u32 %v3692_v15, %v3689_v56  ;;  %v7385_v35 = vld [vmem:[%s10623_s3 + $0x130] sm:$0xff]  }
 0x179   : > { %v4156_v30 = vrot.slane %v9160_v51, 2  ;;  %v4158_v61 = vrot.slane %v9162_v8, 2  ;;  %v3701_v31 = vrot.slane %v3699_v12, 2  ;;  %v3707_v0 = vrot.slane %v3705_v47, 1 }
 0x17a   : > { %6914 = vmatmul.mubr.bf16.gmra.mxu0 %v9220_v4  ;;  %v3698_v25 = vrot.slane %v3696_v23, 1  ;;  %v3710_v27 = vrot.slane %v3708_v50, 2  ;;  %v3714_v32 = vshrl.u32 %v9160_v51, 16  ;;  %v9359_v4 = vsel %vm3677_vm7, %v3685_v41, %v3693_v13 }
 0x17b   : > { %6917 = vmatprep.mubr.bf16.mxu0 %v9237_v6  ;;  %7002 = vmatpush3.bf16.msra.mxu0 %v7395_v44  ;;  %v9362_v56 = vsel %vm4148_vm0, %v4154_v48, %v4156_v30  ;;  %v9365_v42 = vsel %vm4148_vm0, %v4156_v30, %v4158_v61  ;;  %v3717_v6 = vshll.u32 %v9160_v51, 16  ;;  %v7403_v44 = vld [vmem:[%s10623_s3 + $0x148] sm:$0xff]   ;;  %v3723_v47 = vshrl.u32 %v9162_v8, 16 }
 0x17c   : > { %7003 = vmatprep.subr.bf16.mxu0 %v7399_v55  ;;  %v3702_v15 = vor.u32 %v3701_v31, %v3698_v25  ;;  %v3711_v23 = vor.u32 %v3710_v27, %v3707_v0  ;;  %v3716_v12 = vrot.slane %v3714_v32, 1  ;;  %v3726_v48 = vshll.u32 %v9162_v8, 16  ;;  %v7390_v8 = vld [vmem:[%s10623_s3 + $0x128] sm:$0xff]  }
 0x17d   : > { %v3719_v41 = vrot.slane %v3717_v6, 2  ;;  %v4160_v50 = vrot.slane %v9168_v14, 2  ;;  %v4162_v30 = vrot.slane %v9180_v2, 2  ;;  %v3725_v0 = vrot.slane %v3723_v47, 1 }
 0x17e   : > { %v9379_v51 = vsel %vm3677_vm7, %v3693_v13, %v3702_v15  ;;  %v9382_v25 = vsel %vm3677_vm7, %v3702_v15, %v3711_v23  ;;  %v3728_v27 = vrot.slane %v3726_v48, 2  ;;  %v7407_v13 = vld [vmem:[%s10623_s3 + $0x140] sm:$0xff]   ;;  %v3735_v6 = vshll.u32 %v9168_v14, 16 }
 0x17f   : > { %6854 = vmatmul.mubr.bf16.vlgmr.msra.gmra.mxu1 %v9196_v33  ;;  %v3732_v33 = vshrl.u32 %v9168_v14, 16  ;;  %7004 = vmatpush3.bf16.msra.mxu0 %v7399_v55  ;;  %v3720_v31 = vor.u32 %v3719_v41, %v3716_v12  ;;  %v3741_v15 = vshrl.u32 %v9180_v2, 16  ;;  %v3744_v55 = vshll.u32 %v9180_v2, 16  ;;  %v7394_v2 = vld [vmem:[%s10623_s3 + $0x120] sm:$0xff]  }
 0x180   : > { %6857 = vmatprep.mubr.bf16.mxu1 %v9199_v26  ;;  %6942 = vmatpush3.bf16.msra.mxu1 %v9054_v45  ;;  %v9389_v26 = vsel %vm4148_vm0, %v4158_v61, %v4160_v50  ;;  %v9392_v45 = vsel %vm4148_vm0, %v4160_v50, %v4162_v30  ;;  %v3729_v12 = vor.u32 %v3728_v27, %v3725_v0  ;;  %v4164_v47 = vrot.slane %v9191_v16, 2  ;;  %v9424_v0 = vld [vmem:[%s10623_s3 + $0x1f8] sm:$0xff]  }
 0x181   : > { %6943 = vmatprep.subr.bf16.mxu1 %v7385_v35  ;;  %7005 = vmatprep.subr.bf16.mxu0 %v7403_v44  ;;  %v3734_v32 = vrot.slane %v3732_v33, 1  ;;  %v9402_v61 = vsel %vm3677_vm7, %v3711_v23, %v3720_v31  ;;  %v4166_v41 = vrot.slane %v9193_v49, 2  ;;  %v3737_v48 = vrot.slane %v3735_v6, 2 }
 0x182   : > { %6918 = vmatmul.mubr.bf16.gmra.mxu0 %v9274_v28  ;;  %v3743_v50 = vrot.slane %v3741_v15, 1  ;;  %v3746_v14 = vrot.slane %v3744_v55, 2  ;;  %v3750_v33 = vshrl.u32 %v9191_v16, 16  ;;  %v9412_v28 = vsel %vm3677_vm7, %v3720_v31, %v3729_v12 }
 0x183   : > { %6921 = vmatprep.mubr.bf16.mxu0 %v9277_v37  ;;  %7006 = vmatpush3.bf16.msra.mxu0 %v7403_v44  ;;  %v9415_v23 = vsel %vm4148_vm0, %v4162_v30, %v4164_v47  ;;  %v3753_v37 = vshll.u32 %v9191_v16, 16  ;;  %v3738_v27 = vor.u32 %v3737_v48, %v3734_v32  ;;  %v3759_v31 = vshrl.u32 %v9193_v49, 16 }
 0x184   : > { %6944 = vmatpush3.bf16.msra.mxu1 %v7385_v35  ;;  %v9418_v35 = vsel %vm4148_vm0, %v4164_v47, %v4166_v41  ;;  %7007 = vmatprep.subr.bf16.mxu0 %v7407_v13  ;;  %v3747_v6 = vor.u32 %v3746_v14, %v3743_v50  ;;  %v3752_v44 = vrot.slane %v3750_v33, 1  ;;  %v3762_v15 = vshll.u32 %v9193_v49, 16  ;;  %v7398_v49 = vld [vmem:[%s10623_s3 + $0x118] sm:$0xff]  }
 0x185   : > { %6945 = vmatprep.subr.bf16.mxu1 %v7390_v8  ;;  %v3755_v30 = vrot.slane %v3753_v37, 2  ;;  %v4168_v55 = vrot.slane %v9211_v57, 2  ;;  %v4170_v16 = vrot.slane %v9223_v5, 2  ;;  %v9433_v47 = vsel %vm3677_vm7, %v3729_v12, %v3738_v27 }
 0x186   : > { %v9436_v32 = vsel %vm3677_vm7, %v3738_v27, %v3747_v6  ;;  %v3761_v48 = vrot.slane %v3759_v31, 1  ;;  %v3768_v50 = vshrl.u32 %v9211_v57, 16  ;;  %v3764_v14 = vrot.slane %v3762_v15, 2 }
 0x187   : > { %6858 = vmatmul.mubr.bf16.gmra.mxu1 %v9209_v39  ;;  %7008 = vmatpush3.bf16.msra.mxu0 %v7407_v13  ;;  %v3756_v39 = vor.u32 %v3755_v30, %v3752_v44  ;;  %v3771_v33 = vshll.u32 %v9211_v57, 16  ;;  %v3777_v37 = vshrl.u32 %v9223_v5, 16  ;;  %v3780_v27 = vshll.u32 %v9223_v5, 16  ;;  %v9453_v13 = vld [vmem:[#allocation2 + $0x80] sm:$0xff]  }
 0x188   : > { %6861 = vmatprep.mubr.bf16.mxu1 %v9217_v52  ;;  %6946 = vmatpush3.bf16.msra.mxu1 %v7390_v8  ;;  %v9443_v52 = vsel %vm4148_vm0, %v4166_v41, %v4168_v55  ;;  %v9446_v8 = vsel %vm4148_vm0, %v4168_v55, %v4170_v16  ;;  %v3770_v12 = vrot.slane %v3768_v50, 1  ;;  %v3765_v41 = vor.u32 %v3764_v14, %v3761_v48 }
 0x189   : > { %6947 = vmatprep.subr.bf16.mxu1 %v7394_v2  ;;  %7097 = vmatprep.subr.bf16.mxu0 %v9424_v0  ;;  %v9456_v44 = vsel %vm3677_vm7, %v3747_v6, %v3756_v39  ;;  %v4172_v31 = vrot.slane %v9225_v24, 2  ;;  %v4174_v30 = vrot.slane %v9227_v58, 2  ;;  %v3773_v57 = vrot.slane %v3771_v33, 2 }
 0x18a   : > { %6922 = vmatmul.mubr.bf16.gmra.mxu0 %v9289_v18  ;;  %v3779_v15 = vrot.slane %v3777_v37, 1  ;;  %v3782_v55 = vrot.slane %v3780_v27, 2  ;;  %v3786_v5 = vshrl.u32 %v9225_v24, 16  ;;  %v7402_v18 = vld [vmem:[%s10623_s3 + $0x110] sm:$0xff]   ;;  %v9466_v6 = vsel %vm3677_vm7, %v3756_v39, %v3765_v41  ;;  %v9477_v27 = vld [vmem:[#allocation2 + $0x88] sm:$0xff]  }
 0x18b   : > { %6925 = vmatprep.mubr.bf16.mxu0 %v9297_v38  ;;  %v9469_v48 = vsel %vm4148_vm0, %v4170_v16, %v4172_v31  ;;  %v9472_v50 = vsel %vm4148_vm0, %v4172_v31, %v4174_v30  ;;  %v3789_v38 = vshll.u32 %v9225_v24, 16  ;;  %v3795_v37 = vshrl.u32 %v9227_v58, 16 }
 0x18c   : > { %6948 = vmatpush3.bf16.msra.mxu1 %v7394_v2  ;;  %v3774_v2 = vor.u32 %v3773_v57, %v3770_v12  ;;  %v3783_v14 = vor.u32 %v3782_v55, %v3779_v15  ;;  %v3788_v33 = vrot.slane %v3786_v5, 1  ;;  %v3798_v16 = vshll.u32 %v9227_v58, 16  ;;  %v7406_v15 = vld [vmem:[%s10623_s3 + $0x108] sm:$0xff]  }
 0x18d   : > { %6949 = vmatprep.subr.bf16.mxu1 %v7398_v49  ;;  %v3791_v39 = vrot.slane %v3789_v38, 2  ;;  %v4176_v59 = vrot.slane %v9270_v63, 2  ;;  %v4178_v31 = vrot.slane %v9453_v13, 2  ;;  %v3804_v57 = vshrl.u32 %v9270_v63, 16 }
 0x18e   : > { %v9486_v24 = vsel %vm3677_vm7, %v3765_v41, %v3774_v2  ;;  %v9489_v12 = vsel %vm3677_vm7, %v3774_v2, %v3783_v14  ;;  %v3800_v5 = vrot.slane %v3798_v16, 2  ;;  %v3807_v41 = vshll.u32 %v9270_v63, 16 }
 0x18f   : > { %6862 = vmatmul.mubr.bf16.gmra.mxu1 %v9243_v46  ;;  %10867 = vst [vmem:[#allocation3_spill] sm:$0xff] %v9489_v12  ;;  %v3797_v46 = vrot.slane %v3795_v37, 1  ;;  %v3792_v55 = vor.u32 %v3791_v39, %v3788_v33  ;;  %v9496_v38 = vsel %vm4148_vm0, %v4174_v30, %v4176_v59  ;;  %v3813_v2 = vshrl.u32 %v9453_v13, 16 }
 0x190   : > { %6865 = vmatprep.mubr.bf16.mxu1 %v9262_v60  ;;  %6950 = vmatpush3.bf16.msra.mxu1 %v7398_v49  ;;  %v9499_v60 = vsel %vm4148_vm0, %v4176_v59, %v4178_v31  ;;  %v3806_v49 = vrot.slane %v3804_v57, 1  ;;  %v3816_v37 = vshll.u32 %v9453_v13, 16  ;;  %v4180_v39 = vrot.slane %v9477_v27, 2 }
 0x191   : > { %6951 = vmatprep.subr.bf16.mxu1 %v7402_v18  ;;  %v9506_v17 = vsel %vm3677_vm7, %v3783_v14, %v3792_v55  ;;  %v3801_v33 = vor.u32 %v3800_v5, %v3797_v46  ;;  %v10668_v30 = vrot.slane %v9479_v19, 2  ;;  %v3809_v59 = vrot.slane %v3807_v41, 2 }
 0x192   : > { %6926 = vmatmul.mubr.bf16.gmra.mxu0 %v9300_v20  ;;  %10868 = vst [vmem:[#allocation40_spill] sm:$0xff] %v9506_v17  ;;  %v3815_v16 = vrot.slane %v3813_v2, 1  ;;  %v3818_v57 = vrot.slane %v3816_v37, 2  ;;  %v3822_v12 = vshrl.u32 %v9477_v27, 16  ;;  %v7410_v20 = vld [vmem:[%s10623_s3 + $0x100] sm:$0xff]   ;;  %v9519_v46 = vsel %vm4148_vm0, %v4178_v31, %v4180_v39 }
 0x193   : > { %6929 = vmatprep.mubr.bf16.mxu0 %v9305_v29  ;;  %v9516_v14 = vsel %vm3677_vm7, %v3792_v55, %v3801_v33  ;;  %v9524_v29 = vsel %vm4148_vm0, %v4180_v39, %v10668_v30  ;;  %v3810_v5 = vor.u32 %v3809_v59, %v3806_v49  ;;  %v3831_v37 = vshrl.u32 %v9479_v19, 16  ;;  %v9528_v17 = vld [vmem:[#allocation2 + $0x98] ss:$0 sps:$4 sm:$0x33]  }
 0x194   : > { %6952 = vmatpush3.bf16.msra.mxu1 %v7402_v18  ;;  %10869 = vst [vmem:[#allocation41_spill] sm:$0xff] %v9516_v14  ;;  %10870 = vst [vmem:[#allocation42_spill] sm:$0xff] %v9524_v29  ;;  %v3825_v18 = vshll.u32 %v9477_v27, 16  ;;  %v3819_v41 = vor.u32 %v3818_v57, %v3815_v16  ;;  %v3824_v2 = vrot.slane %v3822_v12, 1  ;;  %v10871_v55 = vrot.slane %v8969_v22, 1 }
 0x195   : > { %6953 = vmatprep.subr.bf16.mxu1 %v7406_v15  ;;  %v10872_v31 = vrot.slane %v8937_v9, 1  ;;  %v3369_v39 = vrot.slane %v9453_v13, 1  ;;  %v3834_v29 = vshll.u32 %v9479_v19, 16  ;;  %v9539_v12 = vsel %vm3677_vm7, %v3801_v33, %v3810_v5  ;;  %v9547_v9 = vld [vmem:[%s10623_s3 + $0x1b8] sm:$0xff]  }
 0x196   : > { %v3827_v30 = vrot.slane %v3825_v18, 2  ;;  %v9542_v49 = vsel %vm3677_vm7, %v3810_v5, %v3819_v41  ;;  %v10873_v59 = vrot.slane %v9270_v63, 1  ;;  %v10874_v16 = vrot.slane %v9227_v58, 1 }
 0x197   : > { %6866 = vmatmul.mubr.bf16.gmra.mxu1 %v9285_v53  ;;  %v2895_v14 = vsel %vm2876_vm5, %v10872_v31, %v10871_v55  ;;  %v3833_v53 = vrot.slane %v3831_v37, 1  ;;  %v3836_v13 = vrot.slane %v3834_v29, 2  ;;  %v3840_v33 = vshrl.u32 %v9528_v17, 16 }
 0x198   : > { %6869 = vmatprep.mubr.bf16.mxu1 %v2895_v14  ;;  %6954 = vmatpush3.bf16.msra.mxu1 %v7406_v15  ;;  %v3828_v22 = vor.u32 %v3827_v30, %v3824_v2  ;;  %v3368_v15 = vsel %vm2876_vm5, %v10874_v16, %v10873_v59  ;;  %v10875_v57 = vmov %v10873_v59  ;;  %v3843_v30 = vshll.u32 %v9528_v17, 16  ;;  %v7421_v16 = vld [vmem:[%s10623_s3 + $0x1d0] sm:$0xff]  }
 0x199   : > { %6955 = vmatprep.subr.bf16.mxu1 %v7410_v20  ;;  %v3370_v14 = vsel %vm2876_vm5, %v10875_v57, %v3369_v39  ;;  %v3837_v5 = vor.u32 %v3836_v13, %v3833_v53  ;;  %v3842_v29 = vrot.slane %v3840_v33, 1  ;;  %v3371_v37 = vrot.slane %v9477_v27, 1  ;;  %v7408_v53 = vld [vmem:[#allocation2 + $0x98] ss:$0 sps:$4 sm:$0x11]   ;;  %v9621_v13 = vld [vmem:[#allocation2 + $0x48] sm:$0xff]  }
 0x19a   : > { %6930 = vmatmul.mubr.bf16.gmra.mxu0 %v3368_v15  ;;  %v9559_v18 = vsel %vm3677_vm7, %v3819_v41, %v3828_v22  ;;  %v3845_v2 = vrot.slane %v3843_v30, 2  ;;  %v3373_v63 = vrot.slane %v9479_v19, 1  ;;  %v9631_v33 = vld [vmem:[#allocation2 + $0x58] sm:$0xff]   ;;  %v9638_v30 = vld [vmem:[#allocation2 + $0x70] sm:$0xff]  }
 0x19b   : > { %6933 = vmatprep.mubr.bf16.mxu0 %v3370_v14  ;;  %v9564_v58 = vsel %vm3677_vm7, %v3828_v22, %v3837_v5  ;;  %v9634_v14 = vld [vmem:[#allocation2 + $0x60] sm:$0xff]  }
 0x19c   : > { %6956 = vmatpush3.bf16.msra.mxu1 %v7410_v20  ;;  %v3846_v41 = vor.u32 %v3845_v2, %v3842_v29  ;;  %v3372_v20 = vsel %vm2876_vm5, %v3369_v39, %v3371_v37  ;;  %v3374_v31 = vsel %vm2876_vm5, %v3371_v37, %v3373_v63  ;;  %v9617_v39 = vld [vmem:[#allocation2 + $0x40] sm:$0xff]  }
 0x19d   : > { %7045 = vmatprep.subr.bf16.mxu1 %v9547_v9 }
 0x19e   : > { %v9571_v55 = vsel %vm3677_vm7, %v3837_v5, %v3846_v41  ;;  %v9636_v5 = vld [vmem:[#allocation2 + $0x68] sm:$0xff]   ;;  %v9646_v41 = vld [vmem:[#allocation2 + $0x80] sm:$0xff]  }
 0x19f   : > { %6870 = vmatmul.mubr.bf16.gmra.mxu1 %v9251_v3  ;;  %v3375_v3 = vrot.slane %v7408_v53, 1  ;;  %v5432_v53 = vrot.slane %v9617_v39, 3 }
 0x1a0   : > { %6873 = vmatprep.mubr.bf16.mxu1 %v9257_v7  ;;  %v7413_v7 = vld [vmem:[%s10623_s3 + $0x1f0] sm:$0xff]  }
 0x1a1   : > { %v3376_v27 = vsel %vm2876_vm5, %v3373_v63, %v3375_v3  ;;  %v9644_v63 = vld [vmem:[#allocation2 + $0x78] sm:$0xff]   ;;  %v9656_v3 = vld [vmem:[#allocation2 + $0x88] sm:$0xff]  }
 0x1a2   : > { %6934 = vmatmul.mubr.bf16.gmra.mxu0 %v3372_v20 }
 0x1a3   : > { %6937 = vmatprep.mubr.bf16.mxu0 %v3374_v31 }
 0x1a7   : > { %6874 = vmatmul.mubr.bf16.gmra.mxu1 %v9265_v40  ;;  %v7415_v40 = vld [vmem:[%s10623_s3 + $0x1e8] sm:$0xff]  }
 0x1a8   : > { %6877 = vmatprep.mubr.bf16.mxu1 %v9268_v54  ;;  %v7417_v54 = vld [vmem:[%s10623_s3 + $0x1e0] sm:$0xff]  }
 0x1aa   : > { %6938 = vmatmul.mubr.bf16.gmra.mxu0 %v3376_v27  ;;  %v9658_v27 = vld [vmem:[#allocation2 + $0xa0] ss:$0 sps:$4 sm:$0x77]  }
 0x1ab   : > { %7009 = vmatprep.mubr.bf16.mxu0 %v9335_v11  ;;  %v5399_v11 = vld [vmem:[#allocation2 + $0x10] sm:$0x8] }
 0x1af   : > { %6878 = vmatmul.mubr.bf16.gmra.mxu1 %v9292_v21 }
 0x1b0   : > { %6881 = vmatprep.mubr.bf16.mxu1 %v9308_v43  ;;  %v9599_v43 = vld [vmem:[#allocation2 + $0x18] sm:$0xff]  }
 0x1b1   : > { %v5422_v59 = vrot.slane %v9599_v43, 3 }
 0x1b2   : > { %7010 = vmatmul.mubr.bf16.vlgmr.msra.gmra.mxu0 %v9341_v1  ;;  %v9606_v1 = vld [vmem:[#allocation2 + $0x14] sm:$0xf] }
 0x1b3   : > { %7098 = vmatpush3.bf16.msra.mxu0 %v9424_v0  ;;  %7013 = vmatprep.mubr.bf16.mxu0 %v9344_v10  ;;  %v9608_v10 = vld [vmem:[#allocation2 + $0x20] sm:$0xff]   ;;  %v9612_v0 = vld [vmem:[#allocation2 + $0x30] sm:$0xff]   ;;  %v6389_v22 = vcombine.low %v5399_v11, %v9606_v1 }
 0x1b4   : > { %7099 = vmatprep.subr.bf16.mxu0 %v7413_v7  ;;  %v5428_v2 = vrot.slane %v9612_v0, 3 }
 0x1b5   : > { %v5421_v57 = vrot.slane %v6389_v22, 3 }
 0x1b7   : > { %6882 = vmatmul.mubr.bf16.gmra.mxu1 %v9312_v36  ;;  %7100 = vmatpush3.bf16.msra.mxu0 %v7413_v7  ;;  %v7419_v36 = vld [vmem:[%s10623_s3 + $0x1d8] sm:$0xff]   ;;  %v9649_v20 = vsel %vm5420_vm10, %v5421_v57, %v5422_v59 }
 0x1b8   : > { %6885 = vmatprep.mubr.bf16.mxu1 %v9315_v34  ;;  %7101 = vmatprep.subr.bf16.mxu0 %v7415_v40  ;;  %10876 = vst [vmem:[#allocation43_spill] sm:$0xff] %v9649_v20  ;;  %v5448_v20 = vrot.slane %v9646_v41, 3 }
 0x1b9   : > { %v9596_v21 = vpop.f32.mrf.mxu0 }
 0x1ba   : > { %7014 = vmatmul.mubr.bf16.gmra.mxu0 %v9362_v56  ;;  %v9610_v56 = vld [vmem:[#allocation2 + $0x28] sm:$0xff]  }
 0x1bb   : > { %7017 = vmatprep.mubr.bf16.mxu0 %v9365_v42  ;;  %7102 = vmatpush3.bf16.msra.mxu0 %v7415_v40  ;;  %v9604_v34 = vpop.f32.mrf.mxu0  ;;  %v9614_v42 = vld [vmem:[#allocation2 + $0x38] sm:$0xff]   ;;  %v5426_v29 = vrot.slane %v9610_v56, 3  ;;  %v5434_v40 = vrot.slane %v9621_v13, 3 }
 0x1bc   : > { %7103 = vmatprep.subr.bf16.mxu0 %v7417_v54  ;;  %v5430_v37 = vrot.slane %v9614_v42, 3 }
 0x1bd   : > { %v9627_v15 = vpop.f32.mrf.mxu0  ;;  %v9664_v7 = vsel %vm5420_vm10, %v5426_v29, %v5428_v2 }
 0x1be   : > { %10879 = vst [vmem:[#allocation46_spill] sm:$0xff] %v9664_v7  ;;  %v9677_v22 = vsel %vm5420_vm10, %v5428_v2, %v5430_v37  ;;  %v9688_v7 = vsel %vm5420_vm10, %v5432_v53, %v5434_v40  ;;  %v5444_v2 = vrot.slane %v9638_v30, 3 }
 0x1bf   : > { %6886 = vmatmul.mubr.bf16.gmra.mxu1 %v9328_v62  ;;  %7104 = vmatpush3.bf16.msra.mxu0 %v7417_v54  ;;  %v9629_v62 = vld [vmem:[#allocation2 + $0x50] sm:$0xff]   ;;  %v9670_v11 = vpop.f32.mrf.mxu0  ;;  %10880 = vst [vmem:[#allocation47_spill] sm:$0xff] %v9677_v22  ;;  %10882 = vst [vmem:[#allocation49_spill] sm:$0xff] %v9688_v7  ;;  %v5446_v22 = vrot.slane %v9644_v63, 3 }
 0x1c0   : > { %6957 = vmatprep.mubr.bf16.mxu1 %v9359_v4  ;;  %7105 = vmatprep.subr.bf16.mxu0 %v7419_v36  ;;  %v5424_v4 = vrot.slane %v9608_v10, 3  ;;  %v7414_v54 = vld [vmem:[%s10623_s3 + $0x1b0] sm:$0xff]   ;;  %v5436_v57 = vrot.slane %v9629_v62, 3 }
 0x1c2   : > { %7018 = vmatmul.mubr.bf16.gmra.mxu0 %v9389_v26  ;;  %v9652_v31 = vsel %vm5420_vm10, %v5422_v59, %v5424_v4  ;;  %v9661_v26 = vsel %vm5420_vm10, %v5424_v4, %v5426_v29  ;;  %v9680_v59 = vsel %vm5420_vm10, %v5430_v37, %v5432_v53  ;;  %v5438_v4 = vrot.slane %v9631_v33, 3  ;;  %v7423_v29 = vld [vmem:[%s10623_s3 + $0x1c8] sm:$0xff]  }
 0x1c3   : > { %10877 = vst [vmem:[#allocation44_spill] sm:$0xff] %v9652_v31  ;;  %7021 = vmatprep.mubr.bf16.mxu0 %v9392_v45  ;;  %7106 = vmatpush3.bf16.msra.mxu0 %v7419_v36  ;;  %10878 = vst [vmem:[#allocation45_spill] sm:$0xff] %v9661_v26  ;;  %v9672_v45 = vld [vmem:[#allocation2 + $0x90] sm:$0xff]   ;;  %v9674_v36 = vld [vmem:[#allocation2 + $0x98] sm:$0xff]   ;;  %v5440_v26 = vrot.slane %v9634_v14, 3  ;;  %v5442_v31 = vrot.slane %v9636_v5, 3  ;;  %v9695_v37 = vsel %vm5420_vm10, %v5434_v40, %v5436_v57 }
 0x1c4   : > { %7107 = vmatprep.subr.bf16.mxu0 %v7421_v16  ;;  %10881 = vst [vmem:[#allocation48_spill] sm:$0xff] %v9680_v59  ;;  %10883 = vst [vmem:[#allocation50_spill] sm:$0xff] %v9695_v37  ;;  %v9698_v59 = vsel %vm5420_vm10, %v5436_v57, %v5438_v4  ;;  %v5450_v40 = vrot.slane %v9656_v3, 3  ;;  %v7416_v57 = vld [vmem:[%s10623_s3 + $0x1a8] sm:$0xff]  }
 0x1c5   : > { %10884 = vst [vmem:[#allocation51_spill] sm:$0xff] %v9698_v59  ;;  %v9705_v53 = vsel %vm5420_vm10, %v5438_v4, %v5440_v26  ;;  %v9708_v7 = vsel %vm5420_vm10, %v5440_v26, %v5442_v31  ;;  %v9723_v4 = vsel %vm5420_vm10, %v5446_v22, %v5448_v20  ;;  %v5452_v26 = vrot.slane %v9672_v45, 3 }
 0x1c6   : > { %10885 = vst [vmem:[#allocation52_spill] sm:$0xff] %v9705_v53  ;;  %10886 = vst [vmem:[#allocation53_spill] sm:$0xff] %v9708_v7  ;;  %v9731_v7 = vsel %vm5420_vm10, %v5448_v20, %v5450_v40  ;;  %v7418_v20 = vld [vmem:[%s10623_s3 + $0x1a0] sm:$0xff]  }
 0x1c7   : > { %6958 = vmatmul.mubr.bf16.vlgmr.msra.gmra.mxu1 %v9379_v51  ;;  %v9711_v51 = vsel %vm5420_vm10, %v5442_v31, %v5444_v2  ;;  %7108 = vmatpush3.bf16.msra.mxu0 %v7421_v16  ;;  %10889 = vst [vmem:[#allocation56_spill] sm:$0xff] %v9723_v4  ;;  %v5454_v31 = vrot.slane %v9674_v36, 3  ;;  %10890 = vst [vmem:[#allocation57_spill] sm:$0xff] %v9731_v7  ;;  %v5456_v16 = vrot.slane %v9658_v27, 3  ;;  %v4980_v7 = vshll.u32 %v9610_v56, 16 }
 0x1c8   : > { %6961 = vmatprep.mubr.bf16.mxu1 %v9382_v25  ;;  %7046 = vmatpush3.bf16.msra.mxu1 %v9547_v9  ;;  %10887 = vst [vmem:[#allocation54_spill] sm:$0xff] %v9711_v51  ;;  %v9717_v25 = vpop.f32.mrf.mxu0  ;;  %v9720_v9 = vsel %vm5420_vm10, %v5444_v2, %v5446_v22  ;;  %v7425_v51 = vld [vmem:[%s10623_s3 + $0x1c0] sm:$0xff]   ;;  %v9738_v22 = vsel %vm5420_vm10, %v5450_v40, %v5452_v26  ;;  %v9755_v40 = vld [vmem:[%s10623_s3 + $0x238] sm:$0xff]  }
 0x1c9   : > { %7047 = vmatprep.subr.bf16.mxu1 %v7414_v54  ;;  %10888 = vst [vmem:[#allocation55_spill] sm:$0xff] %v9720_v9  ;;  %7109 = vmatprep.subr.bf16.mxu0 %v7423_v29  ;;  %10891 = vst [vmem:[#allocation58_spill] sm:$0xff] %v9738_v22  ;;  %v9741_v4 = vsel %vm5420_vm10, %v5452_v26, %v5454_v31  ;;  %v9745_v9 = vsel %vm5420_vm10, %v5454_v31, %v5456_v16  ;;  %v4465_v26 = vld [vmem:[#allocation2 + $0x10] sm:$0xc]  ;;  %v4977_v22 = vshrl.u32 %v9610_v56, 16 }
 0x1ca   : > { %7022 = vmatmul.mubr.bf16.gmra.mxu0 %v9415_v23  ;;  %v9735_v2 = vpop.f32.mrf.mxu0  ;;  %10892 = vst [vmem:[#allocation59_spill] sm:$0xff] %v9741_v4  ;;  %10893 = vst [vmem:[#allocation60_spill] sm:$0xff] %v9745_v9 }
 0x1cb   : > { %7025 = vmatprep.mubr.bf16.mxu0 %v9418_v35  ;;  %7110 = vmatpush3.bf16.msra.mxu0 %v7423_v29  ;;  %v4979_v37 = vrot.slane %v4977_v22, 2  ;;  %v4998_v22 = vshll.u32 %v9614_v42, 16 }
 0x1cc   : > { %7048 = vmatpush3.bf16.msra.mxu1 %v7414_v54  ;;  %v9750_v23 = vpop.f32.mrf.mxu0  ;;  %7111 = vmatprep.subr.bf16.mxu0 %v7425_v51  ;;  %v7420_v54 = vld [vmem:[%s10623_s3 + $0x198] sm:$0xff]  }
 0x1cd   : > { %7049 = vmatprep.subr.bf16.mxu1 %v7416_v57 }
 0x1ce   : > { %v9758_v35 = vpop.f32.mrf.mxu0 }
 0x1cf   : > { %6962 = vmatmul.mubr.bf16.gmra.mxu1 %v9402_v61  ;;  %7112 = vmatpush3.bf16.msra.mxu0 %v7425_v51  ;;  %v7422_v61 = vld [vmem:[%s10623_s3 + $0x190] sm:$0xff]  }
 0x1d0   : > { %6965 = vmatprep.mubr.bf16.mxu1 %v9412_v28  ;;  %7050 = vmatpush3.bf16.msra.mxu1 %v7416_v57 }
 0x1d1   : > { %7051 = vmatprep.subr.bf16.mxu1 %v7418_v20  ;;  %7149 = vmatprep.subr.bf16.mxu0 %v9755_v40  ;;  %v9766_v29 = vpop.f32.mrf.mxu0 }
 0x1d2   : > { %7026 = vmatmul.mubr.bf16.gmra.mxu0 %v9443_v52  ;;  %v7424_v52 = vld [vmem:[%s10623_s3 + $0x188] sm:$0xff]  }
 0x1d3   : > { %7029 = vmatprep.mubr.bf16.mxu0 %v9446_v8  ;;  %v9772_v28 = vpop.f32.mrf.mxu0 }
 0x1d4   : > { %7052 = vmatpush3.bf16.msra.mxu1 %v7418_v20 }
 0x1d5   : > { %7053 = vmatprep.subr.bf16.mxu1 %v7420_v54  ;;  %v9776_v51 = vpop.f32.mrf.mxu0 }
 0x1d7   : > { %6966 = vmatmul.mubr.bf16.gmra.mxu1 %v9433_v47  ;;  %v9783_v8 = vpop.f32.mrf.mxu0  ;;  %v7429_v47 = vld [vmem:[%s10623_s3 + $0x180] sm:$0xff]  }
 0x1d8   : > { %6969 = vmatprep.mubr.bf16.mxu1 %v9436_v32  ;;  %7054 = vmatpush3.bf16.msra.mxu1 %v7420_v54 }
 0x1d9   : > { %7055 = vmatprep.subr.bf16.mxu1 %v7422_v61 }
 0x1da   : > { %7030 = vmatmul.mubr.bf16.gmra.mxu0 %v9469_v48 }
 0x1db   : > { %7033 = vmatprep.mubr.bf16.mxu0 %v9472_v50 }
 0x1dc   : > { %7056 = vmatpush3.bf16.msra.mxu1 %v7422_v61 }
 0x1dd   : > { %7057 = vmatprep.subr.bf16.mxu1 %v7424_v52 }
 0x1df   : > { %6970 = vmatmul.mubr.bf16.gmra.mxu1 %v9456_v44  ;;  %v6751_v32 = vpop.f32.mrf.mxu1  ;;  %v9790_v57 = vpop.f32.mrf.mxu0 }
 0x1e0   : > { %6973 = vmatprep.mubr.bf16.mxu1 %v9466_v6  ;;  %7058 = vmatpush3.bf16.msra.mxu1 %v7424_v52  ;;  %v9793_v48 = vadd.f32 %v9596_v21, %v6751_v32  ;;  %v9808_v21 = vcombine.low %v4465_v26, %v9606_v1  ;;  %v10895_v52 = vld [vmem:[#allocation3_spill] sm:$0xff] }
 0x1e1   : > { %7059 = vmatprep.subr.bf16.mxu1 %v7429_v47  ;;  %v2469_v50 = vpop.f32.mrf.mxu1  ;;  %v9795_v31 = vpop.f32.mrf.mxu0 }
 0x1e2   : > { %7034 = vmatmul.mubr.bf16.gmra.mxu0 %v9496_v38  ;;  %v9799_v16 = vadd.f32 %v9604_v34, %v2469_v50  ;;  %v4962_v34 = vshll.u32 %v9599_v43, 16  ;;  %v4954_v1 = vshll.u32 %v9808_v21, 16 }
 0x1e3   : > { %7037 = vmatprep.mubr.bf16.mxu0 %v9499_v60  ;;  %v6752_v44 = vpop.f32.mrf.mxu1  ;;  %v9802_v6 = vpop.f32.mrf.mxu0  ;;  %v4959_v60 = vshrl.u32 %v9599_v43, 16 }
 0x1e4   : > { %7060 = vmatpush3.bf16.msra.mxu1 %v7429_v47  ;;  %v9805_v20 = vadd.f32 %v9627_v15, %v6752_v44  ;;  %v4951_v15 = vshrl.u32 %v9808_v21, 16  ;;  %v4964_v50 = vrot.slane %v4962_v34, 3  ;;  %v4956_v26 = vrot.slane %v4954_v1, 3 }
 0x1e5   : > { %7201 = vmatprep.subr.bf16.mxu1 %v9755_v40  ;;  %v2472_v54 = vpop.f32.mrf.mxu1  ;;  %v9811_v61 = vpop.f32.mrf.mxu0  ;;  %v4961_v32 = vrot.slane %v4959_v60, 2  ;;  %v4968_v44 = vshrl.u32 %v9608_v10, 16  ;;  %v4184_v34 = vrot.slane %v9528_v17, 2 }
 0x1e6   : > { %v9815_v38 = vadd.f32 %v9670_v11, %v2472_v54  ;;  %v4953_v11 = vrot.slane %v4951_v15, 2  ;;  %v4971_v54 = vshll.u32 %v9608_v10, 16 }
 0x1e7   : > { %6974 = vmatmul.mubr.bf16.gmra.mxu1 %v9486_v24  ;;  %v10896_v24 = vld [vmem:[#allocation42_spill] sm:$0xff]  ;;  %v4965_v4 = vor.u32 %v4964_v50, %v4961_v32  ;;  %v4970_v32 = vrot.slane %v4968_v44, 2  ;;  %v4986_v44 = vshrl.u32 %v9612_v0, 16 }
 0x1e8   : > { %10894 = vst [vmem:[#allocation61_spill] sm:$0xff] %v9815_v38  ;;  %6977 = vmatprep.mubr.bf16.mxu1 %v10895_v52  ;;  %v9822_v47 = vpop.f32.mrf.mxu0  ;;  %v10897_v52 = vld [vmem:[#allocation40_spill] sm:$0xff]  ;;  %v4957_v1 = vor.u32 %v4956_v26, %v4953_v11  ;;  %v4973_v50 = vrot.slane %v4971_v54, 3  ;;  %v4982_v38 = vrot.slane %v4980_v7, 3  ;;  %v4989_v54 = vshll.u32 %v9612_v0, 16 }
 0x1e9   : > { %v4995_v7 = vshrl.u32 %v9614_v42, 16 }
 0x1ea   : > { %7038 = vmatmul.mubr.bf16.gmra.mxu0 %v9519_v46  ;;  %v9828_v9 = vpop.f32.mrf.mxu0  ;;  %v10898_v46 = vld [vmem:[#allocation41_spill] sm:$0xff]  ;;  %v4966_v17 = vsel %vm4949_vm11, %v4957_v1, %v4965_v4  ;;  %v4974_v26 = vor.u32 %v4973_v50, %v4970_v32  ;;  %v5000_v32 = vrot.slane %v4998_v22, 3  ;;  %v5016_v22 = vshll.u32 %v9621_v13, 16 }
 0x1eb   : > { %7041 = vmatprep.mubr.bf16.mxu0 %v10896_v24  ;;  %v10899_v24 = vrot.slane %v9479_v19, 2 }
 0x1ec   : > { %v9841_v59 = vpop.f32.mrf.mxu0 }
 0x1ed   : > { %v4185_v53 = vsel %vm4148_vm0, %v10899_v24, %v4184_v34  ;;  %v9864_v34 = vld [vmem:[%s10623_s3 + $0x230] sm:$0xff]   ;;  %v4991_v24 = vrot.slane %v4989_v54, 3 }
 0x1ef   : > { %6978 = vmatmul.mubr.bf16.gmra.mxu1 %v10897_v52 }
 0x1f0   : > { %6981 = vmatprep.mubr.bf16.mxu1 %v10898_v46  ;;  %v6755_v60 = vpop.f32.mrf.mxu1 }
 0x1f1   : > { %v9836_v15 = vadd.f32 %v9717_v25, %v6755_v60  ;;  %v9852_v60 = vpop.f32.mrf.mxu0 }
 0x1f2   : > { %v2485_v52 = vpop.f32.mrf.mxu1  ;;  %7042 = vmatmul.mubr.bf16.gmra.mxu0 %v4185_v53 }
 0x1f3   : > { %v9844_v46 = vadd.f32 %v9735_v2, %v2485_v52  ;;  %7113 = vmatprep.mubr.bf16.mxu0 %v4966_v17  ;;  %v4983_v2 = vor.u32 %v4982_v38, %v4979_v37 }
 0x1f4   : > { %v6756_v25 = vpop.f32.mrf.mxu1 }
 0x1f5   : > { %v9848_v11 = vadd.f32 %v9750_v23, %v6756_v25  ;;  %v4984_v52 = vsel %vm4949_vm11, %v4974_v26, %v4983_v2 }
 0x1f6   : > { %v2488_v19 = vpop.f32.mrf.mxu1 }
 0x1f7   : > { %6982 = vmatmul.mubr.bf16.gmra.mxu1 %v9539_v12  ;;  %v9856_v53 = vadd.f32 %v9758_v35, %v2488_v19  ;;  %v4975_v12 = vsel %vm4949_vm11, %v4965_v4, %v4974_v26  ;;  %v4988_v35 = vrot.slane %v4986_v44, 2  ;;  %v9881_v4 = vld [vmem:[%s10623_s3 + $0x228] sm:$0xff]   ;;  %v5004_v19 = vshrl.u32 %v9617_v39, 16 }
 0x1f8   : > { %6985 = vmatprep.mubr.bf16.mxu1 %v9542_v49  ;;  %v9870_v37 = vpop.f32.mrf.mxu0  ;;  %v4997_v49 = vrot.slane %v4995_v7, 2  ;;  %v5007_v26 = vshll.u32 %v9617_v39, 16  ;;  %v5013_v7 = vshrl.u32 %v9621_v13, 16 }
 0x1f9   : > { %v6759_v23 = vpop.f32.mrf.mxu1  ;;  %v4992_v25 = vor.u32 %v4991_v24, %v4988_v35 }
 0x1fa   : > { %v9867_v1 = vadd.f32 %v9766_v29, %v6759_v23  ;;  %7114 = vmatmul.mubr.bf16.vlgmr.msra.gmra.mxu0 %v4975_v12  ;;  %v9888_v44 = vpop.f32.mrf.mxu0  ;;  %v5001_v54 = vor.u32 %v5000_v32, %v4997_v49  ;;  %v9902_v23 = vld [vmem:[%s10623_s3 + $0x220] sm:$0xff]   ;;  %v5006_v12 = vrot.slane %v5004_v19, 2  ;;  %v5009_v35 = vrot.slane %v5007_v26, 3 }
 0x1fb   : > { %v2501_v38 = vpop.f32.mrf.mxu1  ;;  %7150 = vmatpush3.bf16.msra.mxu0 %v9755_v40  ;;  %7117 = vmatprep.mubr.bf16.mxu0 %v4984_v52  ;;  %v5018_v52 = vrot.slane %v5016_v22, 3  ;;  %v4612_v49 = vrot.slane %v9808_v21, 2  ;;  %v5031_v21 = vshrl.u32 %v9631_v33, 16  ;;  %v9931_v22 = vld [vmem:[%s10623_s3 + $0x210] sm:$0xff]  }
 0x1fc   : > { %v9875_v50 = vadd.f32 %v9772_v28, %v2501_v38  ;;  %7151 = vmatprep.subr.bf16.mxu0 %v9864_v34  ;;  %v9905_v24 = vpop.f32.mrf.mxu0  ;;  %v5015_v38 = vrot.slane %v5013_v7, 2  ;;  %v5010_v32 = vor.u32 %v5009_v35, %v5006_v12  ;;  %v4615_v7 = vrot.slane %v9608_v10, 2 }
 0x1fd   : > { %v6760_v29 = vpop.f32.mrf.mxu1  ;;  %v5033_v10 = vrot.slane %v5031_v21, 2  ;;  %v5043_v21 = vshll.u32 %v9634_v14, 16 }
 0x1fe   : > { %v9884_v17 = vadd.f32 %v9776_v51, %v6760_v29  ;;  %v9917_v29 = vpop.f32.mrf.mxu0  ;;  %v5019_v26 = vor.u32 %v5018_v52, %v5015_v38  ;;  %v4617_v38 = vrot.slane %v9610_v56, 2 }
 0x1ff   : > { %6986 = vmatmul.mubr.bf16.gmra.mxu1 %v9559_v18  ;;  %v2504_v28 = vpop.f32.mrf.mxu1  ;;  %7152 = vmatpush3.bf16.msra.mxu0 %v9864_v34  ;;  %v4993_v18 = vsel %vm4949_vm11, %v4983_v2, %v4992_v25  ;;  %v9915_v2 = vld [vmem:[%s10623_s3 + $0x218] sm:$0xff]  }
 0x200   : > { %6989 = vmatprep.mubr.bf16.mxu1 %v9564_v58  ;;  %v9895_v51 = vadd.f32 %v9783_v8, %v2504_v28  ;;  %7153 = vmatprep.subr.bf16.mxu0 %v9881_v4  ;;  %v4613_v58 = vrot.slane %v9599_v43, 2  ;;  %v5002_v8 = vsel %vm4949_vm11, %v4992_v25, %v5001_v54  ;;  %v5022_v43 = vshrl.u32 %v9629_v62, 16 }
 0x201   : > { %v5025_v25 = vshll.u32 %v9629_v62, 16  ;;  %v5034_v28 = vshll.u32 %v9631_v33, 16  ;;  %v5020_v52 = vsel %vm4949_vm11, %v5010_v32, %v5019_v26 }
 0x202   : > { %10900 = vst [vmem:[#allocation3_spill] sm:$0xff] %v9895_v51  ;;  %7118 = vmatmul.mubr.bf16.gmra.mxu0 %v4993_v18  ;;  %v4614_v19 = vsel %vm4148_vm0, %v4612_v49, %v4613_v58  ;;  %v5024_v12 = vrot.slane %v5022_v43, 2 }
 0x203   : > { %7121 = vmatprep.mubr.bf16.mxu0 %v5002_v8  ;;  %7154 = vmatpush3.bf16.msra.mxu0 %v9881_v4  ;;  %v5027_v35 = vrot.slane %v5025_v25, 3  ;;  %v5036_v49 = vrot.slane %v5034_v28, 3  ;;  %v4618_v28 = vsel %vm4148_vm0, %v4615_v7, %v4617_v38 }
 0x204   : > { %7155 = vmatprep.subr.bf16.mxu0 %v9902_v23 }
 0x205   : > { %v5028_v25 = vor.u32 %v5027_v35, %v5024_v12 }
 0x207   : > { %6990 = vmatmul.mubr.bf16.gmra.mxu1 %v9571_v55  ;;  %7156 = vmatpush3.bf16.msra.mxu0 %v9902_v23  ;;  %v5011_v55 = vsel %vm4949_vm11, %v5001_v54, %v5010_v32  ;;  %v4616_v54 = vsel %vm4148_vm0, %v4613_v58, %v4615_v7  ;;  %v5040_v32 = vshrl.u32 %v9634_v14, 16 }
 0x208   : > { %7061 = vmatprep.mubr.bf16.mxu1 %v4614_v19  ;;  %7157 = vmatprep.subr.bf16.mxu0 %v9915_v2 }
 0x209   : > { %v9934_v18 = vpop.f32.mrf.mxu0 }
 0x20a   : > { %7122 = vmatmul.mubr.bf16.gmra.mxu0 %v5011_v55  ;;  %v5037_v55 = vor.u32 %v5036_v49, %v5033_v10  ;;  %v5029_v10 = vsel %vm4949_vm11, %v5019_v26, %v5028_v25  ;;  %v5042_v49 = vrot.slane %v5040_v32, 2 }
 0x20b   : > { %v6763_v8 = vpop.f32.mrf.mxu1  ;;  %7125 = vmatprep.mubr.bf16.mxu0 %v5020_v52  ;;  %v9941_v51 = vpop.f32.mrf.mxu0  ;;  %7158 = vmatpush3.bf16.msra.mxu0 %v9915_v2 }
 0x20c   : > { %v9939_v19 = vadd.f32 %v9790_v57, %v6763_v8  ;;  %7159 = vmatprep.subr.bf16.mxu0 %v9931_v22  ;;  %v9954_v57 = vld [vmem:[%s10623_s3 + $0x208] sm:$0xff]   ;;  %v5049_v8 = vshrl.u32 %v9636_v5, 16 }
 0x20d   : > { %v2517_v43 = vpop.f32.mrf.mxu1  ;;  %v9963_v35 = vpop.f32.mrf.mxu0 }
 0x20e   : > { %v9947_v56 = vadd.f32 %v9795_v31, %v2517_v43  ;;  %v5052_v31 = vshll.u32 %v9636_v5, 16  ;;  %v4619_v43 = vrot.slane %v9612_v0, 2  ;;  %v4621_v0 = vrot.slane %v9614_v42, 2 }
 0x20f   : > { %7062 = vmatmul.mubr.bf16.vlgmr.msra.gmra.mxu1 %v4616_v54  ;;  %v6764_v58 = vpop.f32.mrf.mxu1  ;;  %7160 = vmatpush3.bf16.msra.mxu0 %v9931_v22  ;;  %v5045_v54 = vrot.slane %v5043_v21, 3  ;;  %v5058_v21 = vshrl.u32 %v9638_v30, 16  ;;  %v5061_v42 = vshll.u32 %v9638_v30, 16 }
 0x210   : > { %7065 = vmatprep.mubr.bf16.mxu1 %v4618_v28  ;;  %7209 = vmatpush3.bf16.msra.mxu1 %v9755_v40  ;;  %v9961_v12 = vadd.f32 %v9802_v6, %v6764_v58  ;;  %v9976_v40 = vld [vmem:[%s10623_s3 + $0x200] sm:$0xff]   ;;  %v5038_v6 = vsel %vm4949_vm11, %v5028_v25, %v5037_v55  ;;  %v5051_v28 = vrot.slane %v5049_v8, 2  ;;  %v5054_v58 = vrot.slane %v5052_v31, 3 }
 0x211   : > { %v2520_v52 = vpop.f32.mrf.mxu1  ;;  %7202 = vmatprep.subr.bf16.mxu1 %v9864_v34  ;;  %7161 = vmatprep.subr.bf16.mxu0 %v9954_v57  ;;  %v4620_v26 = vsel %vm4148_vm0, %v4617_v38, %v4619_v43  ;;  %v5046_v32 = vor.u32 %v5045_v54, %v5042_v49  ;;  %v5067_v31 = vshrl.u32 %v9644_v63, 16  ;;  %v4623_v54 = vrot.slane %v9617_v39, 2 }
 0x212   : > { %v9969_v7 = vadd.f32 %v9811_v61, %v2520_v52  ;;  %7126 = vmatmul.mubr.bf16.gmra.mxu0 %v5029_v10  ;;  %v9981_v61 = vpop.f32.mrf.mxu0  ;;  %v5055_v8 = vor.u32 %v5054_v58, %v5051_v28  ;;  %v5070_v52 = vshll.u32 %v9644_v63, 16  ;;  %v5063_v58 = vrot.slane %v5061_v42, 3 }
 0x213   : > { %7129 = vmatprep.mubr.bf16.mxu0 %v5038_v6  ;;  %7162 = vmatpush3.bf16.msra.mxu0 %v9954_v57  ;;  %v5047_v6 = vsel %vm4949_vm11, %v5037_v55, %v5046_v32  ;;  %v5069_v39 = vrot.slane %v5067_v31, 2  ;;  %v5079_v31 = vshll.u32 %v9646_v41, 16 }
 0x214   : > { %7210 = vmatpush3.bf16.msra.mxu1 %v9864_v34  ;;  %7163 = vmatprep.subr.bf16.mxu0 %v9976_v40  ;;  %v4622_v34 = vsel %vm4148_vm0, %v4619_v43, %v4621_v0 }
 0x215   : > { %7203 = vmatprep.subr.bf16.mxu1 %v9881_v4 }
 0x216   : > { %v9996_v38 = vpop.f32.mrf.mxu0 }
 0x217   : > { %v6767_v25 = vpop.f32.mrf.mxu1  ;;  %7066 = vmatmul.mubr.bf16.gmra.mxu1 %v4620_v26  ;;  %7164 = vmatpush3.bf16.msra.mxu0 %v9976_v40 }
 0x218   : > { %v9993_v10 = vadd.f32 %v9822_v47, %v6767_v25  ;;  %7069 = vmatprep.mubr.bf16.mxu1 %v4622_v34  ;;  %7211 = vmatpush3.bf16.msra.mxu1 %v9881_v4  ;;  %v10005_v28 = vpop.f32.mrf.mxu0  ;;  %v5060_v47 = vrot.slane %v5058_v21, 2  ;;  %v4625_v4 = vrot.slane %v9621_v13, 2  ;;  %v5056_v25 = vsel %vm4949_vm11, %v5046_v32, %v5055_v8 }
 0x219   : > { %v2533_v49 = vpop.f32.mrf.mxu1  ;;  %7204 = vmatprep.subr.bf16.mxu1 %v9902_v23  ;;  %v5072_v34 = vrot.slane %v5070_v52, 3  ;;  %v4624_v21 = vsel %vm4148_vm0, %v4621_v0, %v4623_v54  ;;  %v5076_v32 = vshrl.u32 %v9646_v41, 16  ;;  %v5088_v0 = vshll.u32 %v9656_v3, 16 }
 0x21a   : > { %10901 = vst [vmem:[#allocation42_spill] sm:$0xff] %v9993_v10  ;;  %v10002_v43 = vadd.f32 %v9828_v9, %v2533_v49  ;;  %7130 = vmatmul.mubr.bf16.gmra.mxu0 %v5047_v6  ;;  %v10013_v9 = vpop.f32.mrf.mxu0  ;;  %v5064_v42 = vor.u32 %v5063_v58, %v5060_v47  ;;  %v4626_v52 = vsel %vm4148_vm0, %v4623_v54, %v4625_v4  ;;  %v5085_v6 = vshrl.u32 %v9656_v3, 16 }
 0x21b   : > { %v6768_v26 = vpop.f32.mrf.mxu1  ;;  %7133 = vmatprep.mubr.bf16.mxu0 %v5056_v25  ;;  %v5073_v49 = vor.u32 %v5072_v34, %v5069_v39  ;;  %v4627_v47 = vrot.slane %v9629_v62, 2  ;;  %v5078_v25 = vrot.slane %v5076_v32, 2  ;;  %v5081_v39 = vrot.slane %v5079_v31, 3 }
 0x21c   : > { %v10010_v10 = vadd.f32 %v9841_v59, %v6768_v26  ;;  %7212 = vmatpush3.bf16.msra.mxu1 %v9902_v23  ;;  %v10023_v23 = vpop.f32.mrf.mxu0  ;;  %v5065_v58 = vsel %vm4949_vm11, %v5055_v8, %v5064_v42 }
 0x21d   : > { %v2536_v55 = vpop.f32.mrf.mxu1  ;;  %7205 = vmatprep.subr.bf16.mxu1 %v9915_v2  ;;  %v4628_v8 = vsel %vm4148_vm0, %v4625_v4, %v4627_v47  ;;  %v5082_v31 = vor.u32 %v5081_v39, %v5078_v25  ;;  %v5103_v25 = vshrl.u32 %v9674_v36, 16  ;;  %v5106_v39 = vshll.u32 %v9674_v36, 16 }
 0x21e   : > { %v10018_v13 = vadd.f32 %v9852_v60, %v2536_v55  ;;  %v4629_v55 = vrot.slane %v9631_v33, 2 }
 0x21f   : > { %v6771_v59 = vpop.f32.mrf.mxu1  ;;  %7070 = vmatmul.mubr.bf16.gmra.mxu1 %v4624_v21  ;;  %v5087_v21 = vrot.slane %v5085_v6, 2 }
 0x220   : > { %v10028_v26 = vadd.f32 %v9870_v37, %v6771_v59  ;;  %7073 = vmatprep.mubr.bf16.mxu1 %v4626_v52  ;;  %7213 = vmatpush3.bf16.msra.mxu1 %v9915_v2  ;;  %v5074_v2 = vsel %vm4949_vm11, %v5064_v42, %v5073_v49  ;;  %v5090_v59 = vrot.slane %v5088_v0, 3  ;;  %v5094_v42 = vshrl.u32 %v9672_v45, 16 }
 0x221   : > { %v2549_v60 = vpop.f32.mrf.mxu1  ;;  %7206 = vmatprep.subr.bf16.mxu1 %v9931_v22  ;;  %v5097_v52 = vshll.u32 %v9672_v45, 16  ;;  %v4630_v6 = vsel %vm4148_vm0, %v4627_v47, %v4629_v55 }
 0x222   : > { %v10034_v54 = vadd.f32 %v9888_v44, %v2549_v60  ;;  %v10038_v37 = vpop.f32.mrf.mxu0  ;;  %7134 = vmatmul.mubr.bf16.gmra.mxu0 %v5065_v58  ;;  %v5091_v0 = vor.u32 %v5090_v59, %v5087_v21  ;;  %v4631_v60 = vrot.slane %v9634_v14, 2 }
 0x223   : > { %v6772_v34 = vpop.f32.mrf.mxu1  ;;  %7137 = vmatprep.mubr.bf16.mxu0 %v5074_v2  ;;  %v5099_v2 = vrot.slane %v5097_v52, 3  ;;  %v5108_v52 = vrot.slane %v5106_v39, 3  ;;  %v4635_v39 = vrot.slane %v9638_v30, 2 }
 0x224   : > { %v10042_v62 = vadd.f32 %v9905_v24, %v6772_v34  ;;  %7214 = vmatpush3.bf16.msra.mxu1 %v9931_v22  ;;  %v10046_v32 = vpop.f32.mrf.mxu0  ;;  %v5096_v34 = vrot.slane %v5094_v42, 2  ;;  %v5092_v14 = vsel %vm4949_vm11, %v5082_v31, %v5091_v0  ;;  %v5105_v42 = vrot.slane %v5103_v25, 2 }
 0x225   : > { %v2552_v44 = vpop.f32.mrf.mxu1  ;;  %7207 = vmatprep.subr.bf16.mxu1 %v9954_v57 }
 0x226   : > { %v10050_v33 = vadd.f32 %v9917_v29, %v2552_v44  ;;  %v10055_v22 = vpop.f32.mrf.mxu0 }
 0x227   : > { %v6775_v24 = vpop.f32.mrf.mxu1  ;;  %7074 = vmatmul.mubr.bf16.gmra.mxu1 %v4628_v8  ;;  %v4632_v8 = vsel %vm4148_vm0, %v4629_v55, %v4631_v60 }
 0x228   : > { %v10058_v4 = vadd.f32 %v9934_v18, %v6775_v24  ;;  %7077 = vmatprep.mubr.bf16.mxu1 %v4630_v6  ;;  %7215 = vmatpush3.bf16.msra.mxu1 %v9954_v57  ;;  %v10062_v58 = vpop.f32.mrf.mxu0  ;;  %v5083_v18 = vsel %vm4949_vm11, %v5073_v49, %v5082_v31  ;;  %v4633_v57 = vrot.slane %v9636_v5, 2  ;;  %v5100_v24 = vor.u32 %v5099_v2, %v5096_v34 }
 0x229   : > { %v2565_v29 = vpop.f32.mrf.mxu1  ;;  %7208 = vmatprep.subr.bf16.mxu1 %v9976_v40  ;;  %v5112_v6 = vshrl.u32 %v9658_v27, 16  ;;  %v5115_v31 = vshll.u32 %v9658_v27, 16 }
 0x22a   : > { %v10068_v47 = vadd.f32 %v9941_v51, %v2565_v29  ;;  %v10072_v59 = vpop.f32.mrf.mxu0  ;;  %7138 = vmatmul.mubr.bf16.gmra.mxu0 %v5083_v18  ;;  %v4634_v29 = vsel %vm4148_vm0, %v4631_v60, %v4633_v57  ;;  %v5109_v18 = vor.u32 %v5108_v52, %v5105_v42  ;;  %v5101_v27 = vsel %vm4949_vm11, %v5091_v0, %v5100_v24 }
 0x22b   : > { %v6776_v21 = vpop.f32.mrf.mxu1  ;;  %7141 = vmatprep.mubr.bf16.mxu0 %v5092_v14  ;;  %v5114_v2 = vrot.slane %v5112_v6, 2  ;;  %v4637_v14 = vrot.slane %v9644_v63, 2  ;;  %v4636_v0 = vsel %vm4148_vm0, %v4633_v57, %v4635_v39 }
 0x22c   : > { %v10076_v44 = vadd.f32 %v9963_v35, %v6776_v21  ;;  %7216 = vmatpush3.bf16.msra.mxu1 %v9976_v40  ;;  %v10080_v49 = vpop.f32.mrf.mxu0  ;;  %v5117_v21 = vrot.slane %v5115_v31, 3 }
 0x22d   : > { %v2568_v51 = vpop.f32.mrf.mxu1  ;;  %v4638_v63 = vsel %vm4148_vm0, %v4635_v39, %v4637_v14 }
 0x22e   : > { %v10083_v5 = vadd.f32 %v9981_v61, %v2568_v51  ;;  %v10088_v40 = vpop.f32.mrf.mxu0  ;;  %v5118_v52 = vor.u32 %v5117_v21, %v5114_v2 }
 0x22f   : > { %v6779_v35 = vpop.f32.mrf.mxu1  ;;  %7078 = vmatmul.mubr.bf16.gmra.mxu1 %v4632_v8 }
 0x230   : > { %v10091_v55 = vadd.f32 %v9996_v38, %v6779_v35  ;;  %7081 = vmatprep.mubr.bf16.mxu1 %v4634_v29  ;;  %v10094_v61 = vpop.f32.mrf.mxu0  ;;  %v5110_v38 = vsel %vm4949_vm11, %v5100_v24, %v5109_v18  ;;  %v5119_v57 = vsel %vm4949_vm11, %v5109_v18, %v5118_v52 }
 0x231   : > { %v2581_v25 = vpop.f32.mrf.mxu1 }
 0x232   : > { %v10097_v34 = vadd.f32 %v10005_v28, %v2581_v25  ;;  %v10101_v51 = vpop.f32.mrf.mxu0  ;;  %7142 = vmatmul.mubr.bf16.gmra.mxu0 %v5101_v27  ;;  %v4641_v27 = vrot.slane %v9656_v3, 2 }
 0x233   : > { %v6780_v60 = vpop.f32.mrf.mxu1  ;;  %7145 = vmatprep.mubr.bf16.mxu0 %v5110_v38 }
 0x234   : > { %v10105_v30 = vadd.f32 %v10013_v9, %v6780_v60  ;;  %v10107_v42 = vpop.f32.mrf.mxu0 }
 0x235   : > { %v2584_v8 = vpop.f32.mrf.mxu1 }
 0x236   : > { %v10110_v28 = vadd.f32 %v10023_v23, %v2584_v8  ;;  %v6912_v31 = vpop.f32.mrf.mxu0  ;;  %v4639_v23 = vrot.slane %v9646_v41, 2 }
 0x237   : > { %v6783_v6 = vpop.f32.mrf.mxu1  ;;  %7082 = vmatmul.mubr.bf16.gmra.mxu1 %v4636_v0 }
 0x238   : > { %v10115_v24 = vadd.f32 %v10038_v37, %v6783_v6  ;;  %7085 = vmatprep.mubr.bf16.mxu1 %v4638_v63  ;;  %v10117_v35 = vpop.f32.mrf.mxu0  ;;  %v10902_v37 = vld [vmem:[#allocation43_spill] sm:$0xff]  ;;  %v4642_v18 = vsel %vm4148_vm0, %v4639_v23, %v4641_v27  ;;  %v4643_v6 = vrot.slane %v9672_v45, 2 }
 0x239   : > { %v2597_v9 = vpop.f32.mrf.mxu1 }
 0x23a   : > { %v10120_v29 = vadd.f32 %v10046_v32, %v2597_v9  ;;  %v6915_v2 = vpop.f32.mrf.mxu0  ;;  %7146 = vmatmul.mubr.bf16.gmra.mxu0 %v5119_v57  ;;  %v4640_v32 = vsel %vm4148_vm0, %v4637_v14, %v4639_v23  ;;  %v10903_v14 = vld [vmem:[#allocation44_spill] sm:$0xff]  ;;  %v4644_v45 = vsel %vm4148_vm0, %v4641_v27, %v4643_v6 }
 0x23b   : > { %v6784_v25 = vpop.f32.mrf.mxu1  ;;  %7165 = vmatprep.mubr.bf16.mxu0 %v10902_v37 }
 0x23c   : > { %v10126_v39 = vadd.f32 %v10055_v22, %v6784_v25  ;;  %v3509_v60 = vpop.f32.mrf.mxu0  ;;  %v4645_v25 = vrot.slane %v9674_v36, 2 }
 0x23d   : > { %v2600_v21 = vpop.f32.mrf.mxu1 }
 0x23e   : > { %v10130_v38 = vadd.f32 %v10062_v58, %v2600_v21  ;;  %v6916_v8 = vpop.f32.mrf.mxu0  ;;  %v10904_v21 = vld [vmem:[#allocation61_spill] sm:$0xff] }
 0x23f   : > { %v6855_v41 = vpop.f32.mrf.mxu1  ;;  %7086 = vmatmul.mubr.bf16.gmra.mxu1 %v4640_v32  ;;  %v7456_v32 = vld [vmem:[#allocation2 + $0xa0] ss:$0 sps:$4 sm:$0x33]  }
 0x240   : > { %v3159_v3 = vadd.f32 %v6855_v41, %v9793_v48  ;;  %7089 = vmatprep.mubr.bf16.mxu1 %v4642_v18  ;;  %v3512_v22 = vpop.f32.mrf.mxu0  ;;  %v4646_v18 = vsel %vm4148_vm0, %v4643_v6, %v4645_v25  ;;  %v4647_v27 = vrot.slane %v7456_v32, 2  ;;  %v10905_v32 = vld [vmem:[#allocation45_spill] sm:$0xff] }
 0x241   : > { %v3014_v0 = vpop.f32.mrf.mxu1 }
 0x242   : > { %v3157_v52 = vadd.f32 %v3014_v0, %v9799_v16  ;;  %v10138_v63 = vadd.f32 %v10072_v59, %v3159_v3  ;;  %v6919_v9 = vpop.f32.mrf.mxu0  ;;  %7166 = vmatmul.mubr.bf16.vlgmr.msra.gmra.mxu0 %v10903_v14 }
 0x243   : > { %v6856_v58 = vpop.f32.mrf.mxu1 }
 0x244   : > { %v3160_v57 = vadd.f32 %v6856_v58, %v9805_v20  ;;  %v10143_v23 = vadd.f32 %v10080_v49, %v3157_v52  ;;  %v3525_v37 = vpop.f32.mrf.mxu0 }
 0x245   : > { %v3017_v48 = vpop.f32.mrf.mxu1 }
 0x246   : > { %v3158_v16 = vadd.f32 %v3017_v48, %v10904_v21  ;;  %v10149_v59 = vadd.f32 %v10088_v40, %v3160_v57  ;;  %v6920_v20 = vpop.f32.mrf.mxu0  ;;  %v4648_v21 = vsel %vm4148_vm0, %v4645_v25, %v4647_v27 }
 0x247   : > { %v6859_v41 = vpop.f32.mrf.mxu1  ;;  %7090 = vmatmul.mubr.bf16.gmra.mxu1 %v4644_v45 }
 0x248   : > { %v3163_v49 = vadd.f32 %v6859_v41, %v9836_v15  ;;  %7093 = vmatprep.mubr.bf16.mxu1 %v4646_v18  ;;  %v10154_v3 = vadd.f32 %v10094_v61, %v3158_v16  ;;  %v3528_v0 = vpop.f32.mrf.mxu0 }
 0x249   : > { %v3030_v36 = vpop.f32.mrf.mxu1 }
 0x24a   : > { %v3161_v52 = vadd.f32 %v3030_v36, %v9844_v46  ;;  %v10158_v58 = vadd.f32 %v10101_v51, %v3163_v49  ;;  %v6923_v14 = vpop.f32.mrf.mxu0 }
 0x24b   : > { %v6860_v40 = vpop.f32.mrf.mxu1 }
 0x24c   : > { %v3164_v57 = vadd.f32 %v6860_v40, %v9848_v11  ;;  %v10162_v6 = vadd.f32 %v10107_v42, %v3161_v52  ;;  %v3541_v48 = vpop.f32.mrf.mxu0 }
 0x24d   : > { %v3033_v15 = vpop.f32.mrf.mxu1 }
 0x24e   : > { %v3162_v61 = vadd.f32 %v3033_v15, %v9856_v53  ;;  %v10166_v16 = vadd.f32 %v6912_v31, %v3164_v57  ;;  %v6924_v45 = vpop.f32.mrf.mxu0  ;;  %v10907_v15 = vld [vmem:[#allocation46_spill] sm:$0xff] }
 0x24f   : > { %v6863_v46 = vpop.f32.mrf.mxu1  ;;  %7094 = vmatmul.mubr.bf16.gmra.mxu1 %v4648_v21 }
 0x250   : > { %v3167_v51 = vadd.f32 %v6863_v46, %v9867_v1  ;;  %7169 = vmatprep.mubr.bf16.mxu1 %v10905_v32  ;;  %v10171_v11 = vadd.f32 %v10117_v35, %v3162_v61  ;;  %v3544_v41 = vpop.f32.mrf.mxu0  ;;  %v10906_v1 = vld [vmem:[#allocation3_spill] sm:$0xff] }
 0x251   : > { %v3046_v42 = vpop.f32.mrf.mxu1 }
 0x252   : > { %v3165_v18 = vadd.f32 %v3046_v42, %v9875_v50  ;;  %v10174_v49 = vadd.f32 %v6915_v2, %v3167_v51  ;;  %v6927_v25 = vpop.f32.mrf.mxu0  ;;  %v10908_v2 = vld [vmem:[#allocation47_spill] sm:$0xff] }
 0x253   : > { %v6864_v53 = vpop.f32.mrf.mxu1 }
 0x254   : > { %v3168_v31 = vadd.f32 %v6864_v53, %v9884_v17  ;;  %v10177_v36 = vadd.f32 %v3509_v60, %v3165_v18  ;;  %v3557_v27 = vpop.f32.mrf.mxu0 }
 0x255   : > { %v3049_v52 = vpop.f32.mrf.mxu1 }
 0x256   : > { %v3166_v40 = vadd.f32 %v3049_v52, %v10906_v1  ;;  %v10180_v57 = vadd.f32 %v6916_v8, %v3168_v31  ;;  %v6928_v61 = vpop.f32.mrf.mxu0  ;;  %v10909_v1 = vld [vmem:[#allocation48_spill] sm:$0xff] }
 0x257   : > { %v6867_v35 = vpop.f32.mrf.mxu1  ;;  %7170 = vmatmul.mubr.bf16.vlgmr.msra.gmra.mxu1 %v10907_v15 }
 0x258   : > { %v3171_v50 = vadd.f32 %v6867_v35, %v9939_v19  ;;  %7173 = vmatprep.mubr.bf16.mxu1 %v10908_v2  ;;  %v10185_v21 = vadd.f32 %v3512_v22, %v3166_v40  ;;  %v3560_v17 = vpop.f32.mrf.mxu0  ;;  %v10910_v35 = vld [vmem:[#allocation42_spill] sm:$0xff] }
 0x259   : > { %v3062_v46 = vpop.f32.mrf.mxu1 }
 0x25a   : > { %v3169_v60 = vadd.f32 %v3062_v46, %v9947_v56  ;;  %v10188_v51 = vadd.f32 %v6919_v9, %v3171_v50  ;;  %v6931_v42 = vpop.f32.mrf.mxu0  ;;  %v10911_v9 = vld [vmem:[#allocation49_spill] sm:$0xff] }
 0x25b   : > { %v6868_v32 = vpop.f32.mrf.mxu1 }
 0x25c   : > { %v3172_v8 = vadd.f32 %v6868_v32, %v9961_v12  ;;  %v10191_v18 = vadd.f32 %v3525_v37, %v3169_v60  ;;  %v3573_v31 = vpop.f32.mrf.mxu0 }
 0x25d   : > { %v3065_v53 = vpop.f32.mrf.mxu1 }
 0x25e   : > { %v3170_v19 = vadd.f32 %v3065_v53, %v9969_v7  ;;  %v10194_v52 = vadd.f32 %v6920_v20, %v3172_v8  ;;  %v6932_v40 = vpop.f32.mrf.mxu0 }
 0x25f   : > { %v6871_v22 = vpop.f32.mrf.mxu1  ;;  %7174 = vmatmul.mubr.bf16.gmra.mxu1 %v10909_v1 }
 0x260   : > { %v3175_v56 = vadd.f32 %v6871_v22, %v10910_v35  ;;  %7177 = vmatprep.mubr.bf16.mxu1 %v10911_v9  ;;  %v10199_v15 = vadd.f32 %v3528_v0, %v3170_v19  ;;  %v3576_v12 = vpop.f32.mrf.mxu0  ;;  %v10912_v19 = vld [vmem:[#allocation50_spill] sm:$0xff] }
 0x261   : > { %v3078_v50 = vpop.f32.mrf.mxu1 }
 0x262   : > { %v3173_v37 = vadd.f32 %v3078_v50, %v10002_v43  ;;  %v10202_v2 = vadd.f32 %v6923_v14, %v3175_v56  ;;  %v6935_v7 = vpop.f32.mrf.mxu0  ;;  %v10913_v14 = vld [vmem:[#allocation51_spill] sm:$0xff] }
 0x263   : > { %v6872_v46 = vpop.f32.mrf.mxu1 }
 0x264   : > { %v3176_v20 = vadd.f32 %v6872_v46, %v10010_v10  ;;  %v10205_v60 = vadd.f32 %v3541_v48, %v3173_v37  ;;  %v3589_v8 = vpop.f32.mrf.mxu0 }
 0x265   : > { %v3081_v32 = vpop.f32.mrf.mxu1 }
 0x266   : > { %v3174_v53 = vadd.f32 %v3081_v32, %v10018_v13  ;;  %v10208_v22 = vadd.f32 %v6924_v45, %v3176_v20  ;;  %v6936_v1 = vpop.f32.mrf.mxu0 }
 0x267   : > { %v6875_v0 = vpop.f32.mrf.mxu1  ;;  %7178 = vmatmul.mubr.bf16.gmra.mxu1 %v10912_v19 }
 0x268   : > { %v3179_v43 = vadd.f32 %v6875_v0, %v10028_v26  ;;  %7181 = vmatprep.mubr.bf16.mxu1 %v10913_v14  ;;  %v10213_v35 = vadd.f32 %v3544_v41, %v3174_v53  ;;  %v3592_v10 = vpop.f32.mrf.mxu0  ;;  %v10914_v53 = vld [vmem:[#allocation52_spill] sm:$0xff] }
 0x269   : > { %v3094_v56 = vpop.f32.mrf.mxu1 }
 0x26a   : > { %v3177_v48 = vadd.f32 %v3094_v56, %v10034_v54  ;;  %v10216_v9 = vadd.f32 %v6927_v25, %v3179_v43  ;;  %v6939_v13 = vpop.f32.mrf.mxu0  ;;  %v10915_v25 = vld [vmem:[#allocation53_spill] sm:$0xff] }
 0x26b   : > { %v6876_v50 = vpop.f32.mrf.mxu1 }
 0x26c   : > { %v3180_v45 = vadd.f32 %v6876_v50, %v10042_v62  ;;  %v10219_v37 = vadd.f32 %v3557_v27, %v3177_v48  ;;  %v3605_v20 = vpop.f32.mrf.mxu0 }
 0x26d   : > { %v3097_v46 = vpop.f32.mrf.mxu1 }
 0x26e   : > { %v3178_v26 = vadd.f32 %v3097_v46, %v10050_v33  ;;  %v10222_v32 = vadd.f32 %v6928_v61, %v3180_v45  ;;  %v6940_v0 = vpop.f32.mrf.mxu0 }
 0x26f   : > { %v6879_v41 = vpop.f32.mrf.mxu1  ;;  %7182 = vmatmul.mubr.bf16.gmra.mxu1 %v10914_v53 }
 0x270   : > { %v3183_v54 = vadd.f32 %v6879_v41, %v10058_v4  ;;  %7185 = vmatprep.mubr.bf16.mxu1 %v10915_v25  ;;  %v10227_v19 = vadd.f32 %v3560_v17, %v3178_v26  ;;  %v3608_v62 = vpop.f32.mrf.mxu0  ;;  %v10916_v26 = vld [vmem:[#allocation54_spill] sm:$0xff] }
 0x271   : > { %v3110_v43 = vpop.f32.mrf.mxu1 }
 0x272   : > { %v3181_v27 = vadd.f32 %v3110_v43, %v10068_v47  ;;  %v10230_v14 = vadd.f32 %v6931_v42, %v3183_v54  ;;  %v7011_v33 = vpop.f32.mrf.mxu0  ;;  %v10917_v42 = vld [vmem:[#allocation55_spill] sm:$0xff] }
 0x273   : > { %v6880_v56 = vpop.f32.mrf.mxu1 }
 0x274   : > { %v3184_v61 = vadd.f32 %v6880_v56, %v10076_v44  ;;  %v10233_v48 = vadd.f32 %v3573_v31, %v3181_v27  ;;  %v4286_v45 = vpop.f32.mrf.mxu0 }
 0x275   : > { %v3113_v50 = vpop.f32.mrf.mxu1 }
 0x276   : > { %v3182_v4 = vadd.f32 %v3113_v50, %v10083_v5  ;;  %v10236_v46 = vadd.f32 %v6932_v40, %v3184_v61  ;;  %v7012_v41 = vpop.f32.mrf.mxu0 }
 0x277   : > { %v6883_v17 = vpop.f32.mrf.mxu1  ;;  %7186 = vmatmul.mubr.bf16.gmra.mxu1 %v10916_v26 }
 0x278   : > { %v3187_v47 = vadd.f32 %v6883_v17, %v10091_v55  ;;  %7189 = vmatprep.mubr.bf16.mxu1 %v10917_v42  ;;  %v10241_v53 = vadd.f32 %v3576_v12, %v3182_v4  ;;  %v4289_v44 = vpop.f32.mrf.mxu0  ;;  %v10918_v4 = vld [vmem:[#allocation56_spill] sm:$0xff] }
 0x279   : > { %v3126_v54 = vpop.f32.mrf.mxu1 }
 0x27a   : > { %v3185_v31 = vadd.f32 %v3126_v54, %v10097_v34  ;;  %v10244_v25 = vadd.f32 %v6935_v7, %v3187_v47  ;;  %v7015_v5 = vpop.f32.mrf.mxu0  ;;  %v10919_v7 = vld [vmem:[#allocation57_spill] sm:$0xff] }
 0x27b   : > { %v6884_v43 = vpop.f32.mrf.mxu1 }
 0x27c   : > { %v3188_v40 = vadd.f32 %v6884_v43, %v10105_v30  ;;  %v10247_v27 = vadd.f32 %v3589_v8, %v3185_v31  ;;  %v4302_v61 = vpop.f32.mrf.mxu0 }
 0x27d   : > { %v3129_v56 = vpop.f32.mrf.mxu1 }
 0x27e   : > { %v3186_v55 = vadd.f32 %v3129_v56, %v10110_v28  ;;  %v10250_v50 = vadd.f32 %v6936_v1, %v3188_v40  ;;  %v7016_v17 = vpop.f32.mrf.mxu0 }
 0x27f   : > { %v6887_v12 = vpop.f32.mrf.mxu1  ;;  %7190 = vmatmul.mubr.bf16.gmra.mxu1 %v10918_v4 }
 0x280   : > { %v3191_v34 = vadd.f32 %v6887_v12, %v10115_v24  ;;  %7193 = vmatprep.mubr.bf16.mxu1 %v10919_v7  ;;  %v10255_v26 = vadd.f32 %v3592_v10, %v3186_v55  ;;  %v4305_v30 = vpop.f32.mrf.mxu0  ;;  %v10920_v55 = vld [vmem:[#allocation58_spill] sm:$0xff] }
 0x281   : > { %v3142_v47 = vpop.f32.mrf.mxu1 }
 0x282   : > { %v3189_v8 = vadd.f32 %v3142_v47, %v10120_v29  ;;  %v10258_v42 = vadd.f32 %v6939_v13, %v3191_v34  ;;  %v7019_v28 = vpop.f32.mrf.mxu0  ;;  %v10921_v13 = vld [vmem:[#allocation59_spill] sm:$0xff] }
 0x283   : > { %v6888_v54 = vpop.f32.mrf.mxu1 }
 0x284   : > { %v3192_v1 = vadd.f32 %v6888_v54, %v10126_v39  ;;  %v10261_v31 = vadd.f32 %v3605_v20, %v3189_v8  ;;  %v4318_v40 = vpop.f32.mrf.mxu0 }
 0x285   : > { %v3145_v43 = vpop.f32.mrf.mxu1 }
 0x286   : > { %v3190_v24 = vadd.f32 %v3145_v43, %v10130_v38  ;;  %v10264_v56 = vadd.f32 %v6940_v0, %v3192_v1  ;;  %v7020_v12 = vpop.f32.mrf.mxu0 }
 0x287   : > { %v6959_v10 = vpop.f32.mrf.mxu1  ;;  %7194 = vmatmul.mubr.bf16.gmra.mxu1 %v10920_v55 }
 0x288   : > { %v4093_v29 = vadd.f32 %v6959_v10, %v10138_v63  ;;  %7197 = vmatprep.mubr.bf16.mxu1 %v10921_v13  ;;  %v10269_v4 = vadd.f32 %v3608_v62, %v3190_v24  ;;  %v4321_v39 = vpop.f32.mrf.mxu0  ;;  %v10922_v24 = vld [vmem:[#allocation60_spill] sm:$0xff] }
 0x289   : > { %v3948_v34 = vpop.f32.mrf.mxu1 }
 0x28a   : > { %v4091_v20 = vadd.f32 %v3948_v34, %v10143_v23  ;;  %v10272_v7 = vadd.f32 %v7011_v33, %v4093_v29  ;;  %v7023_v38 = vpop.f32.mrf.mxu0 }
 0x28b   : > { %v6960_v47 = vpop.f32.mrf.mxu1 }
 0x28c   : > { %v4094_v0 = vadd.f32 %v6960_v47, %v10149_v59  ;;  %v10275_v8 = vadd.f32 %v4286_v45, %v4091_v20  ;;  %v4334_v1 = vpop.f32.mrf.mxu0 }
 0x28d   : > { %v3951_v54 = vpop.f32.mrf.mxu1 }
 0x28e   : > { %v4092_v63 = vadd.f32 %v3951_v54, %v10154_v3  ;;  %v10278_v43 = vadd.f32 %v7012_v41, %v4094_v0  ;;  %v7024_v10 = vpop.f32.mrf.mxu0 }
 0x28f   : > { %v6963_v62 = vpop.f32.mrf.mxu1  ;;  %7198 = vmatmul.mubr.bf16.gmra.mxu1 %v10922_v24 }
 0x290   : > { %v4097_v23 = vadd.f32 %v6963_v62, %v10158_v58  ;;  %v10282_v33 = vadd.f32 %v4289_v44, %v4092_v63  ;;  %v4337_v29 = vpop.f32.mrf.mxu0 }
 0x291   : > { %v3964_v55 = vpop.f32.mrf.mxu1 }
 0x292   : > { %v4095_v59 = vadd.f32 %v3964_v55, %v10162_v6  ;;  %v10285_v45 = vadd.f32 %v7015_v5, %v4097_v23  ;;  %v7027_v34 = vpop.f32.mrf.mxu0 }
 0x293   : > { %v6964_v13 = vpop.f32.mrf.mxu1 }
 0x294   : > { %v4098_v3 = vadd.f32 %v6964_v13, %v10166_v16  ;;  %v10288_v41 = vadd.f32 %v4302_v61, %v4095_v59  ;;  %v4350_v47 = vpop.f32.mrf.mxu0 }
 0x295   : > { %v3967_v20 = vpop.f32.mrf.mxu1 }
 0x296   : > { %v4096_v0 = vadd.f32 %v3967_v20, %v10171_v11  ;;  %v10291_v54 = vadd.f32 %v7016_v17, %v4098_v3  ;;  %v7028_v44 = vpop.f32.mrf.mxu0 }
 0x297   : > { %v6967_v58 = vpop.f32.mrf.mxu1 }
 0x298   : > { %v4101_v63 = vadd.f32 %v6967_v58, %v10174_v49  ;;  %v10294_v62 = vadd.f32 %v4305_v30, %v4096_v0  ;;  %v4353_v5 = vpop.f32.mrf.mxu0 }
 0x299   : > { %v3980_v6 = vpop.f32.mrf.mxu1 }
 0x29a   : > { %v4099_v24 = vadd.f32 %v3980_v6, %v10177_v36  ;;  %v10297_v23 = vadd.f32 %v7019_v28, %v4101_v63  ;;  %v7031_v61 = vpop.f32.mrf.mxu0 }
 0x29b   : > { %v6968_v16 = vpop.f32.mrf.mxu1 }
 0x29c   : > { %v4102_v55 = vadd.f32 %v6968_v16, %v10180_v57  ;;  %v10300_v59 = vadd.f32 %v4318_v40, %v4099_v24  ;;  %v4366_v17 = vpop.f32.mrf.mxu0 }
 0x29d   : > { %v3983_v11 = vpop.f32.mrf.mxu1 }
 0x29e   : > { %v4100_v13 = vadd.f32 %v3983_v11, %v10185_v21  ;;  %v10303_v3 = vadd.f32 %v7020_v12, %v4102_v55  ;;  %v7032_v30 = vpop.f32.mrf.mxu0 }
 0x29f   : > { %v6971_v49 = vpop.f32.mrf.mxu1 }
 0x2a0   : > { %v4105_v20 = vadd.f32 %v6971_v49, %v10188_v51  ;;  %v10306_v0 = vadd.f32 %v4321_v39, %v4100_v13  ;;  %v4369_v28 = vpop.f32.mrf.mxu0 }
 0x2a1   : > { %v3996_v36 = vpop.f32.mrf.mxu1 }
 0x2a2   : > { %v4103_v58 = vadd.f32 %v3996_v36, %v10191_v18  ;;  %v10309_v63 = vadd.f32 %v7023_v38, %v4105_v20  ;;  %v7035_v40 = vpop.f32.mrf.mxu0 }
 0x2a3   : > { %v6972_v57 = vpop.f32.mrf.mxu1 }
 0x2a4   : > { %v4106_v6 = vadd.f32 %v6972_v57, %v10194_v52  ;;  %v10312_v24 = vadd.f32 %v4334_v1, %v4103_v58  ;;  %v4382_v12 = vpop.f32.mrf.mxu0 }
 0x2a5   : > { %v3999_v21 = vpop.f32.mrf.mxu1 }
 0x2a6   : > { %v4104_v16 = vadd.f32 %v3999_v21, %v10199_v15  ;;  %v10315_v55 = vadd.f32 %v7024_v10, %v4106_v6  ;;  %v7036_v39 = vpop.f32.mrf.mxu0 }
 0x2a7   : > { %v6975_v51 = vpop.f32.mrf.mxu1 }
 0x2a8   : > { %v4109_v11 = vadd.f32 %v6975_v51, %v10202_v2  ;;  %v10318_v13 = vadd.f32 %v4337_v29, %v4104_v16  ;;  %v4385_v38 = vpop.f32.mrf.mxu0 }
 0x2a9   : > { %v4012_v18 = vpop.f32.mrf.mxu1 }
 0x2aa   : > { %v4107_v49 = vadd.f32 %v4012_v18, %v10205_v60  ;;  %v10321_v20 = vadd.f32 %v7027_v34, %v4109_v11  ;;  %v7039_v1 = vpop.f32.mrf.mxu0 }
 0x2ab   : > { %v6976_v52 = vpop.f32.mrf.mxu1 }
 0x2ac   : > { %v4110_v36 = vadd.f32 %v6976_v52, %v10208_v22  ;;  %v10324_v58 = vadd.f32 %v4350_v47, %v4107_v49  ;;  %v4398_v10 = vpop.f32.mrf.mxu0 }
 0x2ad   : > { %v4015_v15 = vpop.f32.mrf.mxu1 }
 0x2ae   : > { %v4108_v57 = vadd.f32 %v4015_v15, %v10213_v35  ;;  %v10327_v6 = vadd.f32 %v7028_v44, %v4110_v36  ;;  %v7040_v29 = vpop.f32.mrf.mxu0 }
 0x2af   : > { %v6979_v2 = vpop.f32.mrf.mxu1 }
 0x2b0   : > { %v4113_v21 = vadd.f32 %v6979_v2, %v10216_v9  ;;  %v10330_v16 = vadd.f32 %v4353_v5, %v4108_v57  ;;  %v4401_v34 = vpop.f32.mrf.mxu0 }
 0x2b1   : > { %v4028_v60 = vpop.f32.mrf.mxu1 }
 0x2b2   : > { %v4111_v51 = vadd.f32 %v4028_v60, %v10219_v37  ;;  %v10333_v11 = vadd.f32 %v7031_v61, %v4113_v21  ;;  %v7043_v47 = vpop.f32.mrf.mxu0 }
 0x2b3   : > { %v6980_v22 = vpop.f32.mrf.mxu1 }
 0x2b4   : > { %v4114_v18 = vadd.f32 %v6980_v22, %v10222_v32  ;;  %v10336_v49 = vadd.f32 %v4366_v17, %v4111_v51  ;;  %v4414_v44 = vpop.f32.mrf.mxu0 }
 0x2b5   : > { %v4031_v35 = vpop.f32.mrf.mxu1 }
 0x2b6   : > { %v4112_v52 = vadd.f32 %v4031_v35, %v10227_v19  ;;  %v10339_v36 = vadd.f32 %v7032_v30, %v4114_v18  ;;  %v7044_v5 = vpop.f32.mrf.mxu0 }
 0x2b7   : > { %v6983_v9 = vpop.f32.mrf.mxu1 }
 0x2b8   : > { %v4117_v15 = vadd.f32 %v6983_v9, %v10230_v14  ;;  %v10342_v57 = vadd.f32 %v4369_v28, %v4112_v52  ;;  %v4417_v61 = vpop.f32.mrf.mxu0 }
 0x2b9   : > { %v4044_v37 = vpop.f32.mrf.mxu1 }
 0x2ba   : > { %v4115_v2 = vadd.f32 %v4044_v37, %v10233_v48  ;;  %v10345_v21 = vadd.f32 %v7035_v40, %v4117_v15  ;;  %v7115_v17 = vpop.f32.mrf.mxu0 }
 0x2bb   : > { %v6984_v32 = vpop.f32.mrf.mxu1 }
 0x2bc   : > { %v4118_v60 = vadd.f32 %v6984_v32, %v10236_v46  ;;  %v10348_v51 = vadd.f32 %v4382_v12, %v4115_v2  ;;  %v5220_v30 = vpop.f32.mrf.mxu0 }
 0x2bd   : > { %v4047_v19 = vpop.f32.mrf.mxu1 }
 0x2be   : > { %v4116_v22 = vadd.f32 %v4047_v19, %v10241_v53  ;;  %v10351_v18 = vadd.f32 %v7036_v39, %v4118_v60  ;;  %v7116_v28 = vpop.f32.mrf.mxu0 }
 0x2bf   : > { %v6987_v14 = vpop.f32.mrf.mxu1 }
 0x2c0   : > { %v4121_v35 = vadd.f32 %v6987_v14, %v10244_v25  ;;  %v10354_v52 = vadd.f32 %v4385_v38, %v4116_v22  ;;  %v5223_v40 = vpop.f32.mrf.mxu0 }
 0x2c1   : > { %v4060_v48 = vpop.f32.mrf.mxu1 }
 0x2c2   : > { %v4119_v9 = vadd.f32 %v4060_v48, %v10247_v27  ;;  %v10357_v15 = vadd.f32 %v7039_v1, %v4121_v35  ;;  %v7119_v12 = vpop.f32.mrf.mxu0 }
 0x2c3   : > { %v6988_v46 = vpop.f32.mrf.mxu1 }
 0x2c4   : > { %v4122_v37 = vadd.f32 %v6988_v46, %v10250_v50  ;;  %v10360_v2 = vadd.f32 %v4398_v10, %v4119_v9  ;;  %v5236_v39 = vpop.f32.mrf.mxu0 }
 0x2c5   : > { %v4063_v53 = vpop.f32.mrf.mxu1 }
 0x2c6   : > { %v4120_v32 = vadd.f32 %v4063_v53, %v10255_v26  ;;  %v10363_v60 = vadd.f32 %v7040_v29, %v4122_v37  ;;  %v7120_v38 = vpop.f32.mrf.mxu0 }
 0x2c7   : > { %v6991_v25 = vpop.f32.mrf.mxu1 }
 0x2c8   : > { %v4125_v19 = vadd.f32 %v6991_v25, %v10258_v42  ;;  %v10366_v22 = vadd.f32 %v4401_v34, %v4120_v32  ;;  %v5239_v1 = vpop.f32.mrf.mxu0 }
 0x2c9   : > { %v4076_v27 = vpop.f32.mrf.mxu1 }
 0x2ca   : > { %v4123_v14 = vadd.f32 %v4076_v27, %v10261_v31  ;;  %v10369_v35 = vadd.f32 %v7043_v47, %v4125_v19  ;;  %v7123_v10 = vpop.f32.mrf.mxu0 }
 0x2cb   : > { %v6992_v50 = vpop.f32.mrf.mxu1 }
 0x2cc   : > { %v4126_v48 = vadd.f32 %v6992_v50, %v10264_v56  ;;  %v10372_v9 = vadd.f32 %v4414_v44, %v4123_v14  ;;  %v5252_v29 = vpop.f32.mrf.mxu0 }
 0x2cd   : > { %v4079_v26 = vpop.f32.mrf.mxu1 }
 0x2ce   : > { %v4124_v46 = vadd.f32 %v4079_v26, %v10269_v4  ;;  %v10375_v37 = vadd.f32 %v7044_v5, %v4126_v48  ;;  %v7124_v34 = vpop.f32.mrf.mxu0 }
 0x2cf   : > { %v7063_v42 = vpop.f32.mrf.mxu1 }
 0x2d0   : > { %v4894_v53 = vadd.f32 %v7063_v42, %v10272_v7  ;;  %v10378_v32 = vadd.f32 %v4417_v61, %v4124_v46  ;;  %v5255_v47 = vpop.f32.mrf.mxu0 }
 0x2d1   : > { %v4749_v31 = vpop.f32.mrf.mxu1 }
 0x2d2   : > { %v4892_v25 = vadd.f32 %v4749_v31, %v10275_v8  ;;  %v10381_v19 = vadd.f32 %v7115_v17, %v4894_v53  ;;  %v7127_v44 = vpop.f32.mrf.mxu0 }
 0x2d3   : > { %v7064_v56 = vpop.f32.mrf.mxu1 }
 0x2d4   : > { %v4895_v27 = vadd.f32 %v7064_v56, %v10278_v43  ;;  %v10384_v14 = vadd.f32 %v5220_v30, %v4892_v25  ;;  %v5268_v5 = vpop.f32.mrf.mxu0 }
 0x2d5   : > { %v4752_v4 = vpop.f32.mrf.mxu1 }
 0x2d6   : > { %v4893_v50 = vadd.f32 %v4752_v4, %v10282_v33  ;;  %v10387_v48 = vadd.f32 %v7116_v28, %v4895_v27  ;;  %v7128_v61 = vpop.f32.mrf.mxu0 }
 0x2d7   : > { %v7067_v7 = vpop.f32.mrf.mxu1 }
 0x2d8   : > { %v4898_v26 = vadd.f32 %v7067_v7, %v10285_v45  ;;  %v10390_v46 = vadd.f32 %v5223_v40, %v4893_v50  ;;  %v5271_v17 = vpop.f32.mrf.mxu0 }
 0x2d9   : > { %v4765_v8 = vpop.f32.mrf.mxu1 }
 0x2da   : > { %v4896_v42 = vadd.f32 %v4765_v8, %v10288_v41  ;;  %v10393_v53 = vadd.f32 %v7119_v12, %v4898_v26  ;;  %v7131_v30 = vpop.f32.mrf.mxu0 }
 0x2db   : > { %v7068_v43 = vpop.f32.mrf.mxu1 }
 0x2dc   : > { %v4899_v31 = vadd.f32 %v7068_v43, %v10291_v54  ;;  %v10396_v25 = vadd.f32 %v5236_v39, %v4896_v42  ;;  %v5284_v28 = vpop.f32.mrf.mxu0 }
 0x2dd   : > { %v4768_v33 = vpop.f32.mrf.mxu1 }
 0x2de   : > { %v4897_v56 = vadd.f32 %v4768_v33, %v10294_v62  ;;  %v10399_v27 = vadd.f32 %v7120_v38, %v4899_v31  ;;  %v7132_v40 = vpop.f32.mrf.mxu0 }
 0x2df   : > { %v7071_v45 = vpop.f32.mrf.mxu1 }
 0x2e0   : > { %v4902_v4 = vadd.f32 %v7071_v45, %v10297_v23  ;;  %v10402_v50 = vadd.f32 %v5239_v1, %v4897_v56  ;;  %v5287_v12 = vpop.f32.mrf.mxu0 }
 0x2e1   : > { %v4781_v41 = vpop.f32.mrf.mxu1 }
 0x2e2   : > { %v4900_v7 = vadd.f32 %v4781_v41, %v10300_v59  ;;  %v10405_v26 = vadd.f32 %v7123_v10, %v4902_v4  ;;  %v7135_v39 = vpop.f32.mrf.mxu0 }
 0x2e3   : > { %v7072_v54 = vpop.f32.mrf.mxu1 }
 0x2e4   : > { %v4903_v8 = vadd.f32 %v7072_v54, %v10303_v3  ;;  %v10408_v42 = vadd.f32 %v5252_v29, %v4900_v7  ;;  %v5300_v38 = vpop.f32.mrf.mxu0 }
 0x2e5   : > { %v4784_v62 = vpop.f32.mrf.mxu1 }
 0x2e6   : > { %v4901_v43 = vadd.f32 %v4784_v62, %v10306_v0  ;;  %v10411_v31 = vadd.f32 %v7124_v34, %v4903_v8  ;;  %v7136_v1 = vpop.f32.mrf.mxu0 }
 0x2e7   : > { %v7075_v23 = vpop.f32.mrf.mxu1 }
 0x2e8   : > { %v4906_v33 = vadd.f32 %v7075_v23, %v10309_v63  ;;  %v10414_v56 = vadd.f32 %v5255_v47, %v4901_v43  ;;  %v5303_v10 = vpop.f32.mrf.mxu0 }
 0x2e9   : > { %v4797_v59 = vpop.f32.mrf.mxu1 }
 0x2ea   : > { %v4904_v45 = vadd.f32 %v4797_v59, %v10312_v24  ;;  %v10417_v4 = vadd.f32 %v7127_v44, %v4906_v33  ;;  %v7139_v29 = vpop.f32.mrf.mxu0 }
 0x2eb   : > { %v7076_v3 = vpop.f32.mrf.mxu1 }
 0x2ec   : > { %v4907_v41 = vadd.f32 %v7076_v3, %v10315_v55  ;;  %v10420_v7 = vadd.f32 %v5268_v5, %v4904_v45  ;;  %v5316_v34 = vpop.f32.mrf.mxu0 }
 0x2ed   : > { %v4800_v0 = vpop.f32.mrf.mxu1 }
 0x2ee   : > { %v4905_v54 = vadd.f32 %v4800_v0, %v10318_v13  ;;  %v10423_v8 = vadd.f32 %v7128_v61, %v4907_v41  ;;  %v7140_v47 = vpop.f32.mrf.mxu0 }
 0x2ef   : > { %v7079_v63 = vpop.f32.mrf.mxu1 }
 0x2f0   : > { %v4910_v62 = vadd.f32 %v7079_v63, %v10321_v20  ;;  %v10426_v43 = vadd.f32 %v5271_v17, %v4905_v54  ;;  %v5319_v44 = vpop.f32.mrf.mxu0 }
 0x2f1   : > { %v4813_v24 = vpop.f32.mrf.mxu1 }
 0x2f2   : > { %v4908_v23 = vadd.f32 %v4813_v24, %v10324_v58  ;;  %v10429_v33 = vadd.f32 %v7131_v30, %v4910_v62  ;;  %v7143_v5 = vpop.f32.mrf.mxu0 }
 0x2f3   : > { %v7080_v55 = vpop.f32.mrf.mxu1 }
 0x2f4   : > { %v4911_v59 = vadd.f32 %v7080_v55, %v10327_v6  ;;  %v10432_v45 = vadd.f32 %v5284_v28, %v4908_v23  ;;  %v5332_v61 = vpop.f32.mrf.mxu0 }
 0x2f5   : > { %v4816_v13 = vpop.f32.mrf.mxu1 }
 0x2f6   : > { %v4909_v3 = vadd.f32 %v4816_v13, %v10330_v16  ;;  %v10435_v41 = vadd.f32 %v7132_v40, %v4911_v59  ;;  %v7144_v17 = vpop.f32.mrf.mxu0 }
 0x2f7   : > { %v7083_v20 = vpop.f32.mrf.mxu1 }
 0x2f8   : > { %v4914_v0 = vadd.f32 %v7083_v20, %v10333_v11  ;;  %v10438_v58 = vadd.f32 %v5287_v12, %v4909_v3  ;;  %v10440_v54 = vpop.f32.mrf.mxu0 }
 0x2f9   : > { %v4829_v30 = vpop.f32.mrf.mxu1 }
 0x2fa   : > { %v4912_v6 = vadd.f32 %v4829_v30, %v10336_v49  ;;  %v10443_v28 = vadd.f32 %v7135_v39, %v4914_v0  ;;  %v10445_v62 = vpop.f32.mrf.mxu0 }
 0x2fb   : > { %v7084_v63 = vpop.f32.mrf.mxu1 }
 0x2fc   : > { %v4915_v16 = vadd.f32 %v7084_v63, %v10339_v36  ;;  %v10448_v40 = vadd.f32 %v5300_v38, %v4912_v6  ;;  %v10450_v23 = vpop.f32.mrf.mxu0 }
 0x2fd   : > { %v4832_v24 = vpop.f32.mrf.mxu1 }
 0x2fe   : > { %v4913_v11 = vadd.f32 %v4832_v24, %v10342_v57  ;;  %v10453_v12 = vadd.f32 %v7136_v1, %v4915_v16  ;;  %v10455_v59 = vpop.f32.mrf.mxu0 }
 0x2ff   : > { %v7087_v55 = vpop.f32.mrf.mxu1 }
 0x300   : > { %v4918_v49 = vadd.f32 %v7087_v55, %v10345_v21  ;;  %v10459_v39 = vadd.f32 %v5303_v10, %v4913_v11  ;;  %v5351_v3 = vpop.f32.mrf.mxu0 }
 0x301   : > { %v4845_v13 = vpop.f32.mrf.mxu1 }
 0x302   : > { %v4916_v36 = vadd.f32 %v4845_v13, %v10348_v51  ;;  %v10462_v38 = vadd.f32 %v7139_v29, %v4918_v49  ;;  %v7167_v57 = vpop.f32.mrf.mxu0  ;;  %v10924_v13 = vld [vmem:[#allocation4_spill] sm:$0xff] }
 0x303   : > { %v7088_v20 = vpop.f32.mrf.mxu1  ;;  %v5703_v21 = vadd.f32 %v7167_v57, %v10381_v19 }
 0x304   : > { %v4919_v1 = vadd.f32 %v7088_v20, %v10351_v18  ;;  %v10471_v10 = vadd.f32 %v5316_v34, %v4916_v36  ;;  %v5558_v51 = vpop.f32.mrf.mxu0  ;;  %v10923_v34 = vld [vmem:[#allocation5_spill] sm:$0xff] }
 0x305   : > { %v4848_v0 = vpop.f32.mrf.mxu1  ;;  %5739 = vst [vmem:[%s10467_s28 + $0x10] sm:$0xff] %v5703_v21  ;;  %v5701_v30 = vadd.f32 %v5558_v51, %v10384_v14  ;;  %v5775_v36 = vmul.f32 %v10924_v13, %v5703_v21  ;;  %v10926_v51 = vld [vmem:[#allocation6_spill] sm:$0xff] }
 0x306   : > { %v4917_v29 = vadd.f32 %v4848_v0, %v10354_v52  ;;  %v10476_v6 = vadd.f32 %v7140_v47, %v4919_v1  ;;  %v7168_v16 = vpop.f32.mrf.mxu0 }
 0x307   : > { %v7091_v63 = vpop.f32.mrf.mxu1  ;;  %5737 = vst [vmem:[%s10467_s28] sm:$0xff] %v5701_v30  ;;  %v5704_v18 = vadd.f32 %v7168_v16, %v10387_v48  ;;  %v5773_v11 = vmul.f32 %v10923_v34, %v5701_v30  ;;  %v10925_v48 = vld [vmem:[#allocation7_spill] sm:$0xff] }
 0x308   : > { %v4922_v24 = vadd.f32 %v7091_v63, %v10357_v15  ;;  %v5561_v55 = vpop.f32.mrf.mxu0  ;;  %v10482_v49 = vadd.f32 %v5319_v44, %v4917_v29 }
 0x309   : > { %v4861_v19 = vpop.f32.mrf.mxu1  ;;  %5740 = vst [vmem:[%s10467_s28 + $0x18] sm:$0xff] %v5704_v18  ;;  %v5702_v14 = vadd.f32 %v5561_v55, %v10390_v46  ;;  %v5851_v44 = vmul.f32 %v5773_v11, %v5701_v30  ;;  %v5776_v29 = vmul.f32 %v10926_v51, %v5704_v18  ;;  %v10928_v51 = vld [vmem:[#allocation8_spill] sm:$0xff] }
 0x30a   : > { %v4920_v52 = vadd.f32 %v4861_v19, %v10360_v2  ;;  %v10488_v20 = vadd.f32 %v7143_v5, %v4922_v24  ;;  %v5853_v5 = vmul.f32 %v5775_v36, %v5703_v21 }
 0x30b   : > { %v7092_v47 = vpop.f32.mrf.mxu1  ;;  %5738 = vst [vmem:[%s10467_s28 + $0x8] sm:$0xff] %v5702_v14  ;;  %v5774_v57 = vmul.f32 %v10925_v48, %v5702_v14 }
 0x30c   : > { %v4923_v15 = vadd.f32 %v7092_v47, %v10363_v60  ;;  %v10493_v1 = vadd.f32 %v5332_v61, %v4920_v52  ;;  %v5854_v52 = vmul.f32 %v5776_v29, %v5704_v18 }
 0x30d   : > { %v4864_v0 = vpop.f32.mrf.mxu1  ;;  %v5809_v63 = vadd.f32 %v5774_v57, %v5773_v11  ;;  %v5852_v46 = vmul.f32 %v5774_v57, %v5702_v14 }
 0x30e   : > { %v4921_v2 = vadd.f32 %v4864_v0, %v10366_v22  ;;  %v10497_v16 = vadd.f32 %v7144_v17, %v4923_v15 }
 0x30f   : > { %v7095_v19 = vpop.f32.mrf.mxu1  ;;  %v5810_v60 = vadd.f32 %v5809_v63, %v5775_v36  ;;  %v5887_v34 = vadd.f32 %v5852_v46, %v5851_v44 }
 0x310   : > { %v4926_v24 = vadd.f32 %v7095_v19, %v10369_v35  ;;  %v10501_v55 = vadd.f32 %v10440_v54, %v4921_v2 }
 0x311   : > { %v4877_v61 = vpop.f32.mrf.mxu1  ;;  %v5888_v47 = vadd.f32 %v5887_v34, %v5853_v5  ;;  %v5811_v22 = vadd.f32 %v5810_v60, %v5776_v29  ;;  %v10930_v5 = vld [vmem:[#allocation10_spill] sm:$0xff] }
 0x312   : > { %v4924_v30 = vadd.f32 %v4877_v61, %v10372_v9  ;;  %v10505_v17 = vadd.f32 %v10445_v62, %v4926_v24 }
 0x313   : > { %v7096_v11 = vpop.f32.mrf.mxu1  ;;  %v5889_v35 = vadd.f32 %v5888_v47, %v5854_v52  ;;  %v10931_v47 = vld [vmem:[#allocation13_spill] sm:$0xff] }
 0x314   : > { %v4927_v21 = vadd.f32 %v7096_v11, %v10375_v37  ;;  %v10509_v14 = vadd.f32 %v10450_v23, %v4924_v30  ;;  %v10927_v23 = vld [vmem:[#allocation9_spill] sm:$0xff] }
 0x315   : > { %v4880_v54 = vpop.f32.mrf.mxu1 }
 0x316   : > { %v4925_v18 = vadd.f32 %v4880_v54, %v10378_v32  ;;  %v10513_v13 = vadd.f32 %v10455_v59, %v4927_v21 }
 0x317   : > { %v7171_v9 = vpop.f32.mrf.mxu1 }
 0x318   : > { %v5707_v36 = vadd.f32 %v7171_v9, %v10393_v53  ;;  %v10516_v15 = vadd.f32 %v5351_v3, %v4925_v18  ;;  %v10932_v9 = vld [vmem:[#allocation12_spill] sm:$0xff] }
 0x319   : > { %v5574_v62 = vpop.f32.mrf.mxu1 }
 0x31a   : > { %5743 = vst [vmem:[%s10467_s28 + $0x30] sm:$0xff] %v5707_v36  ;;  %v5705_v37 = vadd.f32 %v5574_v62, %v10396_v25  ;;  %v5779_v29 = vmul.f32 %v10928_v51, %v5707_v36  ;;  %v10929_v25 = vld [vmem:[#allocation11_spill] sm:$0xff] }
 0x31b   : > { %v7172_v48 = vpop.f32.mrf.mxu1 }
 0x31c   : > { %5741 = vst [vmem:[%s10467_s28 + $0x20] sm:$0xff] %v5705_v37  ;;  %v5777_v57 = vmul.f32 %v10927_v23, %v5705_v37  ;;  %v5708_v0 = vadd.f32 %v7172_v48, %v10399_v27  ;;  %v5857_v61 = vmul.f32 %v5779_v29, %v5707_v36  ;;  %v10933_v23 = vld [vmem:[#allocation15_spill] sm:$0xff] }
 0x31d   : > { %v5577_v32 = vpop.f32.mrf.mxu1 }
 0x31e   : > { %v5812_v59 = vadd.f32 %v5811_v22, %v5777_v57  ;;  %v5855_v44 = vmul.f32 %v5777_v57, %v5705_v37  ;;  %5744 = vst [vmem:[%s10467_s28 + $0x38] sm:$0xff] %v5708_v0  ;;  %v5706_v53 = vadd.f32 %v5577_v32, %v10402_v50  ;;  %v5780_v27 = vmul.f32 %v10930_v5, %v5708_v0 }
 0x31f   : > { %v7175_v3 = vpop.f32.mrf.mxu1 }
 0x320   : > { %v5890_v2 = vadd.f32 %v5889_v35, %v5855_v44  ;;  %5742 = vst [vmem:[%s10467_s28 + $0x28] sm:$0xff] %v5706_v53  ;;  %v5778_v63 = vmul.f32 %v10929_v25, %v5706_v53  ;;  %v5711_v46 = vadd.f32 %v7175_v3, %v10405_v26  ;;  %v5858_v21 = vmul.f32 %v5780_v27, %v5708_v0 }
 0x321   : > { %v5590_v19 = vpop.f32.mrf.mxu1 }
 0x322   : > { %v5813_v24 = vadd.f32 %v5812_v59, %v5778_v63  ;;  %v5856_v60 = vmul.f32 %v5778_v63, %v5706_v53  ;;  %5747 = vst [vmem:[%s10467_s28 + $0x50] sm:$0xff] %v5711_v46  ;;  %v5709_v34 = vadd.f32 %v5590_v19, %v10408_v42  ;;  %v5783_v62 = vmul.f32 %v10932_v9, %v5711_v46  ;;  %v10934_v59 = vld [vmem:[#allocation14_spill] sm:$0xff]  ;;  %v10935_v19 = vld [vmem:[#allocation17_spill] sm:$0xff] }
 0x323   : > { %v7176_v50 = vpop.f32.mrf.mxu1 }
 0x324   : > { %v5814_v52 = vadd.f32 %v5813_v24, %v5779_v29  ;;  %v5891_v30 = vadd.f32 %v5890_v2, %v5856_v60  ;;  %5745 = vst [vmem:[%s10467_s28 + $0x40] sm:$0xff] %v5709_v34  ;;  %v5781_v22 = vmul.f32 %v10931_v47, %v5709_v34  ;;  %v5712_v11 = vadd.f32 %v7176_v50, %v10411_v31  ;;  %v10936_v50 = vld [vmem:[#allocation16_spill] sm:$0xff] }
 0x325   : > { %v5593_v26 = vpop.f32.mrf.mxu1  ;;  %v5861_v29 = vmul.f32 %v5783_v62, %v5711_v46 }
 0x326   : > { %v5892_v35 = vadd.f32 %v5891_v30, %v5857_v61  ;;  %v5815_v54 = vadd.f32 %v5814_v52, %v5780_v27  ;;  %v5710_v18 = vadd.f32 %v5593_v26, %v10414_v56  ;;  %v5859_v42 = vmul.f32 %v5781_v22, %v5709_v34  ;;  %5748 = vst [vmem:[%s10467_s28 + $0x58] sm:$0xff] %v5712_v11 }
 0x327   : > { %v7179_v36 = vpop.f32.mrf.mxu1  ;;  %v5784_v44 = vmul.f32 %v10934_v59, %v5712_v11 }
 0x328   : > { %v5816_v37 = vadd.f32 %v5815_v54, %v5781_v22  ;;  %v5893_v48 = vadd.f32 %v5892_v35, %v5858_v21  ;;  %5746 = vst [vmem:[%s10467_s28 + $0x48] sm:$0xff] %v5710_v18  ;;  %v5782_v57 = vmul.f32 %v10933_v23, %v5710_v18  ;;  %v5715_v31 = vadd.f32 %v7179_v36, %v10417_v4  ;;  %v10938_v22 = vld [vmem:[#allocation18_spill] sm:$0xff] }
 0x329   : > { %v5606_v32 = vpop.f32.mrf.mxu1  ;;  %v5862_v27 = vmul.f32 %v5784_v44, %v5712_v11 }
 0x32a   : > { %v5894_v0 = vadd.f32 %v5893_v48, %v5859_v42  ;;  %v5817_v53 = vadd.f32 %v5816_v37, %v5782_v57  ;;  %v5860_v56 = vmul.f32 %v5782_v57, %v5710_v18  ;;  %5751 = vst [vmem:[%s10467_s28 + $0x70] sm:$0xff] %v5715_v31  ;;  %v5713_v3 = vadd.f32 %v5606_v32, %v10420_v7  ;;  %v10939_v37 = vld [vmem:[#allocation21_spill] sm:$0xff] }
 0x32b   : > { %v7180_v51 = vpop.f32.mrf.mxu1  ;;  %v5787_v7 = vmul.f32 %v10936_v50, %v5715_v31  ;;  %v10943_v50 = vld [vmem:[#allocation25_spill] sm:$0xff] }
 0x32c   : > { %v5818_v2 = vadd.f32 %v5817_v53, %v5783_v62  ;;  %v5895_v25 = vadd.f32 %v5894_v0, %v5860_v56  ;;  %v5716_v63 = vadd.f32 %v7180_v51, %v10423_v8  ;;  %5749 = vst [vmem:[%s10467_s28 + $0x60] sm:$0xff] %v5713_v3  ;;  %v5785_v4 = vmul.f32 %v10935_v19, %v5713_v3  ;;  %v10937_v8 = vld [vmem:[#allocation19_spill] sm:$0xff]  ;;  %v10942_v19 = vld [vmem:[#allocation22_spill] sm:$0xff] }
 0x32d   : > { %v5609_v5 = vpop.f32.mrf.mxu1  ;;  %v5865_v9 = vmul.f32 %v5787_v7, %v5715_v31 }
 0x32e   : > { %v5896_v24 = vadd.f32 %v5895_v25, %v5861_v29  ;;  %v5819_v60 = vadd.f32 %v5818_v2, %v5784_v44  ;;  %5752 = vst [vmem:[%s10467_s28 + $0x78] sm:$0xff] %v5716_v63  ;;  %v5714_v34 = vadd.f32 %v5609_v5, %v10426_v43  ;;  %v5863_v52 = vmul.f32 %v5785_v4, %v5713_v3  ;;  %v10940_v3 = vld [vmem:[#allocation20_spill] sm:$0xff]  ;;  %v10941_v29 = vld [vmem:[#allocation23_spill] sm:$0xff] }
 0x32f   : > { %v7183_v61 = vpop.f32.mrf.mxu1  ;;  %v5788_v26 = vmul.f32 %v10938_v22, %v5716_v63 }
 0x330   : > { %v5820_v46 = vadd.f32 %v5819_v60, %v5785_v4  ;;  %v5897_v30 = vadd.f32 %v5896_v24, %v5862_v27  ;;  %5750 = vst [vmem:[%s10467_s28 + $0x68] sm:$0xff] %v5714_v34  ;;  %v5786_v47 = vmul.f32 %v10937_v8, %v5714_v34  ;;  %v5719_v11 = vadd.f32 %v7183_v61, %v10429_v33 }
 0x331   : > { %v5622_v21 = vpop.f32.mrf.mxu1  ;;  %v5866_v33 = vmul.f32 %v5788_v26, %v5716_v63 }
 0x332   : > { %v5898_v35 = vadd.f32 %v5897_v30, %v5863_v52  ;;  %v5821_v54 = vadd.f32 %v5820_v46, %v5786_v47  ;;  %v5864_v43 = vmul.f32 %v5786_v47, %v5714_v34  ;;  %v5717_v18 = vadd.f32 %v5622_v21, %v10432_v45  ;;  %5755 = vst [vmem:[%s10467_s28 + $0x90] sm:$0xff] %v5719_v11  ;;  %v10944_v47 = vld [vmem:[#allocation27_spill] sm:$0xff] }
 0x333   : > { %v7184_v62 = vpop.f32.mrf.mxu1  ;;  %v5791_v51 = vmul.f32 %v10940_v3, %v5719_v11 }
 0x334   : > { %v5822_v42 = vadd.f32 %v5821_v54, %v5787_v7  ;;  %v5899_v36 = vadd.f32 %v5898_v35, %v5864_v43  ;;  %5753 = vst [vmem:[%s10467_s28 + $0x80] sm:$0xff] %v5717_v18  ;;  %v5789_v48 = vmul.f32 %v10939_v37, %v5717_v18  ;;  %v5720_v23 = vadd.f32 %v7184_v62, %v10435_v41  ;;  %v10946_v62 = vld [vmem:[#allocation26_spill] sm:$0xff] }
 0x335   : > { %v5625_v57 = vpop.f32.mrf.mxu1  ;;  %v5869_v24 = vmul.f32 %v5791_v51, %v5719_v11 }
 0x336   : > { %v5900_v32 = vadd.f32 %v5899_v36, %v5865_v9  ;;  %v5823_v0 = vadd.f32 %v5822_v42, %v5788_v26  ;;  %5756 = vst [vmem:[%s10467_s28 + $0x98] sm:$0xff] %v5720_v23  ;;  %v5718_v59 = vadd.f32 %v5625_v57, %v10438_v58  ;;  %v5867_v44 = vmul.f32 %v5789_v48, %v5717_v18  ;;  %v10945_v26 = vld [vmem:[#allocation24_spill] sm:$0xff] }
 0x337   : > { %v7187_v45 = vpop.f32.mrf.mxu1  ;;  %v5792_v58 = vmul.f32 %v10942_v19, %v5720_v23 }
 0x338   : > { %v5824_v31 = vadd.f32 %v5823_v0, %v5789_v48  ;;  %v5901_v53 = vadd.f32 %v5900_v32, %v5866_v33  ;;  %v5723_v56 = vadd.f32 %v7187_v45, %v10443_v28  ;;  %5754 = vst [vmem:[%s10467_s28 + $0x88] sm:$0xff] %v5718_v59  ;;  %v5790_v41 = vmul.f32 %v10941_v29, %v5718_v59  ;;  %v10947_v33 = vld [vmem:[#allocation29_spill] sm:$0xff] }
 0x339   : > { %v5638_v2 = vpop.f32.mrf.mxu1 }
 0x33a   : > { %v5902_v25 = vadd.f32 %v5901_v53, %v5867_v44  ;;  %5759 = vst [vmem:[%s10467_s28 + $0xb0] sm:$0xff] %v5723_v56  ;;  %v5721_v63 = vadd.f32 %v5638_v2, %v10448_v40  ;;  %v5825_v4 = vadd.f32 %v5824_v31, %v5790_v41  ;;  %v5868_v5 = vmul.f32 %v5790_v41, %v5718_v59  ;;  %v10948_v53 = vld [vmem:[#allocation31_spill] sm:$0xff] }
 0x33b   : > { %v7188_v27 = vpop.f32.mrf.mxu1  ;;  %v5870_v40 = vmul.f32 %v5792_v58, %v5720_v23  ;;  %v5795_v11 = vmul.f32 %v10945_v26, %v5723_v56 }
 0x33c   : > { %5757 = vst [vmem:[%s10467_s28 + $0xa0] sm:$0xff] %v5721_v63  ;;  %v5724_v28 = vadd.f32 %v7188_v27, %v10453_v12  ;;  %v5826_v60 = vadd.f32 %v5825_v4, %v5791_v51  ;;  %v5903_v34 = vadd.f32 %v5902_v25, %v5868_v5  ;;  %v5793_v7 = vmul.f32 %v10943_v50, %v5721_v63 }
 0x33d   : > { %v5641_v61 = vpop.f32.mrf.mxu1  ;;  %v5873_v48 = vmul.f32 %v5795_v11, %v5723_v56  ;;  %v10949_v56 = vld [vmem:[#allocation28_spill] sm:$0xff] }
 0x33e   : > { %5760 = vst [vmem:[%s10467_s28 + $0xb8] sm:$0xff] %v5724_v28  ;;  %v5722_v46 = vadd.f32 %v5641_v61, %v10459_v39  ;;  %v5904_v52 = vadd.f32 %v5903_v34, %v5869_v24  ;;  %v5827_v30 = vadd.f32 %v5826_v60, %v5792_v58  ;;  %v5871_v35 = vmul.f32 %v5793_v7, %v5721_v63  ;;  %v10950_v58 = vld [vmem:[#allocation30_spill] sm:$0xff]  ;;  %v10951_v34 = vld [vmem:[#allocation33_spill] sm:$0xff] }
 0x33f   : > { %v7191_v8 = vpop.f32.mrf.mxu1  ;;  %v5796_v42 = vmul.f32 %v10946_v62, %v5724_v28 }
 0x340   : > { %5758 = vst [vmem:[%s10467_s28 + $0xa8] sm:$0xff] %v5722_v46  ;;  %v5794_v22 = vmul.f32 %v10944_v47, %v5722_v46  ;;  %v5727_v12 = vadd.f32 %v7191_v8, %v10462_v38  ;;  %v5828_v21 = vadd.f32 %v5827_v30, %v5793_v7  ;;  %v5905_v54 = vadd.f32 %v5904_v52, %v5870_v40  ;;  %v10952_v30 = vld [vmem:[#allocation35_spill] sm:$0xff]  ;;  %v10953_v47 = vld [vmem:[#allocation32_spill] sm:$0xff] }
 0x341   : > { %v5654_v43 = vpop.f32.mrf.mxu1 }
 0x342   : > { %v5872_v18 = vmul.f32 %v5794_v22, %v5722_v46  ;;  %5763 = vst [vmem:[%s10467_s28 + $0xd0] sm:$0xff] %v5727_v12  ;;  %v5725_v39 = vadd.f32 %v5654_v43, %v10471_v10  ;;  %v5906_v9 = vadd.f32 %v5905_v54, %v5871_v35  ;;  %v5829_v36 = vadd.f32 %v5828_v21, %v5794_v22  ;;  %v10954_v43 = vld [vmem:[#allocation34_spill] sm:$0xff] }
 0x343   : > { %v7192_v37 = vpop.f32.mrf.mxu1  ;;  %v5874_v10 = vmul.f32 %v5796_v42, %v5724_v28  ;;  %v5799_v51 = vmul.f32 %v10949_v56, %v5727_v12 }
 0x344   : > { %5761 = vst [vmem:[%s10467_s28 + $0xc0] sm:$0xff] %v5725_v39  ;;  %v5728_v38 = vadd.f32 %v7192_v37, %v10476_v6  ;;  %v5830_v23 = vadd.f32 %v5829_v36, %v5795_v11  ;;  %v5907_v57 = vadd.f32 %v5906_v9, %v5872_v18  ;;  %v5797_v32 = vmul.f32 %v10947_v33, %v5725_v39  ;;  %v10955_v37 = vld [vmem:[#allocation37_spill] sm:$0xff] }
 0x345   : > { %v5657_v0 = vpop.f32.mrf.mxu1  ;;  %v5877_v28 = vmul.f32 %v5799_v51, %v5727_v12 }
 0x346   : > { %5764 = vst [vmem:[%s10467_s28 + $0xd8] sm:$0xff] %v5728_v38  ;;  %v5726_v59 = vadd.f32 %v5657_v0, %v10482_v49  ;;  %v5908_v45 = vadd.f32 %v5907_v57, %v5873_v48  ;;  %v5831_v31 = vadd.f32 %v5830_v23, %v5796_v42  ;;  %v5875_v41 = vmul.f32 %v5797_v32, %v5725_v39 }
 0x347   : > { %v7195_v44 = vpop.f32.mrf.mxu1  ;;  %v5800_v4 = vmul.f32 %v10950_v58, %v5728_v38 }
 0x348   : > { %5762 = vst [vmem:[%s10467_s28 + $0xc8] sm:$0xff] %v5726_v59  ;;  %v5798_v3 = vmul.f32 %v10948_v53, %v5726_v59  ;;  %v5731_v6 = vadd.f32 %v7195_v44, %v10488_v20  ;;  %v5832_v29 = vadd.f32 %v5831_v31, %v5797_v32  ;;  %v5909_v2 = vadd.f32 %v5908_v45, %v5874_v10  ;;  %v10956_v32 = vld [vmem:[#allocation39_spill] sm:$0xff] }
 0x349   : > { %v5670_v25 = vpop.f32.mrf.mxu1 }
 0x34a   : > { %v5876_v63 = vmul.f32 %v5798_v3, %v5726_v59  ;;  %5767 = vst [vmem:[%s10467_s28 + $0xf0] sm:$0xff] %v5731_v6  ;;  %v5729_v49 = vadd.f32 %v5670_v25, %v10493_v1  ;;  %v5910_v19 = vadd.f32 %v5909_v2, %v5875_v41  ;;  %v5833_v5 = vadd.f32 %v5832_v29, %v5798_v3  ;;  %v10957_v59 = vld [vmem:[#allocation36_spill] sm:$0xff]  ;;  %v10958_v3 = vld [vmem:[#allocation38_spill] sm:$0xff] }
 0x34b   : > { %v7196_v27 = vpop.f32.mrf.mxu1  ;;  %v5878_v1 = vmul.f32 %v5800_v4, %v5728_v38  ;;  %v5803_v22 = vmul.f32 %v10953_v47, %v5731_v6 }
 0x34c   : > { %5765 = vst [vmem:[%s10467_s28 + $0xe0] sm:$0xff] %v5729_v49  ;;  %v5732_v20 = vadd.f32 %v7196_v27, %v10497_v16  ;;  %v5834_v24 = vadd.f32 %v5833_v5, %v5799_v51  ;;  %v5911_v60 = vadd.f32 %v5910_v19, %v5876_v63  ;;  %v5801_v50 = vmul.f32 %v10951_v34, %v5729_v49 }
 0x34d   : > { %v5673_v7 = vpop.f32.mrf.mxu1  ;;  %v5881_v62 = vmul.f32 %v5803_v22, %v5731_v6 }
 0x34e   : > { %5768 = vst [vmem:[%s10467_s28 + $0xf8] sm:$0xff] %v5732_v20  ;;  %v5730_v61 = vadd.f32 %v5673_v7, %v10501_v55  ;;  %v5912_v46 = vadd.f32 %v5911_v60, %v5877_v28  ;;  %v5835_v40 = vadd.f32 %v5834_v24, %v5800_v4  ;;  %v5879_v26 = vmul.f32 %v5801_v50, %v5729_v49 }
 0x34f   : > { %v7199_v52 = vpop.f32.mrf.mxu1  ;;  %v5804_v18 = vmul.f32 %v10954_v43, %v5732_v20 }
 0x350   : > { %5766 = vst [vmem:[%s10467_s28 + $0xe8] sm:$0xff] %v5730_v61  ;;  %v5802_v8 = vmul.f32 %v10952_v30, %v5730_v61  ;;  %v5735_v16 = vadd.f32 %v7199_v52, %v10505_v17  ;;  %v5836_v12 = vadd.f32 %v5835_v40, %v5801_v50  ;;  %v5913_v11 = vadd.f32 %v5912_v46, %v5878_v1 }
 0x351   : > { %v5686_v21 = vpop.f32.mrf.mxu1  ;;  %v5882_v57 = vmul.f32 %v5804_v18, %v5732_v20 }
 0x352   : > { %v5880_v35 = vmul.f32 %v5802_v8, %v5730_v61  ;;  %5771 = vst [vmem:[%s10467_s28 + $0x110] sm:$0xff] %v5735_v16  ;;  %v5733_v55 = vadd.f32 %v5686_v21, %v10509_v14  ;;  %v5914_v54 = vadd.f32 %v5913_v11, %v5879_v26  ;;  %v5837_v39 = vadd.f32 %v5836_v12, %v5802_v8 }
 0x353   : > { %v7200_v9 = vpop.f32.mrf.mxu1  ;;  %v5807_v10 = vmul.f32 %v10957_v59, %v5735_v16 }
 0x354   : > { %5769 = vst [vmem:[%s10467_s28 + $0x100] sm:$0xff] %v5733_v55  ;;  %v5736_v17 = vadd.f32 %v7200_v9, %v10513_v13  ;;  %v5838_v42 = vadd.f32 %v5837_v39, %v5803_v22  ;;  %v5915_v36 = vadd.f32 %v5914_v54, %v5880_v35  ;;  %v5805_v38 = vmul.f32 %v10955_v37, %v5733_v55 }
 0x355   : > { %v5689_v48 = vpop.f32.mrf.mxu1  ;;  %v5885_v51 = vmul.f32 %v5807_v10, %v5735_v16 }
 0x356   : > { %5772 = vst [vmem:[%s10467_s28 + $0x118] sm:$0xff] %v5736_v17  ;;  %v5734_v23 = vadd.f32 %v5689_v48, %v10516_v15  ;;  %v5916_v14 = vadd.f32 %v5915_v36, %v5881_v62  ;;  %v5839_v33 = vadd.f32 %v5838_v42, %v5804_v18  ;;  %v5883_v31 = vmul.f32 %v5805_v38, %v5733_v55 }
 0x357   : > { %v5808_v6 = vmul.f32 %v10958_v3, %v5736_v17 }
 0x358   : > { %5770 = vst [vmem:[%s10467_s28 + $0x108] sm:$0xff] %v5734_v23  ;;  %v5806_v0 = vmul.f32 %v10956_v32, %v5734_v23  ;;  %v5840_v45 = vadd.f32 %v5839_v33, %v5805_v38  ;;  %v5917_v13 = vadd.f32 %v5916_v14, %v5882_v57 }
 0x359   : > { %v5886_v41 = vmul.f32 %v5808_v6, %v5736_v17 }
 0x35a   : > { %v5884_v44 = vmul.f32 %v5806_v0, %v5734_v23  ;;  %v5918_v53 = vadd.f32 %v5917_v13, %v5883_v31  ;;  %v5841_v56 = vadd.f32 %v5840_v45, %v5806_v0 }
 0x35c   : > { %v5842_v29 = vadd.f32 %v5841_v56, %v5807_v10  ;;  %v5919_v15 = vadd.f32 %v5918_v53, %v5884_v44 }
 0x35e   : > { %v5843_v2 = vadd.f32 %v5842_v29, %v5808_v6  ;;  %v5920_v25 = vadd.f32 %v5919_v15, %v5885_v51 }
 0x360   : > { %v5844_v63 = vrot.slane %v5843_v2, 4  ;;  %v5921_v49 = vadd.f32 %v5920_v25, %v5886_v41 }
 0x362   : > { %v5845_v19 = vadd.f32 %v5844_v63, %v5843_v2  ;;  %v5922_v58 = vrot.slane %v5921_v49, 4 }
 0x364   : > { %v5846_v4 = vrot.slane %v5845_v19, 2  ;;  %v5923_v5 = vadd.f32 %v5922_v58, %v5921_v49 }
 0x366   : > { %v5847_v27 = vadd.f32 %v5846_v4, %v5845_v19  ;;  %v5924_v20 = vrot.slane %v5923_v5, 2 }
 0x368   : > { %v5848_v28 = vrot.slane %v5847_v27, 1  ;;  %v5925_v24 = vadd.f32 %v5924_v20, %v5923_v5 }
 0x36a   : > { %v5849_v60 = vadd.f32 %v5848_v28, %v5847_v27  ;;  %v5926_v34 = vrot.slane %v5925_v24, 1 }
 0x36c   : > { %5850 = vst [vmem:[%s235_s7] sm:$0x1] %v5849_v60  ;;  %v5927_v50 = vadd.f32 %v5926_v34, %v5925_v24 }
 0x36e   : > { %5928 = vst [vmem:[%s235_s7 + $0x1] sm:$0x1] %v5927_v50 }
 0x36f PF: > { %s16_s18 = sadd.s32 1, %s7474_s18  }
 0x370   : > { %p13_p4 = scmp.ge.s32.totalorder %s16_s18, 4  }
 0x372   :  { %15 = sbr.rel (!%p13_p4) target bundleno = 1 (0x1), region = 86 }

</bundles_post_ra>
